<compile_context>
chip_gen: v6e
topology: v6e:2x2x1
jax: 0.10.0
libtpu: 0.0.40
codegen_flags: <defaults>
</compile_context>

<pallas_src>
import functools

import jax
import jax.numpy as jnp
from jax.experimental import pallas as pl
from jax.experimental.pallas import tpu as pltpu

LRELU_SLOPE = 0.1   # TODO(synk): assumed; PyTorch nn.LeakyReLU default is 0.01.
BN_EPS = 1e-5


# ----------------------------------------------------------------------------
# Fused kernel: one image per grid step.
#   out = x + lrelu(bn2(conv2( lrelu(bn1(conv1(x))) )))    (BN folded)
# ----------------------------------------------------------------------------
def _res_block_kernel(x_ref, w1_ref, b1_ref, w2_ref, b2_ref, o_ref,
                      xpad_ref, col_ref, *, hh, ww, c, slope):
    f32 = jnp.float32

    def im2col():
        # col[:, t*C:(t+1)*C] = xpad[ky:ky+H, kx:kx+W, :]   with t = ky*3 + kx
        for t in range(9):
            ky, kx = divmod(t, 3)
            tap = xpad_ref[ky:ky + hh, kx:kx + ww, :].reshape(hh * ww, c)
            col_ref[:, t * c:(t + 1) * c] = tap

    def conv(w_ref, b_ref):
        # Single MXU matmul, K = 9*C (im2col-fused), f32 accumulation.
        y = jnp.dot(col_ref[...], w_ref[...], preferred_element_type=f32)
        y = y + b_ref[...]                        # folded-BN bias (f32)
        if slope != 1.0:                          # LeakyReLU (static skip)
            y = jnp.where(y >= 0, y, slope * y)
        return y

    # ---- layer1: halo (dense whole-slab memset + interior), im2col, conv ----
    xpad_ref[...] = jnp.zeros_like(xpad_ref)      # zero border, fully vectorized
    xpad_ref[1:hh + 1, 1:ww + 1, :] = x_ref[0]    # bf16 interior
    im2col()
    h = conv(w1_ref, b1_ref)                      # (H*W, C) f32, stays in VMEM

    # ---- layer2: border is still zero; only the interior is rewritten ----
    xpad_ref[1:hh + 1, 1:ww + 1, :] = h.astype(jnp.bfloat16).reshape(hh, ww, c)
    im2col()
    y = conv(w2_ref, b2_ref)                      # (H*W, C) f32

    # ---- residual: reuse the already-resident bf16 x block ----
    y = y + x_ref[0].reshape(hh * ww, c).astype(f32)
    o_ref[0] = y.reshape(hh, ww, c).astype(o_ref.dtype)


def res_block_bn_nhwc(x, params, *, slope=LRELU_SLOPE, out_dtype=jnp.float32):
    """x: (B, H, W, C) NHWC. params: {'l1': (w, b), 'l2': (w, b)}, w in HWIO
    (3, 3, C, C) with eval-mode BN folded into (w, b)."""
    B, H, W, C = x.shape
    (w1, b1), (w2, b2) = params["l1"], params["l2"]

    x_bf = x.astype(jnp.bfloat16)                           # halve HBM read of x
    w1f = jnp.reshape(w1, (9 * C, C)).astype(jnp.bfloat16)  # (ky,kx,ci) -> rows
    w2f = jnp.reshape(w2, (9 * C, C)).astype(jnp.bfloat16)
    b1f = jnp.reshape(b1, (1, C)).astype(jnp.float32)
    b2f = jnp.reshape(b2, (1, C)).astype(jnp.float32)

    kernel = functools.partial(_res_block_kernel, hh=H, ww=W, c=C, slope=slope)

    return pl.pallas_call(
        kernel,
        out_shape=jax.ShapeDtypeStruct((B, H, W, C), out_dtype),
        grid_spec=pltpu.PrefetchScalarGridSpec(
            num_scalar_prefetch=0,
            grid=(B,),
            in_specs=[
                pl.BlockSpec((1, H, W, C), lambda b: (b, 0, 0, 0)),   # x (bf16)
                pl.BlockSpec((9 * C, C), lambda b: (0, 0)),           # w1
                pl.BlockSpec((1, C), lambda b: (0, 0)),               # b1
                pl.BlockSpec((9 * C, C), lambda b: (0, 0)),           # w2
                pl.BlockSpec((1, C), lambda b: (0, 0)),               # b2
            ],
            out_specs=pl.BlockSpec((1, H, W, C), lambda b: (b, 0, 0, 0)),
            scratch_shapes=[
                pltpu.VMEM((H + 2, W + 2, C), jnp.bfloat16),   # padded halo slab
                pltpu.VMEM((H * W, 9 * C), jnp.bfloat16),      # im2col slab
            ],
        ),
        compiler_params=pltpu.CompilerParams(
            dimension_semantics=("parallel",),   # independent per-image steps
            vmem_limit_bytes=32 * 1024 * 1024,   # safe on v5e/v6e/v7x
        ),
    )(x_bf, w1f, b1f, w2f, b2f)


# ----------------------------------------------------------------------------
# Deterministic parameter construction (eval-mode BN folded into conv w + b).
# ----------------------------------------------------------------------------
def _conv_weight(key, cin, cout):
    # PyTorch layout (O, I, 3, 3) -> HWIO (3, 3, I, O)
    w = jax.random.normal(key, (cout, cin, 3, 3), jnp.float32)
    w = w * (1.0 / (cin * 9.0) ** 0.5)
    return jnp.transpose(w, (2, 3, 1, 0))


def _base_conv_params(key, cin, cout):
    kw, kg, kb, km, kv = jax.random.split(key, 5)
    w = _conv_weight(kw, cin, cout)
    gamma = 1.0 + 0.1 * jax.random.normal(kg, (cout,), jnp.float32)
    beta = 0.1 * jax.random.normal(kb, (cout,), jnp.float32)
    mean = 0.1 * jax.random.normal(km, (cout,), jnp.float32)
    var = 1.0 + 0.1 * jax.random.uniform(kv, (cout,), jnp.float32)
    scale = gamma / jnp.sqrt(var + BN_EPS)          # fold eval-mode BN
    return w * scale[None, None, None, :], beta - mean * scale


def init_res_block_bn(key, c):
    k1, k2 = jax.random.split(key)
    return {"l1": _base_conv_params(k1, c, c),
            "l2": _base_conv_params(k2, c, c)}


# ----------------------------------------------------------------------------
# Forward pass with the PyTorch NCHW interface.
# ----------------------------------------------------------------------------
def res_block_bn(x_nchw, params):
    # TODO(synk): keep the surrounding model NHWC end-to-end to drop these two
    # full-tensor transpose passes (wrapper-level only; the kernel is NHWC).
    x = jnp.transpose(x_nchw, (0, 2, 3, 1))
    y = res_block_bn_nhwc(x, params)
    return jnp.transpose(y, (0, 3, 1, 2))


# Pure-XLA f32 reference (loose numerical sanity check).
def _reference_forward(x_nchw, params):
    x = jnp.transpose(x_nchw, (0, 2, 3, 1)).astype(jnp.float32)

    def base_conv(inp, wb):
        w, b = wb
        y = jax.lax.conv_general_dilated(
            inp, w, window_strides=(1, 1), padding=((1, 1), (1, 1)),
            dimension_numbers=("NHWC", "HWIO", "NHWC"))
        y = y + b[None, None, None, :]
        return jnp.where(y >= 0, y, LRELU_SLOPE * y)

    out = x + base_conv(base_conv(x, params["l1"]), params["l2"])
    return jnp.transpose(out, (0, 3, 1, 2))


if __name__ == "__main__":
    key = jax.random.PRNGKey(0)
    kx, kp = jax.random.split(key)

    # Small deterministic example: B=2, C=32 (LST inputchannel), H=W=16.
    x = jax.random.normal(kx, (2, 32, 16, 16), jnp.float32)
    params = init_res_block_bn(kp, 32)

    out = jax.jit(res_block_bn)(x, params)
    out = jax.block_until_ready(out)

    assert out.shape == (2, 32, 16, 16), out.shape
    assert out.dtype == jnp.float32
    assert bool(jnp.all(jnp.isfinite(out)))

    # Loose check vs. f32 XLA reference (kernel uses bf16 MXU operands / x).
    ref = _reference_forward(x, params)
    err = float(jnp.max(jnp.abs(out - ref)))
    assert err < 0.25, f"max abs err {err}"

    print("KERNEL_OK")
</pallas_src>

<mosaic_0001>
module attributes {stable_mosaic.version = 11 : i64} {
  func.func @_res_block_kernel(%arg0: i32, %arg1: memref<1x16x16x32xbf16, #tpu.memory_space<vmem>>, %arg2: memref<288x32xbf16, #tpu.memory_space<vmem>>, %arg3: memref<1x32xf32, #tpu.memory_space<vmem>>, %arg4: memref<288x32xbf16, #tpu.memory_space<vmem>>, %arg5: memref<1x32xf32, #tpu.memory_space<vmem>>, %arg6: memref<1x16x16x32xf32, #tpu.memory_space<vmem>>, %arg7: memref<18x18x32xbf16, #tpu.memory_space<vmem>>, %arg8: memref<256x288xbf16, #tpu.memory_space<vmem>>) attributes {dimension_semantics = [#tpu.dimension_semantics<parallel>], iteration_bounds = array<i64: 2>, scalar_prefetch = 0 : i64, scratch_operands = 2 : i64, tpu.core_type = #tpu.core_type<tc>, window_params = [{transform_indices = @transform_0, window_bounds = array<i64: 1, 16, 16, 32>}, {pipeline_mode = #tpu.pipeline_mode<synchronous>, transform_indices = @transform_1, window_bounds = array<i64: 288, 32>}, {pipeline_mode = #tpu.pipeline_mode<synchronous>, transform_indices = @transform_2, window_bounds = array<i64: 1, 32>}, {pipeline_mode = #tpu.pipeline_mode<synchronous>, transform_indices = @transform_3, window_bounds = array<i64: 288, 32>}, {pipeline_mode = #tpu.pipeline_mode<synchronous>, transform_indices = @transform_4, window_bounds = array<i64: 1, 32>}, {transform_indices = @transform_5, window_bounds = array<i64: 1, 16, 16, 32>}]} {
    %cst = arith.constant 0.000000e+00 : bf16
    %0 = vector.broadcast %cst : bf16 to vector<18x18x32xbf16>
    %c0 = arith.constant 0 : index
    %c0_0 = arith.constant 0 : index
    %c0_1 = arith.constant 0 : index
    %1 = vector.load %arg7[%c0, %c0_0, %c0_1] : memref<18x18x32xbf16, #tpu.memory_space<vmem>>, vector<18x18x32xbf16>
    tpu.vector_store %arg7[%c0, %c0_0, %c0_1], %0 {strides = array<i32>} : memref<18x18x32xbf16, #tpu.memory_space<vmem>>, vector<18x18x32xbf16>,
    %c0_2 = arith.constant 0 : index
    %c0_3 = arith.constant 0 : index
    %c0_4 = arith.constant 0 : index
    %c0_5 = arith.constant 0 : index
    %2 = vector.load %arg1[%c0_2, %c0_3, %c0_4, %c0_5] : memref<1x16x16x32xbf16, #tpu.memory_space<vmem>>, vector<1x16x16x32xbf16>
    %3 = vector.shape_cast %2 : vector<1x16x16x32xbf16> to vector<16x16x32xbf16>
    %c1 = arith.constant 1 : index
    %c1_6 = arith.constant 1 : index
    %c0_7 = arith.constant 0 : index
    %4 = vector.load %arg7[%c1, %c1_6, %c0_7] : memref<18x18x32xbf16, #tpu.memory_space<vmem>>, vector<16x16x32xbf16>
    tpu.vector_store %arg7[%c1, %c1_6, %c0_7], %3 {strides = array<i32>} : memref<18x18x32xbf16, #tpu.memory_space<vmem>>, vector<16x16x32xbf16>,
    %c0_8 = arith.constant 0 : index
    %c0_9 = arith.constant 0 : index
    %c0_10 = arith.constant 0 : index
    %5 = vector.load %arg7[%c0_8, %c0_9, %c0_10] : memref<18x18x32xbf16, #tpu.memory_space<vmem>>, vector<16x16x32xbf16>
    %6 = vector.shape_cast %5 : vector<16x16x32xbf16> to vector<256x32xbf16>
    %c0_11 = arith.constant 0 : index
    %c0_12 = arith.constant 0 : index
    %7 = vector.load %arg8[%c0_11, %c0_12] : memref<256x288xbf16, #tpu.memory_space<vmem>>, vector<256x32xbf16>
    tpu.vector_store %arg8[%c0_11, %c0_12], %6 {strides = array<i32>} : memref<256x288xbf16, #tpu.memory_space<vmem>>, vector<256x32xbf16>,
    %c0_13 = arith.constant 0 : index
    %c1_14 = arith.constant 1 : index
    %c0_15 = arith.constant 0 : index
    %8 = vector.load %arg7[%c0_13, %c1_14, %c0_15] : memref<18x18x32xbf16, #tpu.memory_space<vmem>>, vector<16x16x32xbf16>
    %9 = vector.shape_cast %8 : vector<16x16x32xbf16> to vector<256x32xbf16>
    %c0_16 = arith.constant 0 : index
    %c32 = arith.constant 32 : index
    %10 = vector.load %arg8[%c0_16, %c32] : memref<256x288xbf16, #tpu.memory_space<vmem>>, vector<256x32xbf16>
    tpu.vector_store %arg8[%c0_16, %c32], %9 {strides = array<i32>} : memref<256x288xbf16, #tpu.memory_space<vmem>>, vector<256x32xbf16>,
    %c0_17 = arith.constant 0 : index
    %c2 = arith.constant 2 : index
    %c0_18 = arith.constant 0 : index
    %11 = vector.load %arg7[%c0_17, %c2, %c0_18] : memref<18x18x32xbf16, #tpu.memory_space<vmem>>, vector<16x16x32xbf16>
    %12 = vector.shape_cast %11 : vector<16x16x32xbf16> to vector<256x32xbf16>
    %c0_19 = arith.constant 0 : index
    %c64 = arith.constant 64 : index
    %13 = vector.load %arg8[%c0_19, %c64] : memref<256x288xbf16, #tpu.memory_space<vmem>>, vector<256x32xbf16>
    tpu.vector_store %arg8[%c0_19, %c64], %12 {strides = array<i32>} : memref<256x288xbf16, #tpu.memory_space<vmem>>, vector<256x32xbf16>,
    %c1_20 = arith.constant 1 : index
    %c0_21 = arith.constant 0 : index
    %c0_22 = arith.constant 0 : index
    %14 = vector.load %arg7[%c1_20, %c0_21, %c0_22] : memref<18x18x32xbf16, #tpu.memory_space<vmem>>, vector<16x16x32xbf16>
    %15 = vector.shape_cast %14 : vector<16x16x32xbf16> to vector<256x32xbf16>
    %c0_23 = arith.constant 0 : index
    %c96 = arith.constant 96 : index
    %16 = vector.load %arg8[%c0_23, %c96] : memref<256x288xbf16, #tpu.memory_space<vmem>>, vector<256x32xbf16>
    tpu.vector_store %arg8[%c0_23, %c96], %15 {strides = array<i32>} : memref<256x288xbf16, #tpu.memory_space<vmem>>, vector<256x32xbf16>,
    %c1_24 = arith.constant 1 : index
    %c1_25 = arith.constant 1 : index
    %c0_26 = arith.constant 0 : index
    %17 = vector.load %arg7[%c1_24, %c1_25, %c0_26] : memref<18x18x32xbf16, #tpu.memory_space<vmem>>, vector<16x16x32xbf16>
    %18 = vector.shape_cast %17 : vector<16x16x32xbf16> to vector<256x32xbf16>
    %c0_27 = arith.constant 0 : index
    %c128 = arith.constant 128 : index
    %19 = vector.load %arg8[%c0_27, %c128] : memref<256x288xbf16, #tpu.memory_space<vmem>>, vector<256x32xbf16>
    tpu.vector_store %arg8[%c0_27, %c128], %18 {strides = array<i32>} : memref<256x288xbf16, #tpu.memory_space<vmem>>, vector<256x32xbf16>,
    %c1_28 = arith.constant 1 : index
    %c2_29 = arith.constant 2 : index
    %c0_30 = arith.constant 0 : index
    %20 = vector.load %arg7[%c1_28, %c2_29, %c0_30] : memref<18x18x32xbf16, #tpu.memory_space<vmem>>, vector<16x16x32xbf16>
    %21 = vector.shape_cast %20 : vector<16x16x32xbf16> to vector<256x32xbf16>
    %c0_31 = arith.constant 0 : index
    %c160 = arith.constant 160 : index
    %22 = vector.load %arg8[%c0_31, %c160] : memref<256x288xbf16, #tpu.memory_space<vmem>>, vector<256x32xbf16>
    tpu.vector_store %arg8[%c0_31, %c160], %21 {strides = array<i32>} : memref<256x288xbf16, #tpu.memory_space<vmem>>, vector<256x32xbf16>,
    %c2_32 = arith.constant 2 : index
    %c0_33 = arith.constant 0 : index
    %c0_34 = arith.constant 0 : index
    %23 = vector.load %arg7[%c2_32, %c0_33, %c0_34] : memref<18x18x32xbf16, #tpu.memory_space<vmem>>, vector<16x16x32xbf16>
    %24 = vector.shape_cast %23 : vector<16x16x32xbf16> to vector<256x32xbf16>
    %c0_35 = arith.constant 0 : index
    %c192 = arith.constant 192 : index
    %25 = vector.load %arg8[%c0_35, %c192] : memref<256x288xbf16, #tpu.memory_space<vmem>>, vector<256x32xbf16>
    tpu.vector_store %arg8[%c0_35, %c192], %24 {strides = array<i32>} : memref<256x288xbf16, #tpu.memory_space<vmem>>, vector<256x32xbf16>,
    %c2_36 = arith.constant 2 : index
    %c1_37 = arith.constant 1 : index
    %c0_38 = arith.constant 0 : index
    %26 = vector.load %arg7[%c2_36, %c1_37, %c0_38] : memref<18x18x32xbf16, #tpu.memory_space<vmem>>, vector<16x16x32xbf16>
    %27 = vector.shape_cast %26 : vector<16x16x32xbf16> to vector<256x32xbf16>
    %c0_39 = arith.constant 0 : index
    %c224 = arith.constant 224 : index
    %28 = vector.load %arg8[%c0_39, %c224] : memref<256x288xbf16, #tpu.memory_space<vmem>>, vector<256x32xbf16>
    tpu.vector_store %arg8[%c0_39, %c224], %27 {strides = array<i32>} : memref<256x288xbf16, #tpu.memory_space<vmem>>, vector<256x32xbf16>,
    %c2_40 = arith.constant 2 : index
    %c2_41 = arith.constant 2 : index
    %c0_42 = arith.constant 0 : index
    %29 = vector.load %arg7[%c2_40, %c2_41, %c0_42] : memref<18x18x32xbf16, #tpu.memory_space<vmem>>, vector<16x16x32xbf16>
    %30 = vector.shape_cast %29 : vector<16x16x32xbf16> to vector<256x32xbf16>
    %c0_43 = arith.constant 0 : index
    %c256 = arith.constant 256 : index
    %31 = vector.load %arg8[%c0_43, %c256] : memref<256x288xbf16, #tpu.memory_space<vmem>>, vector<256x32xbf16>
    tpu.vector_store %arg8[%c0_43, %c256], %30 {strides = array<i32>} : memref<256x288xbf16, #tpu.memory_space<vmem>>, vector<256x32xbf16>,
    %c0_44 = arith.constant 0 : index
    %c0_45 = arith.constant 0 : index
    %32 = vector.load %arg8[%c0_44, %c0_45] : memref<256x288xbf16, #tpu.memory_space<vmem>>, vector<256x288xbf16>
    %c0_46 = arith.constant 0 : index
    %c0_47 = arith.constant 0 : index
    %33 = vector.load %arg2[%c0_46, %c0_47] : memref<288x32xbf16, #tpu.memory_space<vmem>>, vector<288x32xbf16>
    %cst_48 = arith.constant dense<0.000000e+00> : vector<256x32xf32>
    %34 = tpu.matmul %32, %33, %cst_48 {dimension_numbers = #tpu.dot_dimension_numbers<[1], [0], [0], [1], [0, 0, 1, 1], [], []>} : vector<256x288xbf16>, vector<288x32xbf16>, vector<256x32xf32> -> vector<256x32xf32>
    %c0_49 = arith.constant 0 : index
    %c0_50 = arith.constant 0 : index
    %35 = vector.load %arg3[%c0_49, %c0_50] : memref<1x32xf32, #tpu.memory_space<vmem>>, vector<1x32xf32>
    %36 = vector.broadcast %35 : vector<1x32xf32> to vector<256x32xf32>
    %37 = arith.addf %34, %36 : vector<256x32xf32>
    %cst_51 = arith.constant 0.000000e+00 : f32
    %38 = vector.broadcast %cst_51 : f32 to vector<256x32xf32>
    %39 = arith.cmpf oge, %37, %38 : vector<256x32xf32>
    %cst_52 = arith.constant 1.000000e-01 : f32
    %40 = vector.broadcast %cst_52 : f32 to vector<256x32xf32>
    %41 = arith.mulf %40, %37 : vector<256x32xf32>
    %42 = arith.select %39, %37, %41 : vector<256x32xi1>, vector<256x32xf32>
    %43 = arith.truncf %42 : vector<256x32xf32> to vector<256x32xbf16>
    %44 = vector.shape_cast %43 : vector<256x32xbf16> to vector<16x16x32xbf16>
    %c1_53 = arith.constant 1 : index
    %c1_54 = arith.constant 1 : index
    %c0_55 = arith.constant 0 : index
    %45 = vector.load %arg7[%c1_53, %c1_54, %c0_55] : memref<18x18x32xbf16, #tpu.memory_space<vmem>>, vector<16x16x32xbf16>
    tpu.vector_store %arg7[%c1_53, %c1_54, %c0_55], %44 {strides = array<i32>} : memref<18x18x32xbf16, #tpu.memory_space<vmem>>, vector<16x16x32xbf16>,
    %c0_56 = arith.constant 0 : index
    %c0_57 = arith.constant 0 : index
    %c0_58 = arith.constant 0 : index
    %46 = vector.load %arg7[%c0_56, %c0_57, %c0_58] : memref<18x18x32xbf16, #tpu.memory_space<vmem>>, vector<16x16x32xbf16>
    %47 = vector.shape_cast %46 : vector<16x16x32xbf16> to vector<256x32xbf16>
    %c0_59 = arith.constant 0 : index
    %c0_60 = arith.constant 0 : index
    %48 = vector.load %arg8[%c0_59, %c0_60] : memref<256x288xbf16, #tpu.memory_space<vmem>>, vector<256x32xbf16>
    tpu.vector_store %arg8[%c0_59, %c0_60], %47 {strides = array<i32>} : memref<256x288xbf16, #tpu.memory_space<vmem>>, vector<256x32xbf16>,
    %c0_61 = arith.constant 0 : index
    %c1_62 = arith.constant 1 : index
    %c0_63 = arith.constant 0 : index
    %49 = vector.load %arg7[%c0_61, %c1_62, %c0_63] : memref<18x18x32xbf16, #tpu.memory_space<vmem>>, vector<16x16x32xbf16>
    %50 = vector.shape_cast %49 : vector<16x16x32xbf16> to vector<256x32xbf16>
    %c0_64 = arith.constant 0 : index
    %c32_65 = arith.constant 32 : index
    %51 = vector.load %arg8[%c0_64, %c32_65] : memref<256x288xbf16, #tpu.memory_space<vmem>>, vector<256x32xbf16>
    tpu.vector_store %arg8[%c0_64, %c32_65], %50 {strides = array<i32>} : memref<256x288xbf16, #tpu.memory_space<vmem>>, vector<256x32xbf16>,
    %c0_66 = arith.constant 0 : index
    %c2_67 = arith.constant 2 : index
    %c0_68 = arith.constant 0 : index
    %52 = vector.load %arg7[%c0_66, %c2_67, %c0_68] : memref<18x18x32xbf16, #tpu.memory_space<vmem>>, vector<16x16x32xbf16>
    %53 = vector.shape_cast %52 : vector<16x16x32xbf16> to vector<256x32xbf16>
    %c0_69 = arith.constant 0 : index
    %c64_70 = arith.constant 64 : index
    %54 = vector.load %arg8[%c0_69, %c64_70] : memref<256x288xbf16, #tpu.memory_space<vmem>>, vector<256x32xbf16>
    tpu.vector_store %arg8[%c0_69, %c64_70], %53 {strides = array<i32>} : memref<256x288xbf16, #tpu.memory_space<vmem>>, vector<256x32xbf16>,
    %c1_71 = arith.constant 1 : index
    %c0_72 = arith.constant 0 : index
    %c0_73 = arith.constant 0 : index
    %55 = vector.load %arg7[%c1_71, %c0_72, %c0_73] : memref<18x18x32xbf16, #tpu.memory_space<vmem>>, vector<16x16x32xbf16>
    %56 = vector.shape_cast %55 : vector<16x16x32xbf16> to vector<256x32xbf16>
    %c0_74 = arith.constant 0 : index
    %c96_75 = arith.constant 96 : index
    %57 = vector.load %arg8[%c0_74, %c96_75] : memref<256x288xbf16, #tpu.memory_space<vmem>>, vector<256x32xbf16>
    tpu.vector_store %arg8[%c0_74, %c96_75], %56 {strides = array<i32>} : memref<256x288xbf16, #tpu.memory_space<vmem>>, vector<256x32xbf16>,
    %c1_76 = arith.constant 1 : index
    %c1_77 = arith.constant 1 : index
    %c0_78 = arith.constant 0 : index
    %58 = vector.load %arg7[%c1_76, %c1_77, %c0_78] : memref<18x18x32xbf16, #tpu.memory_space<vmem>>, vector<16x16x32xbf16>
    %59 = vector.shape_cast %58 : vector<16x16x32xbf16> to vector<256x32xbf16>
    %c0_79 = arith.constant 0 : index
    %c128_80 = arith.constant 128 : index
    %60 = vector.load %arg8[%c0_79, %c128_80] : memref<256x288xbf16, #tpu.memory_space<vmem>>, vector<256x32xbf16>
    tpu.vector_store %arg8[%c0_79, %c128_80], %59 {strides = array<i32>} : memref<256x288xbf16, #tpu.memory_space<vmem>>, vector<256x32xbf16>,
    %c1_81 = arith.constant 1 : index
    %c2_82 = arith.constant 2 : index
    %c0_83 = arith.constant 0 : index
    %61 = vector.load %arg7[%c1_81, %c2_82, %c0_83] : memref<18x18x32xbf16, #tpu.memory_space<vmem>>, vector<16x16x32xbf16>
    %62 = vector.shape_cast %61 : vector<16x16x32xbf16> to vector<256x32xbf16>
    %c0_84 = arith.constant 0 : index
    %c160_85 = arith.constant 160 : index
    %63 = vector.load %arg8[%c0_84, %c160_85] : memref<256x288xbf16, #tpu.memory_space<vmem>>, vector<256x32xbf16>
    tpu.vector_store %arg8[%c0_84, %c160_85], %62 {strides = array<i32>} : memref<256x288xbf16, #tpu.memory_space<vmem>>, vector<256x32xbf16>,
    %c2_86 = arith.constant 2 : index
    %c0_87 = arith.constant 0 : index
    %c0_88 = arith.constant 0 : index
    %64 = vector.load %arg7[%c2_86, %c0_87, %c0_88] : memref<18x18x32xbf16, #tpu.memory_space<vmem>>, vector<16x16x32xbf16>
    %65 = vector.shape_cast %64 : vector<16x16x32xbf16> to vector<256x32xbf16>
    %c0_89 = arith.constant 0 : index
    %c192_90 = arith.constant 192 : index
    %66 = vector.load %arg8[%c0_89, %c192_90] : memref<256x288xbf16, #tpu.memory_space<vmem>>, vector<256x32xbf16>
    tpu.vector_store %arg8[%c0_89, %c192_90], %65 {strides = array<i32>} : memref<256x288xbf16, #tpu.memory_space<vmem>>, vector<256x32xbf16>,
    %c2_91 = arith.constant 2 : index
    %c1_92 = arith.constant 1 : index
    %c0_93 = arith.constant 0 : index
    %67 = vector.load %arg7[%c2_91, %c1_92, %c0_93] : memref<18x18x32xbf16, #tpu.memory_space<vmem>>, vector<16x16x32xbf16>
    %68 = vector.shape_cast %67 : vector<16x16x32xbf16> to vector<256x32xbf16>
    %c0_94 = arith.constant 0 : index
    %c224_95 = arith.constant 224 : index
    %69 = vector.load %arg8[%c0_94, %c224_95] : memref<256x288xbf16, #tpu.memory_space<vmem>>, vector<256x32xbf16>
    tpu.vector_store %arg8[%c0_94, %c224_95], %68 {strides = array<i32>} : memref<256x288xbf16, #tpu.memory_space<vmem>>, vector<256x32xbf16>,
    %c2_96 = arith.constant 2 : index
    %c2_97 = arith.constant 2 : index
    %c0_98 = arith.constant 0 : index
    %70 = vector.load %arg7[%c2_96, %c2_97, %c0_98] : memref<18x18x32xbf16, #tpu.memory_space<vmem>>, vector<16x16x32xbf16>
    %71 = vector.shape_cast %70 : vector<16x16x32xbf16> to vector<256x32xbf16>
    %c0_99 = arith.constant 0 : index
    %c256_100 = arith.constant 256 : index
    %72 = vector.load %arg8[%c0_99, %c256_100] : memref<256x288xbf16, #tpu.memory_space<vmem>>, vector<256x32xbf16>
    tpu.vector_store %arg8[%c0_99, %c256_100], %71 {strides = array<i32>} : memref<256x288xbf16, #tpu.memory_space<vmem>>, vector<256x32xbf16>,
    %c0_101 = arith.constant 0 : index
    %c0_102 = arith.constant 0 : index
    %73 = vector.load %arg8[%c0_101, %c0_102] : memref<256x288xbf16, #tpu.memory_space<vmem>>, vector<256x288xbf16>
    %c0_103 = arith.constant 0 : index
    %c0_104 = arith.constant 0 : index
    %74 = vector.load %arg4[%c0_103, %c0_104] : memref<288x32xbf16, #tpu.memory_space<vmem>>, vector<288x32xbf16>
    %cst_105 = arith.constant dense<0.000000e+00> : vector<256x32xf32>
    %75 = tpu.matmul %73, %74, %cst_105 {dimension_numbers = #tpu.dot_dimension_numbers<[1], [0], [0], [1], [0, 0, 1, 1], [], []>} : vector<256x288xbf16>, vector<288x32xbf16>, vector<256x32xf32> -> vector<256x32xf32>
    %c0_106 = arith.constant 0 : index
    %c0_107 = arith.constant 0 : index
    %76 = vector.load %arg5[%c0_106, %c0_107] : memref<1x32xf32, #tpu.memory_space<vmem>>, vector<1x32xf32>
    %77 = vector.broadcast %76 : vector<1x32xf32> to vector<256x32xf32>
    %78 = arith.addf %75, %77 : vector<256x32xf32>
    %cst_108 = arith.constant 0.000000e+00 : f32
    %79 = vector.broadcast %cst_108 : f32 to vector<256x32xf32>
    %80 = arith.cmpf oge, %78, %79 : vector<256x32xf32>
    %cst_109 = arith.constant 1.000000e-01 : f32
    %81 = vector.broadcast %cst_109 : f32 to vector<256x32xf32>
    %82 = arith.mulf %81, %78 : vector<256x32xf32>
    %83 = arith.select %80, %78, %82 : vector<256x32xi1>, vector<256x32xf32>
    %c0_110 = arith.constant 0 : index
    %c0_111 = arith.constant 0 : index
    %c0_112 = arith.constant 0 : index
    %c0_113 = arith.constant 0 : index
    %84 = vector.load %arg1[%c0_110, %c0_111, %c0_112, %c0_113] : memref<1x16x16x32xbf16, #tpu.memory_space<vmem>>, vector<1x16x16x32xbf16>
    %85 = vector.shape_cast %84 : vector<1x16x16x32xbf16> to vector<16x16x32xbf16>
    %86 = vector.shape_cast %85 : vector<16x16x32xbf16> to vector<256x32xbf16>
    %87 = arith.extf %86 : vector<256x32xbf16> to vector<256x32xf32>
    %88 = arith.addf %83, %87 : vector<256x32xf32>
    %89 = vector.shape_cast %88 : vector<256x32xf32> to vector<16x16x32xf32>
    %c0_114 = arith.constant 0 : index
    %c0_115 = arith.constant 0 : index
    %c0_116 = arith.constant 0 : index
    %c0_117 = arith.constant 0 : index
    %90 = vector.load %arg6[%c0_114, %c0_115, %c0_116, %c0_117] : memref<1x16x16x32xf32, #tpu.memory_space<vmem>>, vector<1x16x16x32xf32>
    %91 = vector.shape_cast %90 : vector<1x16x16x32xf32> to vector<16x16x32xf32>
    %92 = vector.shape_cast %89 : vector<16x16x32xf32> to vector<1x16x16x32xf32>
    tpu.vector_store %arg6[%c0_114, %c0_115, %c0_116, %c0_117], %92 {strides = array<i32>} : memref<1x16x16x32xf32, #tpu.memory_space<vmem>>, vector<1x16x16x32xf32>,
    return
  }
  func.func @transform_0(%arg0: i32) -> (i32, i32, i32, i32) {
    %c0_i32 = arith.constant 0 : i32
    %c0_i32_0 = arith.constant 0 : i32
    %c0_i32_1 = arith.constant 0 : i32
    %c0_i32_2 = arith.constant 0 : i32
    return %arg0, %c0_i32, %c0_i32_0, %c0_i32_1 : i32, i32, i32, i32
  }
  func.func @transform_1(%arg0: i32) -> (i32, i32) {
    %c0_i32 = arith.constant 0 : i32
    %c0_i32_0 = arith.constant 0 : i32
    %c0_i32_1 = arith.constant 0 : i32
    return %c0_i32, %c0_i32_0 : i32, i32
  }
  func.func @transform_2(%arg0: i32) -> (i32, i32) {
    %c0_i32 = arith.constant 0 : i32
    %c0_i32_0 = arith.constant 0 : i32
    %c0_i32_1 = arith.constant 0 : i32
    return %c0_i32, %c0_i32_0 : i32, i32
  }
  func.func @transform_3(%arg0: i32) -> (i32, i32) {
    %c0_i32 = arith.constant 0 : i32
    %c0_i32_0 = arith.constant 0 : i32
    %c0_i32_1 = arith.constant 0 : i32
    return %c0_i32, %c0_i32_0 : i32, i32
  }
  func.func @transform_4(%arg0: i32) -> (i32, i32) {
    %c0_i32 = arith.constant 0 : i32
    %c0_i32_0 = arith.constant 0 : i32
    %c0_i32_1 = arith.constant 0 : i32
    return %c0_i32, %c0_i32_0 : i32, i32
  }
  func.func @transform_5(%arg0: i32) -> (i32, i32, i32, i32) {
    %c0_i32 = arith.constant 0 : i32
    %c0_i32_0 = arith.constant 0 : i32
    %c0_i32_1 = arith.constant 0 : i32
    %c0_i32_2 = arith.constant 0 : i32
    return %arg0, %c0_i32, %c0_i32_0, %c0_i32_1 : i32, i32, i32, i32
  }
}

</mosaic_0001>

<bundles_post_ra>
// kernel: res_block_bn.1
= control target key start
LH: loop header
LB: loop body
LE: loop exit
PB: predicated region body
PF: predicated region fallthrough
CT: control target
= control target key end

     0   :  { %10 = vsyncpa [#allocation5], 0  ;;  %s14317_s0 = inlined_call_operand.vmem [shape: bf16[2,16,16,32], index: 0, kind: input, shape index: {}]   ;;  %s14318_s1 = inlined_call_operand.vmem [shape: bf16[288,32], index: 1, kind: input, shape index: {}]   ;;  %s14319_s2 = inlined_call_operand.vmem [shape: f32[1,32], index: 2, kind: input, shape index: {}]   ;;  %s14320_s3 = inlined_call_operand.vmem [shape: bf16[288,32], index: 3, kind: input, shape index: {}]   ;;  %s14321_s4 = inlined_call_operand.vmem [shape: f32[1,32], index: 4, kind: input, shape index: {}]   ;;  %s14322_s5 = inlined_call_operand.hbm [shape: f32[2,16,16,32], index: 5, kind: output, shape index: {}]  }
   0x1   :  { %12 = vsyncpa [#allocation5 + $0x1], 0  ;;  %s10399_s18 = smov 0   ;;  %s10401_s19 = smov 0  }
   0x2   :  { %s10403_s20 = smov 0   ;;  %s10405_s21 = smov 0  }
   0x3 LB: > { %s10420_s22 = sadd.s32 4294967295, %s10360_s21   ;;  %s9354_s23 = sadd.s32 4294967294, %s10360_s21   ;;  %s10360_s21 = sphi %s10405_s21, %s14338_s21   ;;  %s10356_s20 = sphi %s10403_s20, %s14337_s20   ;;  %s10352_s19 = sphi %s10401_s19, %s14336_s19   ;;  %s10348_s18 = sphi %s10399_s18, %s14335_s18  }
   0x4   : > { %s10424_s24 = sadd.s32 1, %s10360_s21   ;;  %s135_s25 = sadd.s32 1, %s10356_s20 }
   0x5   : > { %s132_s26 = ssub.s32 %s10360_s21, %s10424_s24  ;;  %p145_p0 = scmp.ne.s32.totalorder %s10356_s20, %s10352_s19 }
   0x6   : > { %p133_p1 = scmp.eq.s32.totalorder %s132_s26, 0  ;;  %p146_p2 = scmp.eq.s32.totalorder %s10420_s22, 1 }
   0x7   : > { %p151_p3 = scmp.ne.s32.totalorder %s10352_s19, %s10348_s18  ;;  %p152_p4 = scmp.eq.s32.totalorder %s9354_s23, 1 }
   0x8   : > { %s10435_s27 = scalar_select %p133_p1, %s10356_s20, %s135_s25  }
   0x9   : > { %p10437_p5 = por %p146_p2, %p145_p0  ;;  %p10441_p6 = por %p152_p4, %p151_p3 }
   0xa   : > { %p9357_p7 = scmp.ge.s32.totalorder %s10360_s21, 1  ;;  %p190_p8 = scmp.lt.s32.totalorder %s10360_s21, 3 }
   0xc   : > { %p191_p9 = pnand %p9357_p7, %p190_p8 }
   0xd   : > { %p218_p10 = scmp.lt.s32.totalorder (!%p191_p9), %s10420_s22, 1  ;;  %s10363_s10 = smov (!%p191_p9), 32  }
   0xe   : > { %194 = sbr.rel (%p191_p9) target bundleno = 1298 (0x512), region = 40  ;;  %s10364_s17 = smov (!%p191_p9), 64  }
   0xf   : > { %s10365_s12 = smov (!%p191_p9), 96   ;;  %s215_s13 = sand.u32 (!%p191_p9), 1, %s10352_s19  }
  0x10   : > { %s13932_s14 = sshll.u32 (!%p191_p9), %s215_s13, 8 }
  0x11   : > { %s13962_s15 = scalar_lea.vmem (!%p191_p9), [#allocation4], %s13932_s14 }
  0x13   : > { %vm224_vm0 = vcmask 257024   ;;  %v10362_v0 = vmov 0   ;;  %vm227_vm1 = vcmask 253952   ;;  %vm312_vm2 = vsmask.f32 256  ;;  %s219_s30 = scalar_select %p218_p10, %s10420_s22, 1 }
  0x14   : > { %225 = vst.msk [vmem:[#allocation2] sm:$0xf] %vm224_vm0, %v10362_v0  ;;  %226 = vst.msk [vmem:[#allocation2 + $0x4] sm:$0xf] %vm224_vm0, %v10362_v0  ;;  %vm865_vm3 = vsmask.f32 3328 }
  0x15   : > { %229 = vst.msk [vmem:[#allocation2 + $0xc] sm:$0xf] %vm224_vm0, %v10362_v0  ;;  %230 = vst.msk [vmem:[#allocation2 + $0x10] sm:$0xf] %vm224_vm0, %v10362_v0  ;;  %vm866_vm4 = vsmask.f32 7440 }
  0x16   : > { %232 = vst.msk [vmem:[#allocation2 + $0x18] sm:$0xf] %vm224_vm0, %v10362_v0  ;;  %233 = vst.msk [vmem:[#allocation2 + $0x1c] sm:$0xf] %vm224_vm0, %v10362_v0  ;;  %vm313_vm5 = vsmask.f32 4368 }
  0x17   : > { %235 = vst.msk [vmem:[#allocation2 + $0x24] sm:$0xf] %vm224_vm0, %v10362_v0  ;;  %236 = vst.msk [vmem:[#allocation2 + $0x28] sm:$0xf] %vm224_vm0, %v10362_v0  ;;  %s9660_s6 = sshll.u32 %s219_s30, 7  ;;  %vm1477_vm11 = vcmask 1042432  }
  0x18   : > { %238 = vst.msk [vmem:[#allocation2 + $0x30] sm:$0xf] %vm224_vm0, %v10362_v0  ;;  %239 = vst.msk [vmem:[#allocation2 + $0x34] sm:$0xf] %vm224_vm0, %v10362_v0  ;;  %s10508_s9 = scalar_lea.vmem %s14317_s0, %s9660_s6  ;;  %vm637_vm6 = vsmask.f32 7938 }
  0x19   : > { %241 = vst.msk [vmem:[#allocation2 + $0x3c] sm:$0xf] %vm224_vm0, %v10362_v0  ;;  %242 = vst.msk [vmem:[#allocation2 + $0x40] sm:$0xf] %vm224_vm0, %v10362_v0  ;;  %v280_v1 = vld [vmem:[%s10508_s9] sm:$0xf] }
  0x1a   : > { %244 = vst.msk [vmem:[#allocation2 + $0x48] sm:$0xf] %vm224_vm0, %v10362_v0  ;;  %245 = vst.msk [vmem:[#allocation2 + $0x4c] sm:$0xf] %vm224_vm0, %v10362_v0  ;;  %v281_v2 = vld [vmem:[%s10508_s9 + $0x4] sm:$0xf] }
  0x1b   : > { %247 = vst.msk [vmem:[#allocation2 + $0x54] sm:$0xf] %vm224_vm0, %v10362_v0  ;;  %248 = vst.msk [vmem:[#allocation2 + $0x58] sm:$0xf] %vm224_vm0, %v10362_v0  ;;  %v817_v3 = vld [vmem:[#allocation2] sm:$0xf] }
  0x1c   : > { %250 = vst.msk [vmem:[#allocation2 + $0x60] sm:$0xf] %vm224_vm0, %v10362_v0  ;;  %251 = vst.msk [vmem:[#allocation2 + $0x64] sm:$0xf] %vm224_vm0, %v10362_v0  ;;  %v818_v4 = vld [vmem:[#allocation2 + $0x4] sm:$0xf] }
  0x1d   : > { %253 = vst.msk [vmem:[#allocation2 + $0x6c] sm:$0xf] %vm224_vm0, %v10362_v0  ;;  %254 = vst.msk [vmem:[#allocation2 + $0x70] sm:$0xf] %vm224_vm0, %v10362_v0  ;;  %v316_v5 = vshrl.u32 %v280_v1, 16  ;;  %v319_v6 = vshll.u32 %v280_v1, 16 }
  0x1e   : > { %256 = vst.msk [vmem:[#allocation2 + $0x78] sm:$0xf] %vm224_vm0, %v10362_v0  ;;  %257 = vst.msk [vmem:[#allocation2 + $0x7c] sm:$0xf] %vm224_vm0, %v10362_v0  ;;  %v282_v7 = vld [vmem:[%s10508_s9 + $0x8] sm:$0xf] }
  0x1f   : > { %259 = vst.msk [vmem:[#allocation2 + $0x84] sm:$0xf] %vm224_vm0, %v10362_v0  ;;  %260 = vst.msk [vmem:[#allocation2 + $0x88] sm:$0xf] %vm224_vm0, %v10362_v0  ;;  %v869_v8 = vshrl.u32 %v817_v3, 16  ;;  %v872_v9 = vshll.u32 %v817_v3, 16 }
  0x20   : > { %262 = vst.msk [vmem:[#allocation2 + $0x90] sm:$0xf] %vm224_vm0, %v10362_v0  ;;  %263 = vst.msk [vmem:[#allocation2 + $0x94] sm:$0xf] %vm224_vm0, %v10362_v0  ;;  %v878_v10 = vshll.u32 %v818_v4, 16  ;;  %v882_v11 = vshrl.u32 %v818_v4, 16 }
  0x21   : > { %265 = vst.msk [vmem:[#allocation2 + $0x9c] sm:$0xf] %vm224_vm0, %v10362_v0  ;;  %266 = vst.msk [vmem:[#allocation2 + $0xa0] sm:$0xf] %vm224_vm0, %v10362_v0  ;;  %v318_v14 = vrot.slane %v316_v5, 7  ;;  %v324_v15 = vshrl.u32 %v281_v2, 16 }
  0x22   : > { %268 = vst.msk [vmem:[#allocation2 + $0xa8] sm:$0xf] %vm224_vm0, %v10362_v0  ;;  %269 = vst.msk [vmem:[#allocation2 + $0xac] sm:$0xf] %vm224_vm0, %v10362_v0  ;;  %v327_v16 = vshll.u32 %v281_v2, 16  ;;  %v871_v18 = vrot.slane %v869_v8, 4 }
  0x23   : > { %271 = vst.msk [vmem:[#allocation2 + $0xb4] sm:$0xf] %vm224_vm0, %v10362_v0  ;;  %272 = vst.msk [vmem:[#allocation2 + $0xb8] sm:$0xf] %vm224_vm0, %v10362_v0  ;;  %v639_v17 = vld [vmem:[#allocation2 + $0xc] sm:$0xf]  ;;  %v321_v25 = vor.u32 %v319_v6, %v318_v14 }
  0x24   : > { %274 = vst.msk [vmem:[#allocation2 + $0xc0] sm:$0xf] %vm224_vm0, %v10362_v0  ;;  %275 = vst.msk [vmem:[#allocation2 + $0xc4] sm:$0xf] %vm224_vm0, %v10362_v0  ;;  %v874_v19 = vrot.slane %v872_v9, 5  ;;  %v880_v20 = vrot.slane %v878_v10, 5 }
  0x25   : > { %277 = vst.msk [vmem:[#allocation2 + $0xcc] sm:$0xf] %vm224_vm0, %v10362_v0  ;;  %278 = vst.msk [vmem:[#allocation2 + $0xd0] sm:$0xf] %vm224_vm0, %v10362_v0  ;;  %v884_v21 = vrot.slane %v882_v11, 4  ;;  %v322_v26 = vrot.slane %v318_v14, 4 }
  0x26   : > { %228 = vst.msk [vmem:[#allocation2 + $0x8] sm:$0x1] %vm227_vm1, %v10362_v0  ;;  %231 = vst.msk [vmem:[#allocation2 + $0x14] sm:$0x1] %vm227_vm1, %v10362_v0  ;;  %v283_v23 = vld [vmem:[%s10508_s9 + $0xc] sm:$0xf]  ;;  %v875_v28 = vor.u32 %v874_v19, %v871_v18 }
  0x27   : > { %234 = vst.msk [vmem:[#allocation2 + $0x20] sm:$0x1] %vm227_vm1, %v10362_v0  ;;  %237 = vst.msk [vmem:[#allocation2 + $0x2c] sm:$0x1] %vm227_vm1, %v10362_v0  ;;  %v326_v27 = vrot.slane %v324_v15, 7  ;;  %v885_v29 = vor.u32 %v884_v21, %v880_v20  ;;  %v333_v31 = vshrl.u32 %v282_v7, 16 }
  0x28   : > { %240 = vst.msk [vmem:[#allocation2 + $0x38] sm:$0x1] %vm227_vm1, %v10362_v0  ;;  %243 = vst.msk [vmem:[#allocation2 + $0x44] sm:$0x1] %vm227_vm1, %v10362_v0  ;;  %v336_v32 = vshll.u32 %v282_v7, 16  ;;  %v341_v37 = vshrl.u32 %v283_v23, 16 }
  0x29   : > { %246 = vst.msk [vmem:[#allocation2 + $0x50] sm:$0x1] %vm227_vm1, %v10362_v0  ;;  %249 = vst.msk [vmem:[#allocation2 + $0x5c] sm:$0x1] %vm227_vm1, %v10362_v0  ;;  %v284_v33 = vld [vmem:[%s10508_s9 + $0x10] sm:$0xf]  ;;  %v329_v35 = vor.u32 %v327_v16, %v326_v27 }
  0x2a   : > { %252 = vst.msk [vmem:[#allocation2 + $0x68] sm:$0x1] %vm227_vm1, %v10362_v0  ;;  %255 = vst.msk [vmem:[#allocation2 + $0x74] sm:$0x1] %vm227_vm1, %v10362_v0  ;;  %v344_v38 = vshll.u32 %v283_v23, 16  ;;  %v876_v41 = vrot.slane %v875_v28, 4 }
  0x2b   : > { %258 = vst.msk [vmem:[#allocation2 + $0x80] sm:$0x1] %vm227_vm1, %v10362_v0  ;;  %261 = vst.msk [vmem:[#allocation2 + $0x8c] sm:$0x1] %vm227_vm1, %v10362_v0  ;;  %v648_v39 = vld [vmem:[#allocation2 + $0x18] sm:$0xf] }
  0x2c   : > { %264 = vst.msk [vmem:[#allocation2 + $0x98] sm:$0x1] %vm227_vm1, %v10362_v0  ;;  %267 = vst.msk [vmem:[#allocation2 + $0xa4] sm:$0x1] %vm227_vm1, %v10362_v0  ;;  %v886_v43 = vrot.slane %v885_v29, 4  ;;  %v335_v44 = vrot.slane %v333_v31, 7 }
  0x2d   : > { %270 = vst.msk [vmem:[#allocation2 + $0xb0] sm:$0x1] %vm227_vm1, %v10362_v0  ;;  %273 = vst.msk [vmem:[#allocation2 + $0xbc] sm:$0x1] %vm227_vm1, %v10362_v0  ;;  %v819_v12 = vld [vmem:[#allocation2 + $0x8] sm:$0x1] }
  0x2e   : > { %276 = vst.msk [vmem:[#allocation2 + $0xc8] sm:$0x1] %vm227_vm1, %v10362_v0  ;;  %279 = vst.msk [vmem:[#allocation2 + $0xd4] sm:$0x1] %vm227_vm1, %v10362_v0  ;;  %v888_v13 = vshll.u32 %v819_v12, 16  ;;  %v331_v45 = vrot.slane %v326_v27, 4  ;;  %v338_v54 = vor.u32 %v336_v32, %v335_v44 }
  0x2f   : > { %vm10515_vm7 = vmand %vm224_vm0, %vm637_vm6  ;;  %v645_v40 = vld [vmem:[#allocation2 + $0x14] sm:$0x1]  ;;  %v343_v48 = vrot.slane %v341_v37, 7  ;;  %v350_v49 = vshrl.u32 %v284_v33, 16  ;;  %v353_v50 = vshll.u32 %v284_v33, 16  ;;  %v339_v55 = vrot.slane %v335_v44, 4 }
  0x30   : > { %v890_v24 = vrot.slane %v888_v13, 5  ;;  %vm10522_vm8 = vmor %vm312_vm2, %vm313_vm5  ;;  %v640_v36 = vsel %vm10515_vm7, %v321_v25, %v639_v17  ;;  %v285_v46 = vld [vmem:[%s10508_s9 + $0x14] sm:$0xf]  ;;  %v286_v51 = vld [vmem:[%s10508_s9 + $0x18] sm:$0xf]  ;;  %v649_v62 = vsel %vm10515_vm7, %v338_v54, %v648_v39  ;;  %vm1478_vm12 = vcmask 1046532  }
  0x31   : > { %vm10529_vm9 = vmor %vm865_vm3, %vm866_vm4  ;;  %641 = vst [vmem:[#allocation2 + $0xc] sm:$0xf] %v640_v36  ;;  %v330_v47 = vsel %vm10522_vm8, %v322_v26, %v329_v35  ;;  %v346_v56 = vor.u32 %v344_v38, %v343_v48  ;;  %v352_v58 = vrot.slane %v350_v49, 7  ;;  %v358_v59 = vshrl.u32 %v285_v46, 16  ;;  %v652_v60 = vld [vmem:[#allocation2 + $0x20] sm:$0x1] }
  0x32   : > { %vm10537_vm10 = vmand %vm227_vm1, %vm312_vm2  ;;  %v881_v52 = vsel %vm10529_vm9, %v876_v41, %v880_v20  ;;  %v891_v53 = vsel %vm10529_vm9, %v886_v43, %v890_v24  ;;  %642 = vst.msk [vmem:[#allocation2 + $0x10] sm:$0xf] %vm224_vm0, %v330_v47  ;;  %v287_v61 = vld [vmem:[%s10508_s9 + $0x1c] sm:$0xf]  ;;  %v361_v63 = vshll.u32 %v285_v46, 16  ;;  %v348_v1 = vrot.slane %v343_v48, 4 }
  0x33   : > { %1252 = vrot.lane.b32.xlu0 %v881_v52, %s10363_s10  ;;  %v646_v57 = vsel %vm10537_vm10, %v331_v45, %v645_v40  ;;  %v655_v0 = vld [vmem:[#allocation2 + $0x24] sm:$0xf]  ;;  %v367_v2 = vshrl.u32 %v286_v51, 16  ;;  %v347_v3 = vsel %vm10522_vm8, %v339_v55, %v346_v56  ;;  %650 = vst [vmem:[#allocation2 + $0x18] sm:$0xf] %v649_v62  ;;  %v355_v4 = vor.u32 %v353_v50, %v352_v58  ;;  %vm10745_vm13 = vmor %vm1477_vm11, %vm1478_vm12  ;;  %s10366_s30 = smov [#allocation4]  }
  0x34   : > { %647 = vst [vmem:[#allocation2 + $0x14] sm:$0x1] %v646_v57  ;;  %v356_v5 = vrot.slane %v352_v58, 4  ;;  %v360_v6 = vrot.slane %v358_v59, 7  ;;  %v659_v7 = vld [vmem:[#allocation2 + $0x2c] sm:$0x1]  ;;  %v653_v8 = vsel %vm10537_vm10, %v348_v1, %v652_v60 }
  0x35   : > { %651 = vst.msk [vmem:[#allocation2 + $0x1c] sm:$0xf] %vm224_vm0, %v347_v3  ;;  %v369_v9 = vrot.slane %v367_v2, 7  ;;  %v370_v10 = vshll.u32 %v286_v51, 16  ;;  %v375_v11 = vshrl.u32 %v287_v61, 16  ;;  %v656_v15 = vsel %vm10515_vm7, %v355_v4, %v655_v0  ;;  %s10304_s6 = sshll.u32 %s10366_s30, 4  ;;  %s10305_s6 = int_to_ptr.vmem [resolvable:$false] %s10304_s6 }
  0x36   : > { %v288_v12 = vld [vmem:[%s10508_s9 + $0x20] sm:$0xf]  ;;  %v363_v14 = vor.u32 %v361_v63, %v360_v6  ;;  %654 = vst [vmem:[#allocation2 + $0x20] sm:$0x1] %v653_v8  ;;  %v378_v16 = vshll.u32 %v287_v61, 16  ;;  %v365_v17 = vrot.slane %v360_v6, 4 }
  0x37   : > { %1254 = vrot.lane.b32.xlu0 %v891_v53, %s10363_s10  ;;  %657 = vst [vmem:[#allocation2 + $0x24] sm:$0xf] %v656_v15  ;;  %v372_v20 = vor.u32 %v370_v10, %v369_v9  ;;  %v373_v21 = vrot.slane %v369_v9, 4  ;;  %v662_v23 = vld [vmem:[#allocation2 + $0x30] sm:$0xf]  ;;  %v10567_v26 = vrot.slane %v375_v11, 7 }
  0x38   : > { %v820_v13 = vld [vmem:[#allocation2 + $0xc] sm:$0xf]  ;;  %v364_v25 = vsel %vm10522_vm8, %v356_v5, %v363_v14  ;;  %v660_v27 = vsel %vm10537_vm10, %v365_v17, %v659_v7  ;;  %v384_v28 = vshrl.u32 %v288_v12, 16  ;;  %v387_v39 = vshll.u32 %v288_v12, 16  ;;  %s10306_s7 = scalar_lea.vmem %s10305_s6, 8192 }
  0x39   : > { %v893_v18 = vshrl.u32 %v820_v13, 16  ;;  %v896_v19 = vshll.u32 %v820_v13, 16  ;;  %v821_v24 = vld [vmem:[#allocation2 + $0x10] sm:$0xf]  ;;  %658 = vst.msk [vmem:[#allocation2 + $0x28] sm:$0xf] %vm224_vm0, %v364_v25  ;;  %v380_v36 = vor.u32 %v378_v16, %v10567_v26  ;;  %v663_v37 = vsel %vm10515_vm7, %v372_v20, %v662_v23 }
  0x3a   : > { %v902_v32 = vshll.u32 %v821_v24, 16  ;;  %v906_v33 = vshrl.u32 %v821_v24, 16  ;;  %661 = vst [vmem:[#allocation2 + $0x2c] sm:$0x1] %v660_v27  ;;  %v10575_v38 = vrot.slane %v384_v28, 7  ;;  %vm1348_vm14 = vcmask 519424  }
  0x3b   : > { %v895_v29 = vrot.slane %v893_v18, 4  ;;  %v898_v31 = vrot.slane %v896_v19, 5  ;;  %v822_v35 = vld [vmem:[#allocation2 + $0x14] sm:$0x1]  ;;  %v823_v43 = vld [vmem:[#allocation2 + $0x18] sm:$0xf]  ;;  %v381_v49 = vsel %vm10522_vm8, %v373_v21, %v380_v36 }
  0x3c   : > { %v904_v41 = vrot.slane %v902_v32, 5  ;;  %v908_v44 = vrot.slane %v906_v33, 4  ;;  %v912_v45 = vshll.u32 %v822_v35, 16  ;;  %664 = vst [vmem:[#allocation2 + $0x30] sm:$0xf] %v663_v37  ;;  %v917_v47 = vshrl.u32 %v823_v43, 16 }
  0x3d   : > { %v899_v40 = vor.u32 %v898_v31, %v895_v29  ;;  %v824_v46 = vld [vmem:[#allocation2 + $0x1c] sm:$0xf]  ;;  %v920_v48 = vshll.u32 %v823_v43, 16  ;;  %v10580_v50 = vor.u32 %v387_v39, %v10575_v38  ;;  %v825_v55 = vld [vmem:[#allocation2 + $0x20] sm:$0x1]  ;;  %v390_v39 = vrot.slane %v10575_v38, 4 }
  0x3e   : > { %v926_v52 = vshll.u32 %v824_v46, 16  ;;  %v909_v53 = vor.u32 %v908_v44, %v904_v41  ;;  %v914_v54 = vrot.slane %v912_v45, 5  ;;  %665 = vst.msk [vmem:[#allocation2 + $0x34] sm:$0xf] %vm224_vm0, %v381_v49  ;;  %v919_v56 = vrot.slane %v917_v47, 4 }
  0x3f   : > { %v900_v51 = vrot.slane %v899_v40, 4  ;;  %v922_v57 = vrot.slane %v920_v48, 5  ;;  %v826_v58 = vld [vmem:[#allocation2 + $0x24] sm:$0xf]  ;;  %v930_v59 = vshrl.u32 %v824_v46, 16  ;;  %v936_v60 = vshll.u32 %v825_v55, 16 }
  0x40   : > { %v928_v62 = vrot.slane %v926_v52, 5  ;;  %v910_v63 = vrot.slane %v909_v53, 4  ;;  %v941_v0 = vshrl.u32 %v826_v58, 16  ;;  %v827_v2 = vld [vmem:[#allocation2 + $0x28] sm:$0xf]  ;;  %v944_v3 = vshll.u32 %v826_v58, 16 }
  0x41   : > { %v905_v61 = vsel %vm10529_vm9, %v900_v51, %v904_v41  ;;  %v923_v1 = vor.u32 %v922_v57, %v919_v56  ;;  %v932_v4 = vrot.slane %v930_v59, 4  ;;  %v938_v5 = vrot.slane %v936_v60, 5  ;;  %v828_v9 = vld [vmem:[#allocation2 + $0x2c] sm:$0x1]  ;;  %v289_v20 = vld [vmem:[%s10508_s9 + $0x24] sm:$0xf] }
  0x42   : > { %1256 = vrot.lane.b32.xlu1 %v905_v61, %s10363_s10  ;;  %v915_v6 = vsel %vm10529_vm9, %v910_v63, %v914_v54  ;;  %v943_v7 = vrot.slane %v941_v0, 4  ;;  %v950_v8 = vshll.u32 %v827_v2, 16  ;;  %v954_v10 = vshrl.u32 %v827_v2, 16  ;;  %v669_v28 = vld [vmem:[#allocation2 + $0x3c] sm:$0xf] }
  0x43   : > { %v924_v11 = vrot.slane %v923_v1, 4  ;;  %v946_v12 = vrot.slane %v944_v3, 5  ;;  %v933_v13 = vor.u32 %v932_v4, %v928_v62  ;;  %v829_v14 = vld [vmem:[#allocation2 + $0x30] sm:$0xf]  ;;  %v960_v15 = vshll.u32 %v828_v9, 16 }
  0x44   : > { %v952_v16 = vrot.slane %v950_v8, 5  ;;  %v965_v17 = vshrl.u32 %v829_v14, 16  ;;  %v968_v18 = vshll.u32 %v829_v14, 16  ;;  %v956_v19 = vrot.slane %v954_v10, 4  ;;  %v666_v35 = vld [vmem:[#allocation2 + $0x38] sm:$0x1] }
  0x45   : > { %v929_v21 = vsel %vm10529_vm9, %v924_v11, %v928_v62  ;;  %v947_v23 = vor.u32 %v946_v12, %v943_v7  ;;  %v934_v24 = vrot.slane %v933_v13, 4  ;;  %v830_v25 = vld [vmem:[#allocation2 + $0x34] sm:$0xf]  ;;  %v962_v27 = vrot.slane %v960_v15, 5  ;;  %v290_v41 = vld [vmem:[%s10508_s9 + $0x28] sm:$0xf] }
  0x46   : > { %1258 = vrot.lane.b32.xlu1 %v915_v6, %s10363_s10  ;;  %1260 = vrot.lane.b32.xlu0 %v929_v21, %s10363_s10  ;;  %v967_v29 = vrot.slane %v965_v17, 4  ;;  %v970_v31 = vrot.slane %v968_v18, 5  ;;  %v974_v32 = vshll.u32 %v830_v25, 16  ;;  %v957_v33 = vor.u32 %v956_v19, %v952_v16  ;;  %v291_v47 = vld [vmem:[%s10508_s9 + $0x2c] sm:$0xf] }
  0x47   : > { %v948_v36 = vrot.slane %v947_v23, 4  ;;  %v939_v37 = vsel %vm10529_vm9, %v934_v24, %v938_v5  ;;  %v392_v40 = vshrl.u32 %v289_v20, 16  ;;  %v395_v46 = vshll.u32 %v289_v20, 16  ;;  %v292_v56 = vld [vmem:[%s10508_s9 + $0x30] sm:$0xf] }
  0x48   : > { %v971_v43 = vor.u32 %v970_v31, %v967_v29  ;;  %v976_v44 = vrot.slane %v974_v32, 5  ;;  %v958_v45 = vrot.slane %v957_v33, 4  ;;  %v670_v51 = vsel %vm10515_vm7, %v10580_v50, %v669_v28  ;;  %v673_v50 = vld [vmem:[#allocation2 + $0x44] sm:$0x1]  ;;  %v293_v0 = vld [vmem:[%s10508_s9 + $0x34] sm:$0xf] }
  0x49   : > { %v953_v48 = vsel %vm10529_vm9, %v948_v36, %v952_v16  ;;  %v394_v49 = vrot.slane %v392_v40, 7  ;;  %v382_v38 = vrot.slane %v10567_v26, 4  ;;  %671 = vst [vmem:[#allocation2 + $0x3c] sm:$0xf] %v670_v51  ;;  %v978_v54 = vshrl.u32 %v830_v25, 16 }
  0x4a   : > { %1262 = vrot.lane.b32.xlu1 %v939_v37, %s10363_s10  ;;  %1264 = vrot.lane.b32.xlu0 %v953_v48, %s10363_s10  ;;  %v972_v52 = vrot.slane %v971_v43, 4  ;;  %v963_v53 = vsel %vm10529_vm9, %v958_v45, %v962_v27  ;;  %v401_v55 = vshrl.u32 %v290_v41, 16  ;;  %v404_v59 = vshll.u32 %v290_v41, 16  ;;  %v676_v3 = vld [vmem:[#allocation2 + $0x48] sm:$0xf] }
  0x4b   : > { %v397_v57 = vor.u32 %v395_v46, %v394_v49  ;;  %v667_v58 = vsel %vm10537_vm10, %v382_v38, %v666_v35  ;;  %v409_v60 = vshrl.u32 %v291_v47, 16  ;;  %v980_v61 = vrot.slane %v978_v54, 4  ;;  %v683_v10 = vld [vmem:[#allocation2 + $0x54] sm:$0xf]  ;;  %v680_v15 = vld [vmem:[#allocation2 + $0x50] sm:$0x1] }
  0x4c   : > { %v977_v26 = vsel %vm10529_vm9, %v972_v52, %v976_v44  ;;  %668 = vst [vmem:[#allocation2 + $0x38] sm:$0x1] %v667_v58  ;;  %v403_v62 = vrot.slane %v401_v55, 7  ;;  %v412_v63 = vshll.u32 %v291_v47, 16  ;;  %v399_v4 = vrot.slane %v394_v49, 4 }
  0x4d   : > { %v398_v1 = vsel %vm10522_vm8, %v390_v39, %v397_v57  ;;  %v411_v2 = vrot.slane %v409_v60, 7  ;;  %v418_v5 = vshrl.u32 %v292_v56, 16  ;;  %v981_v6 = vor.u32 %v980_v61, %v976_v44  ;;  %v294_v16 = vld [vmem:[%s10508_s9 + $0x38] sm:$0xf]  ;;  %v295_v21 = vld [vmem:[%s10508_s9 + $0x3c] sm:$0xf] }
  0x4e   : > { %1266 = vrot.lane.b32.xlu1 %v963_v53, %s10363_s10  ;;  %1268 = vrot.lane.b32.xlu0 %v977_v26, %s10363_s10  ;;  %672 = vst.msk [vmem:[#allocation2 + $0x40] sm:$0xf] %vm224_vm0, %v398_v1  ;;  %v406_v7 = vor.u32 %v404_v59, %v403_v62  ;;  %v407_v8 = vrot.slane %v403_v62, 4  ;;  %v421_v9 = vshll.u32 %v292_v56, 16  ;;  %v674_v12 = vsel %vm10537_vm10, %v399_v4, %v673_v50  ;;  %v687_v46 = vld [vmem:[#allocation2 + $0x5c] sm:$0x1] }
  0x4f   : > { %v414_v11 = vor.u32 %v412_v63, %v411_v2  ;;  %v420_v13 = vrot.slane %v418_v5, 7  ;;  %v426_v14 = vshrl.u32 %v293_v0, 16  ;;  %v982_v17 = vrot.slane %v981_v6, 4  ;;  %675 = vst [vmem:[#allocation2 + $0x44] sm:$0x1] %v674_v12 }
  0x50   : > { %v677_v18 = vsel %vm10515_vm7, %v406_v7, %v676_v3  ;;  %v429_v19 = vshll.u32 %v293_v0, 16  ;;  %v416_v20 = vrot.slane %v411_v2, 4  ;;  %v832_v23 = vld [vmem:[#allocation2 + $0x3c] sm:$0xf]  ;;  %v435_v33 = vshrl.u32 %v294_v16, 16 }
  0x51   : > { %v415_v24 = vsel %vm10522_vm8, %v407_v8, %v414_v11  ;;  %678 = vst [vmem:[#allocation2 + $0x48] sm:$0xf] %v677_v18  ;;  %v423_v25 = vor.u32 %v421_v9, %v420_v13  ;;  %v424_v27 = vrot.slane %v420_v13, 4  ;;  %v428_v28 = vrot.slane %v426_v14, 7 }
  0x52   : > { %v989_v29 = vshrl.u32 %v832_v23, 16  ;;  %v992_v31 = vshll.u32 %v832_v23, 16  ;;  %679 = vst.msk [vmem:[#allocation2 + $0x4c] sm:$0xf] %vm224_vm0, %v415_v24  ;;  %v681_v32 = vsel %vm10537_vm10, %v416_v20, %v680_v15  ;;  %v438_v39 = vshll.u32 %v294_v16, 16 }
  0x53   : > { %v831_v35 = vld [vmem:[#allocation2 + $0x38] sm:$0x1]  ;;  %v431_v36 = vor.u32 %v429_v19, %v428_v28  ;;  %v684_v37 = vsel %vm10515_vm7, %v423_v25, %v683_v10  ;;  %682 = vst [vmem:[#allocation2 + $0x50] sm:$0x1] %v681_v32  ;;  %v443_v40 = vshrl.u32 %v295_v21, 16  ;;  %v437_v45 = vrot.slane %v435_v33, 7 }
  0x54   : > { %v991_v41 = vrot.slane %v989_v29, 4  ;;  %v994_v43 = vrot.slane %v992_v31, 5  ;;  %v984_v44 = vshll.u32 %v831_v35, 16  ;;  %685 = vst [vmem:[#allocation2 + $0x54] sm:$0xf] %v684_v37  ;;  %v446_v51 = vshll.u32 %v295_v21, 16 }
  0x55   : > { %v833_v47 = vld [vmem:[#allocation2 + $0x40] sm:$0xf]  ;;  %v432_v48 = vsel %vm10522_vm8, %v424_v27, %v431_v36  ;;  %v10634_v49 = vrot.slane %v443_v40, 7  ;;  %v433_v38 = vrot.slane %v428_v28, 4  ;;  %v440_v57 = vor.u32 %v438_v39, %v437_v45  ;;  %v297_v33 = vld [vmem:[%s10508_s9 + $0x44] sm:$0xf] }
  0x56   : > { %v995_v52 = vor.u32 %v994_v43, %v991_v41  ;;  %v998_v53 = vshll.u32 %v833_v47, 16  ;;  %v986_v54 = vrot.slane %v984_v44, 5  ;;  %v1002_v55 = vshrl.u32 %v833_v47, 16  ;;  %686 = vst.msk [vmem:[#allocation2 + $0x58] sm:$0xf] %vm224_vm0, %v432_v48 }
  0x57   : > { %v834_v56 = vld [vmem:[#allocation2 + $0x44] sm:$0x1]  ;;  %v441_v58 = vrot.slane %v437_v45, 4  ;;  %v448_v59 = vor.u32 %v446_v51, %v10634_v49  ;;  %v688_v60 = vsel %vm10537_vm10, %v433_v38, %v687_v46  ;;  %v690_v10 = vld [vmem:[#allocation2 + $0x60] sm:$0xf]  ;;  %vm4226_vm15 = vcmask 261120  }
  0x58   : > { %v996_v50 = vrot.slane %v995_v52, 4  ;;  %v1000_v26 = vrot.slane %v998_v53, 5  ;;  %v987_v61 = vsel %vm10529_vm9, %v982_v17, %v986_v54  ;;  %v835_v62 = vld [vmem:[#allocation2 + $0x48] sm:$0xf]  ;;  %v1004_v63 = vrot.slane %v1002_v55, 4 }
  0x59   : > { %689 = vst [vmem:[#allocation2 + $0x5c] sm:$0x1] %v688_v60  ;;  %1270 = vrot.lane.b32.xlu1 %v987_v61, %s10363_s10  ;;  %v836_v0 = vld [vmem:[#allocation2 + $0x4c] sm:$0xf]  ;;  %v1013_v1 = vshrl.u32 %v835_v62, 16  ;;  %v1016_v2 = vshll.u32 %v835_v62, 16  ;;  %v449_v4 = vsel %vm10522_vm8, %v441_v58, %v448_v59  ;;  %v691_v27 = vsel %vm10515_vm7, %v440_v57, %v690_v10 }
  0x5a   : > { %v1008_v3 = vshll.u32 %v834_v56, 16  ;;  %v1001_v5 = vsel %vm10529_vm9, %v996_v50, %v1000_v26  ;;  %v1022_v6 = vshll.u32 %v836_v0, 16  ;;  %v1005_v7 = vor.u32 %v1004_v63, %v1000_v26  ;;  %v837_v8 = vld [vmem:[#allocation2 + $0x50] sm:$0x1]  ;;  %693 = vst.msk [vmem:[#allocation2 + $0x64] sm:$0xf] %vm224_vm0, %v449_v4 }
  0x5b   : > { %v1026_v9 = vshrl.u32 %v836_v0, 16  ;;  %1272 = vrot.lane.b32.xlu0 %v1001_v5, %s10363_s10  ;;  %v1015_v11 = vrot.slane %v1013_v1, 4  ;;  %v1018_v12 = vrot.slane %v1016_v2, 5  ;;  %v838_v14 = vld [vmem:[#allocation2 + $0x54] sm:$0xf]  ;;  %v1032_v15 = vshll.u32 %v837_v8, 16 }
  0x5c   : > { %v1010_v13 = vrot.slane %v1008_v3, 5  ;;  %v1024_v16 = vrot.slane %v1022_v6, 5  ;;  %v1006_v17 = vrot.slane %v1005_v7, 4  ;;  %v1037_v18 = vshrl.u32 %v838_v14, 16  ;;  %v296_v20 = vld [vmem:[%s10508_s9 + $0x40] sm:$0xf] }
  0x5d   : > { %v1040_v19 = vshll.u32 %v838_v14, 16  ;;  %v1019_v21 = vor.u32 %v1018_v12, %v1015_v11  ;;  %v839_v23 = vld [vmem:[#allocation2 + $0x58] sm:$0xf]  ;;  %v1028_v24 = vrot.slane %v1026_v9, 4  ;;  %v1034_v25 = vrot.slane %v1032_v15, 5 }
  0x5e   : > { %v1011_v28 = vsel %vm10529_vm9, %v1006_v17, %v1010_v13  ;;  %v1039_v29 = vrot.slane %v1037_v18, 4  ;;  %v1046_v32 = vshll.u32 %v839_v23, 16  ;;  %692 = vst [vmem:[#allocation2 + $0x60] sm:$0xf] %v691_v27  ;;  %v1050_v39 = vshrl.u32 %v839_v23, 16 }
  0x5f   : > { %v1042_v31 = vrot.slane %v1040_v19, 5  ;;  %v1020_v35 = vrot.slane %v1019_v21, 4  ;;  %1274 = vrot.lane.b32.xlu1 %v1011_v28, %s10363_s10  ;;  %v1029_v36 = vor.u32 %v1028_v24, %v1024_v16  ;;  %v452_v40 = vshrl.u32 %v296_v20, 16  ;;  %v697_v56 = vld [vmem:[#allocation2 + $0x6c] sm:$0xf] }
  0x60   : > { %v840_v37 = vld [vmem:[#allocation2 + $0x5c] sm:$0x1]  ;;  %v1048_v43 = vrot.slane %v1046_v32, 5  ;;  %v455_v45 = vshll.u32 %v296_v20, 16  ;;  %v1052_v51 = vrot.slane %v1050_v39, 4  ;;  %v460_v55 = vshrl.u32 %v297_v33, 16 }
  0x61   : > { %v1043_v41 = vor.u32 %v1042_v31, %v1039_v29  ;;  %v1056_v44 = vshll.u32 %v840_v37, 16  ;;  %v1025_v46 = vsel %vm10529_vm9, %v1020_v35, %v1024_v16  ;;  %v1030_v47 = vrot.slane %v1029_v36, 4  ;;  %v842_v48 = vld [vmem:[#allocation2 + $0x64] sm:$0xf]  ;;  %v298_v50 = vld [vmem:[%s10508_s9 + $0x48] sm:$0xf] }
  0x62   : > { %v454_v38 = vrot.slane %v452_v40, 7  ;;  %1276 = vrot.lane.b32.xlu0 %v1025_v46, %s10363_s10  ;;  %v1070_v53 = vshll.u32 %v842_v48, 16  ;;  %v1053_v58 = vor.u32 %v1052_v51, %v1048_v43  ;;  %v462_v62 = vrot.slane %v460_v55, 7  ;;  %v694_v0 = vld [vmem:[#allocation2 + $0x68] sm:$0x1] }
  0x63   : > { %v1044_v52 = vrot.slane %v1043_v41, 4  ;;  %v1058_v54 = vrot.slane %v1056_v44, 5  ;;  %v1035_v57 = vsel %vm10529_vm9, %v1030_v47, %v1034_v25  ;;  %v463_v63 = vshll.u32 %v297_v33, 16  ;;  %v299_v9 = vld [vmem:[%s10508_s9 + $0x4c] sm:$0xf] }
  0x64   : > { %v457_v59 = vor.u32 %v455_v45, %v454_v38  ;;  %v458_v60 = vrot.slane %v454_v38, 4  ;;  %1278 = vrot.lane.b32.xlu1 %v1035_v57, %s10363_s10  ;;  %v1072_v61 = vrot.slane %v1070_v53, 5  ;;  %v1054_v2 = vrot.slane %v1053_v58, 4  ;;  %v704_v15 = vld [vmem:[#allocation2 + $0x78] sm:$0xf] }
  0x65   : > { %v1049_v26 = vsel %vm10529_vm9, %v1044_v52, %v1048_v43  ;;  %v841_v1 = vld [vmem:[#allocation2 + $0x60] sm:$0xf]  ;;  %v450_v4 = vrot.slane %v10634_v49, 4  ;;  %v1074_v5 = vshrl.u32 %v842_v48, 16  ;;  %v465_v8 = vor.u32 %v463_v63, %v462_v62  ;;  %v300_v49 = vld [vmem:[%s10508_s9 + $0x50] sm:$0xf] }
  0x66   : > { %v698_v3 = vsel %vm10515_vm7, %v457_v59, %v697_v56  ;;  %1280 = vrot.lane.b32.xlu0 %v1049_v26, %s10363_s10  ;;  %v1061_v6 = vshrl.u32 %v841_v1, 16  ;;  %v1064_v7 = vshll.u32 %v841_v1, 16  ;;  %v469_v10 = vshrl.u32 %v298_v50, 16  ;;  %v701_v20 = vld [vmem:[#allocation2 + $0x74] sm:$0x1] }
  0x67   : > { %699 = vst [vmem:[#allocation2 + $0x6c] sm:$0xf] %v698_v3  ;;  %v1059_v11 = vsel %vm10529_vm9, %v1054_v2, %v1058_v54  ;;  %v695_v12 = vsel %vm10537_vm10, %v450_v4, %v694_v0  ;;  %v1076_v13 = vrot.slane %v1074_v5, 4  ;;  %v472_v14 = vshll.u32 %v298_v50, 16  ;;  %v301_v27 = vld [vmem:[%s10508_s9 + $0x54] sm:$0xf] }
  0x68   : > { %v1063_v16 = vrot.slane %v1061_v6, 4  ;;  %v1066_v17 = vrot.slane %v1064_v7, 5  ;;  %1282 = vrot.lane.b32.xlu1 %v1059_v11, %s10363_s10  ;;  %v466_v18 = vsel %vm10522_vm8, %v458_v60, %v465_v8  ;;  %696 = vst [vmem:[#allocation2 + $0x68] sm:$0x1] %v695_v12  ;;  %v471_v19 = vrot.slane %v469_v10, 7 }
  0x69   : > { %700 = vst.msk [vmem:[#allocation2 + $0x70] sm:$0xf] %vm224_vm0, %v466_v18  ;;  %v1077_v21 = vor.u32 %v1076_v13, %v1072_v61  ;;  %v477_v23 = vshrl.u32 %v299_v9, 16  ;;  %v480_v24 = vshll.u32 %v299_v9, 16  ;;  %v467_v25 = vrot.slane %v462_v62, 4 }
  0x6a   : > { %v1067_v28 = vor.u32 %v1066_v17, %v1063_v16  ;;  %v474_v29 = vor.u32 %v472_v14, %v471_v19  ;;  %v475_v31 = vrot.slane %v471_v19, 4  ;;  %v486_v32 = vshrl.u32 %v300_v49, 16  ;;  %v302_v33 = vld [vmem:[%s10508_s9 + $0x58] sm:$0xf]  ;;  %v711_v40 = vld [vmem:[#allocation2 + $0x84] sm:$0xf] }
  0x6b   : > { %v1078_v35 = vrot.slane %v1077_v21, 4  ;;  %v479_v36 = vrot.slane %v477_v23, 7  ;;  %v702_v37 = vsel %vm10537_vm10, %v467_v25, %v701_v20  ;;  %v489_v39 = vshll.u32 %v300_v49, 16  ;;  %v708_v46 = vld [vmem:[#allocation2 + $0x80] sm:$0x1] }
  0x6c   : > { %v1068_v41 = vrot.slane %v1067_v28, 4  ;;  %v705_v43 = vsel %vm10515_vm7, %v474_v29, %v704_v15  ;;  %703 = vst [vmem:[#allocation2 + $0x74] sm:$0x1] %v702_v37  ;;  %v488_v44 = vrot.slane %v486_v32, 7  ;;  %v494_v45 = vshrl.u32 %v301_v27, 16 }
  0x6d   : > { %v482_v48 = vor.u32 %v480_v24, %v479_v36  ;;  %706 = vst [vmem:[#allocation2 + $0x78] sm:$0xf] %v705_v43  ;;  %v497_v51 = vshll.u32 %v301_v27, 16  ;;  %v484_v38 = vrot.slane %v479_v36, 4  ;;  %v503_v52 = vshrl.u32 %v302_v33, 16 }
  0x6e   : > { %v844_v47 = vld [vmem:[#allocation2 + $0x6c] sm:$0xf]  ;;  %v1073_v53 = vsel %vm10529_vm9, %v1068_v41, %v1072_v61  ;;  %v491_v56 = vor.u32 %v489_v39, %v488_v44  ;;  %v492_v59 = vrot.slane %v488_v44, 4  ;;  %v10690_v60 = vrot.slane %v494_v45, 7  ;;  %v303_v26 = vld [vmem:[%s10508_s9 + $0x5c] sm:$0xf] }
  0x6f   : > { %v1085_v54 = vshrl.u32 %v844_v47, 16  ;;  %v1088_v55 = vshll.u32 %v844_v47, 16  ;;  %1284 = vrot.lane.b32.xlu0 %v1073_v53, %s10363_s10  ;;  %v843_v57 = vld [vmem:[#allocation2 + $0x68] sm:$0x1]  ;;  %v483_v58 = vsel %vm10522_vm8, %v475_v31, %v482_v48  ;;  %v709_v50 = vsel %vm10537_vm10, %v484_v38, %v708_v46  ;;  %v718_v10 = vld [vmem:[#allocation2 + $0x90] sm:$0xf] }
  0x70   : > { %v845_v62 = vld [vmem:[#allocation2 + $0x70] sm:$0xf]  ;;  %v1080_v61 = vshll.u32 %v843_v57, 16  ;;  %707 = vst.msk [vmem:[#allocation2 + $0x7c] sm:$0xf] %vm224_vm0, %v483_v58  ;;  %v712_v1 = vsel %vm10515_vm7, %v491_v56, %v711_v40  ;;  %v499_v4 = vor.u32 %v497_v51, %v10690_v60  ;;  %v505_v5 = vrot.slane %v503_v52, 7 }
  0x71   : > { %v1087_v63 = vrot.slane %v1085_v54, 4  ;;  %v1090_v0 = vrot.slane %v1088_v55, 5  ;;  %710 = vst [vmem:[#allocation2 + $0x80] sm:$0x1] %v709_v50  ;;  %v1094_v2 = vshll.u32 %v845_v62, 16  ;;  %v1098_v3 = vshrl.u32 %v845_v62, 16 }
  0x72   : > { %713 = vst [vmem:[#allocation2 + $0x84] sm:$0xf] %v712_v1  ;;  %v1082_v7 = vrot.slane %v1080_v61, 5  ;;  %v506_v8 = vshll.u32 %v302_v33, 16  ;;  %v511_v9 = vshrl.u32 %v303_v26, 16  ;;  %v500_v14 = vsel %vm10522_vm8, %v492_v59, %v499_v4 }
  0x73   : > { %v1091_v6 = vor.u32 %v1090_v0, %v1087_v63  ;;  %v1096_v11 = vrot.slane %v1094_v2, 5  ;;  %v846_v12 = vld [vmem:[#allocation2 + $0x74] sm:$0x1]  ;;  %v1100_v13 = vrot.slane %v1098_v3, 4  ;;  %v509_v15 = vrot.slane %v505_v5, 4 }
  0x74   : > { %v1083_v16 = vsel %vm10529_vm9, %v1078_v35, %v1082_v7  ;;  %v847_v17 = vld [vmem:[#allocation2 + $0x78] sm:$0xf]  ;;  %v1104_v18 = vshll.u32 %v846_v12, 16  ;;  %714 = vst.msk [vmem:[#allocation2 + $0x88] sm:$0xf] %vm224_vm0, %v500_v14  ;;  %v508_v19 = vor.u32 %v506_v8, %v505_v5  ;;  %v513_v24 = vrot.slane %v511_v9, 7 }
  0x75   : > { %v1092_v49 = vrot.slane %v1091_v6, 4  ;;  %1286 = vrot.lane.b32.xlu1 %v1083_v16, %s10363_s10  ;;  %v1109_v20 = vshrl.u32 %v847_v17, 16  ;;  %v1112_v21 = vshll.u32 %v847_v17, 16  ;;  %v1101_v23 = vor.u32 %v1100_v13, %v1096_v11  ;;  %v715_v31 = vld [vmem:[#allocation2 + $0x8c] sm:$0x1]  ;;  %v10154_v8 = vld [vmem:[%s14318_s1 + $0x78] sm:$0xff]  }
  0x76   : > { %v1106_v27 = vrot.slane %v1104_v18, 5  ;;  %v514_v28 = vshll.u32 %v303_v26, 16  ;;  %v719_v29 = vsel %vm10515_vm7, %v508_v19, %v718_v10  ;;  %v501_v37 = vrot.slane %v10690_v60, 4  ;;  %v722_v0 = vld [vmem:[#allocation2 + $0x98] sm:$0x1]  ;;  %9773 = vmatprep.subr.bf16.mxu0 %v10154_v8  ;;  %v10156_v17 = vld [vmem:[%s14318_s1 + $0x70] sm:$0xff]  }
  0x77   : > { %v1097_v25 = vsel %vm10529_vm9, %v1092_v49, %v1096_v11  ;;  %v848_v32 = vld [vmem:[#allocation2 + $0x7c] sm:$0xf]  ;;  %v1111_v33 = vrot.slane %v1109_v20, 4  ;;  %v1114_v35 = vrot.slane %v1112_v21, 5  ;;  %v1102_v36 = vrot.slane %v1101_v23, 4 }
  0x78   : > { %1288 = vrot.lane.b32.xlu0 %v1097_v25, %s10363_s10  ;;  %720 = vst [vmem:[#allocation2 + $0x90] sm:$0xf] %v719_v29  ;;  %v1118_v39 = vshll.u32 %v848_v32, 16  ;;  %v849_v41 = vld [vmem:[#allocation2 + $0x80] sm:$0x1]  ;;  %v1122_v43 = vshrl.u32 %v848_v32, 16  ;;  %v516_v44 = vor.u32 %v514_v28, %v513_v24  ;;  %v716_v58 = vsel %vm10537_vm10, %v501_v37, %v715_v31 }
  0x79   : > { %v850_v40 = vld [vmem:[#allocation2 + $0x84] sm:$0xf]  ;;  %v1115_v45 = vor.u32 %v1114_v35, %v1111_v33  ;;  %v1107_v46 = vsel %vm10529_vm9, %v1102_v36, %v1106_v27  ;;  %v1128_v52 = vshll.u32 %v849_v41, 16  ;;  %717 = vst [vmem:[#allocation2 + $0x8c] sm:$0x1] %v716_v58  ;;  %v518_v4 = vrot.slane %v513_v24, 4 }
  0x7a   : > { %v1133_v47 = vshrl.u32 %v850_v40, 16  ;;  %v1136_v48 = vshll.u32 %v850_v40, 16  ;;  %v1120_v51 = vrot.slane %v1118_v39, 5  ;;  %1290 = vrot.lane.b32.xlu1 %v1107_v46, %s10363_s10  ;;  %v1124_v38 = vrot.slane %v1122_v43, 4  ;;  %v2410_v11 = vld [vmem:[#allocation2 + $0xc] sm:$0xe] }
  0x7b   : > { %v517_v53 = vsel %vm10522_vm8, %v509_v15, %v516_v44  ;;  %v1116_v54 = vrot.slane %v1115_v45, 4  ;;  %v851_v55 = vld [vmem:[#allocation2 + $0x88] sm:$0xf]  ;;  %v1130_v50 = vrot.slane %v1128_v52, 5  ;;  %v723_v12 = vsel %vm10537_vm10, %v518_v4, %v722_v0  ;;  %v10155_v13 = vld [vmem:[%s14318_s1 + $0x38] sm:$0xff]   ;;  %v10157_v32 = vld [vmem:[%s14318_s1 + $0x30] sm:$0xff]  }
  0x7c   : > { %v1135_v56 = vrot.slane %v1133_v47, 4  ;;  %v1138_v57 = vrot.slane %v1136_v48, 5  ;;  %721 = vst.msk [vmem:[#allocation2 + $0x94] sm:$0xf] %vm224_vm0, %v517_v53  ;;  %v1142_v59 = vshll.u32 %v851_v55, 16  ;;  %v1125_v60 = vor.u32 %v1124_v38, %v1120_v51  ;;  %9774 = vmatpush3.bf16.msra.mxu0 %v10155_v13  ;;  %v10158_v43 = vld [vmem:[%s14318_s1 + $0x68] sm:$0xff]  }
  0x7d   : > { %v1146_v26 = vshrl.u32 %v851_v55, 16  ;;  %v1121_v62 = vsel %vm10529_vm9, %v1116_v54, %v1120_v51  ;;  %v2411_v16 = vld [vmem:[#allocation2 + $0x10] sm:$0xf]  ;;  %724 = vst [vmem:[#allocation2 + $0x98] sm:$0x1] %v723_v12  ;;  %9775 = vmatprep.subr.bf16.mxu0 %v10156_v17  ;;  %v9377_v29 = vrot.slane %v2410_v11, 9 }
  0x7e   : > { %v1139_v63 = vor.u32 %v1138_v57, %v1135_v56  ;;  %1292 = vrot.lane.b32.xlu0 %v1121_v62, %s10363_s10  ;;  %v1144_v61 = vrot.slane %v1142_v59, 5  ;;  %v1126_v1 = vrot.slane %v1125_v60, 4  ;;  %v1381_v24 = vld [vmem:[#allocation2] sm:$0xe]  ;;  %v2508_v31 = vrot.slane %v2411_v16, 5  ;;  %v10159_v55 = vld [vmem:[%s14318_s1 + $0x28] sm:$0xff]  }
  0x7f   : > { %v853_v2 = vld [vmem:[#allocation2 + $0x90] sm:$0xf]  ;;  %v1148_v3 = vrot.slane %v1146_v26, 4  ;;  %v753_v25 = vld [vmem:[#allocation2] sm:$0xf]  ;;  %v9361_v53 = vrot.slane %v1381_v24, 9 }
  0x80   : > { %v1140_v5 = vrot.slane %v1139_v63, 4  ;;  %v1157_v6 = vshrl.u32 %v853_v2, 16  ;;  %v1160_v7 = vshll.u32 %v853_v2, 16  ;;  %v1131_v9 = vsel %vm10529_vm9, %v1126_v1, %v1130_v50  ;;  %v852_v21 = vld [vmem:[#allocation2 + $0x8c] sm:$0x1]  ;;  %9776 = vmatpush3.bf16.msra.mxu0 %v10157_v32  ;;  %v10160_v60 = vld [vmem:[%s14318_s1 + $0x60] sm:$0xff]  }
  0x81   : > { %v1149_v10 = vor.u32 %v1148_v3, %v1144_v61  ;;  %1294 = vrot.lane.b32.xlu1 %v1131_v9, %s10363_s10  ;;  %v1152_v28 = vshll.u32 %v852_v21, 16  ;;  %785 = vst.msk [vmem:[#allocation3] sm:$0xf] %vm224_vm0, %v753_v25  ;;  %v1382_v39 = vld [vmem:[#allocation2 + $0x4] sm:$0xf]  ;;  %v2509_v38 = vsel %vm10745_vm13, %v9377_v29, %v2508_v31  ;;  %9777 = vmatprep.subr.bf16.mxu0 %v10158_v43  ;;  %v2510_v62 = vrot.slane %v2508_v31, 4 }
  0x82   : > { %v1145_v14 = vsel %vm10529_vm9, %v1140_v5, %v1144_v61  ;;  %v1159_v15 = vrot.slane %v1157_v6, 4  ;;  %v1162_v49 = vrot.slane %v1160_v7, 5  ;;  %v2939_v41 = vld [vmem:[#allocation2 + $0x18] sm:$0xf]  ;;  %v2412_v46 = vld [vmem:[#allocation2 + $0x14] sm:$0x1] }
  0x83   : > { %1296 = vrot.lane.b32.xlu0 %v1145_v14, %s10363_s10  ;;  %v854_v18 = vld [vmem:[#allocation2 + $0x94] sm:$0xf]  ;;  %v1150_v27 = vrot.slane %v1149_v10, 4  ;;  %v1154_v40 = vrot.slane %v1152_v28, 5  ;;  %v754_v47 = vld [vmem:[#allocation2 + $0x4] sm:$0xf] }
  0x84   : > { %v1163_v19 = vor.u32 %v1162_v49, %v1159_v15  ;;  %v1166_v20 = vshll.u32 %v854_v18, 16  ;;  %v1170_v23 = vshrl.u32 %v854_v18, 16  ;;  %v755_v48 = vld [vmem:[#allocation2 + $0xc] sm:$0xf]  ;;  %v855_v52 = vld [vmem:[#allocation2 + $0x98] sm:$0x1]  ;;  %9778 = vmatpush3.bf16.msra.mxu0 %v10159_v55 }
  0x85   : > { %v1155_v51 = vsel %vm10529_vm9, %v1150_v27, %v1154_v40  ;;  %v1482_v54 = vrot.slane %v1382_v39, 5  ;;  %786 = vst.msk [vmem:[#allocation3 + $0xc] sm:$0xf] %vm224_vm0, %v754_v47  ;;  %787 = vst.msk [vmem:[#allocation3 + $0x18] sm:$0xf] %vm224_vm0, %v755_v48  ;;  %v1176_v57 = vshll.u32 %v855_v52, 16  ;;  %9779 = vmatprep.subr.bf16.mxu0 %v10160_v60 }
  0x86   : > { %v1164_v33 = vrot.slane %v1163_v19, 4  ;;  %v1168_v35 = vrot.slane %v1166_v20, 5  ;;  %v1172_v37 = vrot.slane %v1170_v23, 4  ;;  %1298 = vrot.lane.b32.xlu1 %v1155_v51, %s10363_s10  ;;  %v2988_v58 = vshrl.u32 %v2939_v41, 16  ;;  %v10161_v50 = vld [vmem:[%s14318_s1 + $0x20] sm:$0xff]   ;;  %v10162_v9 = vld [vmem:[%s14318_s1 + $0x58] sm:$0xff]  }
  0x87   : > { %v2991_v59 = vshll.u32 %v2939_v41, 16  ;;  %v1178_v26 = vrot.slane %v1176_v57, 5  ;;  %v2511_v63 = vrot.slane %v2412_v46, 5  ;;  %v1383_v0 = vld [vmem:[#allocation2 + $0x8] sm:$0x1]  ;;  %v1483_v4 = vsel %vm10745_vm13, %v9361_v53, %v1482_v54  ;;  %v10163_v15 = vld [vmem:[%s14318_s1 + $0x18] sm:$0xff]  }
  0x88   : > { %v1169_v44 = vsel %vm10529_vm9, %v1164_v33, %v1168_v35  ;;  %v1173_v45 = vor.u32 %v1172_v37, %v1168_v35  ;;  %v2940_v61 = vld [vmem:[#allocation2 + $0x1c] sm:$0xf]  ;;  %v757_v1 = vld [vmem:[#allocation2 + $0x18] sm:$0xf]  ;;  %v756_v2 = vld [vmem:[#allocation2 + $0x10] sm:$0xf]  ;;  %9780 = vmatpush3.bf16.msra.mxu0 %v10161_v50 }
  0x89   : > { %1300 = vrot.lane.b32.xlu0 %v1169_v44, %s10363_s10  ;;  %v2990_v5 = vrot.slane %v2988_v58, 4  ;;  %v2993_v6 = vrot.slane %v2991_v59, 5  ;;  %789 = vst.msk [vmem:[#allocation3 + $0x30] sm:$0xf] %vm224_vm0, %v757_v1  ;;  %788 = vst.msk [vmem:[#allocation3 + $0x24] sm:$0xf] %vm224_vm0, %v756_v2  ;;  %v2512_v10 = vsel %vm10745_vm13, %v2510_v62, %v2511_v63  ;;  %9781 = vmatprep.subr.bf16.mxu0 %v10162_v9 }
  0x8a   : > { %v1174_v56 = vrot.slane %v1173_v45, 4  ;;  %v1485_v7 = vrot.slane %v1383_v0, 5  ;;  %v759_v8 = vld [vmem:[#allocation2 + $0x24] sm:$0xf]  ;;  %v1484_v11 = vrot.slane %v1482_v54, 4  ;;  %v2997_v12 = vshll.u32 %v2940_v61, 16 }
  0x8b   : > { %v3001_v13 = vshrl.u32 %v2940_v61, 16  ;;  %791 = vst.msk [vmem:[#allocation3 + $0x48] sm:$0xf] %vm224_vm0, %v759_v8  ;;  %v758_v14 = vld [vmem:[#allocation2 + $0x1c] sm:$0xf]  ;;  %v2994_v16 = vor.u32 %v2993_v6, %v2990_v5  ;;  %v10164_v18 = vld [vmem:[%s14318_s1 + $0x50] sm:$0xff]  }
  0x8c   : > { %v1179_v3 = vsel %vm10529_vm9, %v1174_v56, %v1178_v26  ;;  %790 = vst.msk [vmem:[#allocation3 + $0x3c] sm:$0xf] %vm224_vm0, %v758_v14  ;;  %v2747_v49 = vld [vmem:[#allocation2 + $0x18] sm:$0xf]  ;;  %v761_v17 = vld [vmem:[#allocation2 + $0x30] sm:$0xf]  ;;  %9782 = vmatpush3.bf16.msra.mxu0 %v10163_v15  ;;  %v1486_v19 = vsel %vm10745_vm13, %v1484_v11, %v1485_v7 }
  0x8d   : > { %2618 = vrot.lane.b32.xlu0 %v2509_v38, %s10363_s10  ;;  %1302 = vrot.lane.b32.xlu1 %v1179_v3, %s10363_s10  ;;  %v2999_v20 = vrot.slane %v2997_v12, 5  ;;  %v3003_v21 = vrot.slane %v3001_v13, 4  ;;  %793 = vst.msk [vmem:[#allocation3 + $0x60] sm:$0xf] %vm224_vm0, %v761_v17  ;;  %v760_v23 = vld [vmem:[#allocation2 + $0x28] sm:$0xf] }
  0x8e   : > { %v2941_v24 = vld [vmem:[#allocation2 + $0x20] sm:$0x1]  ;;  %792 = vst.msk [vmem:[#allocation3 + $0x54] sm:$0xf] %vm224_vm0, %v760_v23  ;;  %9783 = vmatprep.subr.bf16.mxu0 %v10164_v18  ;;  %v10165_v25 = vld [vmem:[%s14318_s1 + $0x10] sm:$0xff]   ;;  %v2995_v28 = vrot.slane %v2994_v16, 4 }
  0x8f   : > { %v1721_v27 = vld [vmem:[#allocation2 + $0xc] sm:$0xf]  ;;  %v2413_v29 = vld [vmem:[#allocation2 + $0x18] sm:$0xe]  ;;  %v2414_v32 = vld [vmem:[#allocation2 + $0x1c] sm:$0xf]  ;;  %v3004_v39 = vor.u32 %v3003_v21, %v2999_v20 }
  0x90   : > { %v10166_v31 = vld [vmem:[%s14318_s1 + $0x48] sm:$0xff]   ;;  %v763_v33 = vld [vmem:[#allocation2 + $0x3c] sm:$0xf]  ;;  %v762_v35 = vld [vmem:[#allocation2 + $0x34] sm:$0xf]  ;;  %9784 = vmatpush3.bf16.msra.mxu0 %v10165_v25  ;;  %v3007_v40 = vshll.u32 %v2941_v24, 16  ;;  %v3000_v43 = vsel %vm10529_vm9, %v2995_v28, %v2999_v20 }
  0x91   : > { %1592 = vrot.lane.b32.xlu0 %v1483_v4, %s10364_s17  ;;  %2620 = vrot.lane.b32.xlu1 %v2512_v10, %s10363_s10  ;;  %v2748_v37 = vld [vmem:[#allocation2 + $0x1c] sm:$0xf]  ;;  %795 = vst.msk [vmem:[#allocation3 + $0x78] sm:$0xf] %vm224_vm0, %v763_v33  ;;  %794 = vst.msk [vmem:[#allocation3 + $0x6c] sm:$0xf] %vm224_vm0, %v762_v35 }
  0x92   : > { %9785 = vmatprep.subr.bf16.mxu0 %v10166_v31  ;;  %v10167_v41 = vld [vmem:[%s14318_s1 + $0x8] sm:$0xff]   ;;  %v9378_v44 = vrot.slane %v2413_v29, 9  ;;  %v2515_v45 = vrot.slane %v2414_v32, 5  ;;  %v1385_v47 = vld [vmem:[#allocation2 + $0x10] sm:$0xf]  ;;  %v3005_v53 = vrot.slane %v3004_v39, 4 }
  0x93   : > { %v1384_v46 = vld [vmem:[#allocation2 + $0xc] sm:$0xe]  ;;  %v2942_v48 = vld [vmem:[#allocation2 + $0x24] sm:$0xf]  ;;  %v765_v51 = vld [vmem:[#allocation2 + $0x48] sm:$0xf] }
  0x94   : > { %v764_v38 = vld [vmem:[#allocation2 + $0x40] sm:$0xf]  ;;  %9786 = vmatpush3.bf16.msra.mxu0 %v10167_v41  ;;  %v1722_v52 = vld [vmem:[#allocation2 + $0x10] sm:$0xf]  ;;  %v3009_v54 = vrot.slane %v3007_v40, 5  ;;  %v9362_v56 = vrot.slane %v1384_v46, 9  ;;  %v2516_v58 = vsel %vm10745_vm13, %v9378_v44, %v2515_v45 }
  0x95   : > { %2811 = vrot.lane.b32.xlu0 %v2747_v49, %s10364_s17  ;;  %1594 = vrot.lane.b32.xlu1 %v1486_v19, %s10364_s17  ;;  %797 = vst.msk [vmem:[#allocation3 + $0x90] sm:$0xf] %vm224_vm0, %v765_v51  ;;  %796 = vst.msk [vmem:[#allocation3 + $0x84] sm:$0xf] %vm224_vm0, %v764_v38  ;;  %v10168_v55 = vld [vmem:[%s14318_s1 + $0x40] sm:$0xff]   ;;  %v1489_v59 = vrot.slane %v1385_v47, 5 }
  0x96   : > { %v2415_v57 = vld [vmem:[#allocation2 + $0x20] sm:$0x1]  ;;  %v3012_v60 = vshrl.u32 %v2942_v48, 16  ;;  %v3015_v50 = vshll.u32 %v2942_v48, 16  ;;  %v767_v26 = vld [vmem:[#allocation2 + $0x54] sm:$0xf]  ;;  %9787 = vmatprep.subr.bf16.mxu0 %v10168_v55  ;;  %v3010_v61 = vsel %vm10529_vm9, %v3005_v53, %v3009_v54 }
  0x97   : > { %v10169_v62 = vld [vmem:[%s14318_s1 + $0x88] sm:$0xff]   ;;  %799 = vst.msk [vmem:[#allocation3 + $0xa8] sm:$0xf] %vm224_vm0, %v767_v26  ;;  %v10170_v0 = vld [vmem:[%s14318_s1] sm:$0xff]   ;;  %v2517_v1 = vrot.slane %v2515_v45, 4  ;;  %v2518_v2 = vrot.slane %v2415_v57, 5  ;;  %v1490_v6 = vsel %vm10745_vm13, %v9362_v56, %v1489_v59 }
  0x98   : > { %v766_v63 = vld [vmem:[#allocation2 + $0x4c] sm:$0xf]  ;;  %v1386_v3 = vld [vmem:[#allocation2 + $0x14] sm:$0x1]  ;;  %v2943_v4 = vld [vmem:[#allocation2 + $0x28] sm:$0xf]  ;;  %10033 = vmatprep.subr.bf16.mxu1 %v10169_v62  ;;  %9788 = vmatpush3.bf16.msra.mxu0 %v10170_v0 }
  0x99   : > { %1785 = vrot.lane.b32.xlu0 %v1721_v27, %s10365_s12  ;;  %2813 = vrot.lane.b32.xlu1 %v2748_v37, %s10364_s17  ;;  %798 = vst.msk [vmem:[#allocation3 + $0x9c] sm:$0xf] %vm224_vm0, %v766_v63  ;;  %v10173_v5 = vld [vmem:[%s14318_s1 + $0x80] sm:$0xff]   ;;  %v3014_v7 = vrot.slane %v3012_v60, 4  ;;  %v3017_v8 = vrot.slane %v3015_v50, 5  ;;  %v1491_v11 = vrot.slane %v1489_v59, 4  ;;  %v2519_v14 = vsel %vm10745_vm13, %v2517_v1, %v2518_v2 }
  0x9a   : > { %v769_v9 = vld [vmem:[#allocation2 + $0x60] sm:$0xf]  ;;  %v768_v10 = vld [vmem:[#allocation2 + $0x58] sm:$0xf]  ;;  %10034 = vmatpush3.bf16.msra.mxu1 %v10169_v62  ;;  %v1492_v12 = vrot.slane %v1386_v3, 5  ;;  %v3021_v13 = vshll.u32 %v2943_v4, 16 }
  0x9b   : > { %801 = vst.msk [vmem:[#allocation3 + $0xc0] sm:$0xf] %vm224_vm0, %v769_v9  ;;  %800 = vst.msk [vmem:[#allocation3 + $0xb4] sm:$0xf] %vm224_vm0, %v768_v10  ;;  %10035 = vmatprep.subr.bf16.mxu1 %v10173_v5  ;;  %v3025_v15 = vshrl.u32 %v2943_v4, 16  ;;  %v3018_v18 = vor.u32 %v3017_v8, %v3014_v7  ;;  %vm1688_vm1 = vcmask 781824  }
  0x9c   : > { %v771_v49 = vld [vmem:[#allocation2 + $0x6c] sm:$0xf]  ;;  %v770_v16 = vld [vmem:[#allocation2 + $0x64] sm:$0xf]  ;;  %v773_v20 = vld [vmem:[#allocation2 + $0x78] sm:$0xf]  ;;  %v1493_v24 = vsel %vm10745_vm13, %v1491_v11, %v1492_v12 }
  0x9d   : > { %3371 = vrot.lane.b32.xlu0 %v3000_v43, %s10365_s12  ;;  %1787 = vrot.lane.b32.xlu1 %v1722_v52, %s10365_s12  ;;  %803 = vst.msk [vmem:[#allocation3 + $0xd8] sm:$0xf] %vm224_vm0, %v771_v49  ;;  %802 = vst.msk [vmem:[#allocation3 + $0xcc] sm:$0xf] %vm224_vm0, %v770_v16  ;;  %v2749_v17 = vld [vmem:[#allocation2 + $0x24] sm:$0xf] }
  0x9e   : > { %10036 = vmatpush3.bf16.msra.mxu1 %v10173_v5  ;;  %v2944_v21 = vld [vmem:[#allocation2 + $0x2c] sm:$0x1]  ;;  %805 = vst.msk [vmem:[#allocation3 + $0xf0] sm:$0xf] %vm224_vm0, %v773_v20  ;;  %v772_v23 = vld [vmem:[#allocation2 + $0x70] sm:$0xf] }
  0x9f   : > { %v3023_v25 = vrot.slane %v3021_v13, 5  ;;  %v3027_v27 = vrot.slane %v3025_v15, 4  ;;  %804 = vst.msk [vmem:[#allocation3 + $0xe4] sm:$0xf] %vm224_vm0, %v772_v23  ;;  %v1723_v28 = vld [vmem:[#allocation2 + $0x18] sm:$0xf] }
  0xa0   : > { %v2416_v29 = vld [vmem:[#allocation2 + $0x24] sm:$0xe]  ;;  %v3019_v31 = vrot.slane %v3018_v18, 4  ;;  %v3031_v32 = vshll.u32 %v2944_v21, 16  ;;  %v774_v37 = vld [vmem:[#allocation2 + $0x7c] sm:$0xf] }
  0xa1   : > { %2622 = vrot.lane.b32.xlu0 %v2516_v58, %s10363_s10  ;;  %3373 = vrot.lane.b32.xlu1 %v3010_v61, %s10365_s12  ;;  %v775_v35 = vld [vmem:[#allocation2 + $0x84] sm:$0xf]  ;;  %v2417_v39 = vld [vmem:[#allocation2 + $0x28] sm:$0xf]  ;;  %v1387_v40 = vld [vmem:[#allocation2 + $0x18] sm:$0xe]  ;;  %v3028_v43 = vor.u32 %v3027_v27, %v3023_v25 }
  0xa2   : > { %807 = vst.msk [vmem:[#allocation3 + $0x108] sm:$0xf] %vm224_vm0, %v775_v35  ;;  %806 = vst.msk [vmem:[#allocation3 + $0xfc] sm:$0xf] %vm224_vm0, %v774_v37  ;;  %v2750_v41 = vld [vmem:[#allocation2 + $0x28] sm:$0xf]  ;;  %v3024_v47 = vsel %vm10529_vm9, %v3019_v31, %v3023_v25 }
  0xa3   : > { %v9379_v44 = vrot.slane %v2416_v29, 9  ;;  %v777_v45 = vld [vmem:[#allocation2 + $0x90] sm:$0xf]  ;;  %v776_v46 = vld [vmem:[#allocation2 + $0x88] sm:$0xf]  ;;  %v3033_v51 = vrot.slane %v3031_v32, 5 }
  0xa4   : > { %v1724_v48 = vld [vmem:[#allocation2 + $0x1c] sm:$0xf]  ;;  %v2522_v38 = vrot.slane %v2417_v39, 5  ;;  %v9363_v52 = vrot.slane %v1387_v40, 9  ;;  %v2945_v53 = vld [vmem:[#allocation2 + $0x30] sm:$0xf] }
  0xa5   : > { %1596 = vrot.lane.b32.xlu0 %v1490_v6, %s10364_s17  ;;  %v1253_v19 = vpop.permute.xlu0 %1252  ;;  %2624 = vrot.lane.b32.xlu1 %v2519_v14, %s10363_s10  ;;  %809 = vst.msk [vmem:[#allocation3 + $0x120] sm:$0xf] %vm224_vm0, %v777_v45  ;;  %808 = vst.msk [vmem:[#allocation3 + $0x114] sm:$0xf] %vm224_vm0, %v776_v46  ;;  %v2418_v54 = vld [vmem:[#allocation2 + $0x2c] sm:$0x1] }
  0xa6   : > { %1349 = vst.msk [vmem:[#allocation3] sm:$0xf] %vm1348_vm14, %v1253_v19  ;;  %v1915_v55 = vld [vmem:[#allocation2 + $0x10] sm:$0xf]  ;;  %v1914_v56 = vld [vmem:[#allocation2 + $0xc] sm:$0xf]  ;;  %v2523_v62 = vsel %vm10745_vm13, %v9379_v44, %v2522_v38 }
  0xa7   : > { %v778_v57 = vld [vmem:[#allocation2 + $0x94] sm:$0xf]  ;;  %v3029_v58 = vrot.slane %v3028_v43, 4  ;;  %v1388_v59 = vld [vmem:[#allocation2 + $0x1c] sm:$0xf]  ;;  %v1972_v60 = vshll.u32 %v1915_v55, 16 }
  0xa8   : > { %v1963_v50 = vshrl.u32 %v1914_v56, 16  ;;  %v1966_v26 = vshll.u32 %v1914_v56, 16  ;;  %810 = vst.msk [vmem:[#allocation3 + $0x12c] sm:$0xf] %vm224_vm0, %v778_v57  ;;  %v3036_v63 = vshrl.u32 %v2945_v53, 16  ;;  %v3039_v0 = vshll.u32 %v2945_v53, 16 }
  0xa9   : > { %2815 = vrot.lane.b32.xlu0 %v2749_v17, %s10364_s17  ;;  %v1255_v33 = vpop.permute.xlu0 %1254  ;;  %1598 = vrot.lane.b32.xlu1 %v1493_v24, %s10364_s17  ;;  %v1916_v61 = vld [vmem:[#allocation2 + $0x14] sm:$0x1]  ;;  %v1976_v1 = vshrl.u32 %v1915_v55, 16  ;;  %v1974_v2 = vrot.slane %v1972_v60, 5  ;;  %v1496_v6 = vrot.slane %v1388_v59, 5  ;;  %v3034_v9 = vsel %vm10529_vm9, %v3029_v58, %v3033_v51 }
  0xaa   : > { %1350 = vst.msk [vmem:[#allocation3 + $0xc] sm:$0xf] %vm1348_vm14, %v1255_v33  ;;  %v1965_v3 = vrot.slane %v1963_v50, 4  ;;  %v1968_v4 = vrot.slane %v1966_v26, 5  ;;  %v1982_v5 = vshll.u32 %v1916_v61, 16  ;;  %v2524_v10 = vrot.slane %v2522_v38, 4 }
  0xab   : > { %v2946_v7 = vld [vmem:[#allocation2 + $0x34] sm:$0xf]  ;;  %v1978_v8 = vrot.slane %v1976_v1, 4  ;;  %v2525_v11 = vrot.slane %v2418_v54, 5  ;;  %v1497_v14 = vsel %vm10745_vm13, %v9363_v52, %v1496_v6  ;;  %v1389_v15 = vld [vmem:[#allocation2 + $0x20] sm:$0x1] }
  0xac   : > { %v1969_v13 = vor.u32 %v1968_v4, %v1965_v3  ;;  %v3038_v49 = vrot.slane %v3036_v63, 4  ;;  %v1984_v17 = vrot.slane %v1982_v5, 5  ;;  %v3041_v18 = vrot.slane %v3039_v0, 5  ;;  %v2751_v31 = vld [vmem:[#allocation2 + $0x30] sm:$0xf] }
  0xad   : > { %1789 = vrot.lane.b32.xlu0 %v1723_v28, %s10365_s12  ;;  %2817 = vrot.lane.b32.xlu1 %v2750_v41, %s10364_s17  ;;  %v1979_v16 = vor.u32 %v1978_v8, %v1974_v2  ;;  %v3045_v19 = vshll.u32 %v2946_v7, 16  ;;  %v3049_v20 = vshrl.u32 %v2946_v7, 16  ;;  %v2526_v24 = vsel %vm10745_vm13, %v2524_v10, %v2525_v11  ;;  %v2947_v40 = vld [vmem:[#allocation2 + $0x38] sm:$0x1]  ;;  %v1725_v43 = vld [vmem:[#allocation2 + $0x24] sm:$0xf] }
  0xae   : > { %v1970_v21 = vrot.slane %v1969_v13, 4  ;;  %v1498_v25 = vrot.slane %v1496_v6, 4  ;;  %v1499_v27 = vrot.slane %v1389_v15, 5  ;;  %v3042_v35 = vor.u32 %v3041_v18, %v3038_v49  ;;  %v2419_v44 = vld [vmem:[#allocation2 + $0x30] sm:$0xe] }
  0xaf   : > { %v1980_v23 = vrot.slane %v1979_v16, 4  ;;  %v3047_v37 = vrot.slane %v3045_v19, 5  ;;  %v3051_v39 = vrot.slane %v3049_v20, 4  ;;  %v2420_v46 = vld [vmem:[#allocation2 + $0x34] sm:$0xf]  ;;  %v3055_v52 = vshll.u32 %v2947_v40, 16 }
  0xb0   : > { %v1975_v29 = vsel %vm10529_vm9, %v1970_v21, %v1974_v2  ;;  %v1500_v41 = vsel %vm10745_vm13, %v1498_v25, %v1499_v27  ;;  %v3043_v51 = vrot.slane %v3042_v35, 4  ;;  %v9380_v53 = vrot.slane %v2419_v44, 9  ;;  %v2948_v54 = vld [vmem:[#allocation2 + $0x3c] sm:$0xf]  ;;  %v1917_v56 = vld [vmem:[#allocation2 + $0x18] sm:$0xf] }
  0xb1   : > { %3375 = vrot.lane.b32.xlu0 %v3024_v47, %s10365_s12  ;;  %1791 = vrot.lane.b32.xlu1 %v1724_v48, %s10365_s12  ;;  %2378 = vst.msk [vmem:[#allocation3 + $0x4] sm:$0xf] %vm224_vm0, %v1975_v29  ;;  %v1985_v33 = vsel %vm10529_vm9, %v1980_v23, %v1984_v17  ;;  %v2752_v48 = vld [vmem:[#allocation2 + $0x34] sm:$0xf]  ;;  %v3052_v38 = vor.u32 %v3051_v39, %v3047_v37  ;;  %v1918_v57 = vld [vmem:[#allocation2 + $0x1c] sm:$0xf] }
  0xb2   : > { %2379 = vst.msk [vmem:[#allocation3 + $0x10] sm:$0xf] %vm224_vm0, %v1985_v33  ;;  %v2529_v58 = vrot.slane %v2420_v46, 5  ;;  %v1390_v59 = vld [vmem:[#allocation2 + $0x24] sm:$0xe]  ;;  %v1987_v50 = vshrl.u32 %v1917_v56, 16  ;;  %v3048_v0 = vsel %vm10529_vm9, %v3043_v51, %v3047_v37 }
  0xb3   : > { %v1990_v26 = vshll.u32 %v1917_v56, 16  ;;  %v1726_v63 = vld [vmem:[#allocation2 + $0x28] sm:$0xf]  ;;  %v3053_v61 = vrot.slane %v3052_v38, 4  ;;  %v3057_v1 = vrot.slane %v3055_v52, 5  ;;  %v3060_v3 = vshrl.u32 %v2948_v54, 16 }
  0xb4   : > { %v1257_v12 = vpop.permute.xlu1 %1256  ;;  %v2421_v2 = vld [vmem:[#allocation2 + $0x38] sm:$0x1]  ;;  %v1391_v4 = vld [vmem:[#allocation2 + $0x28] sm:$0xf]  ;;  %v1989_v5 = vrot.slane %v1987_v50, 4  ;;  %v2000_v8 = vshrl.u32 %v1918_v57, 16 }
  0xb5   : > { %2626 = vrot.lane.b32.xlu0 %v2523_v62, %s10363_s10  ;;  %1351 = vst.msk [vmem:[#allocation3 + $0x18] sm:$0xf] %vm1348_vm14, %v1257_v12  ;;  %3377 = vrot.lane.b32.xlu1 %v3034_v9, %s10365_s12  ;;  %v1996_v62 = vshll.u32 %v1918_v57, 16  ;;  %v1992_v6 = vrot.slane %v1990_v26, 5  ;;  %v1919_v9 = vld [vmem:[#allocation2 + $0x20] sm:$0x1]  ;;  %v3058_v21 = vsel %vm10529_vm9, %v3053_v61, %v3057_v1 }
  0xb6   : > { %v3063_v10 = vshll.u32 %v2948_v54, 16  ;;  %v2002_v12 = vrot.slane %v2000_v8, 4  ;;  %v2006_v13 = vshll.u32 %v1919_v9, 16  ;;  %v9364_v15 = vrot.slane %v1390_v59, 9  ;;  %v2949_v49 = vld [vmem:[#allocation2 + $0x40] sm:$0xf] }
  0xb7   : > { %v1998_v7 = vrot.slane %v1996_v62, 5  ;;  %v1993_v11 = vor.u32 %v1992_v6, %v1989_v5  ;;  %v2532_v16 = vrot.slane %v2421_v2, 5  ;;  %v1392_v17 = vld [vmem:[#allocation2 + $0x2c] sm:$0x1]  ;;  %v2531_v23 = vrot.slane %v2529_v58, 4 }
  0xb8   : > { %v1259_v28 = vpop.permute.xlu1 %1258  ;;  %v1261_v32 = vpop.permute.xlu0 %1260  ;;  %v2008_v20 = vrot.slane %v2006_v13, 5  ;;  %v3062_v25 = vrot.slane %v3060_v3, 4  ;;  %v3065_v27 = vrot.slane %v3063_v10, 5  ;;  %v3073_v33 = vshrl.u32 %v2949_v49, 16  ;;  %v2753_v44 = vld [vmem:[#allocation2 + $0x3c] sm:$0xf] }
  0xb9   : > { %1600 = vrot.lane.b32.xlu0 %v1497_v14, %s10364_s17  ;;  %1352 = vst.msk [vmem:[#allocation3 + $0x24] sm:$0xf] %vm1348_vm14, %v1259_v28  ;;  %1353 = vst.msk [vmem:[#allocation3 + $0x30] sm:$0xf] %vm1348_vm14, %v1261_v32  ;;  %2628 = vrot.lane.b32.xlu1 %v2526_v24, %s10363_s10  ;;  %v2530_v14 = vsel %vm10745_vm13, %v9380_v53, %v2529_v58  ;;  %v1994_v18 = vrot.slane %v1993_v11, 4  ;;  %v2003_v19 = vor.u32 %v2002_v12, %v1998_v7  ;;  %vm1881_vm2 = vcmask 1044224  }
  0xba   : > { %v1503_v24 = vrot.slane %v1391_v4, 5  ;;  %v3069_v32 = vshll.u32 %v2949_v49, 16  ;;  %v2533_v37 = vsel %vm10745_vm13, %v2531_v23, %v2532_v16  ;;  %v1506_v40 = vrot.slane %v1392_v17, 5  ;;  %v10925_v51 = vld [vmem:[#allocation2 + $0x3c] sm:$0xe] }
  0xbb   : > { %v1999_v28 = vsel %vm10529_vm9, %v1994_v18, %v1998_v7  ;;  %v2004_v29 = vrot.slane %v2003_v19, 4  ;;  %v10927_v38 = vld [vmem:[#allocation2 + $0x40] sm:$0xf]  ;;  %v3499_v52 = vld [vmem:[#allocation2 + $0x18] sm:$0xe]  ;;  %v9381_v6 = vrot.slane %v10925_v51, 9 }
  0xbc   : > { %v1263_v45 = vpop.permute.xlu1 %1262  ;;  %v1265_v47 = vpop.permute.xlu0 %1264  ;;  %2380 = vst.msk [vmem:[#allocation3 + $0x1c] sm:$0xf] %vm224_vm0, %v1999_v28  ;;  %v1505_v39 = vrot.slane %v1503_v24, 4  ;;  %v1727_v54 = vld [vmem:[#allocation2 + $0x30] sm:$0xf]  ;;  %v9393_v57 = vrot.slane %v3499_v52, 9 }
  0xbd   : > { %2819 = vrot.lane.b32.xlu0 %v2751_v31, %s10364_s17  ;;  %1354 = vst.msk [vmem:[#allocation3 + $0x3c] sm:$0xf] %vm1348_vm14, %v1263_v45  ;;  %1355 = vst.msk [vmem:[#allocation3 + $0x48] sm:$0xf] %vm1348_vm14, %v1265_v47  ;;  %1602 = vrot.lane.b32.xlu1 %v1500_v41, %s10364_s17  ;;  %v1504_v31 = vsel %vm10745_vm13, %v9364_v15, %v1503_v24  ;;  %v2009_v35 = vsel %vm10529_vm9, %v2004_v29, %v2008_v20  ;;  %v2950_v45 = vld [vmem:[#allocation2 + $0x44] sm:$0x1] }
  0xbe   : > { %2381 = vst.msk [vmem:[#allocation3 + $0x28] sm:$0xf] %vm224_vm0, %v2009_v35  ;;  %v10922_v47 = vrot.slane %v3069_v32, 5  ;;  %v1507_v53 = vsel %vm10745_vm13, %v1505_v39, %v1506_v40  ;;  %v3501_v56 = vld [vmem:[#allocation2 + $0x20] sm:$0x1]  ;;  %v3079_v26 = vshll.u32 %v2950_v45, 16 }
  0xbf   : > { %v3502_v50 = vld [vmem:[#allocation2 + $0x24] sm:$0xe]  ;;  %v2754_v1 = vld [vmem:[#allocation2 + $0x40] sm:$0xf]  ;;  %v2536_v7 = vrot.slane %v10927_v38, 5 }
  0xc0   : > { %v1267_v55 = vpop.permute.xlu1 %1266  ;;  %v1269_v60 = vpop.permute.xlu0 %1268  ;;  %v9394_v61 = vrot.slane %v3502_v50, 9  ;;  %v1393_v8 = vld [vmem:[#allocation2 + $0x30] sm:$0xe]  ;;  %v2951_v9 = vld [vmem:[#allocation2 + $0x48] sm:$0xf] }
  0xc1   : > { %1793 = vrot.lane.b32.xlu0 %v1725_v43, %s10365_s12  ;;  %1356 = vst.msk [vmem:[#allocation3 + $0x54] sm:$0xf] %vm1348_vm14, %v1267_v55  ;;  %1357 = vst.msk [vmem:[#allocation3 + $0x60] sm:$0xf] %vm1348_vm14, %v1269_v60  ;;  %2821 = vrot.lane.b32.xlu1 %v2752_v48, %s10364_s17  ;;  %v3066_v43 = vor.u32 %v3065_v27, %v3062_v25  ;;  %v3075_v48 = vrot.slane %v3073_v33, 4  ;;  %v3600_v60 = vrot.slane %v3501_v56, 5 }
  0xc2   : > { %v3500_v55 = vld [vmem:[#allocation2 + $0x1c] sm:$0xf]  ;;  %v1920_v49 = vld [vmem:[#allocation2 + $0x24] sm:$0xf]  ;;  %v1921_v16 = vld [vmem:[#allocation2 + $0x28] sm:$0xf] }
  0xc3   : > { %v3067_v58 = vrot.slane %v3066_v43, 4  ;;  %v3597_v59 = vrot.slane %v3500_v55, 5  ;;  %v3076_v2 = vor.u32 %v3075_v48, %v10922_v47  ;;  %v1728_v17 = vld [vmem:[#allocation2 + $0x34] sm:$0xf]  ;;  %v2424_v18 = vld [vmem:[#allocation2 + $0x44] sm:$0x1] }
  0xc4   : > { %v2011_v19 = vshrl.u32 %v1920_v49, 16  ;;  %v2014_v20 = vshll.u32 %v1920_v49, 16  ;;  %v1922_v23 = vld [vmem:[#allocation2 + $0x2c] sm:$0x1]  ;;  %v2024_v24 = vshrl.u32 %v1921_v16, 16  ;;  %v3081_v27 = vrot.slane %v3079_v26, 5 }
  0xc5   : > { %3379 = vrot.lane.b32.xlu0 %v3048_v0, %s10365_s12  ;;  %1795 = vrot.lane.b32.xlu1 %v1726_v63, %s10365_s12  ;;  %v3503_v63 = vld [vmem:[#allocation2 + $0x28] sm:$0xf]  ;;  %v3504_v0 = vld [vmem:[#allocation2 + $0x2c] sm:$0x1]  ;;  %v3598_v3 = vsel %vm10745_vm13, %v9393_v57, %v3597_v59  ;;  %v3599_v4 = vrot.slane %v3597_v59, 4  ;;  %v3072_v11 = vsel %vm10529_vm9, %v3067_v58, %v10922_v47  ;;  %v3077_v25 = vrot.slane %v3076_v2, 4 }
  0xc6   : > { %v3604_v5 = vrot.slane %v3503_v63, 5  ;;  %3739 = vst.msk [vmem:[#allocation3 + $0x8] sm:$0xf] %vm224_vm0, %v3598_v3  ;;  %v3607_v10 = vrot.slane %v3504_v0, 5  ;;  %v1394_v28 = vld [vmem:[#allocation2 + $0x34] sm:$0xf] }
  0xc7   : > { %v3601_v13 = vsel %vm10745_vm13, %v3599_v4, %v3600_v60  ;;  %v2030_v32 = vshll.u32 %v1922_v23, 16  ;;  %v1395_v33 = vld [vmem:[#allocation2 + $0x38] sm:$0x1]  ;;  %v2013_v35 = vrot.slane %v2011_v19, 4  ;;  %v2026_v40 = vrot.slane %v2024_v24, 4 }
  0xc8   : > { %v3606_v15 = vrot.slane %v3604_v5, 4  ;;  %3740 = vst.msk [vmem:[#allocation3 + $0x14] sm:$0xf] %vm224_vm0, %v3601_v13  ;;  %v9365_v43 = vrot.slane %v1393_v8, 9  ;;  %v3084_v45 = vshrl.u32 %v2951_v9, 16  ;;  %v2538_v38 = vrot.slane %v2536_v7, 4 }
  0xc9   : > { %2630 = vrot.lane.b32.xlu0 %v2530_v14, %s10363_s10  ;;  %3381 = vrot.lane.b32.xlu1 %v3058_v21, %s10365_s12  ;;  %v3605_v14 = vsel %vm10745_vm13, %v9394_v61, %v3604_v5  ;;  %v2020_v21 = vshll.u32 %v1921_v16, 16  ;;  %v2032_v51 = vrot.slane %v2030_v32, 5  ;;  %v2539_v52 = vrot.slane %v2424_v18, 5  ;;  %v2952_v57 = vld [vmem:[#allocation2 + $0x4c] sm:$0xf] }
  0xca   : > { %3741 = vst.msk [vmem:[#allocation3 + $0x20] sm:$0xf] %vm224_vm0, %v3605_v14  ;;  %v3082_v56 = vsel %vm10529_vm9, %v3077_v25, %v3081_v27  ;;  %v3086_v26 = vrot.slane %v3084_v45, 4  ;;  %v3097_v4 = vshrl.u32 %v2952_v57, 16  ;;  %v2755_v5 = vld [vmem:[#allocation2 + $0x48] sm:$0xf] }
  0xcb   : > { %v1271_v41 = vpop.permute.xlu1 %1270  ;;  %v2022_v39 = vrot.slane %v2020_v21, 5  ;;  %v2540_v3 = vsel %vm10745_vm13, %v2538_v38, %v2539_v52  ;;  %v2953_v8 = vld [vmem:[#allocation2 + $0x50] sm:$0x1]  ;;  %v2426_v16 = vld [vmem:[#allocation2 + $0x4c] sm:$0xf] }
  0xcc   : > { %1358 = vst.msk [vmem:[#allocation3 + $0x6c] sm:$0xf] %vm1348_vm14, %v1271_v41  ;;  %v2537_v41 = vsel %vm10745_vm13, %v9381_v6, %v2536_v7  ;;  %v3099_v49 = vrot.slane %v3097_v4, 4  ;;  %v3103_v21 = vshll.u32 %v2953_v8, 16  ;;  %v2425_v27 = vld [vmem:[#allocation2 + $0x48] sm:$0xe] }
  0xcd   : > { %1604 = vrot.lane.b32.xlu0 %v1504_v31, %s10364_s17  ;;  %v1273_v46 = vpop.permute.xlu0 %1272  ;;  %2632 = vrot.lane.b32.xlu1 %v2533_v37, %s10363_s10  ;;  %v3608_v31 = vsel %vm10745_vm13, %v3606_v15, %v3607_v10  ;;  %v2016_v37 = vrot.slane %v2014_v20, 5  ;;  %v2027_v48 = vor.u32 %v2026_v40, %v2022_v39  ;;  %v1924_v10 = vld [vmem:[#allocation2 + $0x34] sm:$0xf]  ;;  %v1925_v15 = vld [vmem:[#allocation2 + $0x38] sm:$0x1]  ;;  %v9382_v45 = vrot.slane %v2425_v27, 9 }
  0xce   : > { %1359 = vst.msk [vmem:[#allocation3 + $0x78] sm:$0xf] %vm1348_vm14, %v1273_v46  ;;  %v3087_v46 = vshll.u32 %v2951_v9, 16  ;;  %v1923_v9 = vld [vmem:[#allocation2 + $0x30] sm:$0xf]  ;;  %v2048_v18 = vshrl.u32 %v1924_v10, 16 }
  0xcf   : > { %3742 = vst.msk [vmem:[#allocation3 + $0x2c] sm:$0xf] %vm224_vm0, %v3608_v31  ;;  %v2017_v47 = vor.u32 %v2016_v37, %v2013_v35  ;;  %v2028_v59 = vrot.slane %v2027_v48, 4  ;;  %v10174_v50 = vld [vmem:[#allocation3 + $0x8] ss:$12 sps:$4 sm:$0xff]   ;;  %v2035_v13 = vshrl.u32 %v1923_v9, 16 }
  0xd0   : > { %10037 = vmatprep.mubr.msk.bf16.mxu1 %vm4226_vm15, %v10174_v50  ;;  %v2038_v14 = vshll.u32 %v1923_v9, 16  ;;  %v2054_v19 = vshll.u32 %v1925_v15, 16  ;;  %v1729_v20 = vld [vmem:[#allocation2 + $0x3c] sm:$0xf]  ;;  %v2543_v31 = vrot.slane %v2426_v16, 5 }
  0xd1   : > { %2823 = vrot.lane.b32.xlu0 %v2753_v44, %s10364_s17  ;;  %v1275_v62 = vpop.permute.xlu1 %1274  ;;  %1606 = vrot.lane.b32.xlu1 %v1507_v53, %s10364_s17  ;;  %v1510_v53 = vrot.slane %v1394_v28, 5  ;;  %v2018_v58 = vrot.slane %v2017_v47, 4  ;;  %v2033_v0 = vsel %vm10529_vm9, %v2028_v59, %v2032_v51  ;;  %v2037_v23 = vrot.slane %v2035_v13, 4  ;;  %v10985_v32 = vld [vmem:[#allocation2 + $0x50] sm:$0x1] }
  0xd2   : > { %1360 = vst.msk [vmem:[#allocation3 + $0x84] sm:$0xf] %vm1348_vm14, %v1275_v62  ;;  %v3089_v62 = vrot.slane %v3087_v46, 5  ;;  %v2040_v24 = vrot.slane %v2038_v14, 5  ;;  %v2756_v35 = vld [vmem:[#allocation2 + $0x4c] sm:$0xf] }
  0xd3   : > { %v1511_v60 = vsel %vm10745_vm13, %v9365_v43, %v1510_v53  ;;  %v2023_v63 = vsel %vm10529_vm9, %v2018_v58, %v2022_v39  ;;  %v1512_v61 = vrot.slane %v1510_v53, 4  ;;  %2383 = vst.msk [vmem:[#allocation3 + $0x40] sm:$0xf] %vm224_vm0, %v2033_v0  ;;  %v1396_v40 = vld [vmem:[#allocation2 + $0x3c] sm:$0xe]  ;;  %v2056_v43 = vrot.slane %v2054_v19, 5 }
  0xd4   : > { %v1277_v12 = vpop.permute.xlu0 %1276  ;;  %2382 = vst.msk [vmem:[#allocation3 + $0x34] sm:$0xf] %vm224_vm0, %v2023_v63  ;;  %v3090_v7 = vor.u32 %v3089_v62, %v3086_v26  ;;  %v1730_v47 = vld [vmem:[#allocation2 + $0x40] sm:$0xf]  ;;  %v2546_v38 = vrot.slane %v10985_v32, 5 }
  0xd5   : > { %1797 = vrot.lane.b32.xlu0 %v1727_v54, %s10365_s12  ;;  %1361 = vst.msk [vmem:[#allocation3 + $0x90] sm:$0xf] %vm1348_vm14, %v1277_v12  ;;  %2825 = vrot.lane.b32.xlu1 %v2754_v1, %s10364_s17  ;;  %v1513_v54 = vrot.slane %v1395_v33, 5  ;;  %v3093_v1 = vshll.u32 %v2952_v57, 16  ;;  %v2041_v33 = vor.u32 %v2040_v24, %v2037_v23  ;;  %v2954_v52 = vld [vmem:[#allocation2 + $0x54] sm:$0xf] }
  0xd6   : > { %v1279_v29 = vpop.permute.xlu1 %1278  ;;  %v10175_v2 = vld [vmem:[#allocation3 + $0x20] ss:$12 sps:$4 sm:$0xff]   ;;  %v3091_v25 = vrot.slane %v3090_v7, 4  ;;  %v9366_v57 = vrot.slane %v1396_v40, 9  ;;  %v3506_v59 = vld [vmem:[#allocation2 + $0x34] sm:$0xf] }
  0xd7   : > { %1362 = vst.msk [vmem:[#allocation3 + $0x9c] sm:$0xf] %vm1348_vm14, %v1279_v29  ;;  %10038 = vmatmul.mubr.msk.bf16.vlgmr.msra.gmra.mxu1 %vm4226_vm15, %v10175_v2  ;;  %v3095_v12 = vrot.slane %v3093_v1, 5  ;;  %v2050_v29 = vrot.slane %v2048_v18, 4  ;;  %v2042_v46 = vrot.slane %v2041_v33, 4  ;;  %v3611_v63 = vrot.slane %v3506_v59, 5 }
  0xd8   : > { %v1281_v44 = vpop.permute.xlu0 %1280  ;;  %v3508_v0 = vld [vmem:[#allocation2 + $0x3c] sm:$0xe]  ;;  %v2544_v1 = vsel %vm10745_vm13, %v9382_v45, %v2543_v31  ;;  %v3108_v2 = vshrl.u32 %v2954_v52, 16  ;;  %v3509_v4 = vld [vmem:[#allocation2 + $0x40] sm:$0xf]  ;;  %v3111_v7 = vshll.u32 %v2954_v52, 16 }
  0xd9   : > { %3383 = vrot.lane.b32.xlu0 %v3072_v11, %s10365_s12  ;;  %1363 = vst.msk [vmem:[#allocation3 + $0xa8] sm:$0xf] %vm1348_vm14, %v1281_v44  ;;  %1799 = vrot.lane.b32.xlu1 %v1728_v17, %s10365_s12  ;;  %v1514_v11 = vsel %vm10745_vm13, %v1512_v61, %v1513_v54  ;;  %v2044_v17 = vshll.u32 %v1924_v10, 16  ;;  %v3100_v39 = vor.u32 %v3099_v49, %v3095_v12  ;;  %v3105_v44 = vrot.slane %v3103_v21, 5  ;;  %v3505_v54 = vld [vmem:[#allocation2 + $0x30] sm:$0xe] }
  0xda   : > { %v1283_v55 = vpop.permute.xlu1 %1282  ;;  %v3096_v51 = vsel %vm10529_vm9, %v3091_v25, %v3095_v12  ;;  %v9395_v62 = vrot.slane %v3505_v54, 9  ;;  %v3613_v9 = vrot.slane %v3611_v63, 4  ;;  %v9396_v10 = vrot.slane %v3508_v0, 9  ;;  %v1398_v16 = vld [vmem:[#allocation2 + $0x44] sm:$0x1] }
  0xdb   : > { %1364 = vst.msk [vmem:[#allocation3 + $0xb4] sm:$0xf] %vm1348_vm14, %v1283_v55  ;;  %v2046_v28 = vrot.slane %v2044_v17, 5  ;;  %v2545_v55 = vrot.slane %v2543_v31, 4  ;;  %v3101_v50 = vrot.slane %v3100_v39, 4  ;;  %v3110_v24 = vrot.slane %v3108_v2, 4 }
  0xdc   : > { %v3612_v8 = vsel %vm10745_vm13, %v9395_v62, %v3611_v63  ;;  %v3113_v25 = vrot.slane %v3111_v7, 5  ;;  %v1926_v27 = vld [vmem:[#allocation2 + $0x3c] sm:$0xf]  ;;  %v1520_v40 = vrot.slane %v1398_v16, 5  ;;  %v2428_v62 = vld [vmem:[#allocation2 + $0x54] sm:$0xe] }
  0xdd   : > { %2634 = vrot.lane.b32.xlu0 %v2537_v41, %s10363_s10  ;;  %3385 = vrot.lane.b32.xlu1 %v3082_v56, %s10365_s12  ;;  %v2051_v41 = vor.u32 %v2050_v29, %v2046_v28  ;;  %v1397_v56 = vld [vmem:[#allocation2 + $0x40] sm:$0xf]  ;;  %v2047_v58 = vsel %vm10529_vm9, %v2042_v46, %v2046_v28  ;;  %3743 = vst.msk [vmem:[#allocation3 + $0x38] sm:$0xf] %vm224_vm0, %v3612_v8  ;;  %v2059_v31 = vshrl.u32 %v1926_v27, 16  ;;  %v2062_v32 = vshll.u32 %v1926_v27, 16 }
  0xde   : > { %2384 = vst.msk [vmem:[#allocation3 + $0x4c] sm:$0xf] %vm224_vm0, %v2047_v58  ;;  %v3106_v13 = vsel %vm10529_vm9, %v3101_v50, %v3105_v44  ;;  %v1517_v14 = vrot.slane %v1397_v56, 5  ;;  %v2547_v21 = vsel %vm10745_vm13, %v2545_v55, %v2546_v38  ;;  %v1927_v28 = vld [vmem:[#allocation2 + $0x40] sm:$0xf]  ;;  %v3114_v38 = vor.u32 %v3113_v25, %v3110_v24 }
  0xdf   : > { %v2052_v53 = vrot.slane %v2051_v41, 4  ;;  %v2068_v33 = vshll.u32 %v1927_v28, 16  ;;  %v2757_v41 = vld [vmem:[#allocation2 + $0x54] sm:$0xf]  ;;  %v2956_v46 = vld [vmem:[#allocation2 + $0x5c] sm:$0x1] }
  0xe0   : > { %v1518_v23 = vsel %vm10745_vm13, %v9366_v57, %v1517_v14  ;;  %v1519_v39 = vrot.slane %v1517_v14, 4  ;;  %v2957_v55 = vld [vmem:[#allocation2 + $0x60] sm:$0xf]  ;;  %v1731_v58 = vld [vmem:[#allocation2 + $0x48] sm:$0xf]  ;;  %v3115_v0 = vrot.slane %v3114_v38, 4 }
  0xe1   : > { %1608 = vrot.lane.b32.xlu0 %v1511_v60, %s10364_s17  ;;  %v1285_v6 = vpop.permute.xlu0 %1284  ;;  %2636 = vrot.lane.b32.xlu1 %v2540_v3, %s10363_s10  ;;  %v3507_v60 = vld [vmem:[#allocation2 + $0x38] sm:$0x1]  ;;  %v2057_v26 = vsel %vm10529_vm9, %v2052_v53, %v2056_v43  ;;  %v2072_v43 = vshrl.u32 %v1927_v28, 16  ;;  %v11033_v2 = vld [vmem:[#allocation2 + $0x5c] sm:$0x1] }
  0xe2   : > { %1365 = vst.msk [vmem:[#allocation3 + $0xc0] sm:$0xf] %vm1348_vm14, %v1285_v6  ;;  %v3614_v3 = vrot.slane %v3507_v60, 5  ;;  %v2955_v6 = vld [vmem:[#allocation2 + $0x58] sm:$0xf]  ;;  %v1521_v57 = vsel %vm10745_vm13, %v1519_v39, %v1520_v40 }
  0xe3   : > { %2385 = vst.msk [vmem:[#allocation3 + $0x58] sm:$0xf] %vm224_vm0, %v2057_v26  ;;  %v3117_v17 = vshll.u32 %v2955_v6, 16  ;;  %v3121_v18 = vshrl.u32 %v2955_v6, 16  ;;  %v2074_v54 = vrot.slane %v2072_v43, 4  ;;  %v3127_v26 = vshll.u32 %v2956_v46, 16 }
  0xe4   : > { %v3615_v15 = vsel %vm10745_vm13, %v3613_v9, %v3614_v3  ;;  %v2758_v9 = vld [vmem:[#allocation2 + $0x58] sm:$0xf]  ;;  %v1929_v25 = vld [vmem:[#allocation2 + $0x48] sm:$0xf]  ;;  %v1931_v40 = vld [vmem:[#allocation2 + $0x50] sm:$0x1] }
  0xe5   : > { %2827 = vrot.lane.b32.xlu0 %v2755_v5, %s10364_s17  ;;  %1610 = vrot.lane.b32.xlu1 %v1514_v11, %s10364_s17  ;;  %v3510_v5 = vld [vmem:[#allocation2 + $0x44] sm:$0x1]  ;;  %v3618_v11 = vrot.slane %v3509_v4, 5  ;;  %3744 = vst.msk [vmem:[#allocation3 + $0x44] sm:$0xf] %vm224_vm0, %v3615_v15  ;;  %v3119_v52 = vrot.slane %v3117_v17, 5 }
  0xe6   : > { %v3621_v12 = vrot.slane %v3510_v5, 5  ;;  %v3123_v53 = vrot.slane %v3121_v18, 4  ;;  %v3132_v5 = vshrl.u32 %v2957_v55, 16  ;;  %v1732_v15 = vld [vmem:[#allocation2 + $0x4c] sm:$0xf]  ;;  %v3129_v17 = vrot.slane %v3127_v26, 5 }
  0xe7   : > { %v1287_v37 = vpop.permute.xlu1 %1286  ;;  %v3619_v19 = vsel %vm10745_vm13, %v9396_v10, %v3618_v11  ;;  %v2958_v10 = vld [vmem:[#allocation2 + $0x64] sm:$0xf]  ;;  %v2553_v18 = vrot.slane %v11033_v2, 5 }
  0xe8   : > { %1366 = vst.msk [vmem:[#allocation3 + $0xcc] sm:$0xf] %vm1348_vm14, %v1287_v37  ;;  %v3141_v24 = vshll.u32 %v2958_v10, 16  ;;  %v3145_v28 = vshrl.u32 %v2958_v10, 16 }
  0xe9   : > { %1801 = vrot.lane.b32.xlu0 %v1729_v20, %s10365_s12  ;;  %2829 = vrot.lane.b32.xlu1 %v2756_v35, %s10364_s17  ;;  %v3620_v20 = vrot.slane %v3618_v11, 4  ;;  %3745 = vst.msk [vmem:[#allocation3 + $0x50] sm:$0xf] %vm224_vm0, %v3619_v19  ;;  %v1928_v35 = vld [vmem:[#allocation2 + $0x44] sm:$0x1]  ;;  %v3135_v11 = vshll.u32 %v2957_v55, 16 }
  0xea   : > { %v1289_v48 = vpop.permute.xlu0 %1288  ;;  %v2078_v44 = vshll.u32 %v1928_v35, 16  ;;  %v1399_v19 = vld [vmem:[#allocation2 + $0x48] sm:$0xe] }
  0xeb   : > { %1367 = vst.msk [vmem:[#allocation3 + $0xd8] sm:$0xf] %vm1348_vm14, %v1289_v48  ;;  %v3622_v29 = vsel %vm10745_vm13, %v3620_v20, %v3621_v12  ;;  %v2064_v48 = vrot.slane %v2062_v32, 5  ;;  %v3137_v27 = vrot.slane %v3135_v11, 5  ;;  %v2086_v32 = vshll.u32 %v1929_v25, 16 }
  0xec   : > { %v1291_v61 = vpop.permute.xlu1 %1290  ;;  %3746 = vst.msk [vmem:[#allocation3 + $0x5c] sm:$0xf] %vm224_vm0, %v3622_v29  ;;  %v10180_v59 = vld [vmem:[#allocation3 + $0x38] ss:$12 sps:$4 sm:$0xff]   ;;  %v2080_v50 = vrot.slane %v2078_v44, 5  ;;  %v9367_v43 = vrot.slane %v1399_v19, 9 }
  0xed   : > { %3387 = vrot.lane.b32.xlu0 %v3096_v51, %s10365_s12  ;;  %1368 = vst.msk [vmem:[#allocation3 + $0xe4] sm:$0xf] %vm1348_vm14, %v1291_v61  ;;  %1803 = vrot.lane.b32.xlu1 %v1730_v47, %s10365_s12  ;;  %v2061_v47 = vrot.slane %v2059_v31, 4  ;;  %v2070_v51 = vrot.slane %v2068_v33, 5  ;;  %v3124_v61 = vor.u32 %v3123_v53, %v3119_v52  ;;  %v1930_v29 = vld [vmem:[#allocation2 + $0x4c] sm:$0xf] }
  0xee   : > { %10041 = vmatprep.mubr.msk.bf16.mxu1 %vm4226_vm15, %v10180_v59  ;;  %v2083_v31 = vshrl.u32 %v1929_v25, 16  ;;  %v2092_v39 = vshll.u32 %v1930_v29, 16  ;;  %v2959_v44 = vld [vmem:[#allocation2 + $0x68] sm:$0x1]  ;;  %v2088_v46 = vrot.slane %v2086_v32, 5 }
  0xef   : > { %v2065_v56 = vor.u32 %v2064_v48, %v2061_v47  ;;  %v2075_v60 = vor.u32 %v2074_v54, %v2070_v51  ;;  %v3125_v16 = vrot.slane %v3124_v61, 4  ;;  %v2102_v47 = vshll.u32 %v1931_v40, 16  ;;  %v1401_v54 = vld [vmem:[#allocation2 + $0x50] sm:$0x1]  ;;  %v3515_v25 = vld [vmem:[#allocation2 + $0x58] sm:$0xf] }
  0xf0   : > { %v1293_v49 = vpop.permute.xlu0 %1292  ;;  %v1527_v2 = vrot.slane %v1401_v54, 5 }
  0xf1   : > { %2638 = vrot.lane.b32.xlu0 %v2544_v1, %s10363_s10  ;;  %1369 = vst.msk [vmem:[#allocation3 + $0xf0] sm:$0xf] %vm1348_vm14, %v1293_v49  ;;  %3389 = vrot.lane.b32.xlu1 %v3106_v13, %s10365_s12  ;;  %v2066_v63 = vrot.slane %v2065_v56, 4  ;;  %v2429_v1 = vld [vmem:[#allocation2 + $0x58] sm:$0xf]  ;;  %v2076_v3 = vrot.slane %v2075_v60, 4  ;;  %v3120_v49 = vsel %vm10529_vm9, %v3115_v0, %v3119_v52 }
  0xf2   : > { %v9383_v13 = vrot.slane %v2428_v62, 9  ;;  %v2550_v14 = vrot.slane %v2429_v1, 5  ;;  %v2094_v52 = vrot.slane %v2092_v39, 5  ;;  %v11060_v56 = vrot.slane %v3141_v24, 5  ;;  %v3514_v24 = vld [vmem:[#allocation2 + $0x54] sm:$0xe] }
  0xf3   : > { %v1295_v37 = vpop.permute.xlu1 %1294  ;;  %v10181_v6 = vld [vmem:[#allocation3 + $0x50] ss:$12 sps:$4 sm:$0xff]   ;;  %v2071_v7 = vsel %vm10529_vm9, %v2066_v63, %v2070_v51  ;;  %v2081_v12 = vsel %vm10529_vm9, %v2076_v3, %v2080_v50  ;;  %v3130_v51 = vsel %vm10529_vm9, %v3125_v16, %v3129_v17  ;;  %v3151_v60 = vshll.u32 %v2959_v44, 16  ;;  %v2431_v63 = vld [vmem:[#allocation2 + $0x60] sm:$0xe] }
  0xf4   : > { %1370 = vst.msk [vmem:[#allocation3 + $0xfc] sm:$0xf] %vm1348_vm14, %v1295_v37  ;;  %10042 = vmatmul.mubr.msk.bf16.gmra.mxu1 %vm4226_vm15, %v10181_v6  ;;  %v2551_v35 = vsel %vm10745_vm13, %v9383_v13, %v2550_v14  ;;  %v2552_v37 = vrot.slane %v2550_v14, 4  ;;  %v2104_v26 = vrot.slane %v2102_v47, 5  ;;  %v2432_v3 = vld [vmem:[#allocation2 + $0x64] sm:$0xf] }
  0xf5   : > { %v1297_v45 = vpop.permute.xlu0 %1296  ;;  %1612 = vrot.lane.b32.xlu0 %v1518_v23, %s10364_s17  ;;  %2640 = vrot.lane.b32.xlu1 %v2547_v21, %s10363_s10  ;;  %2386 = vst.msk [vmem:[#allocation3 + $0x64] sm:$0xf] %vm224_vm0, %v2071_v7  ;;  %2387 = vst.msk [vmem:[#allocation3 + $0x70] sm:$0xf] %vm224_vm0, %v2081_v12  ;;  %v1400_v21 = vld [vmem:[#allocation2 + $0x4c] sm:$0xf] }
  0xf6   : > { %1371 = vst.msk [vmem:[#allocation3 + $0x108] sm:$0xf] %vm1348_vm14, %v1297_v45  ;;  %v3134_v23 = vrot.slane %v3132_v5, 4  ;;  %v2085_v45 = vrot.slane %v2083_v31, 4  ;;  %v1524_v38 = vrot.slane %v1400_v21, 5  ;;  %v2554_v1 = vsel %vm10745_vm13, %v2552_v37, %v2553_v18 }
  0xf7   : > { %v2759_v7 = vld [vmem:[#allocation2 + $0x60] sm:$0xf]  ;;  %v11078_v12 = vrot.slane %v3151_v60, 5  ;;  %v3511_v14 = vld [vmem:[#allocation2 + $0x48] sm:$0xe]  ;;  %v2557_v16 = vrot.slane %v2432_v3, 5 }
  0xf8   : > { %v1299_v8 = vpop.permute.xlu1 %1298  ;;  %v3138_v55 = vor.u32 %v3137_v27, %v3134_v23  ;;  %v1525_v62 = vsel %vm10745_vm13, %v9367_v43, %v1524_v38  ;;  %v1526_v6 = vrot.slane %v1524_v38, 4  ;;  %v3513_v18 = vld [vmem:[#allocation2 + $0x50] sm:$0x1]  ;;  %v9397_v19 = vrot.slane %v3511_v14, 9  ;;  %v3516_v31 = vld [vmem:[#allocation2 + $0x5c] sm:$0x1] }
  0xf9   : > { %2831 = vrot.lane.b32.xlu0 %v2757_v41, %s10364_s17  ;;  %1614 = vrot.lane.b32.xlu1 %v1521_v57, %s10364_s17  ;;  %1372 = vst.msk [vmem:[#allocation3 + $0x114] sm:$0xf] %vm1348_vm14, %v1299_v8  ;;  %v2096_v41 = vshrl.u32 %v1930_v29, 16  ;;  %v3147_v57 = vrot.slane %v3145_v28, 4  ;;  %v3628_v23 = vrot.slane %v3513_v18, 5  ;;  %v9398_v32 = vrot.slane %v3514_v24, 9 }
  0xfa   : > { %v11072_v8 = vrot.slane %v3138_v55, 4  ;;  %v1528_v27 = vsel %vm10745_vm13, %v1526_v6, %v1527_v2  ;;  %v1733_v37 = vld [vmem:[#allocation2 + $0x54] sm:$0xf]  ;;  %v3635_v43 = vrot.slane %v3516_v31, 5  ;;  %v2760_v44 = vld [vmem:[#allocation2 + $0x64] sm:$0xf] }
  0xfb   : > { %v1301_v4 = vpop.permute.xlu0 %1300  ;;  %v2098_v53 = vrot.slane %v2096_v41, 4  ;;  %v3632_v41 = vrot.slane %v3515_v25, 5  ;;  %v11117_v60 = vld [vmem:[#allocation2 + $0x6c] sm:$0xf] }
  0xfc   : > { %1373 = vst.msk [vmem:[#allocation3 + $0x120] sm:$0xf] %vm1348_vm14, %v1301_v4  ;;  %v11069_v4 = vld [vmem:[#allocation2 + $0x68] sm:$0x1]  ;;  %v3144_v28 = vsel %vm10529_vm9, %v11072_v8, %v11060_v56  ;;  %v3156_v31 = vshrl.u32 %v11117_v60, 16 }
  0xfd   : > { %1805 = vrot.lane.b32.xlu0 %v1731_v58, %s10365_s12  ;;  %2833 = vrot.lane.b32.xlu1 %v2758_v9, %s10364_s17  ;;  %v2089_v58 = vor.u32 %v2088_v46, %v2085_v45  ;;  %v2099_v50 = vor.u32 %v2098_v53, %v2094_v52  ;;  %v3148_v9 = vor.u32 %v3147_v57, %v11060_v56  ;;  %v2560_v17 = vrot.slane %v11069_v4, 5  ;;  %v725_v57 = vld [vmem:[#allocation2 + $0x9c] sm:$0xf] }
  0xfe   : > { %v11105_v46 = vrot.slane %v2557_v16, 4  ;;  %v3633_v54 = vsel %vm10745_vm13, %v9398_v32, %v3632_v41  ;;  %v3634_v55 = vrot.slane %v3632_v41, 4  ;;  %v3159_v41 = vshll.u32 %v11117_v60, 16 }
  0xff   : > { %v2619_v20 = vpop.permute.xlu0 %2618  ;;  %v1303_v33 = vpop.permute.xlu1 %1302  ;;  %v2090_v0 = vrot.slane %v2089_v58, 4  ;;  %v2100_v5 = vrot.slane %v2099_v50, 4  ;;  %v11094_v29 = vrot.slane %v3148_v9, 4  ;;  %3749 = vst.msk [vmem:[#allocation3 + $0x80] sm:$0xf] %vm224_vm0, %v3633_v54 }
 0x100   : > { %2714 = vst.msk [vmem:[#allocation3 + $0x4] sm:$0xf] %vm1348_vm14, %v2619_v20  ;;  %1374 = vst.msk [vmem:[#allocation3 + $0x12c] sm:$0xf] %vm1348_vm14, %v1303_v33  ;;  %v304_v33 = vld [vmem:[%s10508_s9 + $0x60] sm:$0xf] }
 0x101   : > { %3391 = vrot.lane.b32.xlu0 %v3120_v49, %s10365_s12  ;;  %1807 = vrot.lane.b32.xlu1 %v1732_v15, %s10365_s12  ;;  %v2095_v10 = vsel %vm10529_vm9, %v2090_v0, %v2094_v52  ;;  %v2105_v13 = vsel %vm10529_vm9, %v2100_v5, %v2104_v26  ;;  %v3512_v15 = vld [vmem:[#allocation2 + $0x4c] sm:$0xf]  ;;  %v9384_v49 = vrot.slane %v2431_v63, 9  ;;  %v520_v47 = vshrl.u32 %v304_v33, 16  ;;  %v11110_v52 = vld [vmem:[#allocation2 + $0x54] sm:$0xe] }
 0x102   : > { %2388 = vst.msk [vmem:[#allocation3 + $0x7c] sm:$0xf] %vm224_vm0, %v2095_v10  ;;  %2389 = vst.msk [vmem:[#allocation3 + $0x88] sm:$0xf] %vm224_vm0, %v2105_v13  ;;  %v3625_v21 = vrot.slane %v3512_v15, 5  ;;  %v3161_v60 = vrot.slane %v3159_v41, 5 }
 0x103   : > { %v1593_v48 = vpop.permute.xlu0 %1592  ;;  %v2621_v59 = vpop.permute.xlu1 %2620  ;;  %v11103_v45 = vsel %vm10745_vm13, %v9384_v49, %v2557_v16  ;;  %v522_v50 = vrot.slane %v520_v47, 7  ;;  %v1934_v5 = vld [vmem:[#allocation2 + $0x5c] sm:$0x1]  ;;  %v729_v13 = vld [vmem:[#allocation2 + $0xa4] sm:$0x1] }
 0x104   : > { %1689 = vst.msk [vmem:[#allocation3] sm:$0xf] %vm1688_vm1, %v1593_v48  ;;  %v3626_v39 = vsel %vm10745_vm13, %v9397_v19, %v3625_v21  ;;  %v3627_v40 = vrot.slane %v3625_v21, 4  ;;  %v523_v48 = vshll.u32 %v304_v33, 16  ;;  %v1734_v19 = vld [vmem:[#allocation2 + $0x58] sm:$0xf] }
 0x105   : > { %2642 = vrot.lane.b32.xlu0 %v2551_v35, %s10363_s10  ;;  %2715 = vst.msk [vmem:[#allocation3 + $0x10] sm:$0xf] %vm1348_vm14, %v2621_v59  ;;  %3393 = vrot.lane.b32.xlu1 %v3130_v51, %s10365_s12  ;;  %v305_v51 = vld [vmem:[%s10508_s9 + $0x64] sm:$0xf]  ;;  %v1932_v59 = vld [vmem:[#allocation2 + $0x54] sm:$0xf] }
 0x106   : > { %3747 = vst.msk [vmem:[#allocation3 + $0x68] sm:$0xf] %vm224_vm0, %v3626_v39  ;;  %v3629_v53 = vsel %vm10745_vm13, %v3627_v40, %v3628_v23  ;;  %v528_v58 = vshrl.u32 %v305_v51, 16  ;;  %v531_v26 = vshll.u32 %v305_v51, 16  ;;  %v2107_v63 = vshrl.u32 %v1932_v59, 16 }
 0x107   : > { %v2812_v61 = vpop.permute.xlu0 %2811  ;;  %v1595_v11 = vpop.permute.xlu1 %1594  ;;  %3748 = vst.msk [vmem:[#allocation3 + $0x74] sm:$0xf] %vm224_vm0, %v3629_v53  ;;  %v2110_v0 = vshll.u32 %v1932_v59, 16  ;;  %v526_v9 = vrot.slane %v522_v50, 4  ;;  %v9368_v21 = vrot.slane %v11110_v52, 9  ;;  %v2126_v25 = vshll.u32 %v1934_v5, 16 }
 0x108   : > { %2907 = vst.msk [vmem:[#allocation3 + $0x4] sm:$0xf] %vm1688_vm1, %v2812_v61  ;;  %1690 = vst.msk [vmem:[#allocation3 + $0xc] sm:$0xf] %vm1688_vm1, %v1595_v11  ;;  %v530_v2 = vrot.slane %v528_v58, 7  ;;  %v2109_v10 = vrot.slane %v2107_v63, 4  ;;  %v3154_v51 = vsel %vm10529_vm9, %v11094_v29, %v11078_v12 }
 0x109   : > { %1616 = vrot.lane.b32.xlu0 %v1525_v62, %s10364_s17  ;;  %2644 = vrot.lane.b32.xlu1 %v2554_v1, %s10363_s10  ;;  %v1933_v62 = vld [vmem:[#allocation2 + $0x58] sm:$0xf]  ;;  %v3636_v1 = vsel %vm10745_vm13, %v3634_v55, %v3635_v43  ;;  %v2112_v11 = vrot.slane %v2110_v0, 5  ;;  %v11144_v39 = vld [vmem:[#allocation2 + $0x5c] sm:$0x1]  ;;  %v2128_v8 = vrot.slane %v2126_v25, 5 }
 0x10a   : > { %v2116_v3 = vshll.u32 %v1933_v62, 16  ;;  %v2120_v6 = vshrl.u32 %v1933_v62, 16  ;;  %3750 = vst.msk [vmem:[#allocation3 + $0x8c] sm:$0xf] %vm224_vm0, %v3636_v1  ;;  %v533_v15 = vor.u32 %v531_v26, %v530_v2  ;;  %v535_v49 = vrot.slane %v530_v2, 4 }
 0x10b   : > { %v1786_v20 = vpop.permute.xlu0 %1785  ;;  %v2814_v35 = vpop.permute.xlu1 %2813  ;;  %v2113_v24 = vor.u32 %v2112_v11, %v2109_v10  ;;  %v2961_v40 = vld [vmem:[#allocation2 + $0x70] sm:$0xf]  ;;  %v732_v54 = vld [vmem:[#allocation2 + $0xa8] sm:$0xf]  ;;  %v307_v12 = vld [vmem:[%s10508_s9 + $0x6c] sm:$0xf] }
 0x10c   : > { %1882 = vst.msk [vmem:[#allocation3] sm:$0xf] %vm1881_vm2, %v1786_v20  ;;  %v2118_v16 = vrot.slane %v2116_v3, 5  ;;  %v2122_v18 = vrot.slane %v2120_v6, 4  ;;  %v1403_v20 = vld [vmem:[#allocation2 + $0x58] sm:$0xf]  ;;  %v534_v32 = vsel %vm10522_vm8, %v526_v9, %v533_v15 }
 0x10d   : > { %2835 = vrot.lane.b32.xlu0 %v2759_v7, %s10364_s17  ;;  %2908 = vst.msk [vmem:[#allocation3 + $0x10] sm:$0xf] %vm1688_vm1, %v2814_v35  ;;  %1618 = vrot.lane.b32.xlu1 %v1528_v27, %s10364_s17  ;;  %v525_v7 = vor.u32 %v523_v48, %v522_v50  ;;  %v730_v35 = vsel %vm10537_vm10, %v535_v49, %v729_v13  ;;  %v2114_v56 = vrot.slane %v2113_v24, 4  ;;  %v3158_v59 = vrot.slane %v3156_v31, 4  ;;  %v1935_v50 = vld [vmem:[#allocation2 + $0x60] sm:$0xf] }
 0x10e   : > { %v2123_v33 = vor.u32 %v2122_v18, %v2118_v16  ;;  %728 = vst.msk [vmem:[#allocation2 + $0xa0] sm:$0xf] %vm224_vm0, %v534_v32  ;;  %731 = vst [vmem:[#allocation2 + $0xa4] sm:$0x1] %v730_v35  ;;  %v10186_v47 = vld [vmem:[#allocation3 + $0x68] ss:$12 sps:$4 sm:$0xff]  }
 0x10f   : > { %v3372_v38 = vpop.permute.xlu0 %3371  ;;  %v1788_v61 = vpop.permute.xlu1 %1787  ;;  %v726_v23 = vsel %vm10515_vm7, %v525_v7, %v725_v57  ;;  %10045 = vmatprep.mubr.msk.bf16.mxu1 %vm4226_vm15, %v10186_v47  ;;  %v1534_v62 = vrot.slane %v11144_v39, 5  ;;  %v3165_v63 = vshll.u32 %v2961_v40, 16  ;;  %v3169_v0 = vshrl.u32 %v2961_v40, 16  ;;  %v1936_v10 = vld [vmem:[#allocation2 + $0x64] sm:$0xf] }
 0x110   : > { %3467 = vst.msk [vmem:[#allocation3 + $0x4] sm:$0xf] %vm1881_vm2, %v3372_v38  ;;  %1883 = vst.msk [vmem:[#allocation3 + $0xc] sm:$0xf] %vm1881_vm2, %v1788_v61  ;;  %v2124_v48 = vrot.slane %v2123_v33, 4  ;;  %v2119_v38 = vsel %vm10529_vm9, %v2114_v56, %v2118_v16  ;;  %v2561_v61 = vsel %vm10745_vm13, %v11105_v46, %v2560_v17  ;;  %v545_v5 = vshrl.u32 %v307_v12, 16 }
 0x111   : > { %1809 = vrot.lane.b32.xlu0 %v1733_v37, %s10365_s12  ;;  %2837 = vrot.lane.b32.xlu1 %v2760_v44, %s10364_s17  ;;  %727 = vst [vmem:[#allocation2 + $0x9c] sm:$0xf] %v726_v23  ;;  %v306_v37 = vld [vmem:[%s10508_s9 + $0x68] sm:$0xf]  ;;  %v1531_v44 = vrot.slane %v1403_v20, 5  ;;  %v2131_v11 = vshrl.u32 %v1935_v50, 16 }
 0x112   : > { %v540_v53 = vshll.u32 %v306_v37, 16  ;;  %v10187_v57 = vld [vmem:[#allocation3 + $0x80] ss:$12 sps:$4 sm:$0xff]   ;;  %2390 = vst.msk [vmem:[#allocation3 + $0x94] sm:$0xf] %vm224_vm0, %v2119_v38  ;;  %v2129_v58 = vsel %vm10529_vm9, %v2124_v48, %v2128_v8  ;;  %v548_v17 = vshll.u32 %v307_v12, 16 }
 0x113   : > { %v2623_v14 = vpop.permute.xlu0 %2622  ;;  %v3374_v27 = vpop.permute.xlu1 %3373  ;;  %v1532_v29 = vsel %vm10745_vm13, %v9368_v21, %v1531_v44  ;;  %2391 = vst.msk [vmem:[#allocation3 + $0xa0] sm:$0xf] %vm224_vm0, %v2129_v58  ;;  %10046 = vmatmul.mubr.msk.bf16.gmra.mxu1 %vm4226_vm15, %v10187_v57  ;;  %v1533_v2 = vrot.slane %v1531_v44, 4  ;;  %v2761_v13 = vld [vmem:[#allocation2 + $0x6c] sm:$0xf]  ;;  %v3167_v15 = vrot.slane %v3165_v63, 5 }
 0x114   : > { %2716 = vst.msk [vmem:[#allocation3 + $0x1c] sm:$0xf] %vm1348_vm14, %v2623_v14  ;;  %v3162_v14 = vor.u32 %v3161_v60, %v3158_v59  ;;  %v3171_v49 = vrot.slane %v3169_v0, 4  ;;  %v2134_v16 = vshll.u32 %v1935_v50, 16  ;;  %v547_v21 = vrot.slane %v545_v5, 7 }
 0x115   : > { %3395 = vrot.lane.b32.xlu0 %v3144_v28, %s10365_s12  ;;  %3468 = vst.msk [vmem:[#allocation3 + $0x10] sm:$0xf] %vm1881_vm2, %v3374_v27  ;;  %v537_v28 = vshrl.u32 %v306_v37, 16  ;;  %1811 = vrot.lane.b32.xlu1 %v1734_v19, %s10365_s12  ;;  %v1535_v18 = vsel %vm10745_vm13, %v1533_v2, %v1534_v62  ;;  %v2962_v19 = vld [vmem:[#allocation2 + $0x74] sm:$0x1]  ;;  %v2140_v23 = vshll.u32 %v1936_v10, 16 }
 0x116   : > { %v1735_v25 = vld [vmem:[#allocation2 + $0x60] sm:$0xf]  ;;  %v2133_v27 = vrot.slane %v2131_v11, 4  ;;  %v3163_v31 = vrot.slane %v3162_v14, 4  ;;  %v2434_v32 = vld [vmem:[#allocation2 + $0x6c] sm:$0xe]  ;;  %v550_v33 = vor.u32 %v548_v17, %v547_v21  ;;  %v3172_v39 = vor.u32 %v3171_v49, %v3167_v15 }
 0x117   : > { %v1597_v43 = vpop.permute.xlu0 %1596  ;;  %v11156_v52 = vrot.slane %v537_v28, 7  ;;  %v2625_v55 = vpop.permute.xlu1 %2624  ;;  %v3771_v1 = vld [vmem:[#allocation3] sm:$0xff]  ;;  %v1937_v35 = vld [vmem:[#allocation2 + $0x68] sm:$0x1]  ;;  %v3175_v40 = vshll.u32 %v2962_v19, 16  ;;  %v552_v41 = vrot.slane %v547_v21, 4 }
 0x118   : > { %1691 = vst.msk [vmem:[#allocation3 + $0x18] sm:$0xf] %vm1688_vm1, %v1597_v43  ;;  %v2136_v56 = vrot.slane %v2134_v16, 5  ;;  %v736_v8 = vld [vmem:[#allocation2 + $0xb0] sm:$0x1]  ;;  %v2142_v47 = vrot.slane %v2140_v23, 5 }
 0x119   : > { %2646 = vrot.lane.b32.xlu0 %v11103_v45, %s10363_s10  ;;  %2717 = vst.msk [vmem:[#allocation3 + $0x28] sm:$0xf] %vm1348_vm14, %v2625_v55  ;;  %v542_v45 = vor.u32 %v540_v53, %v11156_v52  ;;  %3397 = vrot.lane.b32.xlu1 %v3154_v51, %s10365_s12  ;;  %v543_v20 = vrot.slane %v11156_v52, 4  ;;  %v2762_v28 = vld [vmem:[#allocation2 + $0x70] sm:$0xf]  ;;  %v2144_v48 = vshrl.u32 %v1936_v10, 16  ;;  %v3168_v55 = vsel %vm10529_vm9, %v3163_v31, %v3167_v15 }
 0x11a   : > { %v2435_v43 = vld [vmem:[#allocation2 + $0x70] sm:$0xf]  ;;  %v2963_v38 = vld [vmem:[#allocation2 + $0x78] sm:$0xf]  ;;  %v2137_v52 = vor.u32 %v2136_v56, %v2133_v27  ;;  %v2150_v53 = vshll.u32 %v1937_v35, 16  ;;  %v9385_v57 = vrot.slane %v2434_v32, 9  ;;  %v737_v59 = vsel %vm10537_vm10, %v552_v41, %v736_v8 }
 0x11b   : > { %v2816_v26 = vpop.permute.xlu0 %2815  ;;  %v733_v3 = vsel %vm10515_vm7, %v542_v45, %v732_v54  ;;  %v1599_v6 = vpop.permute.xlu1 %1598  ;;  %v551_v44 = vsel %vm10522_vm8, %v543_v20, %v550_v33  ;;  %v1736_v54 = vld [vmem:[#allocation2 + $0x64] sm:$0xf]  ;;  %v2436_v58 = vld [vmem:[#allocation2 + $0x74] sm:$0x1]  ;;  %v1405_v12 = vld [vmem:[#allocation2 + $0x60] sm:$0xe] }
 0x11c   : > { %2909 = vst.msk [vmem:[#allocation3 + $0x1c] sm:$0xf] %vm1688_vm1, %v2816_v26  ;;  %v3773_v7 = vld [vmem:[#allocation3 + $0xc] sm:$0xff]  ;;  %734 = vst [vmem:[#allocation2 + $0xa8] sm:$0xf] %v733_v3  ;;  %v3173_v45 = vrot.slane %v3172_v39, 4 }
 0x11d   : > { %v10171_v9 = vld [vmem:[#allocation3 + $0x4] ss:$12 sps:$4 sm:$0xff]   ;;  %1620 = vrot.lane.b32.xlu0 %v1532_v29, %s10364_s17  ;;  %1692 = vst.msk [vmem:[#allocation3 + $0x24] sm:$0xf] %vm1688_vm1, %v1599_v6  ;;  %v9410_v4 = vcombine.low %v3771_v1, %v3773_v7  ;;  %2648 = vrot.lane.b32.xlu1 %v2561_v61, %s10363_s10  ;;  %v2146_v29 = vrot.slane %v2144_v48, 4  ;;  %v3177_v50 = vrot.slane %v3175_v40, 5 }
 0x11e   : > { %4307 = vmatprep.mubr.bf16.mxu0 %v10171_v9  ;;  %735 = vst.msk [vmem:[#allocation2 + $0xac] sm:$0xf] %vm224_vm0, %v551_v44  ;;  %v2564_v26 = vrot.slane %v2435_v43, 5  ;;  %v2964_v62 = vld [vmem:[#allocation2 + $0x7c] sm:$0xf]  ;;  %v2138_v63 = vrot.slane %v2137_v52, 4 }
 0x11f   : > { %v1790_v46 = vpop.permute.xlu0 %1789  ;;  %4308 = vmatmul.mubr.bf16.vlgmr.msra.gmra.mxu0 %v9410_v4  ;;  %v2818_v24 = vpop.permute.xlu1 %2817  ;;  %738 = vst [vmem:[#allocation2 + $0xb0] sm:$0x1] %v737_v59  ;;  %v1406_v0 = vld [vmem:[#allocation2 + $0x64] sm:$0xf]  ;;  %v3180_v61 = vshrl.u32 %v2963_v38, 16  ;;  %v3183_v1 = vshll.u32 %v2963_v38, 16  ;;  %v2147_v2 = vor.u32 %v2146_v29, %v2142_v47  ;;  %v3178_v16 = vsel %vm10529_vm9, %v3173_v45, %v3177_v50 }
 0x120   : > { %1884 = vst.msk [vmem:[#allocation3 + $0x18] sm:$0xf] %vm1881_vm2, %v1790_v46  ;;  %v2152_v3 = vrot.slane %v2150_v53, 5  ;;  %v2567_v6 = vrot.slane %v2436_v58, 5  ;;  %v9369_v7 = vrot.slane %v1405_v12, 9  ;;  %v2143_v9 = vsel %vm10529_vm9, %v2138_v63, %v2142_v47 }
 0x121   : > { %2839 = vrot.lane.b32.xlu0 %v2761_v13, %s10364_s17  ;;  %2910 = vst.msk [vmem:[#allocation3 + $0x28] sm:$0xf] %vm1688_vm1, %v2818_v24  ;;  %1622 = vrot.lane.b32.xlu1 %v1535_v18, %s10364_s17  ;;  %v2565_v10 = vsel %vm10745_vm13, %v9385_v57, %v2564_v26  ;;  %v3189_v11 = vshll.u32 %v2964_v62, 16  ;;  %v3193_v4 = vshrl.u32 %v2964_v62, 16  ;;  %v2148_v13 = vrot.slane %v2147_v2, 4 }
 0x122   : > { %2392 = vst.msk [vmem:[#allocation3 + $0xac] sm:$0xf] %vm224_vm0, %v2143_v9  ;;  %v2566_v17 = vrot.slane %v2564_v26, 4  ;;  %v1538_v46 = vrot.slane %v1406_v0, 5  ;;  %v3517_v15 = vld [vmem:[#allocation2 + $0x60] sm:$0xe] }
 0x123   : > { %v3376_v37 = vpop.permute.xlu0 %3375  ;;  %v1792_v51 = vpop.permute.xlu1 %1791  ;;  %v3518_v49 = vld [vmem:[#allocation2 + $0x64] sm:$0xf]  ;;  %v1407_v18 = vld [vmem:[#allocation2 + $0x68] sm:$0x1]  ;;  %v3182_v19 = vrot.slane %v3180_v61, 4  ;;  %v3185_v20 = vrot.slane %v3183_v1, 5  ;;  %v2153_v21 = vsel %vm10529_vm9, %v2148_v13, %v2152_v3 }
 0x124   : > { %3469 = vst.msk [vmem:[#allocation3 + $0x1c] sm:$0xf] %vm1881_vm2, %v3376_v37  ;;  %1885 = vst.msk [vmem:[#allocation3 + $0x24] sm:$0xf] %vm1881_vm2, %v1792_v51  ;;  %v1539_v24 = vsel %vm10745_vm13, %v9369_v7, %v1538_v46  ;;  %v2965_v27 = vld [vmem:[#allocation2 + $0x80] sm:$0x1]  ;;  %v2568_v41 = vsel %vm10745_vm13, %v2566_v17, %v2567_v6 }
 0x125   : > { %1813 = vrot.lane.b32.xlu0 %v1735_v25, %s10365_s12  ;;  %2841 = vrot.lane.b32.xlu1 %v2762_v28, %s10364_s17  ;;  %2393 = vst.msk [vmem:[#allocation3 + $0xb8] sm:$0xf] %vm224_vm0, %v2153_v21  ;;  %v11221_v25 = vrot.slane %v3189_v11, 5  ;;  %v3195_v31 = vrot.slane %v3193_v4, 4  ;;  %v9399_v32 = vrot.slane %v3517_v15, 9  ;;  %v3639_v33 = vrot.slane %v3518_v49, 5 }
 0x126   : > { %v1541_v37 = vrot.slane %v1407_v18, 5  ;;  %v11224_v39 = vld [vmem:[#allocation2 + $0x78] sm:$0xe]  ;;  %v3519_v40 = vld [vmem:[#allocation2 + $0x68] sm:$0x1]  ;;  %v1540_v8 = vrot.slane %v1538_v46, 4  ;;  %v3186_v28 = vor.u32 %v3185_v20, %v3182_v19 }
 0x127   : > { %v2627_v60 = vpop.permute.xlu0 %2626  ;;  %v3378_v5 = vpop.permute.xlu1 %3377  ;;  %v3520_v43 = vld [vmem:[#allocation2 + $0x6c] sm:$0xe]  ;;  %v3521_v44 = vld [vmem:[#allocation2 + $0x70] sm:$0xf]  ;;  %v3199_v38 = vshll.u32 %v2965_v27, 16  ;;  %v3640_v58 = vsel %vm10745_vm13, %v9399_v32, %v3639_v33  ;;  %v3641_v12 = vrot.slane %v3639_v33, 4 }
 0x128   : > { %2718 = vst.msk [vmem:[#allocation3 + $0x34] sm:$0xf] %vm1348_vm14, %v2627_v60  ;;  %v3522_v52 = vld [vmem:[#allocation2 + $0x74] sm:$0x1]  ;;  %v11232_v57 = vld [vmem:[#allocation2 + $0x7c] sm:$0xf]  ;;  %v1542_v26 = vsel %vm10745_vm13, %v1540_v8, %v1541_v37 }
 0x129   : > { %3399 = vrot.lane.b32.xlu0 %v3168_v55, %s10365_s12  ;;  %3470 = vst.msk [vmem:[#allocation3 + $0x28] sm:$0xf] %vm1881_vm2, %v3378_v5  ;;  %1815 = vrot.lane.b32.xlu1 %v1736_v54, %s10365_s12  ;;  %v2763_v54 = vld [vmem:[#allocation2 + $0x78] sm:$0xf]  ;;  %v3196_v55 = vor.u32 %v3195_v31, %v11221_v25  ;;  %v3642_v59 = vrot.slane %v3519_v40, 5  ;;  %v9400_v60 = vrot.slane %v3520_v43, 9 }
 0x12a   : > { %3751 = vst.msk [vmem:[#allocation3 + $0x98] sm:$0xf] %vm224_vm0, %v3640_v58  ;;  %v3646_v45 = vrot.slane %v3521_v44, 5  ;;  %v308_v50 = vld [vmem:[%s10508_s9 + $0x70] sm:$0xf]  ;;  %v11242_v63 = vrot.slane %v3186_v28, 4 }
 0x12b   : > { %v1601_v14 = vpop.permute.xlu0 %1600  ;;  %v2629_v23 = vpop.permute.xlu1 %2628  ;;  %v3775_v56 = vld [vmem:[#allocation3 + $0x18] sm:$0xff]  ;;  %v1737_v62 = vld [vmem:[#allocation2 + $0x6c] sm:$0xf]  ;;  %v9386_v0 = vrot.slane %v11224_v39, 9  ;;  %v3649_v61 = vrot.slane %v3522_v52, 5  ;;  %v2571_v3 = vrot.slane %v11232_v57, 5  ;;  %v3643_v5 = vsel %vm10745_vm13, %v3641_v12, %v3642_v59 }
 0x12c   : > { %1693 = vst.msk [vmem:[#allocation3 + $0x30] sm:$0xf] %vm1688_vm1, %v1601_v14  ;;  %v309_v1 = vld [vmem:[%s10508_s9 + $0x74] sm:$0xf]  ;;  %v3647_v6 = vsel %vm10745_vm13, %v9400_v60, %v3646_v45  ;;  %v3648_v7 = vrot.slane %v3646_v45, 4  ;;  %v11253_v4 = vrot.slane %v3196_v55, 4  ;;  %v3192_v21 = vsel %vm10529_vm9, %v11242_v63, %v11221_v25 }
 0x12d   : > { %2650 = vrot.lane.b32.xlu0 %v2565_v10, %s10363_s10  ;;  %2719 = vst.msk [vmem:[#allocation3 + $0x40] sm:$0xf] %vm1348_vm14, %v2629_v23  ;;  %3401 = vrot.lane.b32.xlu1 %v3178_v16, %s10365_s12  ;;  %v1938_v9 = vld [vmem:[#allocation2 + $0x6c] sm:$0xf]  ;;  %v1939_v10 = vld [vmem:[#allocation2 + $0x70] sm:$0xf]  ;;  %v2572_v60 = vsel %vm10745_vm13, %v9386_v0, %v2571_v3 }
 0x12e   : > { %v2764_v11 = vld [vmem:[#allocation2 + $0x7c] sm:$0xf]  ;;  %v11255_v13 = vrot.slane %v3199_v38, 5  ;;  %3752 = vst.msk [vmem:[#allocation3 + $0xa4] sm:$0xf] %vm224_vm0, %v3643_v5  ;;  %v554_v14 = vshrl.u32 %v308_v50, 16  ;;  %v3650_v16 = vsel %vm10745_vm13, %v3648_v7, %v3649_v61 }
 0x12f   : > { %v2820_v35 = vpop.permute.xlu0 %2819  ;;  %v1603_v47 = vpop.permute.xlu1 %1602  ;;  %3753 = vst.msk [vmem:[#allocation3 + $0xb0] sm:$0xf] %vm224_vm0, %v3647_v6  ;;  %v557_v17 = vshll.u32 %v308_v50, 16  ;;  %v1940_v46 = vld [vmem:[#allocation2 + $0x74] sm:$0x1]  ;;  %v562_v18 = vshrl.u32 %v309_v1, 16 }
 0x130   : > { %2911 = vst.msk [vmem:[#allocation3 + $0x34] sm:$0xf] %vm1688_vm1, %v2820_v35  ;;  %v3777_v48 = vld [vmem:[#allocation3 + $0x24] sm:$0xff]  ;;  %1694 = vst.msk [vmem:[#allocation3 + $0x3c] sm:$0xf] %vm1688_vm1, %v1603_v47  ;;  %v565_v19 = vshll.u32 %v309_v1, 16  ;;  %v3202_v0 = vsel %vm10529_vm9, %v11253_v4, %v11255_v13 }
 0x131   : > { %v10176_v51 = vld [vmem:[#allocation3 + $0x1c] ss:$12 sps:$4 sm:$0xff]   ;;  %1624 = vrot.lane.b32.xlu0 %v1539_v24, %s10364_s17  ;;  %v9413_v53 = vcombine.low %v3775_v56, %v3777_v48  ;;  %2652 = vrot.lane.b32.xlu1 %v2568_v41, %s10363_s10  ;;  %v2155_v20 = vshrl.u32 %v1938_v9, 16  ;;  %3754 = vst.msk [vmem:[#allocation3 + $0xbc] sm:$0xf] %vm224_vm0, %v3650_v16  ;;  %v556_v23 = vrot.slane %v554_v14, 7 }
 0x132   : > { %4315 = vmatprep.mubr.bf16.mxu0 %v10176_v51  ;;  %v11260_v49 = vld [vmem:[#allocation2 + $0x80] sm:$0x1]  ;;  %v739_v24 = vld [vmem:[#allocation2 + $0xb4] sm:$0xf]  ;;  %v2158_v27 = vshll.u32 %v1938_v9, 16  ;;  %v2164_v31 = vshll.u32 %v1939_v10, 16 }
 0x133   : > { %v1794_v29 = vpop.permute.xlu0 %1793  ;;  %4316 = vmatmul.mubr.bf16.gmra.mxu0 %v9413_v53  ;;  %v2822_v2 = vpop.permute.xlu1 %2821  ;;  %v564_v33 = vrot.slane %v562_v18, 7  ;;  %v2157_v35 = vrot.slane %v2155_v20, 4  ;;  %v2168_v37 = vshrl.u32 %v1939_v10, 16  ;;  %v2174_v40 = vshll.u32 %v1940_v46, 16  ;;  %v743_v41 = vld [vmem:[#allocation2 + $0xbc] sm:$0x1] }
 0x134   : > { %1886 = vst.msk [vmem:[#allocation3 + $0x30] sm:$0xf] %vm1881_vm2, %v1794_v29  ;;  %v1738_v56 = vld [vmem:[#allocation2 + $0x70] sm:$0xf]  ;;  %v559_v8 = vor.u32 %v557_v17, %v556_v23  ;;  %v560_v28 = vrot.slane %v556_v23, 4  ;;  %v2160_v25 = vrot.slane %v2158_v27, 5 }
 0x135   : > { %2843 = vrot.lane.b32.xlu0 %v2763_v54, %s10364_s17  ;;  %2912 = vst.msk [vmem:[#allocation3 + $0x40] sm:$0xf] %vm1688_vm1, %v2822_v2  ;;  %1626 = vrot.lane.b32.xlu1 %v1542_v26, %s10364_s17  ;;  %v2166_v43 = vrot.slane %v2164_v31, 5  ;;  %v1408_v47 = vld [vmem:[#allocation2 + $0x6c] sm:$0xe]  ;;  %v567_v51 = vor.u32 %v565_v19, %v564_v33  ;;  %v569_v38 = vrot.slane %v564_v33, 4 }
 0x136   : > { %v2966_v48 = vld [vmem:[#allocation2 + $0x84] sm:$0xf]  ;;  %v2170_v52 = vrot.slane %v2168_v37, 4  ;;  %v2574_v53 = vrot.slane %v11260_v49, 5  ;;  %v1409_v54 = vld [vmem:[#allocation2 + $0x70] sm:$0xf]  ;;  %v740_v58 = vsel %vm10515_vm7, %v559_v8, %v739_v24  ;;  %v2161_v12 = vor.u32 %v2160_v25, %v2157_v35 }
 0x137   : > { %v3380_v15 = vpop.permute.xlu0 %3379  ;;  %v1796_v32 = vpop.permute.xlu1 %1795  ;;  %v2967_v55 = vld [vmem:[#allocation2 + $0x88] sm:$0xf]  ;;  %v2176_v29 = vrot.slane %v2174_v40, 5  ;;  %v10192_v45 = vld [vmem:[#allocation3 + $0x98] ss:$12 sps:$4 sm:$0xff]   ;;  %v568_v50 = vsel %vm10522_vm8, %v560_v28, %v567_v51  ;;  %v9370_v63 = vrot.slane %v1408_v47, 9 }
 0x138   : > { %3471 = vst.msk [vmem:[#allocation3 + $0x34] sm:$0xf] %vm1881_vm2, %v3380_v15  ;;  %1887 = vst.msk [vmem:[#allocation3 + $0x3c] sm:$0xf] %vm1881_vm2, %v1796_v32  ;;  %v2171_v26 = vor.u32 %v2170_v52, %v2166_v43  ;;  %v3204_v61 = vshrl.u32 %v2966_v48, 16  ;;  %v3207_v1 = vshll.u32 %v2966_v48, 16  ;;  %10049 = vmatprep.mubr.msk.bf16.mxu1 %vm4226_vm15, %v10192_v45 }
 0x139   : > { %1817 = vrot.lane.b32.xlu0 %v1737_v62, %s10365_s12  ;;  %2845 = vrot.lane.b32.xlu1 %v2764_v11, %s10364_s17  ;;  %741 = vst [vmem:[#allocation2 + $0xb4] sm:$0xf] %v740_v58  ;;  %v744_v62 = vsel %vm10537_vm10, %v569_v38, %v743_v41  ;;  %742 = vst.msk [vmem:[#allocation2 + $0xb8] sm:$0xf] %vm224_vm0, %v568_v50  ;;  %v2162_v39 = vrot.slane %v2161_v12, 4  ;;  %v2573_v5 = vrot.slane %v2571_v3, 4 }
 0x13a   : > { %745 = vst [vmem:[#allocation2 + $0xbc] sm:$0x1] %v744_v62  ;;  %v10193_v6 = vld [vmem:[#allocation3 + $0xb0] ss:$12 sps:$4 sm:$0xff]   ;;  %v2172_v7 = vrot.slane %v2171_v26, 4  ;;  %v1545_v9 = vrot.slane %v1409_v54, 5 }
 0x13b   : > { %v2631_v44 = vpop.permute.xlu0 %2630  ;;  %v3382_v59 = vpop.permute.xlu1 %3381  ;;  %v3213_v10 = vshll.u32 %v2967_v55, 16  ;;  %v3217_v11 = vshrl.u32 %v2967_v55, 16  ;;  %v2167_v14 = vsel %vm10529_vm9, %v2162_v39, %v2166_v43  ;;  %v1410_v4 = vld [vmem:[#allocation2 + $0x74] sm:$0x1]  ;;  %10050 = vmatmul.mubr.msk.bf16.gmra.mxu1 %vm4226_vm15, %v10193_v6  ;;  %v3206_v13 = vrot.slane %v3204_v61, 4 }
 0x13c   : > { %2720 = vst.msk [vmem:[#allocation3 + $0x4c] sm:$0xf] %vm1348_vm14, %v2631_v44  ;;  %v2177_v57 = vsel %vm10529_vm9, %v2172_v7, %v2176_v29  ;;  %v1546_v3 = vsel %vm10745_vm13, %v9370_v63, %v1545_v9  ;;  %v3209_v46 = vrot.slane %v3207_v1, 5  ;;  %v2575_v15 = vsel %vm10745_vm13, %v2573_v5, %v2574_v53  ;;  %v2968_v18 = vld [vmem:[#allocation2 + $0x8c] sm:$0x1] }
 0x13d   : > { %3403 = vrot.lane.b32.xlu0 %v3192_v21, %s10365_s12  ;;  %3472 = vst.msk [vmem:[#allocation3 + $0x40] sm:$0xf] %vm1881_vm2, %v3382_v59  ;;  %1819 = vrot.lane.b32.xlu1 %v1738_v56, %s10365_s12  ;;  %v1941_v19 = vld [vmem:[#allocation2 + $0x78] sm:$0xf]  ;;  %v1547_v20 = vrot.slane %v1545_v9, 4  ;;  %v1548_v21 = vrot.slane %v1410_v4, 5 }
 0x13e   : > { %2394 = vst.msk [vmem:[#allocation3 + $0xc4] sm:$0xf] %vm224_vm0, %v2167_v14  ;;  %2395 = vst.msk [vmem:[#allocation3 + $0xd0] sm:$0xf] %vm224_vm0, %v2177_v57  ;;  %v11314_v23 = vrot.slane %v3213_v10, 5  ;;  %v3219_v24 = vrot.slane %v3217_v11, 4  ;;  %v3210_v37 = vor.u32 %v3209_v46, %v3206_v13 }
 0x13f   : > { %v1605_v2 = vpop.permute.xlu0 %1604  ;;  %v2633_v17 = vpop.permute.xlu1 %2632  ;;  %v3779_v49 = vld [vmem:[#allocation3 + $0x30] sm:$0xff]  ;;  %v2765_v35 = vld [vmem:[#allocation2 + $0x84] sm:$0xf]  ;;  %v3223_v40 = vshll.u32 %v2968_v18, 16  ;;  %v2179_v56 = vshrl.u32 %v1941_v19, 16  ;;  %v2182_v28 = vshll.u32 %v1941_v19, 16  ;;  %v1549_v25 = vsel %vm10745_vm13, %v1547_v20, %v1548_v21 }
 0x140   : > { %1695 = vst.msk [vmem:[#allocation3 + $0x48] sm:$0xf] %vm1688_vm1, %v1605_v2  ;;  %v11318_v41 = vld [vmem:[#allocation2 + $0x88] sm:$0xf]  ;;  %v1739_v43 = vld [vmem:[#allocation2 + $0x78] sm:$0xf]  ;;  %v3220_v44 = vor.u32 %v3219_v24, %v11314_v23 }
 0x141   : > { %2654 = vrot.lane.b32.xlu0 %v2572_v60, %s10363_s10  ;;  %2721 = vst.msk [vmem:[#allocation3 + $0x58] sm:$0xf] %vm1348_vm14, %v2633_v17  ;;  %3405 = vrot.lane.b32.xlu1 %v3202_v0, %s10365_s12  ;;  %v11325_v47 = vld [vmem:[#allocation2 + $0x84] sm:$0xe]  ;;  %v11327_v48 = vld [vmem:[#allocation2 + $0x8c] sm:$0x1] }
 0x142   : > { %v1942_v51 = vld [vmem:[#allocation2 + $0x7c] sm:$0xf]  ;;  %v2578_v52 = vrot.slane %v11318_v41, 5  ;;  %v1943_v53 = vld [vmem:[#allocation2 + $0x80] sm:$0x1]  ;;  %v3211_v58 = vrot.slane %v3210_v37, 4 }
 0x143   : > { %v2824_v16 = vpop.permute.xlu0 %2823  ;;  %v1607_v27 = vpop.permute.xlu1 %1606  ;;  %v310_v54 = vld [vmem:[%s10508_s9 + $0x78] sm:$0xf]  ;;  %v2766_v55 = vld [vmem:[#allocation2 + $0x88] sm:$0xf]  ;;  %v11333_v12 = vrot.slane %v3223_v40, 5  ;;  %v2181_v59 = vrot.slane %v2179_v56, 4 }
 0x144   : > { %2913 = vst.msk [vmem:[#allocation3 + $0x4c] sm:$0xf] %vm1688_vm1, %v2824_v16  ;;  %v3781_v31 = vld [vmem:[#allocation3 + $0x3c] sm:$0xff]  ;;  %1696 = vst.msk [vmem:[#allocation3 + $0x54] sm:$0xf] %vm1688_vm1, %v1607_v27  ;;  %v9387_v45 = vrot.slane %v11325_v47, 9  ;;  %v3216_v17 = vsel %vm10529_vm9, %v3211_v58, %v11314_v23 }
 0x145   : > { %v10178_v32 = vld [vmem:[#allocation3 + $0x34] ss:$12 sps:$4 sm:$0xff]   ;;  %1628 = vrot.lane.b32.xlu0 %v1546_v3, %s10364_s17  ;;  %v9416_v33 = vcombine.low %v3779_v49, %v3781_v31  ;;  %2656 = vrot.lane.b32.xlu1 %v2575_v15, %s10363_s10  ;;  %v11339_v50 = vld [vmem:[#allocation2 + $0x7c] sm:$0xf]  ;;  %v2184_v26 = vrot.slane %v2182_v28, 5  ;;  %v2188_v62 = vshll.u32 %v1942_v51, 16 }
 0x146   : > { %4323 = vmatprep.mubr.bf16.mxu0 %v10178_v32  ;;  %v11335_v29 = vld [vmem:[#allocation2 + $0x78] sm:$0xe]  ;;  %v2192_v63 = vshrl.u32 %v1942_v51, 16  ;;  %v11342_v61 = vrot.slane %v3220_v44, 4  ;;  %v2581_v1 = vrot.slane %v11327_v48, 5  ;;  %v2198_v39 = vshll.u32 %v1943_v53, 16 }
 0x147   : > { %v1798_v8 = vpop.permute.xlu0 %1797  ;;  %4324 = vmatmul.mubr.bf16.gmra.mxu0 %v9416_v33  ;;  %v2826_v38 = vpop.permute.xlu1 %2825  ;;  %v571_v0 = vshrl.u32 %v310_v54, 16  ;;  %v311_v2 = vld [vmem:[%s10508_s9 + $0x7c] sm:$0xf]  ;;  %v2580_v6 = vrot.slane %v2578_v52, 4  ;;  %v11347_v7 = vld [vmem:[#allocation2 + $0x80] sm:$0x1]  ;;  %v2185_v9 = vor.u32 %v2184_v26, %v2181_v59  ;;  %v2579_v41 = vsel %vm10745_vm13, %v9387_v45, %v2578_v52 }
 0x148   : > { %1888 = vst.msk [vmem:[#allocation3 + $0x48] sm:$0xf] %vm1881_vm2, %v1798_v8  ;;  %v2190_v10 = vrot.slane %v2188_v62, 5  ;;  %v2194_v11 = vrot.slane %v2192_v63, 4  ;;  %v1740_v14 = vld [vmem:[#allocation2 + $0x7c] sm:$0xf]  ;;  %v3226_v44 = vsel %vm10529_vm9, %v11342_v61, %v11333_v12 }
 0x149   : > { %2847 = vrot.lane.b32.xlu0 %v2765_v35, %s10364_s17  ;;  %2914 = vst.msk [vmem:[#allocation3 + $0x58] sm:$0xf] %vm1688_vm1, %v2826_v38  ;;  %1630 = vrot.lane.b32.xlu1 %v1549_v25, %s10364_s17  ;;  %v9371_v4 = vrot.slane %v11335_v29, 9  ;;  %v2969_v57 = vld [vmem:[#allocation2 + $0x90] sm:$0xf]  ;;  %v573_v3 = vrot.slane %v571_v0, 7 }
 0x14a   : > { %v574_v13 = vshll.u32 %v310_v54, 16  ;;  %v2186_v15 = vrot.slane %v2185_v9, 4  ;;  %v2195_v49 = vor.u32 %v2194_v11, %v2190_v10  ;;  %v2200_v16 = vrot.slane %v2198_v39, 5  ;;  %v746_v18 = vld [vmem:[#allocation2 + $0xc0] sm:$0xf] }
 0x14b   : > { %v3384_v60 = vpop.permute.xlu0 %3383  ;;  %v1800_v5 = vpop.permute.xlu1 %1799  ;;  %v579_v19 = vshrl.u32 %v311_v2, 16  ;;  %v1552_v20 = vrot.slane %v11339_v50, 5  ;;  %v1555_v21 = vrot.slane %v11347_v7, 5  ;;  %v11358_v23 = vld [vmem:[#allocation2 + $0x94] sm:$0xf]  ;;  %v582_v27 = vshll.u32 %v311_v2, 16 }
 0x14c   : > { %3473 = vst.msk [vmem:[#allocation3 + $0x4c] sm:$0xf] %vm1881_vm2, %v3384_v60  ;;  %1889 = vst.msk [vmem:[#allocation3 + $0x54] sm:$0xf] %vm1881_vm2, %v1800_v5  ;;  %v576_v24 = vor.u32 %v574_v13, %v573_v3  ;;  %v2191_v32 = vsel %vm10529_vm9, %v2186_v15, %v2190_v10  ;;  %v2196_v33 = vrot.slane %v2195_v49, 4  ;;  %v577_v35 = vrot.slane %v573_v3, 4 }
 0x14d   : > { %1821 = vrot.lane.b32.xlu0 %v1739_v43, %s10365_s12  ;;  %2849 = vrot.lane.b32.xlu1 %v2766_v55, %s10364_s17  ;;  %v581_v37 = vrot.slane %v579_v19, 7  ;;  %v3523_v40 = vld [vmem:[#allocation2 + $0x78] sm:$0xe]  ;;  %v3228_v56 = vshrl.u32 %v2969_v57, 16  ;;  %v3231_v8 = vshll.u32 %v2969_v57, 16  ;;  %v2582_v54 = vsel %vm10745_vm13, %v2580_v6, %v2581_v1 }
 0x14e   : > { %2396 = vst.msk [vmem:[#allocation3 + $0xdc] sm:$0xf] %vm224_vm0, %v2191_v32  ;;  %v747_v28 = vsel %vm10515_vm7, %v576_v24, %v746_v18  ;;  %v750_v25 = vld [vmem:[#allocation2 + $0xc8] sm:$0x1]  ;;  %v3524_v43 = vld [vmem:[#allocation2 + $0x7c] sm:$0xf]  ;;  %v2201_v48 = vsel %vm10529_vm9, %v2196_v33, %v2200_v16  ;;  %v1553_v55 = vsel %vm10745_vm13, %v9371_v4, %v1552_v20 }
 0x14f   : > { %v2635_v46 = vpop.permute.xlu0 %2634  ;;  %v3386_v31 = vpop.permute.xlu1 %3385  ;;  %748 = vst [vmem:[#allocation2 + $0xc0] sm:$0xf] %v747_v28  ;;  %v584_v51 = vor.u32 %v582_v27, %v581_v37  ;;  %v586_v38 = vrot.slane %v581_v37, 4  ;;  %v3525_v52 = vld [vmem:[#allocation2 + $0x80] sm:$0x1]  ;;  %v3237_v58 = vshll.u32 %v11358_v23, 16 }
 0x150   : > { %2722 = vst.msk [vmem:[#allocation3 + $0x64] sm:$0xf] %vm1348_vm14, %v2635_v46  ;;  %v3526_v53 = vld [vmem:[#allocation2 + $0x84] sm:$0xe]  ;;  %v9401_v12 = vrot.slane %v3523_v40, 9  ;;  %v3241_v60 = vshrl.u32 %v11358_v23, 16 }
 0x151   : > { %3407 = vrot.lane.b32.xlu0 %v3216_v17, %s10365_s12  ;;  %3474 = vst.msk [vmem:[#allocation3 + $0x58] sm:$0xf] %vm1881_vm2, %v3386_v31  ;;  %1823 = vrot.lane.b32.xlu1 %v1740_v14, %s10365_s12  ;;  %v3527_v29 = vld [vmem:[#allocation2 + $0x88] sm:$0xf]  ;;  %v585_v45 = vsel %vm10522_vm8, %v577_v35, %v584_v51  ;;  %v751_v50 = vsel %vm10537_vm10, %v586_v38, %v750_v25  ;;  %v3653_v26 = vrot.slane %v3524_v43, 5  ;;  %v3230_v61 = vrot.slane %v3228_v56, 4 }
 0x152   : > { %2397 = vst.msk [vmem:[#allocation3 + $0xe8] sm:$0xf] %vm224_vm0, %v2201_v48  ;;  %v3528_v62 = vld [vmem:[#allocation2 + $0x8c] sm:$0x1]  ;;  %v1944_v63 = vld [vmem:[#allocation2 + $0x84] sm:$0xf] }
 0x153   : > { %v1609_v47 = vpop.permute.xlu0 %1608  ;;  %v2637_v59 = vpop.permute.xlu1 %2636  ;;  %v3233_v1 = vrot.slane %v3231_v8, 5  ;;  %749 = vst.msk [vmem:[#allocation2 + $0xc4] sm:$0xf] %vm224_vm0, %v585_v45  ;;  %752 = vst [vmem:[#allocation2 + $0xc8] sm:$0x1] %v751_v50  ;;  %v3656_v39 = vrot.slane %v3525_v52, 5  ;;  %v3654_v9 = vsel %vm10745_vm13, %v9401_v12, %v3653_v26 }
 0x154   : > { %1697 = vst.msk [vmem:[#allocation3 + $0x60] sm:$0xf] %vm1688_vm1, %v1609_v47  ;;  %v9402_v0 = vrot.slane %v3526_v53, 9  ;;  %v3783_v2 = vld [vmem:[#allocation3 + $0x48] sm:$0xff]  ;;  %v1554_v6 = vrot.slane %v1552_v20, 4  ;;  %v3655_v10 = vrot.slane %v3653_v26, 4 }
 0x155   : > { %2658 = vrot.lane.b32.xlu0 %v2579_v41, %s10363_s10  ;;  %2723 = vst.msk [vmem:[#allocation3 + $0x70] sm:$0xf] %vm1348_vm14, %v2637_v59  ;;  %3409 = vrot.lane.b32.xlu1 %v3226_v44, %s10365_s12  ;;  %v3660_v11 = vrot.slane %v3527_v29, 5  ;;  %v11395_v14 = vrot.slane %v3237_v58, 5  ;;  %v2971_v17 = vld [vmem:[#allocation2 + $0x98] sm:$0x1]  ;;  %v3234_v24 = vor.u32 %v3233_v1, %v3230_v61 }
 0x156   : > { %3755 = vst.msk [vmem:[#allocation3 + $0xc8] sm:$0xf] %vm224_vm0, %v3654_v9  ;;  %v3663_v4 = vrot.slane %v3528_v62, 5  ;;  %v2203_v57 = vshrl.u32 %v1944_v63, 16  ;;  %v2206_v3 = vshll.u32 %v1944_v63, 16  ;;  %v3243_v49 = vrot.slane %v3241_v60, 4 }
 0x157   : > { %v2828_v5 = vpop.permute.xlu0 %2827  ;;  %v1611_v13 = vpop.permute.xlu1 %1610  ;;  %v3657_v16 = vsel %vm10745_vm13, %v3655_v10, %v3656_v39  ;;  %v3661_v18 = vsel %vm10745_vm13, %v9402_v0, %v3660_v11  ;;  %v3662_v19 = vrot.slane %v3660_v11, 4  ;;  %v2767_v23 = vld [vmem:[#allocation2 + $0x90] sm:$0xf]  ;;  %v11406_v31 = vld [vmem:[#allocation2 + $0x94] sm:$0xf]  ;;  %v3247_v33 = vshll.u32 %v2971_v17, 16 }
 0x158   : > { %2915 = vst.msk [vmem:[#allocation3 + $0x64] sm:$0xf] %vm1688_vm1, %v2828_v5  ;;  %v3785_v46 = vld [vmem:[#allocation3 + $0x54] sm:$0xff]  ;;  %1698 = vst.msk [vmem:[#allocation3 + $0x6c] sm:$0xf] %vm1688_vm1, %v1611_v13  ;;  %v1556_v40 = vsel %vm10745_vm13, %v1554_v6, %v1555_v21  ;;  %v2205_v56 = vrot.slane %v2203_v57, 4  ;;  %v3244_v25 = vor.u32 %v3243_v49, %v11395_v14 }
 0x159   : > { %v10182_v15 = vld [vmem:[#allocation3 + $0x4c] ss:$12 sps:$4 sm:$0xff]   ;;  %1632 = vrot.lane.b32.xlu0 %v1553_v55, %s10364_s17  ;;  %v9419_v20 = vcombine.low %v3783_v2, %v3785_v46  ;;  %3756 = vst.msk [vmem:[#allocation3 + $0xd4] sm:$0xf] %vm224_vm0, %v3657_v16  ;;  %3757 = vst.msk [vmem:[#allocation3 + $0xe0] sm:$0xf] %vm224_vm0, %v3661_v18  ;;  %2660 = vrot.lane.b32.xlu1 %v2582_v54, %s10363_s10  ;;  %v3664_v35 = vsel %vm10745_vm13, %v3662_v19, %v3663_v4 }
 0x15a   : > { %v11404_v27 = vld [vmem:[#allocation2 + $0x90] sm:$0xe]  ;;  %4331 = vmatprep.mubr.bf16.mxu0 %v10182_v15  ;;  %v1945_v37 = vld [vmem:[#allocation2 + $0x88] sm:$0xf]  ;;  %v11418_v41 = vld [vmem:[#allocation2 + $0x98] sm:$0x1] }
 0x15b   : > { %v1802_v32 = vpop.permute.xlu0 %1801  ;;  %4332 = vmatmul.mubr.bf16.gmra.mxu0 %v9419_v20  ;;  %3758 = vst.msk [vmem:[#allocation3 + $0xec] sm:$0xf] %vm224_vm0, %v3664_v35  ;;  %v2208_v8 = vrot.slane %v2206_v3, 5  ;;  %v2830_v28 = vpop.permute.xlu1 %2829  ;;  %v9388_v43 = vrot.slane %v11404_v27, 9  ;;  %v2585_v7 = vrot.slane %v11406_v31, 5  ;;  %v3235_v51 = vrot.slane %v3234_v24, 4 }
 0x15c   : > { %1890 = vst.msk [vmem:[#allocation3 + $0x60] sm:$0xf] %vm1881_vm2, %v1802_v32  ;;  %v11425_v44 = vld [vmem:[#allocation2 + $0x84] sm:$0xe]  ;;  %v2972_v21 = vld [vmem:[#allocation2 + $0x9c] sm:$0xf] }
 0x15d   : > { %2851 = vrot.lane.b32.xlu0 %v2767_v23, %s10364_s17  ;;  %2916 = vst.msk [vmem:[#allocation3 + $0x70] sm:$0xf] %vm1688_vm1, %v2830_v28  ;;  %v2768_v47 = vld [vmem:[#allocation2 + $0x94] sm:$0xf]  ;;  %v1741_v48 = vld [vmem:[#allocation2 + $0x84] sm:$0xf]  ;;  %v2209_v38 = vor.u32 %v2208_v8, %v2205_v56  ;;  %1634 = vrot.lane.b32.xlu1 %v1556_v40, %s10364_s17  ;;  %v3240_v39 = vsel %vm10529_vm9, %v3235_v51, %v11395_v14 }
 0x15e   : > { %v2212_v52 = vshll.u32 %v1945_v37, 16  ;;  %v2216_v53 = vshrl.u32 %v1945_v37, 16  ;;  %v11429_v55 = vrot.slane %v3247_v33, 5  ;;  %v2588_v58 = vrot.slane %v11418_v41, 5  ;;  %v1415_v12 = vld [vmem:[#allocation2 + $0x88] sm:$0xf] }
 0x15f   : > { %v3388_v54 = vpop.permute.xlu0 %3387  ;;  %v9372_v29 = vrot.slane %v11425_v44, 9  ;;  %v11434_v59 = vld [vmem:[#allocation2 + $0x8c] sm:$0x1]  ;;  %v3252_v60 = vshrl.u32 %v2972_v21, 16  ;;  %v3255_v45 = vshll.u32 %v2972_v21, 16  ;;  %v2210_v50 = vrot.slane %v2209_v38, 4  ;;  %v1804_v62 = vpop.permute.xlu1 %1803 }
 0x160   : > { %3475 = vst.msk [vmem:[#allocation3 + $0x64] sm:$0xf] %vm1881_vm2, %v3388_v54  ;;  %v1946_v26 = vld [vmem:[#allocation2 + $0x8c] sm:$0x1]  ;;  %v11437_v63 = vrot.slane %v3244_v25, 4  ;;  %v2587_v61 = vrot.slane %v2585_v7, 4  ;;  %v2586_v19 = vsel %vm10745_vm13, %v9388_v43, %v2585_v7 }
 0x161   : > { %1825 = vrot.lane.b32.xlu0 %v1741_v48, %s10365_s12  ;;  %v10199_v1 = vld [vmem:[#allocation3 + $0xc8] ss:$12 sps:$4 sm:$0xff]   ;;  %1891 = vst.msk [vmem:[#allocation3 + $0x6c] sm:$0xf] %vm1881_vm2, %v1804_v62  ;;  %v2214_v2 = vrot.slane %v2212_v52, 5  ;;  %v2218_v5 = vrot.slane %v2216_v53, 4  ;;  %2853 = vrot.lane.b32.xlu1 %v2768_v47, %s10364_s17 }
 0x162   : > { %v2973_v0 = vld [vmem:[#allocation2 + $0xa0] sm:$0xf]  ;;  %v1559_v9 = vrot.slane %v1415_v12, 5  ;;  %10053 = vmatprep.mubr.msk.bf16.mxu1 %vm4226_vm15, %v10199_v1  ;;  %v10200_v10 = vld [vmem:[#allocation3 + $0xe0] ss:$12 sps:$4 sm:$0xff]   ;;  %v2222_v11 = vshll.u32 %v1946_v26, 16  ;;  %v2589_v20 = vsel %vm10745_vm13, %v2587_v61, %v2588_v58  ;;  %v3250_v32 = vsel %vm10529_vm9, %v11437_v63, %v11429_v55 }
 0x163   : > { %v2639_v6 = vpop.permute.xlu0 %2638  ;;  %v1742_v17 = vld [vmem:[#allocation2 + $0x88] sm:$0xf]  ;;  %v3254_v4 = vrot.slane %v3252_v60, 4  ;;  %v3257_v57 = vrot.slane %v3255_v45, 5  ;;  %v11446_v3 = vld [vmem:[#allocation2 + $0x90] sm:$0xe]  ;;  %v2215_v14 = vsel %vm10529_vm9, %v2210_v50, %v2214_v2  ;;  %v2219_v13 = vor.u32 %v2218_v5, %v2214_v2  ;;  %v3390_v46 = vpop.permute.xlu1 %3389  ;;  %10054 = vmatmul.mubr.msk.bf16.gmra.mxu1 %vm4226_vm15, %v10200_v10 }
 0x164   : > { %2724 = vst.msk [vmem:[#allocation3 + $0x7c] sm:$0xf] %vm1348_vm14, %v2639_v6  ;;  %v1562_v15 = vrot.slane %v11434_v59, 5  ;;  %v2974_v49 = vld [vmem:[#allocation2 + $0xa4] sm:$0x1]  ;;  %v2224_v18 = vrot.slane %v2222_v11, 5  ;;  %v1560_v35 = vsel %vm10745_vm13, %v9372_v29, %v1559_v9 }
 0x165   : > { %3411 = vrot.lane.b32.xlu0 %v3240_v39, %s10365_s12  ;;  %v11452_v16 = vld [vmem:[#allocation2 + $0x94] sm:$0xf]  ;;  %2398 = vst.msk [vmem:[#allocation3 + $0xf4] sm:$0xf] %vm224_vm0, %v2215_v14  ;;  %v3261_v23 = vshll.u32 %v2973_v0, 16  ;;  %v2220_v31 = vrot.slane %v2219_v13, 4  ;;  %1827 = vrot.lane.b32.xlu1 %v1742_v17, %s10365_s12  ;;  %v3258_v56 = vor.u32 %v3257_v57, %v3254_v4 }
 0x166   : > { %3476 = vst.msk [vmem:[#allocation3 + $0x70] sm:$0xf] %vm1881_vm2, %v3390_v46  ;;  %v11461_v24 = vld [vmem:[#allocation2 + $0x9c] sm:$0xe]  ;;  %v11463_v27 = vld [vmem:[#allocation2 + $0x98] sm:$0x1] }
 0x167   : > { %v1613_v33 = vpop.permute.xlu0 %1612  ;;  %v1561_v37 = vrot.slane %v1559_v9, 4  ;;  %v3265_v40 = vshrl.u32 %v2973_v0, 16  ;;  %v11472_v41 = vld [vmem:[#allocation2 + $0xa0] sm:$0xf]  ;;  %v3271_v8 = vshll.u32 %v2974_v49, 16  ;;  %v9373_v28 = vrot.slane %v11446_v3, 9  ;;  %v2641_v7 = vpop.permute.xlu1 %2640 }
 0x168   : > { %1699 = vst.msk [vmem:[#allocation3 + $0x78] sm:$0xf] %vm1688_vm1, %v1613_v33  ;;  %v2225_v25 = vsel %vm10529_vm9, %v2220_v31, %v2224_v18  ;;  %v1947_v43 = vld [vmem:[#allocation2 + $0x90] sm:$0xf]  ;;  %v9389_v44 = vrot.slane %v11461_v24, 9  ;;  %v1566_v21 = vrot.slane %v11452_v16, 5 }
 0x169   : > { %2662 = vrot.lane.b32.xlu0 %v2586_v19, %s10363_s10  ;;  %v1569_v47 = vrot.slane %v11463_v27, 5  ;;  %2399 = vst.msk [vmem:[#allocation3 + $0x100] sm:$0xf] %vm224_vm0, %v2225_v25  ;;  %v1948_v48 = vld [vmem:[#allocation2 + $0x94] sm:$0xf]  ;;  %v2227_v51 = vshrl.u32 %v1947_v43, 16  ;;  %3413 = vrot.lane.b32.xlu1 %v3250_v32, %s10365_s12  ;;  %v1563_v13 = vsel %vm10745_vm13, %v1561_v37, %v1562_v15 }
 0x16a   : > { %2725 = vst.msk [vmem:[#allocation3 + $0x88] sm:$0xf] %vm1348_vm14, %v2641_v7  ;;  %v11484_v38 = vrot.slane %v3261_v23, 5  ;;  %v2592_v52 = vrot.slane %v11472_v41, 5  ;;  %v2230_v53 = vshll.u32 %v1947_v43, 16  ;;  %v2236_v54 = vshll.u32 %v1948_v48, 16 }
 0x16b   : > { %v1949_v55 = vld [vmem:[#allocation2 + $0x98] sm:$0x1]  ;;  %v2832_v12 = vpop.permute.xlu0 %2831  ;;  %v11488_v29 = vrot.slane %v3265_v40, 4  ;;  %v2229_v60 = vrot.slane %v2227_v51, 4  ;;  %v2240_v45 = vshrl.u32 %v1948_v48, 16  ;;  %v11491_v62 = vrot.slane %v3258_v56, 4  ;;  %v1615_v0 = vpop.permute.xlu1 %1614 }
 0x16c   : > { %v3787_v58 = vld [vmem:[#allocation3 + $0x60] sm:$0xff]  ;;  %v2246_v50 = vshll.u32 %v1949_v55, 16  ;;  %2917 = vst.msk [vmem:[#allocation3 + $0x7c] sm:$0xf] %vm1688_vm1, %v2832_v12  ;;  %v11493_v63 = vrot.slane %v3271_v8, 5  ;;  %v2232_v61 = vrot.slane %v2230_v53, 5 }
 0x16d   : > { %v2769_v26 = vld [vmem:[#allocation2 + $0x9c] sm:$0xf]  ;;  %v2238_v1 = vrot.slane %v2236_v54, 5  ;;  %v3529_v39 = vld [vmem:[#allocation2 + $0x90] sm:$0xe]  ;;  %v3789_v2 = vld [vmem:[#allocation3 + $0x6c] sm:$0xff]  ;;  %1636 = vrot.lane.b32.xlu0 %v1560_v35, %s10364_s17  ;;  %2664 = vrot.lane.b32.xlu1 %v2589_v20, %s10363_s10  ;;  %v3268_v12 = vor.u32 %v11488_v29, %v11484_v38 }
 0x16e   : > { %v10184_v5 = vld [vmem:[#allocation3 + $0x64] ss:$12 sps:$4 sm:$0xff]   ;;  %v2242_v9 = vrot.slane %v2240_v45, 4  ;;  %1700 = vst.msk [vmem:[#allocation3 + $0x84] sm:$0xf] %vm1688_vm1, %v1615_v0  ;;  %v9422_v10 = vcombine.low %v3787_v58, %v3789_v2  ;;  %v2233_v11 = vor.u32 %v2232_v61, %v2229_v60  ;;  %v2248_v17 = vrot.slane %v2246_v50, 5 }
 0x16f   : > { %v11496_v6 = vld [vmem:[#allocation2 + $0xa8] sm:$0xf]  ;;  %v3530_v4 = vld [vmem:[#allocation2 + $0x94] sm:$0xf]  ;;  %v3531_v57 = vld [vmem:[#allocation2 + $0x98] sm:$0x1]  ;;  %4339 = vmatprep.mubr.bf16.mxu0 %v10184_v5  ;;  %v1806_v46 = vpop.permute.xlu0 %1805  ;;  %v2834_v59 = vpop.permute.xlu1 %2833  ;;  %v3264_v61 = vsel %vm10529_vm9, %v11491_v62, %v11484_v38  ;;  %v2593_v62 = vsel %vm10745_vm13, %v9389_v44, %v2592_v52 }
 0x170   : > { %v9403_v14 = vrot.slane %v3529_v39, 9  ;;  %v2243_v49 = vor.u32 %v2242_v9, %v2238_v1  ;;  %v3667_v18 = vrot.slane %v3530_v4, 5  ;;  %v3670_v19 = vrot.slane %v3531_v57, 5  ;;  %v3532_v23 = vld [vmem:[#allocation2 + $0x9c] sm:$0xe]  ;;  %4340 = vmatmul.mubr.bf16.gmra.mxu0 %v9422_v10 }
 0x171   : > { %v3533_v31 = vld [vmem:[#allocation2 + $0xa0] sm:$0xf]  ;;  %1892 = vst.msk [vmem:[#allocation3 + $0x78] sm:$0xf] %vm1881_vm2, %v1806_v46  ;;  %v1743_v32 = vld [vmem:[#allocation2 + $0x90] sm:$0xf]  ;;  %2855 = vrot.lane.b32.xlu0 %v2769_v26, %s10364_s17  ;;  %1638 = vrot.lane.b32.xlu1 %v1563_v13, %s10364_s17 }
 0x172   : > { %v3276_v33 = vshrl.u32 %v11496_v6, 16  ;;  %v2234_v35 = vrot.slane %v2233_v11, 4  ;;  %v3534_v20 = vld [vmem:[#allocation2 + $0xa4] sm:$0x1]  ;;  %v9404_v40 = vrot.slane %v3532_v23, 9  ;;  %v3674_v56 = vrot.slane %v3533_v31, 5 }
 0x173   : > { %v11507_v15 = vld [vmem:[#allocation2 + $0xa4] sm:$0x1]  ;;  %v2244_v37 = vrot.slane %v2243_v49, 4  ;;  %v3668_v8 = vsel %vm10745_vm13, %v9403_v14, %v3667_v18  ;;  %v3669_v25 = vrot.slane %v3667_v18, 4  ;;  %v3677_v43 = vrot.slane %v3534_v20, 5  ;;  %v3392_v58 = vpop.permute.xlu0 %3391  ;;  %v1808_v29 = vpop.permute.xlu1 %1807 }
 0x174   : > { %2918 = vst.msk [vmem:[#allocation3 + $0x88] sm:$0xf] %vm1688_vm1, %v2834_v59  ;;  %v2770_v7 = vld [vmem:[#allocation2 + $0xa0] sm:$0xf]  ;;  %v3279_v48 = vshll.u32 %v11496_v6, 16  ;;  %v2239_v53 = vsel %vm10529_vm9, %v2234_v35, %v2238_v1  ;;  %v3675_v54 = vsel %vm10745_vm13, %v9404_v40, %v3674_v56  ;;  %v3676_v55 = vrot.slane %v3674_v56, 4 }
 0x175   : > { %v11513_v51 = vld [vmem:[#allocation2 + $0x9c] sm:$0xf]  ;;  %3759 = vst.msk [vmem:[#allocation3 + $0xf8] sm:$0xf] %vm224_vm0, %v3668_v8  ;;  %2400 = vst.msk [vmem:[#allocation3 + $0x10c] sm:$0xf] %vm224_vm0, %v2239_v53  ;;  %v2249_v60 = vsel %vm10529_vm9, %v2244_v37, %v2248_v17  ;;  %v3671_v45 = vsel %vm10745_vm13, %v3669_v25, %v3670_v19  ;;  %1829 = vrot.lane.b32.xlu0 %v1743_v32, %s10365_s12  ;;  %2857 = vrot.lane.b32.xlu1 %v2770_v7, %s10364_s17 }
 0x176   : > { %3761 = vst.msk [vmem:[#allocation3 + $0x110] sm:$0xf] %vm224_vm0, %v3675_v54  ;;  %2401 = vst.msk [vmem:[#allocation3 + $0x118] sm:$0xf] %vm224_vm0, %v2249_v60  ;;  %v3678_v50 = vsel %vm10745_vm13, %v3676_v55, %v3677_v43  ;;  %v1744_v26 = vld [vmem:[#allocation2 + $0x94] sm:$0xf] }
 0x177   : > { %3477 = vst.msk [vmem:[#allocation3 + $0x7c] sm:$0xf] %vm1881_vm2, %v3392_v58  ;;  %1893 = vst.msk [vmem:[#allocation3 + $0x84] sm:$0xf] %vm1881_vm2, %v1808_v29  ;;  %v2594_v1 = vrot.slane %v2592_v52, 4  ;;  %v2595_v39 = vrot.slane %v11507_v15, 5  ;;  %v2643_v0 = vpop.permute.xlu0 %2642  ;;  %v3394_v38 = vpop.permute.xlu1 %3393 }
 0x178   : > { %3760 = vst.msk [vmem:[#allocation3 + $0x104] sm:$0xf] %vm224_vm0, %v3671_v45  ;;  %3762 = vst.msk [vmem:[#allocation3 + $0x11c] sm:$0xf] %vm224_vm0, %v3678_v50  ;;  %v3269_v2 = vrot.slane %v3268_v12, 4  ;;  %v11545_v5 = vrot.slane %v3276_v33, 4 }
 0x179   : > { %v11547_v6 = vrot.slane %v3279_v48, 5  ;;  %v1181_v9 = vshrl.u32 %v11513_v51, 16  ;;  %2726 = vst.msk [vmem:[#allocation3 + $0x94] sm:$0xf] %vm1348_vm14, %v2643_v0  ;;  %v2976_v10 = vld [vmem:[#allocation2 + $0xac] sm:$0xf]  ;;  %3415 = vrot.lane.b32.xlu0 %v3264_v61, %s10365_s12  ;;  %1831 = vrot.lane.b32.xlu1 %v1744_v26, %s10365_s12  ;;  %v2596_v3 = vsel %vm10745_vm13, %v2594_v1, %v2595_v39 }
 0x17a   : > { %v11551_v11 = vld [vmem:[#allocation2 + $0xa0] sm:$0xf]  ;;  %v1950_v17 = vld [vmem:[#allocation2 + $0x9c] sm:$0xf]  ;;  %v1952_v57 = vld [vmem:[#allocation2 + $0xa4] sm:$0x1]  ;;  %v3274_v41 = vsel %vm10529_vm9, %v3269_v2, %v11493_v63  ;;  %v1567_v63 = vsel %vm10745_vm13, %v9373_v28, %v1566_v21 }
 0x17b   : > { %v1951_v4 = vld [vmem:[#allocation2 + $0xa0] sm:$0xf]  ;;  %3478 = vst.msk [vmem:[#allocation3 + $0x88] sm:$0xf] %vm1881_vm2, %v3394_v38  ;;  %v2251_v14 = vshrl.u32 %v1950_v17, 16  ;;  %v2254_v13 = vshll.u32 %v1950_v17, 16  ;;  %v1617_v18 = vpop.permute.xlu0 %1616  ;;  %v2645_v33 = vpop.permute.xlu1 %2644  ;;  %v3282_v12 = vor.u32 %v11547_v6, %v11545_v5 }
 0x17c   : > { %v2260_v46 = vshll.u32 %v1951_v4, 16  ;;  %v2264_v49 = vshrl.u32 %v1951_v4, 16  ;;  %v1184_v24 = vshll.u32 %v11513_v51, 16  ;;  %v2270_v19 = vshll.u32 %v1952_v57, 16  ;;  %1701 = vst.msk [vmem:[#allocation3 + $0x90] sm:$0xf] %vm1688_vm1, %v1617_v18 }
 0x17d   : > { %v2253_v52 = vrot.slane %v2251_v14, 4  ;;  %v2256_v23 = vrot.slane %v2254_v13, 5  ;;  %2666 = vrot.lane.b32.xlu0 %v2593_v62, %s10363_s10  ;;  %v3285_v35 = vshll.u32 %v2976_v10, 16  ;;  %v1190_v20 = vshll.u32 %v11551_v11, 16  ;;  %2727 = vst.msk [vmem:[#allocation3 + $0xa0] sm:$0xf] %vm1348_vm14, %v2645_v33  ;;  %3417 = vrot.lane.b32.xlu1 %v3274_v41, %s10365_s12 }
 0x17e   : > { %v2262_v31 = vrot.slane %v2260_v46, 5  ;;  %v2266_v32 = vrot.slane %v2264_v49, 4  ;;  %v3289_v56 = vshrl.u32 %v2976_v10, 16  ;;  %v2272_v37 = vrot.slane %v2270_v19, 5  ;;  %v3791_v8 = vld [vmem:[#allocation3 + $0x78] sm:$0xff] }
 0x17f   : > { %v10206_v44 = vld [vmem:[#allocation3 + $0xf8] ss:$12 sps:$4 sm:$0xff]   ;;  %v10207_v40 = vld [vmem:[#allocation3 + $0x110] ss:$12 sps:$4 sm:$0xff]   ;;  %v2257_v59 = vor.u32 %v2256_v23, %v2253_v52  ;;  %v2836_v25 = vpop.permute.xlu0 %2835  ;;  %v1568_v28 = vrot.slane %v1566_v21, 4  ;;  %v1183_v7 = vrot.slane %v1181_v9, 4  ;;  %v1619_v54 = vpop.permute.xlu1 %1618 }
 0x180   : > { %10057 = vmatprep.mubr.msk.bf16.mxu1 %vm4226_vm15, %v10206_v44  ;;  %v2267_v15 = vor.u32 %v2266_v32, %v2262_v31  ;;  %2919 = vst.msk [vmem:[#allocation3 + $0x94] sm:$0xf] %vm1688_vm1, %v2836_v25  ;;  %v2771_v43 = vld [vmem:[#allocation2 + $0xa8] sm:$0xf]  ;;  %v1194_v48 = vshrl.u32 %v11551_v11, 16  ;;  %v3287_v16 = vrot.slane %v3285_v35, 5 }
 0x181   : > { %10058 = vmatmul.mubr.msk.bf16.gmra.mxu1 %vm4226_vm15, %v10207_v40  ;;  %v2258_v51 = vrot.slane %v2257_v59, 4  ;;  %1640 = vrot.lane.b32.xlu0 %v1567_v63, %s10364_s17  ;;  %v1186_v21 = vrot.slane %v1184_v24, 5  ;;  %v11588_v60 = vrot.slane %v1190_v20, 5  ;;  %1702 = vst.msk [vmem:[#allocation3 + $0x9c] sm:$0xf] %vm1688_vm1, %v1619_v54  ;;  %v3291_v50 = vrot.slane %v3289_v56, 4 }
 0x182   : > { %v2268_v53 = vrot.slane %v2267_v15, 4  ;;  %v3793_v55 = vld [vmem:[#allocation3 + $0x84] sm:$0xff]  ;;  %2668 = vrot.lane.b32.xlu1 %v2596_v3, %s10363_s10  ;;  %v1570_v1 = vsel %vm10745_vm13, %v1568_v28, %v1569_v47  ;;  %v2977_v2 = vld [vmem:[#allocation2 + $0xb0] sm:$0x1]  ;;  %v3283_v5 = vrot.slane %v3282_v12, 4  ;;  %v1196_v10 = vrot.slane %v1194_v48, 4 }
 0x183   : > { %v10188_v58 = vld [vmem:[#allocation3 + $0x7c] ss:$12 sps:$4 sm:$0xff]   ;;  %v9425_v45 = vcombine.low %v3791_v8, %v3793_v55  ;;  %v2263_v29 = vsel %vm10529_vm9, %v2258_v51, %v2262_v31  ;;  %v1810_v61 = vpop.permute.xlu0 %1809  ;;  %v1745_v39 = vld [vmem:[#allocation2 + $0x9c] sm:$0xf]  ;;  %v2838_v0 = vpop.permute.xlu1 %2837  ;;  %v1187_v6 = vor.u32 %v1186_v21, %v1183_v7  ;;  %v858_v9 = vld [vmem:[#allocation2 + $0xa4] sm:$0x1]  ;;  %v3292_v47 = vor.u32 %v3291_v50, %v3287_v16 }
 0x184   : > { %v2273_v26 = vsel %vm10529_vm9, %v2268_v53, %v2272_v37  ;;  %4347 = vmatprep.mubr.bf16.mxu0 %v10188_v58  ;;  %2402 = vst.msk [vmem:[#allocation3 + $0x124] sm:$0xf] %vm224_vm0, %v2263_v29  ;;  %v2772_v27 = vld [vmem:[#allocation2 + $0xac] sm:$0xf]  ;;  %v3295_v38 = vshll.u32 %v2977_v2, 16  ;;  %v3288_v17 = vsel %vm10529_vm9, %v3283_v5, %v3287_v16  ;;  %v1197_v14 = vor.u32 %v1196_v10, %v11588_v60 }
 0x185   : > { %2403 = vst.msk [vmem:[#allocation3 + $0x130] sm:$0xf] %vm224_vm0, %v2273_v26  ;;  %4348 = vmatmul.mubr.bf16.gmra.mxu0 %v9425_v45  ;;  %2859 = vrot.lane.b32.xlu0 %v2771_v43, %s10364_s17  ;;  %v1188_v4 = vrot.slane %v1187_v6, 4  ;;  %v1200_v13 = vshll.u32 %v858_v9, 16  ;;  %v2449_v46 = vld [vmem:[#allocation2 + $0xa8] sm:$0xe] }
 0x186   : > { %1894 = vst.msk [vmem:[#allocation3 + $0x90] sm:$0xf] %vm1881_vm2, %v1810_v61  ;;  %1642 = vrot.lane.b32.xlu1 %v1570_v1, %s10364_s17  ;;  %v1746_v49 = vld [vmem:[#allocation2 + $0xa0] sm:$0xf]  ;;  %v3293_v41 = vrot.slane %v3292_v47, 4  ;;  %v3297_v18 = vrot.slane %v3295_v38, 5 }
 0x187   : > { %2920 = vst.msk [vmem:[#allocation3 + $0xa0] sm:$0xf] %vm1688_vm1, %v2838_v0  ;;  %v3396_v11 = vpop.permute.xlu0 %3395  ;;  %v1812_v62 = vpop.permute.xlu1 %1811  ;;  %v2450_v24 = vld [vmem:[#allocation2 + $0xac] sm:$0xf]  ;;  %v1421_v44 = vld [vmem:[#allocation2 + $0xa0] sm:$0xf]  ;;  %v1193_v31 = vsel %vm10529_vm9, %v1188_v4, %v11588_v60 }
 0x188   : > { %3479 = vst.msk [vmem:[#allocation3 + $0x94] sm:$0xf] %vm1881_vm2, %v3396_v11  ;;  %1895 = vst.msk [vmem:[#allocation3 + $0x9c] sm:$0xf] %vm1881_vm2, %v1812_v62  ;;  %v779_v52 = vld [vmem:[#allocation2 + $0x9c] sm:$0xf]  ;;  %v3298_v59 = vsel %vm10529_vm9, %v3293_v41, %v3297_v18 }
 0x189   : > { %1833 = vrot.lane.b32.xlu0 %v1745_v39, %s10365_s12  ;;  %v780_v23 = vld [vmem:[#allocation2 + $0xa0] sm:$0xf]  ;;  %v9390_v32 = vrot.slane %v2449_v46, 9  ;;  %v2978_v33 = vld [vmem:[#allocation2 + $0xb4] sm:$0xf]  ;;  %v1198_v35 = vrot.slane %v1197_v14, 4 }
 0x18a   : > { %2861 = vrot.lane.b32.xlu1 %v2772_v27, %s10364_s17  ;;  %811 = vst.msk [vmem:[#allocation3 + $0x138] sm:$0xf] %vm224_vm0, %v779_v52  ;;  %812 = vst.msk [vmem:[#allocation3 + $0x144] sm:$0xf] %vm224_vm0, %v780_v23  ;;  %v1202_v20 = vrot.slane %v1200_v13, 5  ;;  %v2599_v40 = vrot.slane %v2450_v24, 5 }
 0x18b   : > { %v2647_v57 = vpop.permute.xlu0 %2646  ;;  %v3398_v19 = vpop.permute.xlu1 %3397  ;;  %v1420_v56 = vld [vmem:[#allocation2 + $0x9c] sm:$0xe]  ;;  %v2451_v15 = vld [vmem:[#allocation2 + $0xb0] sm:$0x1]  ;;  %v1573_v37 = vrot.slane %v1421_v44, 5  ;;  %v3300_v25 = vshrl.u32 %v2978_v33, 16 }
 0x18c   : > { %2728 = vst.msk [vmem:[#allocation3 + $0xac] sm:$0xf] %vm1348_vm14, %v2647_v57  ;;  %v1422_v8 = vld [vmem:[#allocation2 + $0xa4] sm:$0x1]  ;;  %v3303_v28 = vshll.u32 %v2978_v33, 16  ;;  %v2600_v7 = vsel %vm10745_vm13, %v9390_v32, %v2599_v40  ;;  %v9374_v48 = vrot.slane %v1420_v56, 9  ;;  %v1203_v53 = vsel %vm10529_vm9, %v1198_v35, %v1202_v20 }
 0x18d   : > { %3419 = vrot.lane.b32.xlu0 %v3288_v17, %s10365_s12  ;;  %3480 = vst.msk [vmem:[#allocation3 + $0xa0] sm:$0xf] %vm1881_vm2, %v3398_v19  ;;  %v859_v43 = vld [vmem:[#allocation2 + $0xa8] sm:$0xf]  ;;  %v860_v51 = vld [vmem:[#allocation2 + $0xac] sm:$0xf] }
 0x18e   : > { %1835 = vrot.lane.b32.xlu1 %v1746_v49, %s10365_s12  ;;  %v2601_v58 = vrot.slane %v2599_v40, 4  ;;  %v2602_v12 = vrot.slane %v2451_v15, 5  ;;  %v1575_v16 = vrot.slane %v1573_v37, 4  ;;  %v1576_v21 = vrot.slane %v1422_v8, 5  ;;  %v2979_v60 = vld [vmem:[#allocation2 + $0xb8] sm:$0xf] }
 0x18f   : > { %v1621_v63 = vpop.permute.xlu0 %1620  ;;  %v2649_v3 = vpop.permute.xlu1 %2648  ;;  %v3795_v54 = vld [vmem:[#allocation3 + $0x90] sm:$0xff]  ;;  %v1205_v45 = vshrl.u32 %v859_v43, 16  ;;  %v1208_v50 = vshll.u32 %v859_v43, 16  ;;  %v3302_v1 = vrot.slane %v3300_v25, 4  ;;  %v3305_v39 = vrot.slane %v3303_v28, 5 }
 0x190   : > { %1703 = vst.msk [vmem:[#allocation3 + $0xa8] sm:$0xf] %vm1688_vm1, %v1621_v63  ;;  %v1214_v0 = vshll.u32 %v860_v51, 16  ;;  %v1574_v5 = vsel %vm10745_vm13, %v9374_v48, %v1573_v37  ;;  %v3309_v9 = vshll.u32 %v2979_v60, 16  ;;  %v3313_v10 = vshrl.u32 %v2979_v60, 16 }
 0x191   : > { %1304 = vrot.lane.b32.xlu0 %v1193_v31, %s10363_s10  ;;  %2729 = vst.msk [vmem:[#allocation3 + $0xb8] sm:$0xf] %vm1348_vm14, %v2649_v3  ;;  %v1218_v11 = vshrl.u32 %v860_v51, 16  ;;  %v2603_v27 = vsel %vm10745_vm13, %v2601_v58, %v2602_v12  ;;  %v11641_v47 = vld [vmem:[#allocation2 + $0xbc] sm:$0x1]  ;;  %v1207_v38 = vrot.slane %v1205_v45, 4  ;;  %v1577_v17 = vsel %vm10745_vm13, %v1575_v16, %v1576_v21 }
 0x192   : > { %3421 = vrot.lane.b32.xlu1 %v3298_v59, %s10365_s12  ;;  %v3306_v4 = vor.u32 %v3305_v39, %v3302_v1  ;;  %v1210_v57 = vrot.slane %v1208_v50, 5  ;;  %v11646_v14 = vrot.slane %v1214_v0, 5  ;;  %v1953_v13 = vld [vmem:[#allocation2 + $0xa8] sm:$0xf]  ;;  %v1954_v46 = vld [vmem:[#allocation2 + $0xac] sm:$0xf] }
 0x193   : > { %v2840_v55 = vpop.permute.xlu0 %2839  ;;  %v1623_v29 = vpop.permute.xlu1 %1622  ;;  %v2773_v49 = vld [vmem:[#allocation2 + $0xb4] sm:$0xf]  ;;  %v2275_v41 = vshrl.u32 %v1953_v13, 16  ;;  %v2278_v18 = vshll.u32 %v1953_v13, 16  ;;  %v2284_v24 = vshll.u32 %v1954_v46, 16  ;;  %v2288_v19 = vshrl.u32 %v1954_v46, 16 }
 0x194   : > { %2921 = vst.msk [vmem:[#allocation3 + $0xac] sm:$0xf] %vm1688_vm1, %v2840_v55  ;;  %v3797_v26 = vld [vmem:[#allocation3 + $0x9c] sm:$0xff]  ;;  %1704 = vst.msk [vmem:[#allocation3 + $0xb4] sm:$0xf] %vm1688_vm1, %v1623_v29  ;;  %v11650_v52 = vrot.slane %v3309_v9, 5  ;;  %v1211_v37 = vor.u32 %v1210_v57, %v1207_v38 }
 0x195   : > { %v10190_v61 = vld [vmem:[#allocation3 + $0x94] ss:$12 sps:$4 sm:$0xff]   ;;  %2670 = vrot.lane.b32.xlu0 %v2600_v7, %s10363_s10  ;;  %v9428_v2 = vcombine.low %v3795_v54, %v3797_v26  ;;  %v3315_v23 = vrot.slane %v3313_v10, 4  ;;  %v3319_v31 = vshll.u32 %v11641_v47, 16  ;;  %v11653_v32 = vrot.slane %v1218_v11, 4 }
 0x196   : > { %1306 = vrot.lane.b32.xlu1 %v1203_v53, %s10363_s10  ;;  %4355 = vmatprep.mubr.bf16.mxu0 %v10190_v61  ;;  %v1747_v33 = vld [vmem:[#allocation2 + $0xa8] sm:$0xf]  ;;  %v2277_v63 = vrot.slane %v2275_v41, 4  ;;  %v2280_v35 = vrot.slane %v2278_v18, 5  ;;  %v2286_v20 = vrot.slane %v2284_v24, 5  ;;  %v2290_v40 = vrot.slane %v2288_v19, 4 }
 0x197   : > { %v1814_v6 = vpop.permute.xlu0 %1813  ;;  %4356 = vmatmul.mubr.bf16.gmra.mxu0 %v9428_v2  ;;  %v2842_v62 = vpop.permute.xlu1 %2841  ;;  %v3536_v56 = vld [vmem:[#allocation2 + $0xac] sm:$0xf]  ;;  %v3307_v15 = vrot.slane %v3306_v4, 4  ;;  %v1955_v3 = vld [vmem:[#allocation2 + $0xb0] sm:$0x1]  ;;  %v3316_v12 = vor.u32 %v3315_v23, %v11650_v52  ;;  %v1212_v39 = vrot.slane %v1211_v37, 4  ;;  %v1221_v46 = vor.u32 %v11653_v32, %v11646_v14 }
 0x198   : > { %1896 = vst.msk [vmem:[#allocation3 + $0xa8] sm:$0xf] %vm1881_vm2, %v1814_v6  ;;  %v3681_v8 = vrot.slane %v3536_v56, 5  ;;  %v3539_v25 = vld [vmem:[#allocation2 + $0xb8] sm:$0xf]  ;;  %v2281_v43 = vor.u32 %v2280_v35, %v2277_v63  ;;  %v2291_v7 = vor.u32 %v2290_v40, %v2286_v20  ;;  %v2294_v48 = vshll.u32 %v1955_v3, 16 }
 0x199   : > { %1644 = vrot.lane.b32.xlu0 %v1574_v5, %s10364_s17  ;;  %2922 = vst.msk [vmem:[#allocation3 + $0xb8] sm:$0xf] %vm1688_vm1, %v2842_v62  ;;  %v861_v28 = vld [vmem:[#allocation2 + $0xb0] sm:$0x1]  ;;  %v3535_v51 = vld [vmem:[#allocation2 + $0xa8] sm:$0xe]  ;;  %v3312_v9 = vsel %vm10529_vm9, %v3307_v15, %v11650_v52 }
 0x19a   : > { %2672 = vrot.lane.b32.xlu1 %v2603_v27, %s10363_s10  ;;  %v3537_v53 = vld [vmem:[#allocation2 + $0xb0] sm:$0x1]  ;;  %v3688_v54 = vrot.slane %v3539_v25, 5  ;;  %v2774_v55 = vld [vmem:[#allocation2 + $0xb8] sm:$0xf]  ;;  %v9405_v16 = vrot.slane %v3535_v51, 9 }
 0x19b   : > { %v3400_v44 = vpop.permute.xlu0 %3399  ;;  %v1816_v59 = vpop.permute.xlu1 %1815  ;;  %v3683_v21 = vrot.slane %v3681_v8, 4  ;;  %v3684_v60 = vrot.slane %v3537_v53, 5  ;;  %v2282_v45 = vrot.slane %v2281_v43, 4  ;;  %v2292_v50 = vrot.slane %v2291_v7, 4  ;;  %v3538_v26 = vld [vmem:[#allocation2 + $0xb4] sm:$0xe] }
 0x19c   : > { %3481 = vst.msk [vmem:[#allocation3 + $0xac] sm:$0xf] %vm1881_vm2, %v3400_v44  ;;  %1897 = vst.msk [vmem:[#allocation3 + $0xb4] sm:$0xf] %vm1881_vm2, %v1816_v59  ;;  %v2296_v29 = vrot.slane %v2294_v48, 5  ;;  %v3690_v61 = vrot.slane %v3688_v54, 4  ;;  %v3682_v0 = vsel %vm10745_vm13, %v9405_v16, %v3681_v8  ;;  %v1217_v44 = vsel %vm10529_vm9, %v1212_v39, %v11646_v14 }
 0x19d   : > { %2863 = vrot.lane.b32.xlu0 %v2773_v49, %s10364_s17  ;;  %v3685_v2 = vsel %vm10745_vm13, %v3683_v21, %v3684_v60  ;;  %v3540_v5 = vld [vmem:[#allocation2 + $0xbc] sm:$0x1]  ;;  %v9406_v6 = vrot.slane %v3538_v26, 9  ;;  %v2287_v10 = vsel %vm10529_vm9, %v2282_v45, %v2286_v20  ;;  %3763 = vst.msk [vmem:[#allocation3 + $0x128] sm:$0xf] %vm224_vm0, %v3682_v0  ;;  %v1224_v62 = vshll.u32 %v861_v28, 16 }
 0x19e   : > { %1646 = vrot.lane.b32.xlu1 %v1577_v17, %s10364_s17  ;;  %v2297_v11 = vsel %vm10529_vm9, %v2292_v50, %v2296_v29  ;;  %3764 = vst.msk [vmem:[#allocation3 + $0x134] sm:$0xf] %vm224_vm0, %v3685_v2  ;;  %v3691_v27 = vrot.slane %v3540_v5, 5  ;;  %v1748_v47 = vld [vmem:[#allocation2 + $0xac] sm:$0xf]  ;;  %v3317_v57 = vrot.slane %v3316_v12, 4 }
 0x19f   : > { %v2651_v58 = vpop.permute.xlu0 %2650  ;;  %v3402_v1 = vpop.permute.xlu1 %3401  ;;  %v2452_v17 = vld [vmem:[#allocation2 + $0xb4] sm:$0xe]  ;;  %2404 = vst.msk [vmem:[#allocation3 + $0x13c] sm:$0xf] %vm224_vm0, %v2287_v10  ;;  %2405 = vst.msk [vmem:[#allocation3 + $0x148] sm:$0xf] %vm224_vm0, %v2297_v11  ;;  %v3689_v4 = vsel %vm10745_vm13, %v9406_v6, %v3688_v54 }
 0x1a0   : > { %2730 = vst.msk [vmem:[#allocation3 + $0xc4] sm:$0xf] %vm1348_vm14, %v2651_v58  ;;  %v3321_v13 = vrot.slane %v3319_v31, 5  ;;  %v2453_v49 = vld [vmem:[#allocation2 + $0xb8] sm:$0xf]  ;;  %v3692_v18 = vsel %vm10745_vm13, %v3690_v61, %v3691_v27  ;;  %v9391_v52 = vrot.slane %v2452_v17, 9 }
 0x1a1   : > { %1837 = vrot.lane.b32.xlu0 %v1747_v33, %s10365_s12  ;;  %3482 = vst.msk [vmem:[#allocation3 + $0xb8] sm:$0xf] %vm1881_vm2, %v3402_v1  ;;  %v1423_v41 = vld [vmem:[#allocation2 + $0xa8] sm:$0xe]  ;;  %v2981_v19 = vld [vmem:[#allocation2 + $0xc0] sm:$0xf] }
 0x1a2   : > { %2865 = vrot.lane.b32.xlu1 %v2774_v55, %s10364_s17  ;;  %3765 = vst.msk [vmem:[#allocation3 + $0x140] sm:$0xf] %vm224_vm0, %v3689_v4  ;;  %3766 = vst.msk [vmem:[#allocation3 + $0x14c] sm:$0xf] %vm224_vm0, %v3692_v18  ;;  %v1424_v23 = vld [vmem:[#allocation2 + $0xac] sm:$0xf]  ;;  %v3322_v20 = vsel %vm10529_vm9, %v3317_v57, %v3321_v13 }
 0x1a3   : > { %v1625_v38 = vpop.permute.xlu0 %1624  ;;  %v2653_v24 = vpop.permute.xlu1 %2652  ;;  %v3799_v31 = vld [vmem:[#allocation3 + $0xa8] sm:$0xff]  ;;  %v1226_v33 = vrot.slane %v1224_v62, 5  ;;  %v2606_v63 = vrot.slane %v2453_v49, 5  ;;  %v9375_v35 = vrot.slane %v1423_v41, 9  ;;  %v1222_v40 = vrot.slane %v1221_v46, 4 }
 0x1a4   : > { %1705 = vst.msk [vmem:[#allocation3 + $0xc0] sm:$0xf] %vm1688_vm1, %v1625_v38  ;;  %v2454_v56 = vld [vmem:[#allocation2 + $0xbc] sm:$0x1]  ;;  %v3324_v59 = vshrl.u32 %v2981_v19, 16  ;;  %v3327_v15 = vshll.u32 %v2981_v19, 16 }
 0x1a5   : > { %3423 = vrot.lane.b32.xlu0 %v3312_v9, %s10365_s12  ;;  %2731 = vst.msk [vmem:[#allocation3 + $0xd0] sm:$0xf] %vm1348_vm14, %v2653_v24  ;;  %v1580_v8 = vrot.slane %v1424_v23, 5  ;;  %v2607_v28 = vsel %vm10745_vm13, %v9391_v52, %v2606_v63  ;;  %v1425_v43 = vld [vmem:[#allocation2 + $0xb0] sm:$0x1]  ;;  %v2608_v53 = vrot.slane %v2606_v63, 4  ;;  %v1227_v58 = vsel %vm10529_vm9, %v1222_v40, %v1226_v33 }
 0x1a6   : > { %1839 = vrot.lane.b32.xlu1 %v1748_v47, %s10365_s12  ;;  %v862_v7 = vld [vmem:[#allocation2 + $0xb4] sm:$0xf]  ;;  %v10213_v48 = vld [vmem:[#allocation3 + $0x128] ss:$12 sps:$4 sm:$0xff]   ;;  %v2609_v54 = vrot.slane %v2454_v56, 5  ;;  %v3326_v12 = vrot.slane %v3324_v59, 4 }
 0x1a7   : > { %v2844_v32 = vpop.permute.xlu0 %2843  ;;  %v1627_v37 = vpop.permute.xlu1 %1626  ;;  %v2982_v55 = vld [vmem:[#allocation2 + $0xc4] sm:$0xf]  ;;  %v3329_v16 = vrot.slane %v3327_v15, 5  ;;  %10061 = vmatprep.mubr.msk.bf16.mxu1 %vm4226_vm15, %v10213_v48  ;;  %v863_v45 = vld [vmem:[#allocation2 + $0xb8] sm:$0xf]  ;;  %v1229_v50 = vshrl.u32 %v862_v7, 16  ;;  %v1581_v26 = vsel %vm10745_vm13, %v9375_v35, %v1580_v8 }
 0x1a8   : > { %2923 = vst.msk [vmem:[#allocation3 + $0xc4] sm:$0xf] %vm1688_vm1, %v2844_v32  ;;  %v3801_v14 = vld [vmem:[#allocation3 + $0xb4] sm:$0xff]  ;;  %1706 = vst.msk [vmem:[#allocation3 + $0xcc] sm:$0xf] %vm1688_vm1, %v1627_v37  ;;  %v1232_v29 = vshll.u32 %v862_v7, 16  ;;  %v2610_v2 = vsel %vm10745_vm13, %v2608_v53, %v2609_v54 }
 0x1a9   : > { %v10194_v3 = vld [vmem:[#allocation3 + $0xac] ss:$12 sps:$4 sm:$0xff]   ;;  %1308 = vrot.lane.b32.xlu0 %v1217_v44, %s10363_s10  ;;  %v9431_v25 = vcombine.low %v3799_v31, %v3801_v14  ;;  %v1583_v1 = vrot.slane %v1425_v43, 5  ;;  %v3333_v39 = vshll.u32 %v2982_v55, 16  ;;  %v3337_v0 = vshrl.u32 %v2982_v55, 16 }
 0x1aa   : > { %3425 = vrot.lane.b32.xlu1 %v3322_v20, %s10365_s12  ;;  %4363 = vmatprep.mubr.bf16.mxu0 %v10194_v3  ;;  %v10214_v21 = vld [vmem:[#allocation3 + $0x140] ss:$12 sps:$4 sm:$0xff]   ;;  %v1582_v5 = vrot.slane %v1580_v8, 4  ;;  %v3330_v6 = vor.u32 %v3329_v16, %v3326_v12  ;;  %v1238_v9 = vshll.u32 %v863_v45, 16  ;;  %v1231_v11 = vrot.slane %v1229_v50, 4 }
 0x1ab   : > { %v1818_v51 = vpop.permute.xlu0 %1817  ;;  %4364 = vmatmul.mubr.bf16.gmra.mxu0 %v9431_v25  ;;  %v2846_v60 = vpop.permute.xlu1 %2845  ;;  %10062 = vmatmul.mubr.msk.bf16.gmra.mxu1 %vm4226_vm15, %v10214_v21  ;;  %v1234_v27 = vrot.slane %v1232_v29, 5  ;;  %v781_v47 = vld [vmem:[#allocation2 + $0xa8] sm:$0xf]  ;;  %v782_v38 = vld [vmem:[#allocation2 + $0xac] sm:$0xf]  ;;  %v3335_v4 = vrot.slane %v3333_v39, 5 }
 0x1ac   : > { %1898 = vst.msk [vmem:[#allocation3 + $0xc0] sm:$0xf] %vm1881_vm2, %v1818_v51  ;;  %v2775_v62 = vld [vmem:[#allocation2 + $0xc0] sm:$0xf]  ;;  %v3339_v57 = vrot.slane %v3337_v0, 4  ;;  %v1242_v13 = vshrl.u32 %v863_v45, 16  ;;  %v1584_v46 = vsel %vm10745_vm13, %v1582_v5, %v1583_v1 }
 0x1ad   : > { %2674 = vrot.lane.b32.xlu0 %v2607_v28, %s10363_s10  ;;  %2924 = vst.msk [vmem:[#allocation3 + $0xd0] sm:$0xf] %vm1688_vm1, %v2846_v60  ;;  %v3331_v49 = vrot.slane %v3330_v6, 4  ;;  %v2983_v41 = vld [vmem:[#allocation2 + $0xc8] sm:$0x1]  ;;  %v11723_v18 = vrot.slane %v1238_v9, 5  ;;  %v1235_v19 = vor.u32 %v1234_v27, %v1231_v11 }
 0x1ae   : > { %1310 = vrot.lane.b32.xlu1 %v1227_v58, %s10363_s10  ;;  %813 = vst.msk [vmem:[#allocation3 + $0x150] sm:$0xf] %vm224_vm0, %v781_v47  ;;  %814 = vst.msk [vmem:[#allocation3 + $0x15c] sm:$0xf] %vm224_vm0, %v782_v38  ;;  %v1956_v44 = vld [vmem:[#allocation2 + $0xb4] sm:$0xf]  ;;  %v3340_v40 = vor.u32 %v3339_v57, %v3335_v4 }
 0x1af   : > { %v3404_v61 = vpop.permute.xlu0 %3403  ;;  %v1820_v10 = vpop.permute.xlu1 %1819  ;;  %v1957_v52 = vld [vmem:[#allocation2 + $0xb8] sm:$0xf]  ;;  %v1958_v23 = vld [vmem:[#allocation2 + $0xbc] sm:$0x1]  ;;  %v1749_v31 = vld [vmem:[#allocation2 + $0xb4] sm:$0xf]  ;;  %v3336_v51 = vsel %vm10529_vm9, %v3331_v49, %v3335_v4 }
 0x1b0   : > { %3483 = vst.msk [vmem:[#allocation3 + $0xc4] sm:$0xf] %vm1881_vm2, %v3404_v61  ;;  %1899 = vst.msk [vmem:[#allocation3 + $0xcc] sm:$0xf] %vm1881_vm2, %v1820_v10  ;;  %v2299_v32 = vshrl.u32 %v1956_v44, 16  ;;  %v2302_v33 = vshll.u32 %v1956_v44, 16 }
 0x1b1   : > { %1648 = vrot.lane.b32.xlu0 %v1581_v26, %s10364_s17  ;;  %v2308_v63 = vshll.u32 %v1957_v52, 16  ;;  %v2312_v35 = vshrl.u32 %v1957_v52, 16  ;;  %v3343_v56 = vshll.u32 %v2983_v41, 16  ;;  %v864_v59 = vld [vmem:[#allocation2 + $0xbc] sm:$0x1]  ;;  %v1244_v15 = vrot.slane %v1242_v13, 4 }
 0x1b2   : > { %2676 = vrot.lane.b32.xlu1 %v2610_v2, %s10363_s10  ;;  %v2318_v37 = vshll.u32 %v1958_v23, 16  ;;  %v2776_v14 = vld [vmem:[#allocation2 + $0xc4] sm:$0xf]  ;;  %v2301_v3 = vrot.slane %v2299_v32, 4  ;;  %v2304_v8 = vrot.slane %v2302_v33, 5  ;;  %v1236_v7 = vrot.slane %v1235_v19, 4 }
 0x1b3   : > { %v2655_v17 = vpop.permute.xlu0 %2654  ;;  %v3406_v24 = vpop.permute.xlu1 %3405  ;;  %v2310_v25 = vrot.slane %v2308_v63, 5  ;;  %v2314_v28 = vrot.slane %v2312_v35, 4  ;;  %v1750_v48 = vld [vmem:[#allocation2 + $0xb8] sm:$0xf]  ;;  %v1245_v12 = vor.u32 %v1244_v15, %v11723_v18  ;;  %v1248_v16 = vshll.u32 %v864_v59, 16 }
 0x1b4   : > { %2732 = vst.msk [vmem:[#allocation3 + $0xdc] sm:$0xf] %vm1348_vm14, %v2655_v17  ;;  %v2305_v53 = vor.u32 %v2304_v8, %v2301_v3  ;;  %v2320_v55 = vrot.slane %v2318_v37, 5  ;;  %v2455_v21 = vld [vmem:[#allocation2 + $0xc0] sm:$0xe]  ;;  %v3341_v45 = vrot.slane %v3340_v40, 4  ;;  %v1241_v2 = vsel %vm10529_vm9, %v1236_v7, %v11723_v18 }
 0x1b5   : > { %2867 = vrot.lane.b32.xlu0 %v2775_v62, %s10364_s17  ;;  %3484 = vst.msk [vmem:[#allocation3 + $0xd0] sm:$0xf] %vm1881_vm2, %v3406_v24  ;;  %v2315_v54 = vor.u32 %v2314_v28, %v2310_v25  ;;  %v1427_v60 = vld [vmem:[#allocation2 + $0xb8] sm:$0xf]  ;;  %v3345_v50 = vrot.slane %v3343_v56, 5  ;;  %v9392_v5 = vrot.slane %v2455_v21, 9 }
 0x1b6   : > { %1650 = vrot.lane.b32.xlu1 %v1584_v46, %s10364_s17  ;;  %v2456_v29 = vld [vmem:[#allocation2 + $0xc4] sm:$0xf]  ;;  %v2306_v26 = vrot.slane %v2305_v53, 4  ;;  %v2984_v6 = vld [vmem:[#allocation2 + $0xcc] sm:$0xf]  ;;  %v1246_v27 = vrot.slane %v1245_v12, 4 }
 0x1b7   : > { %v1629_v20 = vpop.permute.xlu0 %1628  ;;  %v2657_v43 = vpop.permute.xlu1 %2656  ;;  %v2316_v61 = vrot.slane %v2315_v54, 4  ;;  %v10198_v0 = vld [vmem:[#allocation3 + $0xc0] ss:$12 sps:$4 sm:$0xff]   ;;  %v1250_v47 = vrot.slane %v1248_v16, 5  ;;  %v2613_v38 = vrot.slane %v2456_v29, 5  ;;  %v3346_v17 = vsel %vm10529_vm9, %v3341_v45, %v3345_v50 }
 0x1b8   : > { %1707 = vst.msk [vmem:[#allocation3 + $0xd8] sm:$0xf] %vm1688_vm1, %v1629_v20  ;;  %v2311_v9 = vsel %vm10529_vm9, %v2306_v26, %v2310_v25  ;;  %v1426_v62 = vld [vmem:[#allocation2 + $0xb4] sm:$0xe]  ;;  %v2457_v4 = vld [vmem:[#allocation2 + $0xc8] sm:$0x1] }
 0x1b9   : > { %1841 = vrot.lane.b32.xlu0 %v1749_v31, %s10365_s12  ;;  %2733 = vst.msk [vmem:[#allocation3 + $0xe8] sm:$0xf] %vm1348_vm14, %v2657_v43  ;;  %v2321_v10 = vsel %vm10529_vm9, %v2316_v61, %v2320_v55  ;;  %v1587_v57 = vrot.slane %v1427_v60, 5  ;;  %v1428_v13 = vld [vmem:[#allocation2 + $0xbc] sm:$0x1]  ;;  %v3348_v41 = vshrl.u32 %v2984_v6, 16  ;;  %v2614_v19 = vsel %vm10745_vm13, %v9392_v5, %v2613_v38 }
 0x1ba   : > { %2869 = vrot.lane.b32.xlu1 %v2776_v14, %s10364_s17  ;;  %2406 = vst.msk [vmem:[#allocation3 + $0x154] sm:$0xf] %vm224_vm0, %v2311_v9  ;;  %2407 = vst.msk [vmem:[#allocation3 + $0x160] sm:$0xf] %vm224_vm0, %v2321_v10  ;;  %v2985_v49 = vld [vmem:[#allocation2 + $0xd0] sm:$0xf]  ;;  %v1251_v52 = vsel %vm10529_vm9, %v1246_v27, %v1250_v47 }
 0x1bb   : > { %v2848_v58 = vpop.permute.xlu0 %2847  ;;  %v1631_v1 = vpop.permute.xlu1 %1630  ;;  %v3351_v18 = vshll.u32 %v2984_v6, 16  ;;  %v5285_v24 = vld [vmem:[#allocation2] sm:$0xf]  ;;  %v9376_v44 = vrot.slane %v1426_v62, 9  ;;  %v2615_v31 = vrot.slane %v2613_v38, 4  ;;  %v2616_v32 = vrot.slane %v2457_v4, 5 }
 0x1bc   : > { %2925 = vst.msk [vmem:[#allocation3 + $0xdc] sm:$0xf] %vm1688_vm1, %v2848_v58  ;;  %v10196_v39 = vld [vmem:[#allocation3 + $0xc4] ss:$12 sps:$4 sm:$0xff]   ;;  %1708 = vst.msk [vmem:[#allocation3 + $0xe4] sm:$0xf] %vm1688_vm1, %v1631_v1 }
 0x1bd   : > { %3427 = vrot.lane.b32.xlu0 %v3336_v51, %s10365_s12  ;;  %4371 = vmatprep.mubr.bf16.mxu0 %v10196_v39  ;;  %v1590_v33 = vrot.slane %v1428_v13, 5  ;;  %v1589_v63 = vrot.slane %v1587_v57, 4  ;;  %v3357_v35 = vshll.u32 %v2985_v49, 16  ;;  %v5334_v20 = vshrl.u32 %v5285_v24, 16  ;;  %v783_v37 = vld [vmem:[#allocation2 + $0xb4] sm:$0xf] }
 0x1be   : > { %1843 = vrot.lane.b32.xlu1 %v1750_v48, %s10365_s12  ;;  %4372 = vmatmul.mubr.bf16.gmra.mxu0 %v10198_v0  ;;  %v5337_v40 = vshll.u32 %v5285_v24, 16  ;;  %v3350_v59 = vrot.slane %v3348_v41, 4  ;;  %v3353_v15 = vrot.slane %v3351_v18, 5  ;;  %v784_v14 = vld [vmem:[#allocation2 + $0xb8] sm:$0xf]  ;;  %v1588_v3 = vsel %vm10745_vm13, %v9376_v44, %v1587_v57 }
 0x1bf   : > { %v1822_v11 = vpop.permute.xlu0 %1821  ;;  %v2850_v46 = vpop.permute.xlu1 %2849  ;;  %815 = vst.msk [vmem:[#allocation3 + $0x168] sm:$0xf] %vm224_vm0, %v783_v37  ;;  %816 = vst.msk [vmem:[#allocation3 + $0x174] sm:$0xf] %vm224_vm0, %v784_v14  ;;  %v3361_v25 = vshrl.u32 %v2985_v49, 16  ;;  %v2617_v28 = vsel %vm10745_vm13, %v2615_v31, %v2616_v32  ;;  %v11769_v43 = vrot.slane %v3357_v35, 5  ;;  %v1591_v54 = vsel %vm10745_vm13, %v1589_v63, %v1590_v33 }
 0x1c0   : > { %1900 = vst.msk [vmem:[#allocation3 + $0xd8] sm:$0xf] %vm1881_vm2, %v1822_v11  ;;  %v5286_v7 = vld [vmem:[#allocation2 + $0x4] sm:$0xf]  ;;  %v5336_v48 = vrot.slane %v5334_v20, 4  ;;  %v5339_v51 = vrot.slane %v5337_v40, 5  ;;  %v3354_v55 = vor.u32 %v3353_v15, %v3350_v59 }
 0x1c1   : > { %1312 = vrot.lane.b32.xlu0 %v1241_v2, %s10363_s10  ;;  %2926 = vst.msk [vmem:[#allocation3 + $0xe8] sm:$0xf] %vm1688_vm1, %v2850_v46  ;;  %v1959_v58 = vld [vmem:[#allocation2 + $0xc0] sm:$0xf]  ;;  %v1960_v12 = vld [vmem:[#allocation2 + $0xc4] sm:$0xf] }
 0x1c2   : > { %3429 = vrot.lane.b32.xlu1 %v3346_v17, %s10365_s12  ;;  %v1961_v16 = vld [vmem:[#allocation2 + $0xc8] sm:$0x1]  ;;  %v2777_v21 = vld [vmem:[#allocation2 + $0xcc] sm:$0xf]  ;;  %v2323_v60 = vshrl.u32 %v1959_v58, 16  ;;  %v2326_v45 = vshll.u32 %v1959_v58, 16  ;;  %v5340_v38 = vor.u32 %v5339_v51, %v5336_v48 }
 0x1c3   : > { %v3408_v23 = vpop.permute.xlu0 %3407  ;;  %v1824_v56 = vpop.permute.xlu1 %1823  ;;  %v2332_v50 = vshll.u32 %v1960_v12, 16  ;;  %v2336_v29 = vshrl.u32 %v1960_v12, 16  ;;  %v3363_v61 = vrot.slane %v3361_v25, 4  ;;  %v5343_v1 = vshll.u32 %v5286_v7, 16  ;;  %v2986_v2 = vld [vmem:[#allocation2 + $0xd4] sm:$0x1] }
 0x1c4   : > { %3485 = vst.msk [vmem:[#allocation3 + $0xdc] sm:$0xf] %vm1881_vm2, %v3408_v23  ;;  %1901 = vst.msk [vmem:[#allocation3 + $0xe4] sm:$0xf] %vm1881_vm2, %v1824_v56  ;;  %v5347_v39 = vshrl.u32 %v5286_v7, 16  ;;  %v2342_v0 = vshll.u32 %v1961_v16, 16 }
 0x1c5   : > { %2678 = vrot.lane.b32.xlu0 %v2614_v19, %s10363_s10  ;;  %v2325_v5 = vrot.slane %v2323_v60, 4  ;;  %v2328_v6 = vrot.slane %v2326_v45, 5  ;;  %v2334_v9 = vrot.slane %v2332_v50, 5  ;;  %v2338_v10 = vrot.slane %v2336_v29, 4  ;;  %v1751_v47 = vld [vmem:[#allocation2 + $0xc0] sm:$0xf] }
 0x1c6   : > { %1314 = vrot.lane.b32.xlu1 %v1251_v52, %s10363_s10  ;;  %v3355_v27 = vrot.slane %v3354_v55, 4  ;;  %v2344_v4 = vrot.slane %v2342_v0, 5  ;;  %v2778_v57 = vld [vmem:[#allocation2 + $0xd0] sm:$0xf]  ;;  %v3364_v49 = vor.u32 %v3363_v61, %v11769_v43  ;;  %v3367_v41 = vshll.u32 %v2986_v2, 16 }
 0x1c7   : > { %v2659_v8 = vpop.permute.xlu0 %2658  ;;  %v3410_v53 = vpop.permute.xlu1 %3409  ;;  %v2329_v62 = vor.u32 %v2328_v6, %v2325_v5  ;;  %v2339_v17 = vor.u32 %v2338_v10, %v2334_v9  ;;  %v5345_v18 = vrot.slane %v5343_v1, 5  ;;  %v5287_v24 = vld [vmem:[#allocation2 + $0x8] sm:$0x1]  ;;  %v5349_v19 = vrot.slane %v5347_v39, 4  ;;  %v1752_v15 = vld [vmem:[#allocation2 + $0xc4] sm:$0xf] }
 0x1c8   : > { %2734 = vst.msk [vmem:[#allocation3 + $0xf4] sm:$0xf] %vm1348_vm14, %v2659_v8  ;;  %v3360_v33 = vsel %vm10529_vm9, %v3355_v27, %v11769_v43  ;;  %v5341_v35 = vrot.slane %v5340_v38, 4  ;;  %v5353_v59 = vshll.u32 %v5287_v24, 16  ;;  %v3365_v37 = vrot.slane %v3364_v49, 4  ;;  %v11811_v5 = vpop.f32.mrf.mxu1 }
 0x1c9   : > { %1652 = vrot.lane.b32.xlu0 %v1588_v3, %s10364_s17  ;;  %3486 = vst.msk [vmem:[#allocation3 + $0xe8] sm:$0xf] %vm1881_vm2, %v3410_v53  ;;  %v2330_v44 = vrot.slane %v2329_v62, 4  ;;  %v2340_v52 = vrot.slane %v2339_v17, 4  ;;  %v3369_v14 = vrot.slane %v3367_v41, 5  ;;  %v5350_v3 = vor.u32 %v5349_v19, %v5345_v18  ;;  %v10227_v17 = vld [vmem:[%s14320_s3 + $0x80] sm:$0xff]  }
 0x1ca   : > { %2680 = vrot.lane.b32.xlu1 %v2617_v28, %s10363_s10  ;;  %v5346_v25 = vsel %vm10529_vm9, %v5341_v35, %v5345_v18  ;;  %v3542_v28 = vld [vmem:[#allocation2 + $0xc4] sm:$0xf]  ;;  %v5355_v7 = vrot.slane %v5353_v59, 5  ;;  %v3545_v51 = vld [vmem:[#allocation2 + $0xd0] sm:$0xf] }
 0x1cb   : > { %v1633_v26 = vpop.permute.xlu0 %1632  ;;  %v2661_v11 = vpop.permute.xlu1 %2660  ;;  %v3807_v13 = vld [vmem:[#allocation3 + $0xd8] sm:$0xff]  ;;  %v2335_v20 = vsel %vm10529_vm9, %v2330_v44, %v2334_v9  ;;  %v2345_v40 = vsel %vm10529_vm9, %v2340_v52, %v2344_v4  ;;  %v3695_v48 = vrot.slane %v3542_v28, 5  ;;  %v3370_v53 = vsel %vm10529_vm9, %v3365_v37, %v3369_v14  ;;  %v3541_v55 = vld [vmem:[#allocation2 + $0xc0] sm:$0xe]  ;;  %v3543_v58 = vld [vmem:[#allocation2 + $0xc8] sm:$0x1] }
 0x1cc   : > { %1709 = vst.msk [vmem:[#allocation3 + $0xf0] sm:$0xf] %vm1688_vm1, %v1633_v26  ;;  %v3702_v12 = vrot.slane %v3545_v51, 5  ;;  %v3698_v45 = vrot.slane %v3543_v58, 5  ;;  %v3544_v50 = vld [vmem:[#allocation2 + $0xcc] sm:$0xe] }
 0x1cd   : > { %2871 = vrot.lane.b32.xlu0 %v2777_v21, %s10364_s17  ;;  %2735 = vst.msk [vmem:[#allocation3 + $0x100] sm:$0xf] %vm1348_vm14, %v2661_v11  ;;  %v9407_v21 = vrot.slane %v3541_v55, 9  ;;  %v3697_v60 = vrot.slane %v3695_v48, 4  ;;  %v3546_v29 = vld [vmem:[#allocation2 + $0xd4] sm:$0x1] }
 0x1ce   : > { %1654 = vrot.lane.b32.xlu1 %v1591_v54, %s10364_s17  ;;  %2408 = vst.msk [vmem:[#allocation3 + $0x16c] sm:$0xf] %vm224_vm0, %v2335_v20  ;;  %2409 = vst.msk [vmem:[#allocation3 + $0x178] sm:$0xf] %vm224_vm0, %v2345_v40  ;;  %v5351_v54 = vrot.slane %v5350_v3, 4  ;;  %v9408_v26 = vrot.slane %v3544_v50, 9 }
 0x1cf   : > { %v2852_v46 = vpop.permute.xlu0 %2851  ;;  %v1635_v23 = vpop.permute.xlu1 %1634  ;;  %v3704_v61 = vrot.slane %v3702_v12, 4  ;;  %v3696_v39 = vsel %vm10745_vm13, %v9407_v21, %v3695_v48  ;;  %v3699_v0 = vsel %vm10745_vm13, %v3697_v60, %v3698_v45  ;;  %v3705_v2 = vrot.slane %v3546_v29, 5  ;;  %v11822_v11 = vld [vmem:[%s14320_s3 + $0x88] sm:$0xff]   ;;  %v8003_v38 = vld [vmem:[#allocation2 + $0xd0] sm:$0xf] }
 0x1d0   : > { %2927 = vst.msk [vmem:[#allocation3 + $0xf4] sm:$0xf] %vm1688_vm1, %v2852_v46  ;;  %v3809_v31 = vld [vmem:[#allocation3 + $0xe4] sm:$0xff]  ;;  %1710 = vst.msk [vmem:[#allocation3 + $0xfc] sm:$0xf] %vm1688_vm1, %v1635_v23  ;;  %v5356_v6 = vsel %vm10529_vm9, %v5351_v54, %v5355_v7  ;;  %v3703_v9 = vsel %vm10745_vm13, %v9408_v26, %v3702_v12  ;;  %10069 = vmatprep.subr.bf16.mxu0 %v11822_v11  ;;  %v4470_v46 = vpop.f32.mrf.mxu1 }
 0x1d1   : > { %v10201_v32 = vld [vmem:[#allocation3 + $0xdc] ss:$12 sps:$4 sm:$0xff]   ;;  %1845 = vrot.lane.b32.xlu0 %v1751_v47, %s10365_s12  ;;  %v9437_v63 = vcombine.low %v3807_v13, %v3809_v31  ;;  %3767 = vst.msk [vmem:[#allocation3 + $0x158] sm:$0xf] %vm224_vm0, %v3696_v39  ;;  %3768 = vst.msk [vmem:[#allocation3 + $0x164] sm:$0xf] %vm224_vm0, %v3699_v0  ;;  %v3706_v27 = vsel %vm10745_vm13, %v3704_v61, %v3705_v2  ;;  %10070 = vmatpush3.bf16.msra.mxu0 %v11822_v11 }
 0x1d2   : > { %2873 = vrot.lane.b32.xlu1 %v2778_v57, %s10364_s17  ;;  %4379 = vmatprep.mubr.bf16.mxu0 %v10201_v32  ;;  %3769 = vst.msk [vmem:[#allocation3 + $0x170] sm:$0xf] %vm224_vm0, %v3703_v9  ;;  %v8002_v47 = vld [vmem:[#allocation2 + $0xcc] sm:$0xe]  ;;  %3770 = vst.msk [vmem:[#allocation3 + $0x17c] sm:$0xf] %vm224_vm0, %v3706_v27 }
 0x1d3   : > { %v1826_v56 = vpop.permute.xlu0 %1825  ;;  %4380 = vmatmul.mubr.bf16.gmra.mxu0 %v9437_v63  ;;  %v2854_v8 = vpop.permute.xlu1 %2853  ;;  %v8004_v62 = vld [vmem:[#allocation2 + $0xd4] sm:$0x1]  ;;  %v8160_v57 = vrot.slane %v8003_v38, 5  ;;  %v9571_v49 = vrot.slane %v8002_v47, 9  ;;  %10071 = vmatprep.subr.bf16.mxu0 %v10227_v17  ;;  %v11840_v44 = vld [vmem:[%s14319_s2] ss:$0 sm:$0xff] }
 0x1d4   : > { %1902 = vst.msk [vmem:[#allocation3 + $0xf0] sm:$0xf] %vm1881_vm2, %v1826_v56  ;;  %v8163_v41 = vrot.slane %v8004_v62, 5  ;;  %v5109_v29 = vld [vmem:[#allocation2 + $0xc] sm:$0xf] }
 0x1d5   : > { %3431 = vrot.lane.b32.xlu0 %v3360_v33, %s10365_s12  ;;  %2928 = vst.msk [vmem:[#allocation3 + $0x100] sm:$0xf] %vm1688_vm1, %v2854_v8  ;;  %v8162_v24 = vrot.slane %v8160_v57, 4  ;;  %v11842_v33 = vpop.f32.mrf.mxu1  ;;  %v8161_v63 = vsel %vm10745_vm13, %v9571_v49, %v8160_v57  ;;  %10072 = vmatpush3.bf16.msra.mxu0 %v10227_v17 }
 0x1d6   : > { %1847 = vrot.lane.b32.xlu1 %v1752_v15, %s10365_s12 }
 0x1d7   : > { %v3412_v43 = vpop.permute.xlu0 %3411  ;;  %v1828_v16 = vpop.permute.xlu1 %1827  ;;  %v8164_v35 = vsel %vm10745_vm13, %v8162_v24, %v8163_v41 }
 0x1d8   : > { %3487 = vst.msk [vmem:[#allocation3 + $0xf4] sm:$0xf] %vm1881_vm2, %v3412_v43  ;;  %1903 = vst.msk [vmem:[#allocation3 + $0xfc] sm:$0xf] %vm1881_vm2, %v1828_v16  ;;  %v10223_v31 = vld [vmem:[#allocation3 + $0x158] ss:$12 sps:$4 sm:$0xff]  }
 0x1d9   : > { %5717 = vrot.lane.b32.xlu0 %v5346_v25, %s10363_s10  ;;  %10065 = vmatprep.mubr.msk.bf16.mxu1 %vm4226_vm15, %v10223_v31  ;;  %v10225_v37 = vld [vmem:[#allocation3 + $0x170] ss:$12 sps:$4 sm:$0xff]   ;;  %v4473_v25 = vpop.f32.mrf.mxu1 }
 0x1da   : > { %3433 = vrot.lane.b32.xlu1 %v3370_v53, %s10365_s12  ;;  %8227 = vst.msk [vmem:[#allocation3 + $0x170] sm:$0xf] %vm224_vm0, %v8161_v63  ;;  %8228 = vst.msk [vmem:[#allocation3 + $0x17c] sm:$0xf] %vm224_vm0, %v8164_v35  ;;  %10066 = vmatmul.mubr.msk.bf16.gmra.mxu1 %vm4226_vm15, %v10225_v37 }
 0x1db   : > { %v2663_v1 = vpop.permute.xlu0 %2662  ;;  %v3414_v10 = vpop.permute.xlu1 %3413 }
 0x1dc   : > { %2736 = vst.msk [vmem:[#allocation3 + $0x10c] sm:$0xf] %vm1348_vm14, %v2663_v1 }
 0x1dd   : > { %3488 = vst.msk [vmem:[#allocation3 + $0x100] sm:$0xf] %vm1881_vm2, %v3414_v10  ;;  %v5113_v10 = vld [vmem:[#allocation2 + $0x14] sm:$0x1] }
 0x1de   : > { %5719 = vrot.lane.b32.xlu1 %v5356_v6, %s10363_s10 }
 0x1df   : > { %v1637_v4 = vpop.permute.xlu0 %1636  ;;  %v9789_v13 = vpop.f32.mrf.mxu0  ;;  %v10205_v59 = vld [vmem:[#allocation3 + $0xf0] ss:$12 sps:$4 sm:$0xff]  }
 0x1e0   : > { %1711 = vst.msk [vmem:[#allocation3 + $0x108] sm:$0xf] %vm1688_vm1, %v1637_v4  ;;  %v2665_v18 = vpop.permute.xlu1 %2664 }
 0x1e1   : > { %2737 = vst.msk [vmem:[#allocation3 + $0x118] sm:$0xf] %vm1348_vm14, %v2665_v18  ;;  %v9790_v19 = vpop.f32.mrf.mxu0 }
 0x1e2   : > { %v9791_v52 = vadd.f32 %v9790_v19, %v9789_v13 }
 0x1e3   : > { %v2856_v23 = vpop.permute.xlu0 %2855  ;;  %v9792_v32 = vpop.f32.mrf.mxu0 }
 0x1e4   : > { %2929 = vst.msk [vmem:[#allocation3 + $0x10c] sm:$0xf] %vm1688_vm1, %v2856_v23  ;;  %v1639_v20 = vpop.permute.xlu1 %1638  ;;  %v4310_v40 = vadd.f32 %v9791_v52, %v11840_v44  ;;  %v10203_v56 = vld [vmem:[#allocation3 + $0xf4] ss:$12 sps:$4 sm:$0xff]  }
 0x1e5   : > { %1712 = vst.msk [vmem:[#allocation3 + $0x114] sm:$0xf] %vm1688_vm1, %v1639_v20  ;;  %v9793_v15 = vpop.f32.mrf.mxu0  ;;  %4387 = vmatprep.mubr.bf16.mxu0 %v10203_v56  ;;  %v5845_v20 = vld [vmem:[#allocation2] sm:$0xe] }
 0x1e6   : > { %v9794_v14 = vadd.f32 %v9793_v15, %v9792_v32  ;;  %v4471_v3 = vadd.f32 %v4470_v46, %v4310_v40  ;;  %4388 = vmatmul.mubr.bf16.gmra.mxu0 %v10205_v59  ;;  %v5846_v15 = vld [vmem:[#allocation2 + $0x4] sm:$0xf] }
 0x1e7   : > { %v1830_v8 = vpop.permute.xlu0 %1829 }
 0x1e8   : > { %1904 = vst.msk [vmem:[#allocation3 + $0x108] sm:$0xf] %vm1881_vm2, %v1830_v8  ;;  %vm4597_vm3 = vcmp.ge.f32.partialorder %v4471_v3, 0.0  ;;  %v4629_v28 = vmul.f32 0.1, %v4471_v3  ;;  %v2858_v43 = vpop.permute.xlu1 %2857  ;;  %v4313_v7 = vadd.f32 %v9794_v14, %v11840_v44 }
 0x1e9   : > { %2930 = vst.msk [vmem:[#allocation3 + $0x118] sm:$0xf] %vm1688_vm1, %v2858_v43  ;;  %v5847_v8 = vld [vmem:[#allocation2 + $0x8] sm:$0x1] }
 0x1ea   : > { %v4661_v48 = vsel %vm4597_vm3, %v4471_v3, %v4629_v28  ;;  %v4474_v51 = vadd.f32 %v4473_v25, %v4313_v7 }
 0x1eb   : > { %v3416_v53 = vpop.permute.xlu0 %3415  ;;  %v9661_v54 = vpack.c.bf16 %v4661_v48, %v4661_v48  ;;  %v9524_v48 = vrot.slane %v5845_v20, 9 }
 0x1ec   : > { %3489 = vst.msk [vmem:[#allocation3 + $0x10c] sm:$0xf] %vm1881_vm2, %v3416_v53  ;;  %vm4598_vm4 = vcmp.ge.f32.partialorder %v4474_v51, 0.0  ;;  %v4630_v55 = vmul.f32 0.1, %v4474_v51  ;;  %v1832_v58 = vpop.permute.xlu1 %1831 }
 0x1ed   : > { %v4790_v12 = vshrl.u32 %v9661_v54, 16  ;;  %1905 = vst.msk [vmem:[#allocation3 + $0x114] sm:$0xf] %vm1881_vm2, %v1832_v58  ;;  %v4793_v45 = vshll.u32 %v9661_v54, 16 }
 0x1ee   : > { %v4662_v16 = vsel %vm4598_vm4, %v4474_v51, %v4630_v55  ;;  %v5943_v51 = vrot.slane %v5846_v15, 5 }
 0x1ef   : > { %v2667_v21 = vpop.permute.xlu0 %2666  ;;  %v4792_v60 = vrot.slane %v4790_v12, 7  ;;  %v9662_v50 = vpack.c.bf16 %v4662_v16, %v4662_v16  ;;  %v5946_v16 = vrot.slane %v5847_v8, 5 }
 0x1f0   : > { %2738 = vst.msk [vmem:[#allocation3 + $0x124] sm:$0xf] %vm1348_vm14, %v2667_v21  ;;  %v3418_v26 = vpop.permute.xlu1 %3417 }
 0x1f1   : > { %v4795_v61 = vor.u32 %v4793_v45, %v4792_v60  ;;  %v4798_v1 = vshrl.u32 %v9662_v50, 16  ;;  %3490 = vst.msk [vmem:[#allocation3 + $0x118] sm:$0xf] %vm1881_vm2, %v3418_v26  ;;  %v4801_v6 = vshll.u32 %v9662_v50, 16  ;;  %v4796_v47 = vrot.slane %v4792_v60, 4 }
 0x1f3   : > { %v1641_v39 = vpop.permute.xlu0 %1640  ;;  %v5110_v0 = vsel %vm10515_vm7, %v4795_v61, %v5109_v29  ;;  %v4800_v2 = vrot.slane %v4798_v1, 7  ;;  %v9795_v9 = vpop.f32.mrf.mxu0  ;;  %v3815_v13 = vld [vmem:[#allocation3 + $0x108] sm:$0xff] }
 0x1f4   : > { %1713 = vst.msk [vmem:[#allocation3 + $0x120] sm:$0xf] %vm1688_vm1, %v1641_v39  ;;  %5111 = vst [vmem:[#allocation2 + $0xc] sm:$0xf] %v5110_v0  ;;  %v2669_v27 = vpop.permute.xlu1 %2668  ;;  %v5221_v0 = vld [vmem:[#allocation2] sm:$0xf] }
 0x1f5   : > { %v4803_v38 = vor.u32 %v4801_v6, %v4800_v2  ;;  %v4805_v62 = vrot.slane %v4800_v2, 4  ;;  %2739 = vst.msk [vmem:[#allocation3 + $0x130] sm:$0xf] %vm1348_vm14, %v2669_v27  ;;  %v9796_v17 = vpop.f32.mrf.mxu0  ;;  %v5116_v2 = vld [vmem:[#allocation2 + $0x18] sm:$0xf] }
 0x1f6   : > { %v9797_v4 = vadd.f32 %v9796_v17, %v9795_v9  ;;  %5253 = vst.msk [vmem:[#allocation3] sm:$0xf] %vm224_vm0, %v5221_v0  ;;  %v10232_v27 = vld [vmem:[%s14320_s3 + $0x78] sm:$0xff]   ;;  %v5222_v17 = vld [vmem:[#allocation2 + $0x4] sm:$0xf] }
 0x1f7   : > { %v2860_v57 = vpop.permute.xlu0 %2859  ;;  %v4804_v46 = vsel %vm10522_vm8, %v4796_v47, %v4803_v38  ;;  %v5114_v49 = vsel %vm10537_vm10, %v4805_v62, %v5113_v10  ;;  %v9798_v41 = vpop.f32.mrf.mxu0  ;;  %v5944_v10 = vsel %vm10745_vm13, %v9524_v48, %v5943_v51  ;;  %5254 = vst.msk [vmem:[#allocation3 + $0xc] sm:$0xf] %vm224_vm0, %v5222_v17  ;;  %9903 = vmatprep.subr.bf16.mxu1 %v10232_v27  ;;  %v10237_v48 = vld [vmem:[%s14320_s3 + $0x28] sm:$0xff]  }
 0x1f8   : > { %2931 = vst.msk [vmem:[#allocation3 + $0x124] sm:$0xf] %vm1688_vm1, %v2860_v57  ;;  %5115 = vst [vmem:[#allocation2 + $0x14] sm:$0x1] %v5114_v49  ;;  %v4318_v18 = vadd.f32 %v9797_v4, %v11840_v44  ;;  %v1643_v24 = vpop.permute.xlu1 %1642  ;;  %v3817_v19 = vld [vmem:[#allocation3 + $0x114] sm:$0xff]  ;;  %v11896_v62 = vpop.f32.mrf.mxu1  ;;  %v10233_v4 = vld [vmem:[%s14320_s3 + $0x38] sm:$0xff]  }
 0x1f9   : > { %5112 = vst.msk [vmem:[#allocation2 + $0x10] sm:$0xf] %vm224_vm0, %v4804_v46  ;;  %v10208_v52 = vld [vmem:[#allocation3 + $0x10c] ss:$12 sps:$4 sm:$0xff]   ;;  %v9799_v23 = vpop.f32.mrf.mxu0  ;;  %v9443_v31 = vcombine.low %v3815_v13, %v3817_v19  ;;  %9904 = vmatpush3.bf16.msra.mxu1 %v10233_v4 }
 0x1fa   : > { %1714 = vst.msk [vmem:[#allocation3 + $0x12c] sm:$0xf] %vm1688_vm1, %v1643_v24  ;;  %v4479_v32 = vadd.f32 %v11811_v5, %v4318_v18  ;;  %v9800_v63 = vadd.f32 %v9799_v23, %v9798_v41  ;;  %4395 = vmatprep.mubr.bf16.mxu0 %v10208_v52  ;;  %v10234_v52 = vld [vmem:[%s14320_s3 + $0x70] sm:$0xff]   ;;  %v5120_v23 = vld [vmem:[#allocation2 + $0x20] sm:$0x1] }
 0x1fb   : > { %v1834_v35 = vpop.permute.xlu0 %1833  ;;  %4396 = vmatmul.mubr.bf16.gmra.mxu0 %v9443_v31  ;;  %v6869_v37 = vld [vmem:[#allocation2 + $0xc] sm:$0xe]  ;;  %9905 = vmatprep.subr.bf16.mxu1 %v10234_v52 }
 0x1fc   : > { %1906 = vst.msk [vmem:[#allocation3 + $0x120] sm:$0xf] %vm1881_vm2, %v1834_v35  ;;  %vm4599_vm5 = vcmp.ge.f32.partialorder %v4479_v32, 0.0  ;;  %v4631_v40 = vmul.f32 0.1, %v4479_v32  ;;  %v4321_v56 = vadd.f32 %v9800_v63, %v11840_v44  ;;  %v2862_v59 = vpop.permute.xlu1 %2861  ;;  %v9540_v55 = vrot.slane %v6869_v37, 9 }
 0x1fd   : > { %2932 = vst.msk [vmem:[#allocation3 + $0x130] sm:$0xf] %vm1688_vm1, %v2862_v59  ;;  %v5223_v25 = vld [vmem:[#allocation2 + $0xc] sm:$0xf]  ;;  %v4486_v59 = vpop.f32.mrf.mxu1 }
 0x1fe   : > { %v4663_v14 = vsel %vm4599_vm5, %v4479_v32, %v4631_v40  ;;  %v4482_v3 = vadd.f32 %v11842_v33, %v4321_v56  ;;  %5255 = vst.msk [vmem:[#allocation3 + $0x18] sm:$0xf] %vm224_vm0, %v5223_v25  ;;  %v5945_v33 = vrot.slane %v5943_v51, 4  ;;  %v5288_v39 = vld [vmem:[#allocation2 + $0xc] sm:$0xf]  ;;  %v10235_v32 = vld [vmem:[%s14320_s3 + $0x30] sm:$0xff]  }
 0x1ff   : > { %v3420_v5 = vpop.permute.xlu0 %3419  ;;  %v9663_v28 = vpack.c.bf16 %v4663_v14, %v4663_v14  ;;  %v6871_v7 = vld [vmem:[#allocation2 + $0x14] sm:$0x1]  ;;  %v5358_v46 = vshrl.u32 %v5288_v39, 16  ;;  %v5361_v19 = vshll.u32 %v5288_v39, 16  ;;  %v10236_v63 = vld [vmem:[%s14320_s3 + $0x68] sm:$0xff]   ;;  %9906 = vmatpush3.bf16.msra.mxu1 %v10235_v32  ;;  %v10238_v51 = vld [vmem:[%s14320_s3 + $0x60] sm:$0xff]  }
 0x200   : > { %3491 = vst.msk [vmem:[#allocation3 + $0x124] sm:$0xf] %vm1881_vm2, %v3420_v5  ;;  %v6870_v43 = vld [vmem:[#allocation2 + $0x10] sm:$0xf]  ;;  %vm4600_vm6 = vcmp.ge.f32.partialorder %v4482_v3, 0.0  ;;  %v1836_v54 = vpop.permute.xlu1 %1835  ;;  %v6970_v50 = vrot.slane %v6871_v7, 5  ;;  %v5947_v13 = vsel %vm10745_vm13, %v5945_v33, %v5946_v16  ;;  %9907 = vmatprep.subr.bf16.mxu1 %v10236_v63  ;;  %v11936_v33 = vpop.f32.mrf.mxu1 }
 0x201   : > { %v4632_v53 = vmul.f32 0.1, %v4482_v3  ;;  %v6967_v58 = vrot.slane %v6870_v43, 5  ;;  %v4807_v12 = vshrl.u32 %v9663_v28, 16  ;;  %1907 = vst.msk [vmem:[#allocation3 + $0x12c] sm:$0xf] %vm1881_vm2, %v1836_v54 }
 0x202   : > { %v4810_v61 = vshll.u32 %v9663_v28, 16  ;;  %v5224_v15 = vld [vmem:[#allocation2 + $0x10] sm:$0xf]  ;;  %v5360_v28 = vrot.slane %v5358_v46, 4  ;;  %v5363_v43 = vrot.slane %v5361_v19, 5 }
 0x203   : > { %v4664_v21 = vsel %vm4600_vm6, %v4482_v3, %v4632_v53  ;;  %v6968_v60 = vsel %vm10745_vm13, %v9540_v55, %v6967_v58  ;;  %v6969_v45 = vrot.slane %v6967_v58, 4  ;;  %v1305_v29 = vpop.permute.xlu0 %1304  ;;  %v4809_v26 = vrot.slane %v4807_v12, 7  ;;  %v5289_v3 = vld [vmem:[#allocation2 + $0x10] sm:$0xf]  ;;  %5256 = vst.msk [vmem:[#allocation3 + $0x24] sm:$0xf] %vm224_vm0, %v5224_v15  ;;  %9908 = vmatpush3.bf16.msra.mxu1 %v10237_v48 }
 0x204   : > { %v9664_v1 = vpack.c.bf16 %v4664_v21, %v4664_v21  ;;  %7077 = vrot.lane.b32.xlu0 %v6968_v60, %s10363_s10  ;;  %1375 = vst.msk [vmem:[#allocation3 + $0x138] sm:$0xf] %vm1348_vm14, %v1305_v29  ;;  %v3422_v6 = vpop.permute.xlu1 %3421  ;;  %v11925_v7 = vld [vmem:[#allocation2 + $0xc] sm:$0xe]  ;;  %v5367_v16 = vshll.u32 %v5289_v3, 16  ;;  %v5371_v21 = vshrl.u32 %v5289_v3, 16  ;;  %v5364_v39 = vor.u32 %v5363_v43, %v5360_v28  ;;  %9909 = vmatprep.subr.bf16.mxu1 %v10238_v51 }
 0x205   : > { %v6971_v9 = vsel %vm10745_vm13, %v6969_v45, %v6970_v50  ;;  %v4812_v47 = vor.u32 %v4810_v61, %v4809_v26  ;;  %3492 = vst.msk [vmem:[#allocation3 + $0x130] sm:$0xf] %vm1881_vm2, %v3422_v6  ;;  %v4813_v35 = vrot.slane %v4809_v26, 4  ;;  %v5290_v29 = vld [vmem:[#allocation2 + $0x14] sm:$0x1]  ;;  %v9525_v0 = vrot.slane %v11925_v7, 9 }
 0x206   : > { %v4815_v38 = vshrl.u32 %v9664_v1, 16  ;;  %7079 = vrot.lane.b32.xlu1 %v6971_v9, %s10363_s10  ;;  %v4818_v18 = vshll.u32 %v9664_v1, 16  ;;  %v11938_v26 = vld [vmem:[#allocation2 + $0x10] sm:$0xf]  ;;  %v11948_v17 = vrot.slane %v5367_v16, 5  ;;  %v11950_v4 = vrot.slane %v5371_v21, 4 }
 0x207   : > { %v2671_v57 = vpop.permute.xlu0 %2670  ;;  %v5117_v49 = vsel %vm10515_vm7, %v4812_v47, %v5116_v2  ;;  %v9801_v24 = vpop.f32.mrf.mxu0  ;;  %v10240_v2 = vld [vmem:[%s14320_s3 + $0x20] sm:$0xff]   ;;  %v11954_v32 = vrot.slane %v5364_v39, 4  ;;  %v11956_v63 = vld [vmem:[#allocation2 + $0x14] sm:$0x1]  ;;  %v6182_v21 = vld [vmem:[#allocation2 + $0x10] sm:$0xf] }
 0x208   : > { %v4817_v41 = vrot.slane %v4815_v38, 7  ;;  %2740 = vst.msk [vmem:[#allocation3 + $0x13c] sm:$0xf] %vm1348_vm14, %v2671_v57  ;;  %6053 = vrot.lane.b32.xlu0 %v5944_v10, %s10364_s17  ;;  %5118 = vst [vmem:[#allocation2 + $0x18] sm:$0xf] %v5117_v49  ;;  %v1307_v31 = vpop.permute.xlu1 %1306  ;;  %v4489_v47 = vpop.f32.mrf.mxu1  ;;  %v5377_v57 = vshll.u32 %v5290_v29, 16  ;;  %9910 = vmatpush3.bf16.msra.mxu1 %v10240_v2  ;;  %v5374_v3 = vor.u32 %v11950_v4, %v11948_v17 }
 0x209   : > { %1376 = vst.msk [vmem:[#allocation3 + $0x144] sm:$0xf] %vm1348_vm14, %v1307_v31  ;;  %v9802_v56 = vpop.f32.mrf.mxu0  ;;  %v10212_v58 = vld [vmem:[#allocation3 + $0x120] ss:$12 sps:$4 sm:$0xff]   ;;  %v6181_v49 = vld [vmem:[#allocation2 + $0xc] sm:$0xf] }
 0x20a   : > { %v4820_v20 = vor.u32 %v4818_v18, %v4817_v41  ;;  %v4822_v40 = vrot.slane %v4817_v41, 4  ;;  %6055 = vrot.lane.b32.xlu1 %v5947_v13, %s10364_s17  ;;  %v9803_v37 = vadd.f32 %v9802_v56, %v9801_v24  ;;  %v5950_v24 = vrot.slane %v11938_v26, 5  ;;  %v10243_v2 = vld [vmem:[%s14320_s3 + $0x50] sm:$0xff]  }
 0x20b   : > { %v1645_v14 = vpop.permute.xlu0 %1644  ;;  %v9804_v25 = vpop.f32.mrf.mxu0 }
 0x20c   : > { %v4821_v5 = vsel %vm10522_vm8, %v4813_v35, %v4820_v20  ;;  %v5121_v8 = vsel %vm10537_vm10, %v4822_v40, %v5120_v23  ;;  %1715 = vst.msk [vmem:[#allocation3 + $0x138] sm:$0xf] %vm1688_vm1, %v1645_v14  ;;  %v4326_v53 = vadd.f32 %v9803_v37, %v11840_v44  ;;  %v2673_v54 = vpop.permute.xlu1 %2672  ;;  %v10210_v55 = vld [vmem:[#allocation3 + $0x124] ss:$12 sps:$4 sm:$0xff]  }
 0x20d   : > { %5119 = vst.msk [vmem:[#allocation2 + $0x1c] sm:$0xf] %vm224_vm0, %v4821_v5  ;;  %5122 = vst [vmem:[#allocation2 + $0x20] sm:$0x1] %v5121_v8  ;;  %v9805_v12 = vpop.f32.mrf.mxu0  ;;  %4403 = vmatprep.mubr.bf16.mxu0 %v10210_v55  ;;  %v11966_v5 = vrot.slane %v5377_v57, 5  ;;  %v10242_v55 = vld [vmem:[%s14320_s3 + $0x18] sm:$0xff]  }
 0x20e   : > { %2741 = vst.msk [vmem:[#allocation3 + $0x148] sm:$0xf] %vm1348_vm14, %v2673_v54  ;;  %v4487_v60 = vadd.f32 %v4486_v59, %v4326_v53  ;;  %v9806_v45 = vadd.f32 %v9805_v12, %v9804_v25  ;;  %4404 = vmatmul.mubr.bf16.gmra.mxu0 %v10212_v58  ;;  %v10241_v59 = vld [vmem:[%s14320_s3 + $0x58] sm:$0xff]   ;;  %v11968_v8 = vld [vmem:[#allocation2 + $0x10] sm:$0xf] }
 0x20f   : > { %v2864_v50 = vpop.permute.xlu0 %2863  ;;  %v7205_v61 = vld [vmem:[#allocation2 + $0x18] sm:$0xf]  ;;  %v5123_v25 = vld [vmem:[#allocation2 + $0x24] sm:$0xf]  ;;  %v11971_v54 = vld [vmem:[#allocation2 + $0xc] sm:$0xf]  ;;  %9911 = vmatprep.subr.bf16.mxu1 %v10241_v59 }
 0x210   : > { %2933 = vst.msk [vmem:[#allocation3 + $0x13c] sm:$0xf] %vm1688_vm1, %v2864_v50  ;;  %v7397_v1 = vld [vmem:[#allocation2 + $0x18] sm:$0xf]  ;;  %vm4601_vm11 = vcmp.ge.f32.partialorder %v4487_v60, 0.0  ;;  %v4329_v9 = vadd.f32 %v9806_v45, %v11840_v44  ;;  %v1647_v10 = vpop.permute.xlu1 %1646  ;;  %7269 = vrot.lane.b32.xlu0 %v7205_v61, %s10364_s17  ;;  %v5952_v61 = vrot.slane %v5950_v24, 4  ;;  %9912 = vmatpush3.bf16.msra.mxu1 %v10242_v55 }
 0x211   : > { %v4633_v6 = vmul.f32 0.1, %v4487_v60  ;;  %v7446_v27 = vshrl.u32 %v7397_v1, 16  ;;  %1716 = vst.msk [vmem:[#allocation3 + $0x144] sm:$0xf] %vm1688_vm1, %v1647_v10  ;;  %v7449_v38 = vshll.u32 %v7397_v1, 16  ;;  %9913 = vmatprep.subr.bf16.mxu1 %v10243_v2 }
 0x212   : > { %v4490_v46 = vadd.f32 %v4489_v47, %v4329_v9  ;;  %v5953_v1 = vrot.slane %v11956_v63, 5  ;;  %v6431_v39 = vshll.u32 %v11968_v8, 16  ;;  %v5291_v10 = vld [vmem:[#allocation2 + $0x18] sm:$0xf]  ;;  %v6422_v47 = vshrl.u32 %v11971_v54, 16  ;;  %v10245_v63 = vld [vmem:[%s14320_s3 + $0x48] sm:$0xff]  }
 0x213   : > { %v4665_v13 = vsel %vm4601_vm11, %v4487_v60, %v4633_v6  ;;  %v1838_v41 = vpop.permute.xlu0 %1837  ;;  %v7448_v18 = vrot.slane %v7446_v27, 4  ;;  %v7451_v31 = vrot.slane %v7449_v38, 5  ;;  %v6435_v27 = vshrl.u32 %v11968_v8, 16  ;;  %v10244_v38 = vld [vmem:[%s14320_s3 + $0x10] sm:$0xff]  }
 0x214   : > { %v9665_v19 = vpack.c.bf16 %v4665_v13, %v4665_v13  ;;  %v7206_v52 = vld [vmem:[#allocation2 + $0x1c] sm:$0xf]  ;;  %1908 = vst.msk [vmem:[#allocation3 + $0x138] sm:$0xf] %vm1881_vm2, %v1838_v41  ;;  %vm4602_vm12 = vcmp.ge.f32.partialorder %v4490_v46, 0.0  ;;  %v2866_v20 = vpop.permute.xlu1 %2865  ;;  %6245 = vrot.lane.b32.xlu0 %v6181_v49, %s10365_s12  ;;  %v5375_v49 = vrot.slane %v5374_v3, 4  ;;  %9914 = vmatpush3.bf16.msra.mxu1 %v10244_v38 }
 0x215   : > { %v7398_v23 = vld [vmem:[#allocation2 + $0x1c] sm:$0xf]  ;;  %v4634_v35 = vmul.f32 0.1, %v4490_v46  ;;  %7271 = vrot.lane.b32.xlu1 %v7206_v52, %s10364_s17  ;;  %2934 = vst.msk [vmem:[#allocation3 + $0x148] sm:$0xf] %vm1688_vm1, %v2866_v20  ;;  %v7452_v37 = vor.u32 %v7451_v31, %v7448_v18  ;;  %9915 = vmatprep.subr.bf16.mxu1 %v10245_v63 }
 0x216   : > { %v7455_v40 = vshll.u32 %v7398_v23, 16  ;;  %v7459_v56 = vshrl.u32 %v7398_v23, 16  ;;  %v4824_v15 = vshrl.u32 %v9665_v19, 16  ;;  %v7399_v14 = vld [vmem:[#allocation2 + $0x20] sm:$0x1]  ;;  %v4827_v12 = vshll.u32 %v9665_v19, 16 }
 0x217   : > { %v4666_v28 = vsel %vm4602_vm12, %v4490_v46, %v4634_v35  ;;  %v3424_v48 = vpop.permute.xlu0 %3423  ;;  %v7465_v53 = vshll.u32 %v7399_v14, 16  ;;  %v7453_v60 = vrot.slane %v7452_v37, 4  ;;  %v11980_v29 = vld [vmem:[#allocation2 + $0x1c] sm:$0xf]  ;;  %v5127_v52 = vld [vmem:[#allocation2 + $0x2c] sm:$0x1] }
 0x218   : > { %v7457_v43 = vrot.slane %v7455_v40, 5  ;;  %v7461_v51 = vrot.slane %v7459_v56, 4  ;;  %v11976_v58 = vrot.slane %v4824_v15, 7  ;;  %v9666_v16 = vpack.c.bf16 %v4666_v28, %v4666_v28  ;;  %3493 = vst.msk [vmem:[#allocation3 + $0x13c] sm:$0xf] %vm1881_vm2, %v3424_v48  ;;  %v1840_v45 = vpop.permute.xlu1 %1839 }
 0x219   : > { %6247 = vrot.lane.b32.xlu1 %v6182_v21, %s10365_s12  ;;  %1909 = vst.msk [vmem:[#allocation3 + $0x144] sm:$0xf] %vm1881_vm2, %v1840_v45  ;;  %v7467_v13 = vrot.slane %v7465_v53, 5  ;;  %v6974_v31 = vrot.slane %v11980_v29, 5  ;;  %v6872_v40 = vld [vmem:[#allocation2 + $0x18] sm:$0xe]  ;;  %v5370_v53 = vsel %vm10529_vm9, %v11954_v32, %v11948_v17 }
 0x21a   : > { %v7462_v50 = vor.u32 %v7461_v51, %v7457_v43  ;;  %v4829_v6 = vor.u32 %v4827_v12, %v11976_v58  ;;  %v4832_v9 = vshrl.u32 %v9666_v16, 16  ;;  %v7458_v4 = vsel %vm10529_vm9, %v7453_v60, %v7457_v43  ;;  %v6874_v28 = vld [vmem:[#allocation2 + $0x20] sm:$0x1]  ;;  %v7957_v48 = vld [vmem:[#allocation2 + $0x18] sm:$0xe] }
 0x21b   : > { %v1309_v46 = vpop.permute.xlu0 %1308  ;;  %v4835_v19 = vshll.u32 %v9666_v16, 16  ;;  %7829 = vrot.lane.b32.xlu0 %v7458_v4, %s10365_s12  ;;  %v9807_v23 = vpop.f32.mrf.mxu0  ;;  %v5382_v56 = vshrl.u32 %v5291_v10, 16  ;;  %v5385_v59 = vshll.u32 %v5291_v10, 16  ;;  %v12008_v15 = vrot.slane %v6431_v39, 5  ;;  %v12029_v26 = vld [vmem:[#allocation2 + $0x1c] sm:$0xf] }
 0x21c   : > { %v7463_v57 = vrot.slane %v7462_v50, 4  ;;  %v5124_v41 = vsel %vm10515_vm7, %v4829_v6, %v5123_v25  ;;  %v4834_v18 = vrot.slane %v4832_v9, 7  ;;  %1377 = vst.msk [vmem:[#allocation3 + $0x150] sm:$0xf] %vm1348_vm14, %v1309_v46  ;;  %v3426_v35 = vpop.permute.xlu1 %3425  ;;  %v4830_v37 = vrot.slane %v11976_v58, 4 }
 0x21d   : > { %5125 = vst [vmem:[#allocation2 + $0x24] sm:$0xf] %v5124_v41  ;;  %3494 = vst.msk [vmem:[#allocation3 + $0x148] sm:$0xf] %vm1881_vm2, %v3426_v35  ;;  %v9808_v25 = vpop.f32.mrf.mxu0  ;;  %v12019_v43 = vsel %vm10745_vm13, %v9525_v0, %v5950_v24  ;;  %v12027_v58 = vsel %vm10745_vm13, %v5952_v61, %v5953_v1  ;;  %v12031_v7 = vld [vmem:[#allocation2 + $0x1c] sm:$0xf]  ;;  %v5380_v16 = vsel %vm10529_vm9, %v5375_v49, %v11966_v5 }
 0x21e   : > { %v7468_v20 = vsel %vm10529_vm9, %v7463_v57, %v7467_v13  ;;  %v4837_v14 = vor.u32 %v4835_v19, %v4834_v18  ;;  %v4839_v3 = vrot.slane %v4834_v18, 4  ;;  %v9809_v51 = vadd.f32 %v9808_v25, %v9807_v23  ;;  %v10246_v24 = vld [vmem:[%s14320_s3 + $0x8] sm:$0xff]   ;;  %v5225_v60 = vld [vmem:[#allocation2 + $0x18] sm:$0xf]  ;;  %v5226_v39 = vld [vmem:[#allocation2 + $0x1c] sm:$0xf] }
 0x21f   : > { %7831 = vrot.lane.b32.xlu1 %v7468_v20, %s10365_s12  ;;  %v2675_v55 = vpop.permute.xlu0 %2674  ;;  %v6425_v0 = vshll.u32 %v11971_v54, 16  ;;  %5721 = vrot.lane.b32.xlu0 %v5370_v53, %s10363_s10  ;;  %v9810_v32 = vpop.f32.mrf.mxu0  ;;  %v6976_v21 = vrot.slane %v6974_v31, 4  ;;  %v9541_v29 = vrot.slane %v6872_v40, 9  ;;  %v12048_v61 = vrot.slane %v5382_v56, 4  ;;  %5257 = vst.msk [vmem:[#allocation3 + $0x30] sm:$0xf] %vm224_vm0, %v5225_v60 }
 0x220   : > { %v4838_v12 = vsel %vm10522_vm8, %v4830_v37, %v4837_v14  ;;  %v5128_v17 = vsel %vm10537_vm10, %v4839_v3, %v5127_v52  ;;  %2742 = vst.msk [vmem:[#allocation3 + $0x154] sm:$0xf] %vm1348_vm14, %v2675_v55  ;;  %v4334_v45 = vadd.f32 %v9809_v51, %v11840_v44  ;;  %v1311_v50 = vpop.permute.xlu1 %1310  ;;  %v12050_v1 = vrot.slane %v5385_v59, 5  ;;  %9916 = vmatpush3.bf16.msra.mxu1 %v10246_v24  ;;  %v3823_v46 = vld [vmem:[#allocation3 + $0x138] sm:$0xff]  ;;  %v7959_v19 = vld [vmem:[#allocation2 + $0x20] sm:$0x1] }
 0x221   : > { %5129 = vst [vmem:[#allocation2 + $0x2c] sm:$0x1] %v5128_v17  ;;  %5126 = vst.msk [vmem:[#allocation2 + $0x28] sm:$0xf] %vm224_vm0, %v4838_v12  ;;  %v9811_v5 = vpop.f32.mrf.mxu0  ;;  %v6977_v2 = vrot.slane %v6874_v28, 5  ;;  %v5391_v6 = vshll.u32 %v12029_v26, 16  ;;  %v6975_v57 = vsel %vm10745_vm13, %v9541_v29, %v6974_v31 }
 0x222   : > { %1378 = vst.msk [vmem:[#allocation3 + $0x15c] sm:$0xf] %vm1348_vm14, %v1311_v50  ;;  %v9556_v9 = vrot.slane %v7957_v48, 9  ;;  %v8055_v10 = vrot.slane %v12031_v7, 5  ;;  %v4495_v38 = vadd.f32 %v11896_v62, %v4334_v45  ;;  %v9812_v4 = vadd.f32 %v9811_v5, %v9810_v32  ;;  %v5293_v28 = vld [vmem:[#allocation2 + $0x20] sm:$0x1] }
 0x223   : > { %5723 = vrot.lane.b32.xlu1 %v5380_v16, %s10363_s10  ;;  %5258 = vst.msk [vmem:[#allocation3 + $0x3c] sm:$0xf] %vm224_vm0, %v5226_v39  ;;  %v1649_v13 = vpop.permute.xlu0 %1648  ;;  %v5395_v49 = vshrl.u32 %v12029_v26, 16  ;;  %7081 = vrot.lane.b32.xlu0 %v6975_v57, %s10363_s10  ;;  %v6978_v41 = vsel %vm10745_vm13, %v6976_v21, %v6977_v2  ;;  %v12070_v52 = vrot.slane %v6422_v47, 4  ;;  %v12072_v23 = vrot.slane %v6425_v0, 5  ;;  %v10247_v32 = vld [vmem:[%s14320_s3 + $0x40] sm:$0xff]  }
 0x224   : > { %1717 = vst.msk [vmem:[#allocation3 + $0x150] sm:$0xf] %vm1688_vm1, %v1649_v13  ;;  %v7400_v18 = vld [vmem:[#allocation2 + $0x24] sm:$0xf]  ;;  %v8056_v62 = vsel %vm10745_vm13, %v9556_v9, %v8055_v10  ;;  %vm4603_vm3 = vcmp.ge.f32.partialorder %v4495_v38, 0.0  ;;  %v4337_v63 = vadd.f32 %v9812_v4, %v11840_v44  ;;  %v2677_v35 = vpop.permute.xlu1 %2676  ;;  %v3825_v20 = vld [vmem:[#allocation3 + $0x144] sm:$0xff]  ;;  %v5388_v56 = vor.u32 %v12050_v1, %v12048_v61  ;;  %9917 = vmatprep.subr.bf16.mxu1 %v10247_v32 }
 0x225   : > { %v4635_v31 = vmul.f32 0.1, %v4495_v38  ;;  %v10215_v40 = vld [vmem:[#allocation3 + $0x13c] ss:$12 sps:$4 sm:$0xff]   ;;  %8197 = vst.msk [vmem:[#allocation3 + $0x8] sm:$0xf] %vm224_vm0, %v8056_v62  ;;  %v9449_v54 = vcombine.low %v3823_v46, %v3825_v20 }
 0x226   : > { %2743 = vst.msk [vmem:[#allocation3 + $0x160] sm:$0xf] %vm1348_vm14, %v2677_v35  ;;  %v7470_v47 = vshrl.u32 %v7400_v18, 16  ;;  %v7473_v59 = vshll.u32 %v7400_v18, 16  ;;  %v12080_v37 = vrot.slane %v5391_v6, 5  ;;  %v4498_v3 = vadd.f32 %v11936_v33, %v4337_v63  ;;  %4411 = vmatprep.mubr.bf16.mxu0 %v10215_v40 }
 0x227   : > { %7083 = vrot.lane.b32.xlu1 %v6978_v41, %s10363_s10  ;;  %v4667_v14 = vsel %vm4603_vm3, %v4495_v38, %v4635_v31  ;;  %v2868_v25 = vpop.permute.xlu0 %2867  ;;  %v12083_v48 = vrot.slane %v5395_v49, 4  ;;  %v8057_v51 = vrot.slane %v8055_v10, 4  ;;  %6057 = vrot.lane.b32.xlu0 %v12019_v43, %s10364_s17  ;;  %v8058_v0 = vrot.slane %v7959_v19, 5  ;;  %v5851_v21 = vld [vmem:[#allocation2 + $0x18] sm:$0xe]  ;;  %v12108_v38 = vpop.f32.mrf.mxu1 }
 0x228   : > { %v9667_v53 = vpack.c.bf16 %v4667_v14, %v4667_v14  ;;  %2935 = vst.msk [vmem:[#allocation3 + $0x154] sm:$0xf] %vm1688_vm1, %v2868_v25  ;;  %4412 = vmatmul.mubr.bf16.gmra.mxu0 %v9449_v54  ;;  %v7401_v55 = vld [vmem:[#allocation2 + $0x28] sm:$0xf]  ;;  %v7472_v26 = vrot.slane %v7470_v47, 4  ;;  %v7475_v7 = vrot.slane %v7473_v59, 5  ;;  %v1651_v33 = vpop.permute.xlu1 %1650  ;;  %v6428_v14 = vor.u32 %v12072_v23, %v12070_v52 }
 0x229   : > { %vm4604_vm4 = vcmp.ge.f32.partialorder %v4498_v3, 0.0  ;;  %v4636_v24 = vmul.f32 0.1, %v4498_v3  ;;  %v7479_v12 = vshll.u32 %v7401_v55, 16  ;;  %v7483_v17 = vshrl.u32 %v7401_v55, 16 }
 0x22a   : > { %v4841_v16 = vshrl.u32 %v9667_v53, 16  ;;  %1718 = vst.msk [vmem:[#allocation3 + $0x15c] sm:$0xf] %vm1688_vm1, %v1651_v33  ;;  %v5401_v43 = vshll.u32 %v5293_v28, 16  ;;  %v12094_v60 = vld [vmem:[#allocation2 + $0x1c] sm:$0xf]  ;;  %v8059_v45 = vsel %vm10745_vm13, %v8057_v51, %v8058_v0  ;;  %v7476_v1 = vor.u32 %v7475_v7, %v7472_v26 }
 0x22b   : > { %6059 = vrot.lane.b32.xlu1 %v12027_v58, %s10364_s17  ;;  %v4668_v50 = vsel %vm4604_vm4, %v4498_v3, %v4636_v24  ;;  %v7207_v29 = vld [vmem:[#allocation2 + $0x24] sm:$0xf]  ;;  %v1842_v61 = vpop.permute.xlu0 %1841  ;;  %v12098_v39 = vrot.slane %v7479_v12, 5  ;;  %v7485_v5 = vrot.slane %v7483_v17, 4  ;;  %8198 = vst.msk [vmem:[#allocation3 + $0x14] sm:$0xf] %vm224_vm0, %v8059_v45  ;;  %v5398_v57 = vor.u32 %v12083_v48, %v12080_v37 }
 0x22c   : > { %v10248_v58 = vld [vmem:[%s14320_s3] sm:$0xff]   ;;  %v12104_v2 = vrot.slane %v4841_v16, 7  ;;  %v4844_v6 = vshll.u32 %v9667_v53, 16  ;;  %v5130_v9 = vld [vmem:[#allocation2 + $0x30] sm:$0xf]  ;;  %v9668_v10 = vpack.c.bf16 %v4668_v50, %v4668_v50  ;;  %7273 = vrot.lane.b32.xlu0 %v7207_v29, %s10364_s17  ;;  %v2870_v13 = vpop.permute.xlu1 %2869  ;;  %v12113_v18 = vrot.slane %v5388_v56, 4 }
 0x22d   : > { %1910 = vst.msk [vmem:[#allocation3 + $0x150] sm:$0xf] %vm1881_vm2, %v1842_v61  ;;  %v7402_v4 = vld [vmem:[#allocation2 + $0x2c] sm:$0x1]  ;;  %v7208_v46 = vld [vmem:[#allocation2 + $0x28] sm:$0xf]  ;;  %v7486_v41 = vor.u32 %v7485_v5, %v12098_v39  ;;  %9918 = vmatpush3.bf16.msra.mxu1 %v10248_v58 }
 0x22e   : > { %v6183_v49 = vld [vmem:[#allocation2 + $0x18] sm:$0xf]  ;;  %v5957_v19 = vrot.slane %v12094_v60, 5  ;;  %v4846_v62 = vor.u32 %v4844_v6, %v12104_v2  ;;  %v4849_v31 = vshrl.u32 %v9668_v10, 16  ;;  %2936 = vst.msk [vmem:[#allocation3 + $0x160] sm:$0xf] %vm1688_vm1, %v2870_v13  ;;  %10105 = vmatprep.subr.bf16.mxu1 %v11822_v11  ;;  %v4502_v11 = vpop.f32.mrf.mxu1  ;;  %v5394_v52 = vsel %vm10529_vm9, %v12113_v18, %v12080_v37 }
 0x22f   : > { %7275 = vrot.lane.b32.xlu1 %v7208_v46, %s10364_s17  ;;  %v12119_v63 = vrot.slane %v5401_v43, 5  ;;  %v9526_v35 = vrot.slane %v5851_v21, 9  ;;  %v12121_v20 = vld [vmem:[#allocation2 + $0x20] sm:$0x1]  ;;  %v5134_v40 = vld [vmem:[#allocation2 + $0x38] sm:$0x1]  ;;  %v3428_v54 = vpop.permute.xlu0 %3427 }
 0x230   : > { %v7477_v56 = vrot.slane %v7476_v1, 4  ;;  %v7489_v47 = vshll.u32 %v7402_v4, 16  ;;  %v6876_v59 = vld [vmem:[#allocation2 + $0x28] sm:$0xf]  ;;  %v5131_v3 = vsel %vm10515_vm7, %v4846_v62, %v5130_v9  ;;  %v4851_v25 = vrot.slane %v4849_v31, 7  ;;  %6249 = vrot.lane.b32.xlu0 %v6183_v49, %s10365_s12  ;;  %v9813_v48 = vpop.f32.mrf.mxu0  ;;  %v1844_v55 = vpop.permute.xlu1 %1843 }
 0x231   : > { %v4852_v28 = vshll.u32 %v9668_v10, 16  ;;  %v6184_v51 = vld [vmem:[#allocation2 + $0x1c] sm:$0xf]  ;;  %3495 = vst.msk [vmem:[#allocation3 + $0x154] sm:$0xf] %vm1881_vm2, %v3428_v54  ;;  %v12130_v53 = vrot.slane %v5398_v57, 4  ;;  %v12138_v7 = vsel %vm10745_vm13, %v9526_v35, %v5957_v19  ;;  %v12156_v58 = vpop.f32.mrf.mxu1 }
 0x232   : > { %5132 = vst [vmem:[#allocation2 + $0x30] sm:$0xf] %v5131_v3  ;;  %v7487_v26 = vrot.slane %v7486_v41, 4  ;;  %v6875_v23 = vld [vmem:[#allocation2 + $0x24] sm:$0xe]  ;;  %v5960_v0 = vrot.slane %v12121_v20, 5  ;;  %v9814_v32 = vpop.f32.mrf.mxu0  ;;  %v7482_v43 = vsel %vm10529_vm9, %v7477_v56, %v12098_v39 }
 0x233   : > { %v12141_v24 = vld [vmem:[#allocation2 + $0x24] sm:$0xf]  ;;  %v4847_v33 = vrot.slane %v12104_v2, 4  ;;  %v4854_v12 = vor.u32 %v4852_v28, %v4851_v25  ;;  %v4856_v17 = vrot.slane %v4851_v25, 4  ;;  %1911 = vst.msk [vmem:[#allocation3 + $0x15c] sm:$0xf] %vm1881_vm2, %v1844_v55  ;;  %6251 = vrot.lane.b32.xlu1 %v6184_v51, %s10365_s12  ;;  %v9815_v37 = vadd.f32 %v9814_v32, %v9813_v48  ;;  %v1313_v60 = vpop.permute.xlu0 %1312 }
 0x234   : > { %v6981_v16 = vrot.slane %v6876_v59, 5  ;;  %v7491_v21 = vrot.slane %v7489_v47, 5  ;;  %v12149_v45 = vrot.slane %v5957_v19, 4  ;;  %v7960_v50 = vld [vmem:[#allocation2 + $0x24] sm:$0xe]  ;;  %7833 = vrot.lane.b32.xlu0 %v7482_v43, %s10365_s12  ;;  %v9816_v5 = vpop.f32.mrf.mxu0  ;;  %v5404_v39 = vsel %vm10529_vm9, %v12130_v53, %v12119_v63  ;;  %v3430_v9 = vpop.permute.xlu1 %3429 }
 0x235   : > { %v7961_v29 = vld [vmem:[#allocation2 + $0x28] sm:$0xf]  ;;  %v4855_v61 = vsel %vm10522_vm8, %v4847_v33, %v4854_v12  ;;  %v5135_v1 = vsel %vm10537_vm10, %v4856_v17, %v5134_v40  ;;  %1379 = vst.msk [vmem:[#allocation3 + $0x168] sm:$0xf] %vm1348_vm14, %v1313_v60  ;;  %v6877_v2 = vld [vmem:[#allocation2 + $0x2c] sm:$0x1]  ;;  %v4342_v10 = vadd.f32 %v9815_v37, %v11840_v44  ;;  %v4505_v47 = vpop.f32.mrf.mxu1 }
 0x236   : > { %v6429_v6 = vrot.slane %v6428_v14, 4  ;;  %5133 = vst.msk [vmem:[#allocation2 + $0x34] sm:$0xf] %vm224_vm0, %v4855_v61  ;;  %5136 = vst [vmem:[#allocation2 + $0x38] sm:$0x1] %v5135_v1  ;;  %v7492_v4 = vsel %vm10529_vm9, %v7487_v26, %v7491_v21  ;;  %v9542_v57 = vrot.slane %v6875_v23, 9  ;;  %v9817_v49 = vpop.f32.mrf.mxu0 }
 0x237   : > { %v5295_v13 = vld [vmem:[#allocation2 + $0x28] sm:$0xf]  ;;  %v5406_v46 = vshrl.u32 %v12141_v24, 16  ;;  %3496 = vst.msk [vmem:[#allocation3 + $0x160] sm:$0xf] %vm1881_vm2, %v3430_v9  ;;  %7835 = vrot.lane.b32.xlu1 %v7492_v4, %s10365_s12  ;;  %v6983_v41 = vrot.slane %v6981_v16, 4  ;;  %v9818_v31 = vadd.f32 %v9817_v49, %v9816_v5  ;;  %v4503_v63 = vadd.f32 %v4502_v11, %v4342_v10  ;;  %v2679_v35 = vpop.permute.xlu0 %2678 }
 0x238   : > { %v5409_v18 = vshll.u32 %v12141_v24, 16  ;;  %v9557_v19 = vrot.slane %v7960_v50, 9  ;;  %v8062_v62 = vrot.slane %v7961_v29, 5  ;;  %v6982_v44 = vsel %vm10745_vm13, %v9542_v57, %v6981_v16  ;;  %v12173_v56 = vld [vmem:[#allocation2 + $0x2c] sm:$0x1]  ;;  %5725 = vrot.lane.b32.xlu0 %v5394_v52, %s10363_s10  ;;  %v1315_v51 = vpop.permute.xlu1 %1314 }
 0x239   : > { %v6984_v40 = vrot.slane %v6877_v2, 5  ;;  %v5227_v54 = vld [vmem:[#allocation2 + $0x24] sm:$0xf]  ;;  %2744 = vst.msk [vmem:[#allocation3 + $0x16c] sm:$0xf] %vm1348_vm14, %v2679_v35  ;;  %v5415_v14 = vshll.u32 %v5295_v13, 16  ;;  %v6434_v28 = vsel %vm10529_vm9, %v6429_v6, %v12008_v15 }
 0x23a   : > { %v7403_v59 = vld [vmem:[#allocation2 + $0x30] sm:$0xf]  ;;  %v5419_v3 = vshrl.u32 %v5295_v13, 16  ;;  %v8063_v25 = vsel %vm10745_vm13, %v9557_v19, %v8062_v62  ;;  %5259 = vst.msk [vmem:[#allocation3 + $0x48] sm:$0xf] %vm224_vm0, %v5227_v54  ;;  %vm4605_vm5 = vcmp.ge.f32.partialorder %v4503_v63, 0.0 }
 0x23b   : > { %v4637_v48 = vmul.f32 0.1, %v4503_v63  ;;  %v12186_v11 = vld [vmem:[%s14319_s2] ss:$0 sm:$0xff]  ;;  %v12189_v55 = vrot.slane %v5406_v46, 4  ;;  %5727 = vrot.lane.b32.xlu1 %v5404_v39, %s10363_s10  ;;  %v6985_v52 = vsel %vm10745_vm13, %v6983_v41, %v6984_v40  ;;  %v7494_v23 = vshrl.u32 %v7403_v59, 16  ;;  %v1653_v32 = vpop.permute.xlu0 %1652 }
 0x23c   : > { %v4345_v53 = vadd.f32 %v12186_v11, %v9818_v31  ;;  %v7962_v26 = vld [vmem:[#allocation2 + $0x2c] sm:$0x1]  ;;  %8199 = vst.msk [vmem:[#allocation3 + $0x20] sm:$0xf] %vm224_vm0, %v8063_v25  ;;  %6837 = vst.msk [vmem:[#allocation3 + $0x4] sm:$0xf] %vm224_vm0, %v6434_v28  ;;  %7085 = vrot.lane.b32.xlu0 %v6982_v44, %s10363_s10  ;;  %v2681_v5 = vpop.permute.xlu1 %2680 }
 0x23d   : > { %1380 = vst.msk [vmem:[#allocation3 + $0x174] sm:$0xf] %vm1348_vm14, %v1315_v51  ;;  %v12197_v24 = vrot.slane %v5409_v18, 5  ;;  %v5425_v33 = vshll.u32 %v12173_v56, 16  ;;  %v4669_v12 = vsel %vm4605_vm5, %v4503_v63, %v4637_v48  ;;  %v7497_v16 = vshll.u32 %v7403_v59, 16 }
 0x23e   : > { %v4506_v17 = vadd.f32 %v4505_v47, %v4345_v53  ;;  %v8064_v37 = vrot.slane %v8062_v62, 4  ;;  %v9669_v43 = vpack.c.bf16 %v4669_v12, %v4669_v12  ;;  %1719 = vst.msk [vmem:[#allocation3 + $0x168] sm:$0xf] %vm1688_vm1, %v1653_v32  ;;  %v7404_v21 = vld [vmem:[#allocation2 + $0x34] sm:$0xf]  ;;  %v12202_v60 = vrot.slane %v5415_v14, 5 }
 0x23f   : > { %v12204_v50 = vrot.slane %v5419_v3, 4  ;;  %v8065_v29 = vrot.slane %v7962_v26, 5  ;;  %v12206_v61 = vld [vmem:[#allocation2 + $0x14] sm:$0x1]  ;;  %v7503_v39 = vshll.u32 %v7404_v21, 16  ;;  %v7507_v2 = vshrl.u32 %v7404_v21, 16  ;;  %7087 = vrot.lane.b32.xlu1 %v6985_v52, %s10363_s10  ;;  %v2872_v46 = vpop.permute.xlu0 %2871 }
 0x240   : > { %vm4606_vm6 = vcmp.ge.f32.partialorder %v4506_v17, 0.0  ;;  %v4638_v1 = vmul.f32 0.1, %v4506_v17  ;;  %v4858_v6 = vshrl.u32 %v9669_v43, 16  ;;  %v4861_v9 = vshll.u32 %v9669_v43, 16  ;;  %6061 = vrot.lane.b32.xlu0 %v12138_v7, %s10364_s17  ;;  %v1655_v40 = vpop.permute.xlu1 %1654 }
 0x241   : > { %2745 = vst.msk [vmem:[#allocation3 + $0x178] sm:$0xf] %vm1348_vm14, %v2681_v5  ;;  %v12210_v10 = vrot.slane %v7494_v23, 4  ;;  %v10217_v4 = vld [vmem:[#allocation3 + $0x154] ss:$12 sps:$4 sm:$0xff]   ;;  %v8066_v57 = vsel %vm10745_vm13, %v8064_v37, %v8065_v29  ;;  %v7499_v49 = vrot.slane %v7497_v16, 5  ;;  %v5961_v56 = vsel %vm10745_vm13, %v12149_v45, %v5960_v0 }
 0x242   : > { %v4670_v13 = vsel %vm4606_vm6, %v4506_v17, %v4638_v1  ;;  %v12214_v41 = vrot.slane %v7503_v39, 5  ;;  %v7509_v18 = vrot.slane %v7507_v2, 4  ;;  %v10219_v19 = vld [vmem:[#allocation3 + $0x150] ss:$12 sps:$4 sm:$0xff]   ;;  %8200 = vst.msk [vmem:[#allocation3 + $0x2c] sm:$0xf] %vm224_vm0, %v8066_v57  ;;  %4419 = vmatprep.mubr.bf16.mxu0 %v10217_v4  ;;  %v5412_v54 = vor.u32 %v12197_v24, %v12189_v55 }
 0x243   : > { %v12217_v62 = vrot.slane %v4858_v6, 7  ;;  %v9670_v31 = vpack.c.bf16 %v4670_v13, %v4670_v13  ;;  %2937 = vst.msk [vmem:[#allocation3 + $0x16c] sm:$0xf] %vm1688_vm1, %v2872_v46  ;;  %v7963_v63 = vld [vmem:[#allocation2 + $0x30] sm:$0xe]  ;;  %v12224_v44 = vrot.slane %v6435_v27, 4  ;;  %4420 = vmatmul.mubr.bf16.gmra.mxu0 %v10219_v19  ;;  %v5422_v7 = vor.u32 %v12204_v50, %v12202_v60  ;;  %6063 = vrot.lane.b32.xlu1 %v5961_v56, %s10364_s17  ;;  %v1846_v25 = vpop.permute.xlu0 %1845 }
 0x244   : > { %v5137_v35 = vld [vmem:[#allocation2 + $0x3c] sm:$0xf]  ;;  %v6441_v47 = vshll.u32 %v12206_v61, 16  ;;  %1720 = vst.msk [vmem:[#allocation3 + $0x174] sm:$0xf] %vm1688_vm1, %v1655_v40  ;;  %v12241_v59 = vrot.slane %v5425_v33, 5  ;;  %v7500_v28 = vor.u32 %v7499_v49, %v12210_v10  ;;  %v7510_v48 = vor.u32 %v7509_v18, %v12214_v41  ;;  %v2874_v17 = vpop.permute.xlu1 %2873 }
 0x245   : > { %v4863_v8 = vor.u32 %v4861_v9, %v12217_v62  ;;  %v4866_v27 = vshrl.u32 %v9670_v31, 16  ;;  %v12239_v20 = vld [vmem:[#allocation2 + $0x38] sm:$0x1]  ;;  %v7964_v0 = vld [vmem:[#allocation2 + $0x34] sm:$0xf]  ;;  %v4864_v45 = vrot.slane %v12217_v62, 4  ;;  %v9819_v23 = vpop.f32.mrf.mxu0 }
 0x246   : > { %v5141_v14 = vld [vmem:[#allocation2 + $0x44] sm:$0x1]  ;;  %v7209_v3 = vld [vmem:[#allocation2 + $0x30] sm:$0xf]  ;;  %v7965_v51 = vld [vmem:[#allocation2 + $0x38] sm:$0x1] }
 0x247   : > { %v9558_v53 = vrot.slane %v7963_v63, 9  ;;  %v5138_v55 = vsel %vm10515_vm7, %v4863_v8, %v5137_v35  ;;  %v4868_v26 = vrot.slane %v4866_v27, 7  ;;  %v4869_v52 = vshll.u32 %v9670_v31, 16  ;;  %7277 = vrot.lane.b32.xlu0 %v7209_v3, %s10364_s17  ;;  %1912 = vst.msk [vmem:[#allocation3 + $0x168] sm:$0xf] %vm1881_vm2, %v1846_v25  ;;  %v9820_v5 = vpop.f32.mrf.mxu0  ;;  %v3432_v4 = vpop.permute.xlu0 %3431 }
 0x248   : > { %v12250_v24 = vld [vmem:[#allocation2 + $0x24] sm:$0xe]  ;;  %v8069_v33 = vrot.slane %v7964_v0, 5  ;;  %v5297_v12 = vld [vmem:[#allocation2 + $0x30] sm:$0xf]  ;;  %v7513_v37 = vshll.u32 %v12239_v20, 16  ;;  %v9821_v9 = vadd.f32 %v9820_v5, %v9819_v23  ;;  %v1848_v56 = vpop.permute.xlu1 %1847 }
 0x249   : > { %5139 = vst [vmem:[#allocation2 + $0x3c] sm:$0xf] %v5138_v55  ;;  %v7210_v32 = vld [vmem:[#allocation2 + $0x34] sm:$0xf]  ;;  %v6185_v16 = vld [vmem:[#allocation2 + $0x24] sm:$0xf]  ;;  %v4871_v29 = vor.u32 %v4869_v52, %v4868_v26  ;;  %v9822_v19 = vpop.f32.mrf.mxu0 }
 0x24a   : > { %v12253_v43 = vrot.slane %v5412_v54, 4  ;;  %v12255_v21 = vrot.slane %v5422_v7, 4  ;;  %v8072_v50 = vrot.slane %v7965_v51, 5  ;;  %v4873_v1 = vrot.slane %v4868_v26, 4  ;;  %2938 = vst.msk [vmem:[#allocation3 + $0x178] sm:$0xf] %vm1688_vm1, %v2874_v17  ;;  %7279 = vrot.lane.b32.xlu1 %v7210_v32, %s10364_s17 }
 0x24b   : > { %v12259_v39 = vld [vmem:[#allocation2 + $0x28] sm:$0xf]  ;;  %v8070_v2 = vsel %vm10745_vm13, %v9558_v53, %v8069_v33  ;;  %v8071_v6 = vrot.slane %v8069_v33, 4  ;;  %v7501_v10 = vrot.slane %v7500_v28, 4  ;;  %v7511_v57 = vrot.slane %v7510_v48, 4  ;;  %6253 = vrot.lane.b32.xlu0 %v6185_v16, %s10365_s12  ;;  %v9823_v20 = vpop.f32.mrf.mxu0 }
 0x24c   : > { %v12263_v13 = vld [vmem:[#allocation2 + $0x2c] sm:$0x1]  ;;  %8201 = vst.msk [vmem:[#allocation3 + $0x38] sm:$0xf] %vm224_vm0, %v8070_v2  ;;  %v5430_v46 = vshrl.u32 %v5297_v12, 16  ;;  %v4872_v49 = vsel %vm10522_vm8, %v4864_v45, %v4871_v29  ;;  %v5142_v18 = vsel %vm10537_vm10, %v4873_v1, %v5141_v14  ;;  %v5433_v35 = vshll.u32 %v5297_v12, 16  ;;  %v3434_v17 = vpop.permute.xlu1 %3433 }
 0x24d   : > { %v6186_v62 = vld [vmem:[#allocation2 + $0x28] sm:$0xf]  ;;  %3497 = vst.msk [vmem:[#allocation3 + $0x16c] sm:$0xf] %vm1881_vm2, %v3432_v4  ;;  %v6879_v31 = vld [vmem:[#allocation2 + $0x34] sm:$0xf]  ;;  %v8073_v63 = vsel %vm10745_vm13, %v8071_v6, %v8072_v50  ;;  %v4350_v40 = vadd.f32 %v12186_v11, %v9821_v9  ;;  %v5418_v45 = vsel %vm10529_vm9, %v12253_v43, %v12202_v60  ;;  %v5428_v14 = vsel %vm10529_vm9, %v12255_v21, %v12241_v59  ;;  %v5718_v60 = vpop.permute.xlu0 %5717 }
 0x24e   : > { %5143 = vst [vmem:[#allocation2 + $0x44] sm:$0x1] %v5142_v18  ;;  %5140 = vst.msk [vmem:[#allocation2 + $0x40] sm:$0xf] %vm224_vm0, %v4872_v49  ;;  %v9527_v54 = vrot.slane %v12250_v24, 9  ;;  %v5964_v7 = vrot.slane %v12259_v39, 5  ;;  %6255 = vrot.lane.b32.xlu1 %v6186_v62, %s10365_s12  ;;  %v9824_v48 = vadd.f32 %v9823_v20, %v9822_v19  ;;  %v7506_v51 = vsel %vm10529_vm9, %v7501_v10, %v12214_v41 }
 0x24f   : > { %8202 = vst.msk [vmem:[#allocation3 + $0x44] sm:$0xf] %vm224_vm0, %v8073_v63  ;;  %v5298_v8 = vld [vmem:[#allocation2 + $0x34] sm:$0xf]  ;;  %v5228_v27 = vld [vmem:[#allocation2 + $0x28] sm:$0xf]  ;;  %v4511_v28 = vadd.f32 %v12108_v38, %v4350_v40  ;;  %7837 = vrot.lane.b32.xlu0 %v7506_v51, %s10365_s12 }
 0x250   : > { %1913 = vst.msk [vmem:[#allocation3 + $0x174] sm:$0xf] %vm1881_vm2, %v1848_v56  ;;  %v7515_v0 = vrot.slane %v7513_v37, 5  ;;  %v6878_v3 = vld [vmem:[#allocation2 + $0x30] sm:$0xe]  ;;  %v5967_v25 = vrot.slane %v12263_v13, 5  ;;  %v4353_v12 = vadd.f32 %v12186_v11, %v9824_v48  ;;  %v5720_v62 = vpop.permute.xlu1 %5719 }
 0x251   : > { %5260 = vst.msk [vmem:[#allocation3 + $0x54] sm:$0xf] %vm224_vm0, %v5228_v27  ;;  %v6988_v53 = vrot.slane %v6879_v31, 5  ;;  %v6880_v55 = vld [vmem:[#allocation2 + $0x38] sm:$0x1]  ;;  %v12298_v23 = vrot.slane %v5430_v46, 4 }
 0x252   : > { %v5229_v26 = vld [vmem:[#allocation2 + $0x30] sm:$0xf]  ;;  %v7516_v59 = vsel %vm10529_vm9, %v7511_v57, %v7515_v0  ;;  %v7406_v52 = vld [vmem:[#allocation2 + $0x3c] sm:$0xf]  ;;  %v12300_v33 = vrot.slane %v5433_v35, 5  ;;  %v5439_v38 = vshll.u32 %v5298_v8, 16  ;;  %v4514_v1 = vadd.f32 %v12156_v58, %v4353_v12 }
 0x253   : > { %5813 = vst.msk [vmem:[#allocation3] sm:$0xf] %vm1348_vm14, %v5718_v60  ;;  %vm4607_vm11 = vcmp.ge.f32.partialorder %v4511_v28, 0.0  ;;  %v4639_v41 = vmul.f32 0.1, %v4511_v28  ;;  %v5443_v32 = vshrl.u32 %v5298_v8, 16  ;;  %7839 = vrot.lane.b32.xlu1 %v7516_v59, %s10365_s12  ;;  %5729 = vrot.lane.b32.xlu0 %v5418_v45, %s10363_s10 }
 0x254   : > { %5261 = vst.msk [vmem:[#allocation3 + $0x60] sm:$0xf] %vm224_vm0, %v5229_v26  ;;  %v12305_v16 = vld [vmem:[#allocation2 + $0x38] sm:$0x1]  ;;  %v9543_v37 = vrot.slane %v6878_v3, 9  ;;  %v5966_v43 = vrot.slane %v5964_v7, 4  ;;  %v5436_v58 = vor.u32 %v12300_v33, %v12298_v23  ;;  %v5965_v26 = vsel %vm10745_vm13, %v9527_v54, %v5964_v7 }
 0x255   : > { %3498 = vst.msk [vmem:[#allocation3 + $0x178] sm:$0xf] %vm1881_vm2, %v3434_v17  ;;  %v7518_v21 = vshrl.u32 %v7406_v52, 16  ;;  %v7521_v50 = vshll.u32 %v7406_v52, 16  ;;  %v4671_v29 = vsel %vm4607_vm11, %v4511_v28, %v4639_v41  ;;  %v6990_v5 = vrot.slane %v6988_v53, 4 }
 0x256   : > { %v6991_v2 = vrot.slane %v6880_v55, 5  ;;  %v12312_v6 = vld [vmem:[#allocation2 + $0x30] sm:$0xe]  ;;  %v9671_v9 = vpack.c.bf16 %v4671_v29, %v4671_v29  ;;  %v6989_v10 = vsel %vm10745_vm13, %v9543_v37, %v6988_v53  ;;  %v12317_v4 = vrot.slane %v5439_v38, 5  ;;  %v12320_v46 = vld [vmem:[#allocation2 + $0x34] sm:$0xf] }
 0x257   : > { %v5449_v57 = vshll.u32 %v12305_v16, 16  ;;  %vm4608_vm12 = vcmp.ge.f32.partialorder %v4514_v1, 0.0  ;;  %v4640_v49 = vmul.f32 0.1, %v4514_v1  ;;  %v7407_v18 = vld [vmem:[#allocation2 + $0x40] sm:$0xf]  ;;  %5731 = vrot.lane.b32.xlu1 %v5428_v14, %s10363_s10  ;;  %7089 = vrot.lane.b32.xlu0 %v6989_v10, %s10363_s10  ;;  %v12333_v14 = vpop.f32.mrf.mxu1  ;;  %v6438_v55 = vor.u32 %v12224_v44, %v12008_v15 }
 0x258   : > { %v12324_v19 = vrot.slane %v5443_v32, 4  ;;  %v4875_v31 = vshrl.u32 %v9671_v9, 16  ;;  %v7520_v63 = vrot.slane %v7518_v21, 4  ;;  %v7523_v35 = vrot.slane %v7521_v50, 5  ;;  %v12328_v56 = vld [vmem:[#allocation2 + $0x38] sm:$0x1]  ;;  %v9825_v21 = vpop.f32.mrf.mxu0 }
 0x259   : > { %v9528_v40 = vrot.slane %v12312_v6, 9  ;;  %5814 = vst.msk [vmem:[#allocation3 + $0xc] sm:$0xf] %vm1348_vm14, %v5720_v62  ;;  %v5144_v8 = vld [vmem:[#allocation2 + $0x48] sm:$0xf]  ;;  %v4672_v27 = vsel %vm4608_vm12, %v4514_v1, %v4640_v49  ;;  %v7527_v20 = vshll.u32 %v7407_v18, 16  ;;  %v6992_v60 = vsel %vm10745_vm13, %v6990_v5, %v6991_v2  ;;  %v4518_v50 = vpop.f32.mrf.mxu1 }
 0x25a   : > { %v7531_v0 = vshrl.u32 %v7407_v18, 16  ;;  %v5971_v45 = vrot.slane %v12320_v46, 5  ;;  %v4877_v3 = vrot.slane %v4875_v31, 7  ;;  %v4878_v28 = vshll.u32 %v9671_v9, 16  ;;  %v7966_v51 = vld [vmem:[#allocation2 + $0x3c] sm:$0xe]  ;;  %v9826_v62 = vpop.f32.mrf.mxu0 }
 0x25b   : > { %v9672_v48 = vpack.c.bf16 %v4672_v27, %v4672_v27  ;;  %v7967_v53 = vld [vmem:[#allocation2 + $0x40] sm:$0xf]  ;;  %v5968_v23 = vsel %vm10745_vm13, %v5966_v43, %v5967_v25  ;;  %v5974_v33 = vrot.slane %v12328_v56, 5  ;;  %7091 = vrot.lane.b32.xlu1 %v6992_v60, %s10363_s10  ;;  %v7524_v38 = vor.u32 %v7523_v35, %v7520_v63  ;;  %v12351_v39 = vld [vmem:[#allocation2 + $0x44] sm:$0x1]  ;;  %6065 = vrot.lane.b32.xlu0 %v5965_v26, %s10364_s17 }
 0x25c   : > { %v10220_v59 = vld [vmem:[#allocation3 + $0x16c] ss:$12 sps:$4 sm:$0xff]   ;;  %v10222_v52 = vld [vmem:[#allocation3 + $0x168] ss:$12 sps:$4 sm:$0xff]   ;;  %v4880_v15 = vor.u32 %v4878_v28, %v4877_v3  ;;  %v12353_v24 = vrot.slane %v5436_v58, 4  ;;  %v12355_v7 = vrot.slane %v7527_v20, 5  ;;  %v5446_v29 = vor.u32 %v12324_v19, %v12317_v4 }
 0x25d   : > { %v4883_v44 = vshrl.u32 %v9672_v48, 16  ;;  %v7968_v41 = vld [vmem:[#allocation2 + $0x44] sm:$0x1]  ;;  %4427 = vmatprep.mubr.bf16.mxu0 %v10220_v59  ;;  %v10226_v54 = vld [vmem:[#allocation3 + $0x8] ss:$12 sps:$4 sm:$0xff]   ;;  %v12357_v13 = vrot.slane %v7531_v0, 4  ;;  %v9827_v63 = vadd.f32 %v9826_v62, %v9825_v21 }
 0x25e   : > { %v9559_v12 = vrot.slane %v7966_v51, 9  ;;  %v8076_v25 = vrot.slane %v7967_v53, 5  ;;  %v5145_v17 = vsel %vm10515_vm7, %v4880_v15, %v5144_v8  ;;  %v4886_v37 = vshll.u32 %v9672_v48, 16  ;;  %v5148_v43 = vld [vmem:[#allocation2 + $0x50] sm:$0x1]  ;;  %4428 = vmatmul.mubr.bf16.gmra.mxu0 %v10222_v52  ;;  %v9828_v48 = vpop.f32.mrf.mxu0  ;;  %v12385_v51 = vpop.f32.mrf.mxu1 }
 0x25f   : > { %v4885_v32 = vrot.slane %v4883_v44, 7  ;;  %5146 = vst [vmem:[#allocation2 + $0x48] sm:$0xf] %v5145_v17  ;;  %10073 = vmatprep.mubr.msk.bf16.mxu0 %vm4226_vm15, %v10226_v54  ;;  %v7537_v1 = vshll.u32 %v12351_v39, 16  ;;  %v8079_v9 = vrot.slane %v7968_v41, 5  ;;  %v4881_v49 = vrot.slane %v4877_v3, 4  ;;  %6067 = vrot.lane.b32.xlu1 %v5968_v23, %s10364_s17 }
 0x260   : > { %v8077_v5 = vsel %vm10745_vm13, %v9559_v12, %v8076_v25  ;;  %v8078_v2 = vrot.slane %v8076_v25, 4  ;;  %v12368_v10 = vld [vmem:[#allocation2 + $0x40] sm:$0xf]  ;;  %v12371_v31 = vrot.slane %v7524_v38, 4  ;;  %v12374_v19 = vld [vmem:[#allocation2 + $0x3c] sm:$0xe]  ;;  %v7534_v8 = vor.u32 %v12357_v13, %v12355_v7  ;;  %v9829_v61 = vpop.f32.mrf.mxu0 }
 0x261   : > { %v4888_v18 = vor.u32 %v4886_v37, %v4885_v32  ;;  %v4890_v58 = vrot.slane %v4885_v32, 4  ;;  %8203 = vst.msk [vmem:[#allocation3 + $0x50] sm:$0xf] %vm224_vm0, %v8077_v5  ;;  %v7211_v35 = vld [vmem:[#allocation2 + $0x3c] sm:$0xf]  ;;  %v6439_v20 = vrot.slane %v6438_v55, 4  ;;  %v4358_v59 = vadd.f32 %v12186_v11, %v9827_v63 }
 0x262   : > { %v8080_v27 = vsel %vm10745_vm13, %v8078_v2, %v8079_v9  ;;  %v5300_v0 = vld [vmem:[#allocation2 + $0x3c] sm:$0xf]  ;;  %7281 = vrot.lane.b32.xlu0 %v7211_v35, %s10364_s17  ;;  %v6995_v53 = vrot.slane %v12368_v10, 5  ;;  %v6443_v60 = vrot.slane %v6441_v47, 5  ;;  %v12391_v55 = vld [vmem:[#allocation2 + $0x40] sm:$0xf]  ;;  %v9830_v16 = vadd.f32 %v9829_v61, %v9828_v48 }
 0x263   : > { %v4889_v3 = vsel %vm10522_vm8, %v4881_v49, %v4888_v18  ;;  %v5149_v28 = vsel %vm10537_vm10, %v4890_v58, %v5148_v43  ;;  %8204 = vst.msk [vmem:[#allocation3 + $0x5c] sm:$0xf] %vm224_vm0, %v8080_v27  ;;  %v5230_v26 = vld [vmem:[#allocation2 + $0x34] sm:$0xf]  ;;  %v7212_v52 = vld [vmem:[#allocation2 + $0x40] sm:$0xf]  ;;  %v4521_v43 = vpop.f32.mrf.mxu1  ;;  %v7530_v21 = vsel %vm10529_vm9, %v12371_v31, %v12355_v7 }
 0x264   : > { %5147 = vst.msk [vmem:[#allocation2 + $0x4c] sm:$0xf] %vm224_vm0, %v4889_v3  ;;  %5150 = vst [vmem:[#allocation2 + $0x50] sm:$0x1] %v5149_v28  ;;  %v6187_v23 = vld [vmem:[#allocation2 + $0x30] sm:$0xf]  ;;  %7283 = vrot.lane.b32.xlu1 %v7212_v52, %s10364_s17  ;;  %v6444_v41 = vsel %vm10529_vm9, %v6439_v20, %v6443_v60  ;;  %v4361_v9 = vadd.f32 %v12186_v11, %v9830_v16 }
 0x265   : > { %v12395_v15 = vrot.slane %v5446_v29, 4  ;;  %v12399_v44 = vrot.slane %v5449_v57, 5  ;;  %v9544_v38 = vrot.slane %v12374_v19, 9  ;;  %5262 = vst.msk [vmem:[#allocation3 + $0x6c] sm:$0xf] %vm224_vm0, %v5230_v26  ;;  %v12406_v39 = vrot.slane %v5971_v45, 4 }
 0x266   : > { %v10228_v47 = vld [vmem:[#allocation3 + $0x20] ss:$12 sps:$4 sm:$0xff]   ;;  %v5454_v54 = vshrl.u32 %v5300_v0, 16  ;;  %v5457_v13 = vshll.u32 %v5300_v0, 16  ;;  %v4519_v57 = vadd.f32 %v4518_v50, %v4358_v59  ;;  %v10229_v12 = vld [vmem:[#allocation3 + $0x38] ss:$12 sps:$4 sm:$0xff]   ;;  %6257 = vrot.lane.b32.xlu0 %v6187_v23, %s10365_s12  ;;  %v4522_v63 = vadd.f32 %v4521_v43, %v4361_v9 }
 0x267   : > { %v6188_v25 = vld [vmem:[#allocation2 + $0x34] sm:$0xf]  ;;  %v7539_v17 = vrot.slane %v7537_v1, 5  ;;  %6838 = vst.msk [vmem:[#allocation3 + $0x10] sm:$0xf] %vm224_vm0, %v6444_v41  ;;  %v5463_v32 = vshll.u32 %v12391_v55, 16  ;;  %10074 = vmatmul.mubr.msk.bf16.vlgmr.msra.gmra.mxu0 %vm4226_vm15, %v10228_v47  ;;  %v5442_v0 = vsel %vm10529_vm9, %v12353_v24, %v12317_v4  ;;  %v5452_v28 = vsel %vm10529_vm9, %v12395_v15, %v12399_v44 }
 0x268   : > { %v5231_v37 = vld [vmem:[#allocation2 + $0x3c] sm:$0xf]  ;;  %v7535_v29 = vrot.slane %v7534_v8, 4  ;;  %v12420_v50 = vrot.slane %v6995_v53, 4  ;;  %v7969_v1 = vld [vmem:[#allocation2 + $0x48] sm:$0xe]  ;;  %10077 = vmatprep.mubr.msk.bf16.mxu0 %vm4226_vm15, %v10229_v12  ;;  %6259 = vrot.lane.b32.xlu1 %v6188_v25, %s10365_s12 }
 0x269   : > { %v7409_v5 = vld [vmem:[#allocation2 + $0x48] sm:$0xf]  ;;  %5263 = vst.msk [vmem:[#allocation3 + $0x78] sm:$0xf] %vm224_vm0, %v5231_v37  ;;  %vm4609_vm3 = vcmp.ge.f32.partialorder %v4519_v57, 0.0  ;;  %v5467_v49 = vshrl.u32 %v12391_v55, 16 }
 0x26a   : > { %v4641_v2 = vmul.f32 0.1, %v4519_v57  ;;  %v7542_v7 = vshrl.u32 %v7409_v5, 16  ;;  %v7545_v18 = vshll.u32 %v7409_v5, 16  ;;  %v12427_v58 = vrot.slane %v5454_v54, 4  ;;  %7841 = vrot.lane.b32.xlu0 %v7530_v21, %s10365_s12 }
 0x26b   : > { %v12429_v62 = vrot.slane %v5457_v13, 5  ;;  %v9560_v35 = vrot.slane %v7969_v1, 9  ;;  %v12431_v8 = vrot.slane %v5463_v32, 5  ;;  %v7540_v20 = vsel %vm10529_vm9, %v7535_v29, %v7539_v17  ;;  %v10230_v3 = vld [vmem:[#allocation3 + $0x50] ss:$12 sps:$4 sm:$0xff]   ;;  %v9831_v10 = vpop.f32.mrf.mxu0 }
 0x26c   : > { %v4673_v31 = vsel %vm4609_vm3, %v4519_v57, %v4641_v2  ;;  %v6883_v48 = vld [vmem:[#allocation2 + $0x44] sm:$0x1]  ;;  %v7970_v60 = vld [vmem:[#allocation2 + $0x4c] sm:$0xf]  ;;  %v7971_v55 = vld [vmem:[#allocation2 + $0x50] sm:$0x1]  ;;  %7843 = vrot.lane.b32.xlu1 %v7540_v20, %s10365_s12 }
 0x26d   : > { %v9673_v27 = vpack.c.bf16 %v4673_v31, %v4673_v31  ;;  %vm4610_vm4 = vcmp.ge.f32.partialorder %v4522_v63, 0.0  ;;  %v4642_v26 = vmul.f32 0.1, %v4522_v63  ;;  %v8083_v59 = vrot.slane %v7970_v60, 5  ;;  %v7410_v47 = vld [vmem:[#allocation2 + $0x4c] sm:$0xf] }
 0x26e   : > { %v8086_v52 = vrot.slane %v7971_v55, 5  ;;  %v7544_v41 = vrot.slane %v7542_v7, 4  ;;  %v7547_v4 = vrot.slane %v7545_v18, 5  ;;  %v7551_v15 = vshll.u32 %v7410_v47, 16  ;;  %5733 = vrot.lane.b32.xlu0 %v5442_v0, %s10363_s10  ;;  %v5302_v12 = vld [vmem:[#allocation2 + $0x44] sm:$0x1]  ;;  %v9832_v55 = vpop.f32.mrf.mxu0 }
 0x26f   : > { %v4892_v23 = vshrl.u32 %v9673_v27, 16  ;;  %v4895_v61 = vshll.u32 %v9673_v27, 16  ;;  %v4674_v24 = vsel %vm4610_vm4, %v4522_v63, %v4642_v26  ;;  %v8084_v54 = vsel %vm10745_vm13, %v9560_v35, %v8083_v59  ;;  %10078 = vmatmul.mubr.msk.bf16.gmra.mxu0 %vm4226_vm15, %v10230_v3  ;;  %v5151_v17 = vld [vmem:[#allocation2 + $0x54] sm:$0xf]  ;;  %v7411_v9 = vld [vmem:[#allocation2 + $0x50] sm:$0x1] }
 0x270   : > { %v8085_v13 = vrot.slane %v8083_v59, 4  ;;  %v9674_v16 = vpack.c.bf16 %v4674_v24, %v4674_v24  ;;  %8205 = vst.msk [vmem:[#allocation3 + $0x68] sm:$0xf] %vm224_vm0, %v8084_v54  ;;  %v7555_v57 = vshrl.u32 %v7410_v47, 16  ;;  %v5469_v25 = vrot.slane %v5467_v49, 4  ;;  %5735 = vrot.lane.b32.xlu1 %v5452_v28, %s10363_s10 }
 0x271   : > { %v4894_v44 = vrot.slane %v4892_v23, 7  ;;  %v6998_v32 = vrot.slane %v6883_v48, 5  ;;  %v12452_v43 = vrot.slane %v7551_v15, 5  ;;  %v5460_v21 = vor.u32 %v12429_v62, %v12427_v58  ;;  %v12458_v49 = vld [vmem:[#allocation2 + $0x3c] sm:$0xe] }
 0x272   : > { %v8087_v37 = vsel %vm10745_vm13, %v8085_v13, %v8086_v52  ;;  %v4900_v1 = vshrl.u32 %v9674_v16, 16  ;;  %v4903_v5 = vshll.u32 %v9674_v16, 16  ;;  %v7548_v2 = vor.u32 %v7547_v4, %v7544_v41  ;;  %v6885_v31 = vld [vmem:[#allocation2 + $0x4c] sm:$0xf]  ;;  %v5155_v20 = vld [vmem:[#allocation2 + $0x5c] sm:$0x1]  ;;  %v9834_v13 = vpop.f32.mrf.mxu0 }
 0x273   : > { %v4897_v29 = vor.u32 %v4895_v61, %v4894_v44  ;;  %8206 = vst.msk [vmem:[#allocation3 + $0x74] sm:$0xf] %vm224_vm0, %v8087_v37  ;;  %v6996_v7 = vsel %vm10745_vm13, %v9544_v38, %v6995_v53  ;;  %v6999_v18 = vsel %vm10745_vm13, %v12420_v50, %v6998_v32  ;;  %v7557_v58 = vrot.slane %v7555_v57, 4  ;;  %v6884_v0 = vld [vmem:[#allocation2 + $0x48] sm:$0xe] }
 0x274   : > { %v5473_v62 = vshll.u32 %v5302_v12, 16  ;;  %v4898_v63 = vrot.slane %v4894_v44, 4  ;;  %v4902_v27 = vrot.slane %v4900_v1, 7  ;;  %7093 = vrot.lane.b32.xlu0 %v6996_v7, %s10363_s10  ;;  %v5470_v19 = vor.u32 %v5469_v25, %v12431_v8  ;;  %v5861_v3 = vld [vmem:[#allocation2 + $0x40] sm:$0xf]  ;;  %7095 = vrot.lane.b32.xlu1 %v6999_v18, %s10363_s10  ;;  %v9835_v25 = vpop.f32.mrf.mxu0 }
 0x275   : > { %v5152_v35 = vsel %vm10515_vm7, %v4897_v29, %v5151_v17  ;;  %v7558_v53 = vor.u32 %v7557_v58, %v12452_v43  ;;  %v7561_v38 = vshll.u32 %v7411_v9, 16  ;;  %v12474_v50 = vrot.slane %v5460_v21, 4  ;;  %v12480_v52 = vld [vmem:[#allocation2 + $0x50] sm:$0x1]  ;;  %v5232_v4 = vld [vmem:[#allocation2 + $0x40] sm:$0xf] }
 0x276   : > { %5153 = vst [vmem:[#allocation2 + $0x54] sm:$0xf] %v5152_v35  ;;  %v9529_v28 = vrot.slane %v12458_v49, 9  ;;  %v4905_v48 = vor.u32 %v4903_v5, %v4902_v27  ;;  %v4907_v60 = vrot.slane %v4902_v27, 4  ;;  %v12478_v26 = vrot.slane %v7548_v2, 4 }
 0x277   : > { %v7002_v59 = vrot.slane %v6885_v31, 5  ;;  %v9833_v23 = vadd.f32 %v9832_v55, %v9831_v10  ;;  %v5972_v61 = vsel %vm10745_vm13, %v9528_v40, %v5971_v45  ;;  %v12488_v47 = vrot.slane %v5470_v19, 4  ;;  %v6376_v6 = vld [vmem:[#allocation2 + $0x18] sm:$0xf]  ;;  %5264 = vst.msk [vmem:[#allocation3 + $0x84] sm:$0xf] %vm224_vm0, %v5232_v4 }
 0x278   : > { %v9545_v41 = vrot.slane %v6884_v0, 9  ;;  %v4906_v24 = vsel %vm10522_vm8, %v4898_v63, %v4905_v48  ;;  %v5156_v54 = vsel %vm10537_vm10, %v4907_v60, %v5155_v20  ;;  %6069 = vrot.lane.b32.xlu0 %v5972_v61, %s10364_s17  ;;  %v12495_v15 = vrot.slane %v7558_v53, 4  ;;  %v12509_v12 = vld [vmem:[#allocation2 + $0x1c] sm:$0xf]  ;;  %v7213_v17 = vld [vmem:[#allocation2 + $0x48] sm:$0xf]  ;;  %v7078_v20 = vpop.permute.xlu0 %7077 }
 0x279   : > { %v5978_v46 = vrot.slane %v5861_v3, 5  ;;  %5154 = vst.msk [vmem:[#allocation2 + $0x58] sm:$0xf] %vm224_vm0, %v4906_v24  ;;  %5157 = vst [vmem:[#allocation2 + $0x5c] sm:$0x1] %v5156_v54  ;;  %v4366_v40 = vadd.f32 %v12186_v11, %v9833_v23  ;;  %v5975_v45 = vsel %vm10745_vm13, %v12406_v39, %v5974_v33  ;;  %v12505_v16 = vrot.slane %v7561_v38, 5 }
 0x27a   : > { %v10231_v44 = vld [vmem:[#allocation3 + $0x68] ss:$12 sps:$4 sm:$0xff]   ;;  %v12507_v57 = vrot.slane %v5473_v62, 5  ;;  %6071 = vrot.lane.b32.xlu1 %v5975_v45, %s10364_s17  ;;  %v7554_v56 = vsel %vm10529_vm9, %v12478_v26, %v12452_v43  ;;  %v5466_v33 = vsel %vm10529_vm9, %v12474_v50, %v12431_v8  ;;  %v12522_v39 = vsel %vm10745_vm13, %v9545_v41, %v7002_v59  ;;  %v12525_v37 = vld [vmem:[#allocation2 + $0x44] sm:$0x1] }
 0x27b   : > { %v7005_v32 = vrot.slane %v12480_v52, 5  ;;  %v4527_v21 = vadd.f32 %v12333_v14, %v4366_v40  ;;  %v9836_v29 = vadd.f32 %v9835_v25, %v9834_v13  ;;  %10081 = vmatprep.mubr.msk.bf16.mxu0 %vm4226_vm15, %v10231_v44  ;;  %v7004_v5 = vrot.slane %v7002_v59, 4  ;;  %v5233_v2 = vld [vmem:[#allocation2 + $0x48] sm:$0xf]  ;;  %v5234_v9 = vld [vmem:[#allocation2 + $0x4c] sm:$0xf]  ;;  %v7080_v52 = vpop.permute.xlu1 %7079 }
 0x27c   : > { %v5476_v1 = vsel %vm10529_vm9, %v12488_v47, %v12507_v57  ;;  %7285 = vrot.lane.b32.xlu0 %v7213_v17, %s10364_s17  ;;  %v7564_v49 = vsel %vm10529_vm9, %v12495_v15, %v12505_v16  ;;  %v12540_v14 = vsel %vm10745_vm13, %v9529_v28, %v5978_v46  ;;  %v6446_v58 = vshrl.u32 %v6376_v6, 16  ;;  %5265 = vst.msk [vmem:[#allocation3 + $0x90] sm:$0xf] %vm224_vm0, %v5233_v2  ;;  %v7214_v35 = vld [vmem:[#allocation2 + $0x4c] sm:$0xf] }
 0x27d   : > { %v7972_v7 = vld [vmem:[#allocation2 + $0x54] sm:$0xe]  ;;  %v6449_v62 = vshll.u32 %v6376_v6, 16  ;;  %5266 = vst.msk [vmem:[#allocation3 + $0x9c] sm:$0xf] %vm224_vm0, %v5234_v9  ;;  %vm4611_vm5 = vcmp.ge.f32.partialorder %v4527_v21, 0.0  ;;  %v4369_v63 = vadd.f32 %v12186_v11, %v9836_v29  ;;  %v12558_v23 = vsel %vm10745_vm13, %v7004_v5, %v7005_v32  ;;  %v6054_v6 = vpop.permute.xlu0 %6053 }
 0x27e   : > { %v7412_v18 = vld [vmem:[#allocation2 + $0x54] sm:$0xf]  ;;  %v4643_v31 = vmul.f32 0.1, %v4527_v21  ;;  %v12545_v27 = vrot.slane %v5978_v46, 4  ;;  %7287 = vrot.lane.b32.xlu1 %v7214_v35, %s10364_s17  ;;  %v5981_v19 = vrot.slane %v12525_v37, 5  ;;  %v9837_v15 = vpop.f32.mrf.mxu0 }
 0x27f   : > { %v6189_v10 = vld [vmem:[#allocation2 + $0x3c] sm:$0xf]  ;;  %v7566_v0 = vshrl.u32 %v7412_v18, 16  ;;  %v7569_v53 = vshll.u32 %v7412_v18, 16  ;;  %v6455_v38 = vshll.u32 %v12509_v12, 16  ;;  %v4530_v28 = vadd.f32 %v12385_v51, %v4369_v63  ;;  %v12573_v18 = vpop.f32.mrf.mxu1 }
 0x280   : > { %v4675_v3 = vsel %vm4611_vm5, %v4527_v21, %v4643_v31  ;;  %7173 = vst.msk [vmem:[#allocation3 + $0x4] sm:$0xf] %vm1348_vm14, %v7078_v20  ;;  %v6190_v48 = vld [vmem:[#allocation2 + $0x40] sm:$0xf]  ;;  %v9561_v11 = vrot.slane %v7972_v7, 9  ;;  %v6459_v60 = vshrl.u32 %v12509_v12, 16  ;;  %6261 = vrot.lane.b32.xlu0 %v6189_v10, %s10365_s12  ;;  %v6056_v7 = vpop.permute.xlu1 %6055  ;;  %v9838_v50 = vpop.f32.mrf.mxu0 }
 0x281   : > { %v12553_v55 = vld [vmem:[#allocation2 + $0x48] sm:$0xf]  ;;  %v9675_v59 = vpack.c.bf16 %v4675_v3, %v4675_v3  ;;  %v7973_v61 = vld [vmem:[#allocation2 + $0x58] sm:$0xf]  ;;  %v7974_v41 = vld [vmem:[#allocation2 + $0x5c] sm:$0x1]  ;;  %v4534_v16 = vpop.f32.mrf.mxu1 }
 0x282   : > { %v6448_v4 = vrot.slane %v6446_v58, 4  ;;  %v6451_v51 = vrot.slane %v6449_v62, 5  ;;  %vm4612_vm6 = vcmp.ge.f32.partialorder %v4530_v28, 0.0  ;;  %v4644_v24 = vmul.f32 0.1, %v4530_v28  ;;  %6263 = vrot.lane.b32.xlu1 %v6190_v48, %s10365_s12 }
 0x283   : > { %7174 = vst.msk [vmem:[#allocation3 + $0x10] sm:$0xf] %vm1348_vm14, %v7080_v52  ;;  %v8090_v54 = vrot.slane %v7973_v61, 5  ;;  %v8093_v13 = vrot.slane %v7974_v41, 5  ;;  %v4909_v46 = vshrl.u32 %v9675_v59, 16  ;;  %v7568_v45 = vrot.slane %v7566_v0, 4 }
 0x284   : > { %v7413_v40 = vld [vmem:[#allocation2 + $0x58] sm:$0xf]  ;;  %v7571_v44 = vrot.slane %v7569_v53, 5  ;;  %v5478_v25 = vshrl.u32 %v12553_v55, 16  ;;  %v4676_v17 = vsel %vm4612_vm6, %v4530_v28, %v4644_v24  ;;  %6149 = vst.msk [vmem:[#allocation3] sm:$0xf] %vm1688_vm1, %v6054_v6  ;;  %7845 = vrot.lane.b32.xlu0 %v7554_v56, %s10365_s12  ;;  %v6452_v43 = vor.u32 %v6451_v51, %v6448_v4 }
 0x285   : > { %v8091_v32 = vsel %vm10745_vm13, %v9561_v11, %v8090_v54  ;;  %v8092_v21 = vrot.slane %v8090_v54, 4  ;;  %v7575_v29 = vshll.u32 %v7413_v40, 16  ;;  %v4911_v5 = vrot.slane %v4909_v46, 7  ;;  %v12575_v62 = vld [vmem:[#allocation2 + $0x5c] sm:$0x1] }
 0x286   : > { %v4912_v2 = vshll.u32 %v9675_v59, 16  ;;  %v9676_v9 = vpack.c.bf16 %v4676_v17, %v4676_v17  ;;  %8207 = vst.msk [vmem:[#allocation3 + $0x80] sm:$0xf] %vm224_vm0, %v8091_v32  ;;  %v7579_v58 = vshrl.u32 %v7413_v40, 16  ;;  %v5158_v31 = vld [vmem:[#allocation2 + $0x60] sm:$0xf]  ;;  %7847 = vrot.lane.b32.xlu1 %v7564_v49, %s10365_s12  ;;  %v7572_v0 = vor.u32 %v7571_v44, %v7568_v45  ;;  %v7270_v40 = vpop.permute.xlu0 %7269 }
 0x287   : > { %6150 = vst.msk [vmem:[#allocation3 + $0xc] sm:$0xf] %vm1688_vm1, %v6056_v7  ;;  %v8094_v63 = vsel %vm10745_vm13, %v8092_v21, %v8093_v13  ;;  %v12580_v35 = vrot.slane %v7575_v29, 5  ;;  %v12582_v20 = vrot.slane %v6455_v38, 5  ;;  %v5304_v26 = vld [vmem:[#allocation2 + $0x4c] sm:$0xf]  ;;  %v9839_v45 = vadd.f32 %v9838_v50, %v9837_v15  ;;  %v12629_v21 = vpop.f32.mrf.mxu1 }
 0x288   : > { %v4914_v56 = vor.u32 %v4912_v2, %v4911_v5  ;;  %v4917_v10 = vshrl.u32 %v9676_v9, 16  ;;  %8208 = vst.msk [vmem:[#allocation3 + $0x8c] sm:$0xf] %vm224_vm0, %v8094_v63  ;;  %v5480_v53 = vrot.slane %v5478_v25, 4  ;;  %v4920_v3 = vshll.u32 %v9676_v9, 16  ;;  %5737 = vrot.lane.b32.xlu0 %v5466_v33, %s10363_s10 }
 0x289   : > { %v6453_v28 = vrot.slane %v6452_v43, 4  ;;  %v7581_v48 = vrot.slane %v7579_v58, 4  ;;  %v7585_v38 = vshll.u32 %v12575_v62, 16  ;;  %v5481_v49 = vshll.u32 %v12553_v55, 16  ;;  %v6378_v61 = vld [vmem:[#allocation2 + $0x20] sm:$0x1] }
 0x28a   : > { %v5159_v11 = vsel %vm10515_vm7, %v4914_v56, %v5158_v31  ;;  %v4919_v59 = vrot.slane %v4917_v10, 7  ;;  %v5487_v52 = vshll.u32 %v5304_v26, 16  ;;  %v4915_v41 = vrot.slane %v4911_v5, 4  ;;  %v5162_v4 = vld [vmem:[#allocation2 + $0x68] sm:$0x1]  ;;  %5739 = vrot.lane.b32.xlu1 %v5476_v1, %s10363_s10  ;;  %v9840_v1 = vpop.f32.mrf.mxu0  ;;  %v7272_v10 = vpop.permute.xlu1 %7271 }
 0x28b   : > { %5160 = vst [vmem:[#allocation2 + $0x60] sm:$0xf] %v5159_v11  ;;  %v6458_v51 = vsel %vm10529_vm9, %v6453_v28, %v12582_v20  ;;  %v7582_v24 = vor.u32 %v7581_v48, %v12580_v35  ;;  %v5491_v54 = vshrl.u32 %v5304_v26, 16  ;;  %v5305_v13 = vld [vmem:[#allocation2 + $0x50] sm:$0x1]  ;;  %v5483_v33 = vrot.slane %v5481_v49, 5 }
 0x28c   : > { %v4922_v46 = vor.u32 %v4920_v3, %v4919_v59  ;;  %v4924_v8 = vrot.slane %v4919_v59, 4  ;;  %6839 = vst.msk [vmem:[#allocation3 + $0x1c] sm:$0xf] %vm224_vm0, %v6458_v51  ;;  %v12612_v55 = vrot.slane %v5487_v52, 5  ;;  %v12614_v6 = vld [vmem:[#allocation2 + $0x58] sm:$0xf]  ;;  %7097 = vrot.lane.b32.xlu0 %v12522_v39, %s10363_s10  ;;  %v9841_v31 = vpop.f32.mrf.mxu0 }
 0x28d   : > { %v12616_v44 = vrot.slane %v7572_v0, 4  ;;  %v6465_v25 = vshll.u32 %v6378_v61, 16  ;;  %v6461_v17 = vrot.slane %v6459_v60, 4  ;;  %v12620_v32 = vld [vmem:[#allocation2 + $0x54] sm:$0xe]  ;;  %v5484_v29 = vor.u32 %v5483_v33, %v5480_v53  ;;  %v6246_v0 = vpop.permute.xlu0 %6245 }
 0x28e   : > { %v4923_v47 = vsel %vm10522_vm8, %v4915_v41, %v4922_v46  ;;  %v5163_v57 = vsel %vm10537_vm10, %v4924_v8, %v5162_v4  ;;  %7365 = vst.msk [vmem:[#allocation3 + $0x4] sm:$0xf] %vm1688_vm1, %v7270_v40  ;;  %v5493_v5 = vrot.slane %v5491_v54, 4  ;;  %v5235_v12 = vld [vmem:[#allocation2 + $0x54] sm:$0xf]  ;;  %v12638_v7 = vrot.slane %v7582_v24, 4  ;;  %7099 = vrot.lane.b32.xlu1 %v12558_v23, %s10363_s10  ;;  %v6248_v54 = vpop.permute.xlu1 %6247 }
 0x28f   : > { %v5236_v60 = vld [vmem:[#allocation2 + $0x58] sm:$0xf]  ;;  %5161 = vst.msk [vmem:[#allocation2 + $0x64] sm:$0xf] %vm224_vm0, %v4923_v47  ;;  %5164 = vst [vmem:[#allocation2 + $0x68] sm:$0x1] %v5163_v57  ;;  %v6462_v62 = vor.u32 %v6461_v17, %v12582_v20  ;;  %v9842_v53 = vadd.f32 %v9841_v31, %v9840_v1  ;;  %v5982_v23 = vsel %vm10745_vm13, %v12545_v27, %v5981_v19 }
 0x290   : > { %v10239_v2 = vld [vmem:[#allocation3 + $0x80] ss:$12 sps:$4 sm:$0xff]   ;;  %v12635_v9 = vld [vmem:[%s14319_s2] ss:$0 sm:$0xff]  ;;  %v12640_v58 = vrot.slane %v7585_v38, 5  ;;  %v12647_v63 = vrot.slane %v5484_v29, 4  ;;  %v5494_v26 = vor.u32 %v5493_v5, %v12612_v55  ;;  %6073 = vrot.lane.b32.xlu0 %v12540_v14, %s10364_s17  ;;  %v4537_v38 = vpop.f32.mrf.mxu1  ;;  %v7578_v37 = vsel %vm10529_vm9, %v12616_v44, %v12580_v35 }
 0x291   : > { %v4374_v39 = vadd.f32 %v12635_v9, %v9839_v45  ;;  %5267 = vst.msk [vmem:[#allocation3 + $0xa8] sm:$0xf] %vm224_vm0, %v5235_v12  ;;  %5268 = vst.msk [vmem:[#allocation3 + $0xb4] sm:$0xf] %vm224_vm0, %v5236_v60  ;;  %v6467_v43 = vrot.slane %v6465_v25, 5  ;;  %v5497_v56 = vshll.u32 %v5305_v13, 16  ;;  %10082 = vmatmul.mubr.msk.bf16.gmra.mxu0 %vm4226_vm15, %v10239_v2  ;;  %v4377_v14 = vadd.f32 %v12635_v9, %v9842_v53  ;;  %v7830_v60 = vpop.permute.xlu0 %7829 }
 0x292   : > { %v6463_v3 = vrot.slane %v6462_v62, 4  ;;  %v7009_v28 = vrot.slane %v12614_v6, 5  ;;  %v6889_v48 = vld [vmem:[#allocation2 + $0x5c] sm:$0x1]  ;;  %7366 = vst.msk [vmem:[#allocation3 + $0x10] sm:$0xf] %vm1688_vm1, %v7272_v10  ;;  %6075 = vrot.lane.b32.xlu1 %v5982_v23, %s10364_s17  ;;  %v7588_v27 = vsel %vm10529_vm9, %v12638_v7, %v12640_v58  ;;  %v5490_v8 = vsel %vm10529_vm9, %v12647_v63, %v12612_v55 }
 0x293   : > { %v4535_v20 = vadd.f32 %v4534_v16, %v4374_v39  ;;  %6341 = vst.msk [vmem:[#allocation3] sm:$0xf] %vm1881_vm2, %v6246_v0  ;;  %v12661_v11 = vrot.slane %v5494_v26, 4  ;;  %v12663_v59 = vrot.slane %v5497_v56, 5  ;;  %v9546_v15 = vrot.slane %v12620_v32, 9 }
 0x294   : > { %v6468_v49 = vsel %vm10529_vm9, %v6463_v3, %v6467_v43  ;;  %v7975_v52 = vld [vmem:[#allocation2 + $0x60] sm:$0xe]  ;;  %v7011_v19 = vrot.slane %v7009_v28, 4  ;;  %v7012_v61 = vrot.slane %v6889_v48, 5  ;;  %v12679_v41 = vld [vmem:[#allocation2 + $0x48] sm:$0xe]  ;;  %v4538_v46 = vadd.f32 %v4537_v38, %v4377_v14 }
 0x295   : > { %vm4613_vm11 = vcmp.ge.f32.partialorder %v4535_v20, 0.0  ;;  %v4645_v16 = vmul.f32 0.1, %v4535_v20  ;;  %6840 = vst.msk [vmem:[#allocation3 + $0x28] sm:$0xf] %vm224_vm0, %v6468_v49  ;;  %v5500_v50 = vsel %vm10529_vm9, %v12661_v11, %v12663_v59  ;;  %v12695_v40 = vsel %vm10745_vm13, %v9546_v15, %v7009_v28  ;;  %v7832_v28 = vpop.permute.xlu1 %7831 }
 0x296   : > { %v7415_v4 = vld [vmem:[#allocation2 + $0x60] sm:$0xf]  ;;  %v7215_v51 = vld [vmem:[#allocation2 + $0x54] sm:$0xf]  ;;  %v7216_v13 = vld [vmem:[#allocation2 + $0x58] sm:$0xf]  ;;  %v12701_v39 = vsel %vm10745_vm13, %v7011_v19, %v7012_v61 }
 0x297   : > { %v4677_v24 = vsel %vm4613_vm11, %v4535_v20, %v4645_v16  ;;  %v12689_v33 = vld [vmem:[#allocation2 + $0x4c] sm:$0xf]  ;;  %7289 = vrot.lane.b32.xlu0 %v7215_v51, %s10364_s17  ;;  %6342 = vst.msk [vmem:[#allocation3 + $0xc] sm:$0xf] %vm1881_vm2, %v6248_v54  ;;  %v7976_v45 = vld [vmem:[#allocation2 + $0x64] sm:$0xf]  ;;  %7291 = vrot.lane.b32.xlu1 %v7216_v13, %s10364_s17 }
 0x298   : > { %v9677_v6 = vpack.c.bf16 %v4677_v24, %v4677_v24  ;;  %v7977_v25 = vld [vmem:[#allocation2 + $0x68] sm:$0x1]  ;;  %v9562_v17 = vrot.slane %v7975_v52, 9  ;;  %v7590_v32 = vshrl.u32 %v7415_v4, 16  ;;  %v6379_v47 = vld [vmem:[#allocation2 + $0x24] sm:$0xf]  ;;  %v5722_v24 = vpop.permute.xlu0 %5721 }
 0x299   : > { %vm4614_vm12 = vcmp.ge.f32.partialorder %v4538_v46, 0.0  ;;  %v4646_v57 = vmul.f32 0.1, %v4538_v46  ;;  %v8097_v1 = vrot.slane %v7976_v45, 5  ;;  %v9530_v29 = vrot.slane %v12679_v41, 9 }
 0x29a   : > { %v4926_v5 = vshrl.u32 %v9677_v6, 16  ;;  %v4929_v12 = vshll.u32 %v9677_v6, 16  ;;  %v6191_v2 = vld [vmem:[#allocation2 + $0x48] sm:$0xf]  ;;  %v5985_v62 = vrot.slane %v12689_v33, 5  ;;  %v8100_v10 = vrot.slane %v7977_v25, 5 }
 0x29b   : > { %v5165_v31 = vld [vmem:[#allocation2 + $0x6c] sm:$0xf]  ;;  %7925 = vst.msk [vmem:[#allocation3 + $0x4] sm:$0xf] %vm1881_vm2, %v7830_v60  ;;  %v4678_v43 = vsel %vm4614_vm12, %v4538_v46, %v4646_v57  ;;  %v8098_v26 = vsel %vm10745_vm13, %v9562_v17, %v8097_v1  ;;  %v8099_v56 = vrot.slane %v8097_v1, 4  ;;  %6265 = vrot.lane.b32.xlu0 %v6191_v2, %s10365_s12  ;;  %v12711_v48 = vrot.slane %v7590_v32, 4  ;;  %v9843_v57 = vpop.f32.mrf.mxu0  ;;  %v5724_v1 = vpop.permute.xlu1 %5723 }
 0x29c   : > { %v12707_v0 = vld [vmem:[#allocation2 + $0x50] sm:$0x1]  ;;  %v7416_v53 = vld [vmem:[#allocation2 + $0x64] sm:$0xf]  ;;  %v4928_v20 = vrot.slane %v4926_v5, 7  ;;  %v9678_v3 = vpack.c.bf16 %v4678_v43, %v4678_v43  ;;  %v7593_v23 = vshll.u32 %v7415_v4, 16  ;;  %v12749_v44 = vsel %vm10745_vm13, %v9530_v29, %v5985_v62 }
 0x29d   : > { %8209 = vst.msk [vmem:[#allocation3 + $0x98] sm:$0xf] %vm224_vm0, %v8098_v26  ;;  %v12713_v38 = vld [vmem:[#allocation2 + $0x28] sm:$0xf]  ;;  %v6192_v15 = vld [vmem:[#allocation2 + $0x4c] sm:$0xf]  ;;  %v8101_v16 = vsel %vm10745_vm13, %v8099_v56, %v8100_v10  ;;  %v7082_v56 = vpop.permute.xlu0 %7081  ;;  %v9844_v35 = vpop.f32.mrf.mxu0 }
 0x29e   : > { %7926 = vst.msk [vmem:[#allocation3 + $0x10] sm:$0xf] %vm1881_vm2, %v7832_v28  ;;  %v7599_v14 = vshll.u32 %v7416_v53, 16  ;;  %v7603_v49 = vshrl.u32 %v7416_v53, 16  ;;  %v6470_v52 = vshrl.u32 %v6379_v47, 16  ;;  %v4931_v19 = vor.u32 %v4929_v12, %v4928_v20  ;;  %6267 = vrot.lane.b32.xlu1 %v6192_v15, %s10365_s12 }
 0x29f   : > { %v4934_v61 = vshrl.u32 %v9678_v3, 16  ;;  %v4937_v51 = vshll.u32 %v9678_v3, 16  ;;  %8210 = vst.msk [vmem:[#allocation3 + $0xa4] sm:$0xf] %vm224_vm0, %v8101_v16  ;;  %v5988_v4 = vrot.slane %v12707_v0, 5  ;;  %v5987_v54 = vrot.slane %v5985_v62, 4  ;;  %7849 = vrot.lane.b32.xlu0 %v7578_v37, %s10365_s12  ;;  %v7084_v41 = vpop.permute.xlu1 %7083 }
 0x2a0   : > { %5815 = vst.msk [vmem:[#allocation3 + $0x18] sm:$0xf] %vm1348_vm14, %v5722_v24  ;;  %v7595_v13 = vrot.slane %v7593_v23, 5  ;;  %v6472_v46 = vrot.slane %v6470_v52, 4  ;;  %v6473_v33 = vshll.u32 %v6379_v47, 16  ;;  %v4932_v45 = vrot.slane %v4928_v20, 4 }
 0x2a1   : > { %v12722_v6 = vld [vmem:[#allocation2 + $0x54] sm:$0xf]  ;;  %v5166_v25 = vsel %vm10515_vm7, %v4931_v19, %v5165_v31  ;;  %v4936_v17 = vrot.slane %v4934_v61, 7  ;;  %v6479_v5 = vshll.u32 %v12713_v38, 16  ;;  %5816 = vst.msk [vmem:[#allocation3 + $0x24] sm:$0xf] %vm1348_vm14, %v5724_v1  ;;  %v9845_v10 = vadd.f32 %v9844_v35, %v9843_v57 }
 0x2a2   : > { %v5169_v32 = vld [vmem:[#allocation2 + $0x74] sm:$0x1]  ;;  %5167 = vst [vmem:[#allocation2 + $0x6c] sm:$0xf] %v5166_v25  ;;  %v7596_v47 = vor.u32 %v7595_v13, %v12711_v48  ;;  %v12735_v12 = vrot.slane %v7599_v14, 5  ;;  %v6475_v60 = vrot.slane %v6473_v33, 5  ;;  %7851 = vrot.lane.b32.xlu1 %v7588_v27, %s10365_s12  ;;  %v9846_v27 = vpop.f32.mrf.mxu0  ;;  %v12770_v48 = vsel %vm10745_vm13, %v5987_v54, %v5988_v4 }
 0x2a3   : > { %v7417_v2 = vld [vmem:[#allocation2 + $0x68] sm:$0x1]  ;;  %v12737_v31 = vrot.slane %v7603_v49, 4  ;;  %v4939_v43 = vor.u32 %v4937_v51, %v4936_v17  ;;  %v4941_v26 = vrot.slane %v4936_v17, 4  ;;  %v5502_v37 = vshrl.u32 %v12722_v6, 16  ;;  %5741 = vrot.lane.b32.xlu0 %v5490_v8, %s10363_s10  ;;  %v6058_v8 = vpop.permute.xlu0 %6057  ;;  %v6060_v54 = vpop.permute.xlu1 %6059  ;;  %v10296_v17 = vld [vmem:[%s14320_s3 + $0x80] sm:$0xff]  }
 0x2a4   : > { %7175 = vst.msk [vmem:[#allocation3 + $0x1c] sm:$0xf] %vm1348_vm14, %v7082_v56  ;;  %v6476_v0 = vor.u32 %v6475_v60, %v6472_v46  ;;  %v12753_v53 = vrot.slane %v6479_v5, 5  ;;  %v6483_v20 = vshrl.u32 %v12713_v38, 16  ;;  %v5307_v3 = vld [vmem:[#allocation2 + $0x58] sm:$0xf]  ;;  %v4382_v38 = vadd.f32 %v12635_v9, %v9845_v10  ;;  %v9847_v14 = vpop.f32.mrf.mxu0 }
 0x2a5   : > { %v12756_v28 = vld [vmem:[#allocation2 + $0x2c] sm:$0x1]  ;;  %v4940_v7 = vsel %vm10522_vm8, %v4932_v45, %v4939_v43  ;;  %v5170_v58 = vsel %vm10537_vm10, %v4941_v26, %v5169_v32  ;;  %v10249_v29 = vld [vmem:[#allocation3] ss:$12 sps:$4 sm:$0xff]   ;;  %v10251_v62 = vld [vmem:[#allocation3 + $0x4] ss:$12 sps:$4 sm:$0xff]   ;;  %v7606_v63 = vor.u32 %v12737_v31, %v12735_v12  ;;  %v9848_v24 = vadd.f32 %v9847_v14, %v9846_v27 }
 0x2a6   : > { %v7609_v23 = vshll.u32 %v7417_v2, 16  ;;  %5168 = vst.msk [vmem:[#allocation2 + $0x70] sm:$0xf] %vm224_vm0, %v4940_v7  ;;  %5171 = vst [vmem:[#allocation2 + $0x74] sm:$0x1] %v5170_v58  ;;  %v12775_v16 = vrot.slane %v7596_v47, 4  ;;  %5743 = vrot.lane.b32.xlu1 %v5500_v50, %s10363_s10  ;;  %8764 = vmatprep.mubr.bf16.mxu1 %v10251_v62  ;;  %v4543_v51 = vadd.f32 %v12573_v18, %v4382_v38 }
 0x2a7   : > { %7176 = vst.msk [vmem:[#allocation3 + $0x28] sm:$0xf] %vm1348_vm14, %v7084_v41  ;;  %v10252_v15 = vld [vmem:[#allocation3 + $0x98] ss:$12 sps:$4 sm:$0xff]   ;;  %v6477_v55 = vrot.slane %v6476_v0, 4  ;;  %v5504_v49 = vrot.slane %v5502_v37, 4  ;;  %8765 = vmatmul.mubr.bf16.vlgmr.msra.gmra.mxu1 %v10249_v29  ;;  %7101 = vrot.lane.b32.xlu0 %v12695_v40, %s10363_s10  ;;  %v4385_v40 = vadd.f32 %v12635_v9, %v9848_v24  ;;  %v7274_v32 = vpop.permute.xlu0 %7273 }
 0x2a8   : > { %v5505_v52 = vshll.u32 %v12722_v6, 16  ;;  %v5511_v19 = vshll.u32 %v5307_v3, 16  ;;  %v5515_v61 = vshrl.u32 %v5307_v3, 16  ;;  %6151 = vst.msk [vmem:[#allocation3 + $0x18] sm:$0xf] %vm1688_vm1, %v6058_v8  ;;  %10085 = vmatprep.mubr.msk.bf16.mxu0 %vm4226_vm15, %v10252_v15  ;;  %v6485_v11 = vrot.slane %v6483_v20, 4  ;;  %v12836_v8 = vpop.f32.mrf.mxu1 }
 0x2a9   : > { %v6482_v4 = vsel %vm10529_vm9, %v6477_v55, %v12753_v53  ;;  %v5308_v59 = vld [vmem:[#allocation2 + $0x5c] sm:$0x1]  ;;  %v5237_v50 = vld [vmem:[#allocation2 + $0x60] sm:$0xf]  ;;  %v12795_v18 = vrot.slane %v7609_v23, 5  ;;  %v6489_v33 = vshll.u32 %v12756_v28, 16  ;;  %v7602_v57 = vsel %vm10529_vm9, %v12775_v16, %v12735_v12 }
 0x2aa   : > { %6841 = vst.msk [vmem:[#allocation3 + $0x34] sm:$0xf] %vm224_vm0, %v6482_v4  ;;  %v5507_v13 = vrot.slane %v5505_v52, 5  ;;  %v12797_v46 = vrot.slane %v5511_v19, 5  ;;  %5269 = vst.msk [vmem:[#allocation3 + $0xc0] sm:$0xf] %vm224_vm0, %v5237_v50  ;;  %v6486_v25 = vor.u32 %v6485_v11, %v12753_v53  ;;  %7103 = vrot.lane.b32.xlu1 %v12701_v39, %s10363_s10  ;;  %v4546_v31 = vadd.f32 %v12629_v21, %v4385_v40  ;;  %v7276_v39 = vpop.permute.xlu1 %7275 }
 0x2ab   : > { %v10295_v6 = vld [vmem:[%s14320_s3 + $0x88] sm:$0xff]   ;;  %vm4615_vm3 = vcmp.ge.f32.partialorder %v4543_v51, 0.0  ;;  %v4647_v45 = vmul.f32 0.1, %v4543_v51  ;;  %6152 = vst.msk [vmem:[#allocation3 + $0x24] sm:$0xf] %vm1688_vm1, %v6060_v54  ;;  %6077 = vrot.lane.b32.xlu0 %v12749_v44, %s10364_s17  ;;  %v6250_v27 = vpop.permute.xlu0 %6249 }
 0x2ac   : > { %10107 = vmatpush3.bf16.msra.mxu1 %v10295_v6  ;;  %v5508_v1 = vor.u32 %v5507_v13, %v5504_v49  ;;  %v5517_v5 = vrot.slane %v5515_v61, 4  ;;  %v5521_v47 = vshll.u32 %v5308_v59, 16  ;;  %v6891_v60 = vld [vmem:[#allocation2 + $0x64] sm:$0xf]  ;;  %7367 = vst.msk [vmem:[#allocation3 + $0x1c] sm:$0xf] %vm1688_vm1, %v7274_v32 }
 0x2ad   : > { %10106 = vmatprep.subr.bf16.mxu1 %v10296_v17  ;;  %v4679_v2 = vsel %vm4615_vm3, %v4543_v51, %v4647_v45  ;;  %v6487_v43 = vrot.slane %v6486_v25, 4  ;;  %v6491_v26 = vrot.slane %v6489_v33, 5  ;;  %v6890_v56 = vld [vmem:[#allocation2 + $0x60] sm:$0xe]  ;;  %v12820_v37 = vrot.slane %v7606_v63, 4 }
 0x2ae   : > { %v9679_v35 = vpack.c.bf16 %v4679_v2, %v4679_v2  ;;  %v12822_v10 = vrot.slane %v5508_v1, 4  ;;  %v5518_v0 = vor.u32 %v5517_v5, %v12797_v46  ;;  %v7978_v53 = vld [vmem:[#allocation2 + $0x6c] sm:$0xe]  ;;  %v7979_v20 = vld [vmem:[#allocation2 + $0x70] sm:$0xf]  ;;  %vm4616_vm4 = vcmp.ge.f32.partialorder %v4546_v31, 0.0  ;;  %6079 = vrot.lane.b32.xlu1 %v12770_v48, %s10364_s17  ;;  %v6252_v48 = vpop.permute.xlu1 %6251 }
 0x2af   : > { %v4648_v21 = vmul.f32 0.1, %v4546_v31  ;;  %7368 = vst.msk [vmem:[#allocation3 + $0x28] sm:$0xf] %vm1688_vm1, %v7276_v39  ;;  %v6492_v3 = vsel %vm10529_vm9, %v6487_v43, %v6491_v26  ;;  %v7016_v28 = vrot.slane %v6891_v60, 5  ;;  %v12833_v29 = vrot.slane %v5521_v47, 5  ;;  %v7834_v45 = vpop.permute.xlu0 %7833  ;;  %v4550_v43 = vpop.f32.mrf.mxu1 }
 0x2b0   : > { %10108 = vmatpush3.bf16.msra.mxu1 %v10296_v17  ;;  %v7980_v7 = vld [vmem:[#allocation2 + $0x74] sm:$0x1]  ;;  %v4943_v44 = vshrl.u32 %v9679_v35, 16  ;;  %v4946_v58 = vshll.u32 %v9679_v35, 16  ;;  %6842 = vst.msk [vmem:[#allocation3 + $0x40] sm:$0xf] %vm224_vm0, %v6492_v3  ;;  %v7612_v52 = vsel %vm10529_vm9, %v12820_v37, %v12795_v18  ;;  %v5514_v11 = vsel %vm10529_vm9, %v12822_v10, %v12797_v46 }
 0x2b1   : > { %v12831_v41 = vrot.slane %v5518_v0, 4  ;;  %v5172_v62 = vld [vmem:[#allocation2 + $0x78] sm:$0xf]  ;;  %v4680_v23 = vsel %vm4616_vm4, %v4546_v31, %v4648_v21  ;;  %6343 = vst.msk [vmem:[#allocation3 + $0x18] sm:$0xf] %vm1881_vm2, %v6250_v27  ;;  %v9547_v15 = vrot.slane %v6890_v56, 9 }
 0x2b2   : > { %v7217_v38 = vld [vmem:[#allocation2 + $0x60] sm:$0xf]  ;;  %v9563_v55 = vrot.slane %v7978_v53, 9  ;;  %v8104_v63 = vrot.slane %v7979_v20, 5  ;;  %v12838_v14 = vrot.slane %v4943_v44, 7  ;;  %v9680_v49 = vpack.c.bf16 %v4680_v23, %v4680_v23  ;;  %v7836_v0 = vpop.permute.xlu1 %7835  ;;  %v9849_v53 = vpop.f32.mrf.mxu0 }
 0x2b3   : > { %7293 = vrot.lane.b32.xlu0 %v7217_v38, %s10364_s17  ;;  %v8107_v19 = vrot.slane %v7980_v7, 5  ;;  %v12845_v61 = vld [vmem:[#allocation2 + $0x68] sm:$0x1]  ;;  %v12847_v51 = vld [vmem:[#allocation2 + $0x54] sm:$0xe]  ;;  %v12858_v59 = vsel %vm10745_vm13, %v9547_v15, %v7016_v28  ;;  %v5524_v40 = vsel %vm10529_vm9, %v12831_v41, %v12833_v29  ;;  %v7018_v25 = vrot.slane %v7016_v28, 4  ;;  %v5726_v23 = vpop.permute.xlu0 %5725 }
 0x2b4   : > { %v12849_v24 = vld [vmem:[#allocation2 + $0x58] sm:$0xf]  ;;  %6344 = vst.msk [vmem:[#allocation3 + $0x24] sm:$0xf] %vm1881_vm2, %v6252_v48  ;;  %v7218_v4 = vld [vmem:[#allocation2 + $0x64] sm:$0xf]  ;;  %v8105_v50 = vsel %vm10745_vm13, %v9563_v55, %v8104_v63  ;;  %v4948_v33 = vor.u32 %v4946_v58, %v12838_v14  ;;  %v9850_v38 = vpop.f32.mrf.mxu0  ;;  %v12888_v48 = vpop.f32.mrf.mxu1 }
 0x2b5   : > { %v8106_v54 = vrot.slane %v8104_v63, 4  ;;  %v7418_v13 = vld [vmem:[#allocation2 + $0x6c] sm:$0xf]  ;;  %v4951_v6 = vshrl.u32 %v9680_v49, 16  ;;  %7295 = vrot.lane.b32.xlu1 %v7218_v4, %s10364_s17  ;;  %8211 = vst.msk [vmem:[#allocation3 + $0xb0] sm:$0xf] %vm224_vm0, %v8105_v50 }
 0x2b6   : > { %v12869_v17 = vld [vmem:[#allocation2 + $0x5c] sm:$0x1]  ;;  %v7419_v32 = vld [vmem:[#allocation2 + $0x70] sm:$0xf]  ;;  %v4949_v1 = vrot.slane %v12838_v14, 4  ;;  %v7019_v2 = vrot.slane %v12845_v61, 5  ;;  %v5173_v56 = vsel %vm10515_vm7, %v4948_v33, %v5172_v62  ;;  %v9851_v14 = vadd.f32 %v9850_v38, %v9849_v53  ;;  %v5728_v50 = vpop.permute.xlu1 %5727 }
 0x2b7   : > { %v5176_v5 = vld [vmem:[#allocation2 + $0x80] sm:$0x1]  ;;  %7927 = vst.msk [vmem:[#allocation3 + $0x1c] sm:$0xf] %vm1881_vm2, %v7834_v45  ;;  %v6193_v47 = vld [vmem:[#allocation2 + $0x54] sm:$0xf]  ;;  %v8108_v60 = vsel %vm10745_vm13, %v8106_v54, %v8107_v19  ;;  %v9852_v54 = vpop.f32.mrf.mxu0  ;;  %v7086_v16 = vpop.permute.xlu0 %7085 }
 0x2b8   : > { %v5992_v31 = vrot.slane %v12849_v24, 5  ;;  %v6382_v26 = vld [vmem:[#allocation2 + $0x30] sm:$0xf]  ;;  %v4953_v35 = vrot.slane %v4951_v6, 7  ;;  %v4954_v39 = vshll.u32 %v9680_v49, 16  ;;  %6269 = vrot.lane.b32.xlu0 %v6193_v47, %s10365_s12  ;;  %v7614_v20 = vshrl.u32 %v7418_v13, 16 }
 0x2b9   : > { %8212 = vst.msk [vmem:[#allocation3 + $0xbc] sm:$0xf] %vm224_vm0, %v8108_v60  ;;  %v12881_v21 = vld [vmem:[#allocation2 + $0x34] sm:$0xf]  ;;  %5174 = vst [vmem:[#allocation2 + $0x78] sm:$0xf] %v5173_v56  ;;  %v12907_v6 = vsel %vm10745_vm13, %v7018_v25, %v7019_v2  ;;  %v4390_v45 = vadd.f32 %v12635_v9, %v9851_v14 }
 0x2ba   : > { %7928 = vst.msk [vmem:[#allocation3 + $0x28] sm:$0xf] %vm1881_vm2, %v7836_v0  ;;  %v6194_v3 = vld [vmem:[#allocation2 + $0x58] sm:$0xf]  ;;  %v9531_v28 = vrot.slane %v12847_v51, 9  ;;  %v5995_v7 = vrot.slane %v12869_v17, 5  ;;  %v4956_v27 = vor.u32 %v4954_v39, %v4953_v35  ;;  %v7088_v18 = vpop.permute.xlu1 %7087 }
 0x2bb   : > { %v7617_v44 = vshll.u32 %v7418_v13, 16  ;;  %v7623_v58 = vshll.u32 %v7419_v32, 16  ;;  %v4958_v62 = vrot.slane %v4953_v35, 4  ;;  %6271 = vrot.lane.b32.xlu1 %v6194_v3, %s10365_s12  ;;  %v7616_v15 = vrot.slane %v7614_v20, 4  ;;  %v7420_v63 = vld [vmem:[#allocation2 + $0x74] sm:$0x1] }
 0x2bc   : > { %v7627_v55 = vshrl.u32 %v7419_v32, 16  ;;  %5817 = vst.msk [vmem:[#allocation3 + $0x30] sm:$0xf] %vm1348_vm14, %v5726_v23  ;;  %v5994_v49 = vrot.slane %v5992_v31, 4  ;;  %v5238_v51 = vld [vmem:[#allocation2 + $0x64] sm:$0xf]  ;;  %v4957_v24 = vsel %vm10522_vm8, %v4949_v1, %v4956_v27  ;;  %7853 = vrot.lane.b32.xlu0 %v7602_v57, %s10365_s12  ;;  %v9853_v57 = vpop.f32.mrf.mxu0  ;;  %v5993_v2 = vsel %vm10745_vm13, %v9531_v28, %v5992_v31  ;;  %v4553_v31 = vpop.f32.mrf.mxu1 }
 0x2bd   : > { %v7619_v19 = vrot.slane %v7617_v44, 5  ;;  %v12890_v61 = vrot.slane %v7623_v58, 5  ;;  %v5177_v4 = vsel %vm10537_vm10, %v4958_v62, %v5176_v5  ;;  %v6494_v13 = vshrl.u32 %v6382_v26, 16  ;;  %5270 = vst.msk [vmem:[#allocation3 + $0xcc] sm:$0xf] %vm224_vm0, %v5238_v51  ;;  %v6062_v28 = vpop.permute.xlu0 %6061 }
 0x2be   : > { %v6497_v33 = vshll.u32 %v6382_v26, 16  ;;  %5175 = vst.msk [vmem:[#allocation2 + $0x7c] sm:$0xf] %vm224_vm0, %v4957_v24  ;;  %5178 = vst [vmem:[#allocation2 + $0x80] sm:$0x1] %v5177_v4  ;;  %v6503_v12 = vshll.u32 %v12881_v21, 16  ;;  %v9854_v26 = vadd.f32 %v9853_v57, %v9852_v54  ;;  %v4551_v56 = vadd.f32 %v4550_v43, %v4390_v45  ;;  %v6064_v29 = vpop.permute.xlu1 %6063 }
 0x2bf   : > { %5818 = vst.msk [vmem:[#allocation3 + $0x3c] sm:$0xf] %vm1348_vm14, %v5728_v50  ;;  %v7620_v17 = vor.u32 %v7619_v19, %v7616_v15  ;;  %7855 = vrot.lane.b32.xlu1 %v7612_v52, %s10365_s12  ;;  %v6496_v32 = vrot.slane %v6494_v13, 4  ;;  %v7629_v5 = vrot.slane %v7627_v55, 4  ;;  %v7633_v47 = vshll.u32 %v7420_v63, 16  ;;  %v8233_v37 = vld [vmem:[#allocation3 + $0x18] sm:$0xff] }
 0x2c0   : > { %v6499_v1 = vrot.slane %v6497_v33, 5  ;;  %v5309_v25 = vld [vmem:[#allocation2 + $0x60] sm:$0xf]  ;;  %7177 = vst.msk [vmem:[#allocation3 + $0x34] sm:$0xf] %vm1348_vm14, %v7086_v16  ;;  %5745 = vrot.lane.b32.xlu0 %v5514_v11, %s10363_s10  ;;  %v12930_v0 = vsel %vm10745_vm13, %v5994_v49, %v5995_v7  ;;  %v12932_v43 = vrot.slane %v6503_v12, 5  ;;  %v4393_v10 = vadd.f32 %v12635_v9, %v9854_v26 }
 0x2c1   : > { %v10255_v60 = vld [vmem:[#allocation3 + $0xb0] ss:$12 sps:$4 sm:$0xff]   ;;  %v12920_v35 = vrot.slane %v7620_v17, 4  ;;  %v8235_v52 = vld [vmem:[#allocation3 + $0x24] sm:$0xff]  ;;  %v7630_v20 = vor.u32 %v7629_v5, %v12890_v61  ;;  %7178 = vst.msk [vmem:[#allocation3 + $0x40] sm:$0xf] %vm1348_vm14, %v7088_v18 }
 0x2c2   : > { %v10253_v39 = vld [vmem:[#allocation3 + $0x1c] ss:$12 sps:$4 sm:$0xff]   ;;  %v6500_v53 = vor.u32 %v6499_v1, %v6496_v32  ;;  %v9576_v3 = vcombine.low %v8233_v37, %v8235_v52  ;;  %10086 = vmatmul.mubr.msk.bf16.gmra.mxu0 %vm4226_vm15, %v10255_v60  ;;  %vm4617_vm5 = vcmp.ge.f32.partialorder %v4551_v56, 0.0  ;;  %v4649_v46 = vmul.f32 0.1, %v4551_v56  ;;  %v7280_v32 = vpop.permute.xlu1 %7279 }
 0x2c3   : > { %v7981_v11 = vld [vmem:[#allocation2 + $0x78] sm:$0xe]  ;;  %5747 = vrot.lane.b32.xlu1 %v5524_v40, %s10363_s10  ;;  %8772 = vmatprep.mubr.bf16.mxu1 %v10253_v39  ;;  %v7626_v7 = vsel %vm10529_vm9, %v12920_v35, %v12890_v61  ;;  %v6507_v58 = vshrl.u32 %v12881_v21, 16  ;;  %v12949_v27 = vrot.slane %v7633_v47, 5  ;;  %v5310_v62 = vld [vmem:[#allocation2 + $0x64] sm:$0xf]  ;;  %v4554_v38 = vadd.f32 %v4553_v31, %v4393_v10 }
 0x2c4   : > { %v6501_v44 = vrot.slane %v6500_v53, 4  ;;  %6153 = vst.msk [vmem:[#allocation3 + $0x30] sm:$0xf] %vm1688_vm1, %v6062_v28  ;;  %8773 = vmatmul.mubr.bf16.gmra.mxu1 %v9576_v3  ;;  %v4681_v23 = vsel %vm4617_vm5, %v4551_v56, %v4649_v46  ;;  %v5526_v15 = vshrl.u32 %v5309_v25, 16  ;;  %v5529_v41 = vshll.u32 %v5309_v25, 16  ;;  %7105 = vrot.lane.b32.xlu0 %v12858_v59, %s10363_s10  ;;  %v7278_v59 = vpop.permute.xlu0 %7277 }
 0x2c5   : > { %v9681_v40 = vpack.c.bf16 %v4681_v23, %v4681_v23  ;;  %v7982_v55 = vld [vmem:[#allocation2 + $0x7c] sm:$0xf]  ;;  %v7983_v63 = vld [vmem:[#allocation2 + $0x80] sm:$0x1]  ;;  %v9564_v14 = vrot.slane %v7981_v11, 9  ;;  %v12957_v49 = vrot.slane %v7630_v20, 4 }
 0x2c6   : > { %v6506_v21 = vsel %vm10529_vm9, %v6501_v44, %v12932_v43  ;;  %6154 = vst.msk [vmem:[#allocation3 + $0x3c] sm:$0xf] %vm1688_vm1, %v6064_v29  ;;  %vm4618_vm6 = vcmp.ge.f32.partialorder %v4554_v38, 0.0  ;;  %v4650_v19 = vmul.f32 0.1, %v4554_v38  ;;  %v8111_v51 = vrot.slane %v7982_v55, 5  ;;  %v6256_v23 = vpop.permute.xlu1 %6255 }
 0x2c7   : > { %6843 = vst.msk [vmem:[#allocation3 + $0x4c] sm:$0xf] %vm224_vm0, %v6506_v21  ;;  %v5535_v24 = vshll.u32 %v5310_v62, 16  ;;  %7107 = vrot.lane.b32.xlu1 %v12907_v6, %s10363_s10  ;;  %v4960_v4 = vshrl.u32 %v9681_v40, 16  ;;  %v4963_v50 = vshll.u32 %v9681_v40, 16  ;;  %v5528_v54 = vrot.slane %v5526_v15, 4  ;;  %v9855_v15 = vpop.f32.mrf.mxu0 }
 0x2c8   : > { %v5531_v13 = vrot.slane %v5529_v41, 5  ;;  %v6384_v33 = vld [vmem:[#allocation2 + $0x38] sm:$0x1]  ;;  %7369 = vst.msk [vmem:[#allocation3 + $0x34] sm:$0xf] %vm1688_vm1, %v7278_v59  ;;  %v4682_v45 = vsel %vm4618_vm6, %v4554_v38, %v4650_v19  ;;  %v8112_v17 = vsel %vm10745_vm13, %v9564_v14, %v8111_v51  ;;  %v8113_v12 = vrot.slane %v8111_v51, 4  ;;  %6081 = vrot.lane.b32.xlu0 %v5993_v2, %s10364_s17  ;;  %v6254_v2 = vpop.permute.xlu0 %6253 }
 0x2c9   : > { %v8114_v16 = vrot.slane %v7983_v63, 5  ;;  %v5311_v57 = vld [vmem:[#allocation2 + $0x68] sm:$0x1]  ;;  %v12967_v1 = vrot.slane %v4960_v4, 7  ;;  %v5179_v6 = vld [vmem:[#allocation2 + $0x84] sm:$0xf]  ;;  %v9682_v5 = vpack.c.bf16 %v4682_v45, %v4682_v45  ;;  %v7636_v10 = vsel %vm10529_vm9, %v12957_v49, %v12949_v27  ;;  %v9856_v4 = vpop.f32.mrf.mxu0 }
 0x2ca   : > { %8213 = vst.msk [vmem:[#allocation3 + $0xc8] sm:$0xf] %vm224_vm0, %v8112_v17  ;;  %v5532_v47 = vor.u32 %v5531_v13, %v5528_v54  ;;  %v5539_v25 = vshrl.u32 %v5310_v62, 16  ;;  %v12973_v26 = vrot.slane %v5535_v24, 5  ;;  %v6509_v56 = vrot.slane %v6507_v58, 4 }
 0x2cb   : > { %7370 = vst.msk [vmem:[#allocation3 + $0x40] sm:$0xf] %vm1688_vm1, %v7280_v32  ;;  %v8115_v60 = vsel %vm10745_vm13, %v8113_v12, %v8114_v16  ;;  %v6513_v18 = vshll.u32 %v6384_v33, 16  ;;  %v12975_v37 = vld [vmem:[#allocation2 + $0x6c] sm:$0xe]  ;;  %6083 = vrot.lane.b32.xlu1 %v12930_v0, %s10364_s17  ;;  %v4965_v52 = vor.u32 %v4963_v50, %v12967_v1  ;;  %v4968_v39 = vshrl.u32 %v9682_v5, 16 }
 0x2cc   : > { %v4971_v31 = vshll.u32 %v9682_v5, 16  ;;  %8214 = vst.msk [vmem:[#allocation3 + $0xd4] sm:$0xf] %vm224_vm0, %v8115_v60  ;;  %v5545_v53 = vshll.u32 %v5311_v57, 16  ;;  %v6894_v20 = vld [vmem:[#allocation2 + $0x70] sm:$0xf]  ;;  %v6510_v0 = vor.u32 %v6509_v56, %v12932_v43  ;;  %v7838_v51 = vpop.permute.xlu0 %7837  ;;  %v9857_v33 = vadd.f32 %v9856_v4, %v9855_v15 }
 0x2cd   : > { %6345 = vst.msk [vmem:[#allocation3 + $0x30] sm:$0xf] %vm1881_vm2, %v6254_v2  ;;  %v7219_v3 = vld [vmem:[#allocation2 + $0x6c] sm:$0xf]  ;;  %v12986_v11 = vrot.slane %v5532_v47, 4  ;;  %v5541_v28 = vrot.slane %v5539_v25, 4  ;;  %v5180_v62 = vsel %vm10515_vm7, %v4965_v52, %v5179_v6  ;;  %v7840_v6 = vpop.permute.xlu1 %7839  ;;  %v9858_v47 = vpop.f32.mrf.mxu0 }
 0x2ce   : > { %v5183_v46 = vld [vmem:[#allocation2 + $0x8c] sm:$0x1]  ;;  %v6895_v44 = vld [vmem:[#allocation2 + $0x74] sm:$0x1]  ;;  %7297 = vrot.lane.b32.xlu0 %v7219_v3, %s10364_s17  ;;  %v4966_v58 = vrot.slane %v12967_v1, 4  ;;  %v4970_v38 = vrot.slane %v4968_v39, 7 }
 0x2cf   : > { %v6515_v41 = vrot.slane %v6513_v18, 5  ;;  %v12993_v29 = vld [vmem:[#allocation2 + $0x60] sm:$0xe]  ;;  %v12995_v40 = vld [vmem:[#allocation2 + $0x64] sm:$0xf]  ;;  %v6511_v63 = vrot.slane %v6510_v0, 4  ;;  %v5542_v14 = vor.u32 %v5541_v28, %v12973_v26  ;;  %v5538_v45 = vsel %vm10529_vm9, %v12986_v11, %v12973_v26 }
 0x2d0   : > { %5181 = vst [vmem:[#allocation2 + $0x84] sm:$0xf] %v5180_v62  ;;  %6346 = vst.msk [vmem:[#allocation3 + $0x3c] sm:$0xf] %vm1881_vm2, %v6256_v23  ;;  %v7220_v43 = vld [vmem:[#allocation2 + $0x70] sm:$0xf]  ;;  %v4973_v24 = vor.u32 %v4971_v31, %v4970_v38  ;;  %v4398_v18 = vadd.f32 %v12635_v9, %v9857_v33  ;;  %v5730_v31 = vpop.permute.xlu0 %5729 }
 0x2d1   : > { %v6195_v55 = vld [vmem:[#allocation2 + $0x60] sm:$0xf]  ;;  %v9548_v21 = vrot.slane %v12975_v37, 9  ;;  %v7023_v19 = vrot.slane %v6894_v20, 5  ;;  %7299 = vrot.lane.b32.xlu1 %v7220_v43, %s10364_s17  ;;  %v4975_v59 = vrot.slane %v4970_v38, 4  ;;  %v13001_v50 = vrot.slane %v5545_v53, 5  ;;  %v9859_v53 = vpop.f32.mrf.mxu0  ;;  %v5732_v15 = vpop.permute.xlu1 %5731 }
 0x2d2   : > { %v7026_v54 = vrot.slane %v6895_v44, 5  ;;  %v7421_v13 = vld [vmem:[#allocation2 + $0x78] sm:$0xf]  ;;  %7929 = vst.msk [vmem:[#allocation3 + $0x34] sm:$0xf] %vm1881_vm2, %v7838_v51  ;;  %v6516_v17 = vsel %vm10529_vm9, %v6511_v63, %v6515_v41  ;;  %v13010_v12 = vrot.slane %v5542_v14, 4  ;;  %6273 = vrot.lane.b32.xlu0 %v6195_v55, %s10365_s12  ;;  %v4974_v32 = vsel %vm10522_vm8, %v4966_v58, %v4973_v24 }
 0x2d3   : > { %v13012_v16 = vld [vmem:[#allocation2 + $0x68] sm:$0x1]  ;;  %v13014_v57 = vld [vmem:[#allocation2 + $0x3c] sm:$0xf]  ;;  %v5184_v1 = vsel %vm10537_vm10, %v4975_v59, %v5183_v46  ;;  %v6196_v5 = vld [vmem:[#allocation2 + $0x64] sm:$0xf]  ;;  %v13028_v2 = vsel %vm10745_vm13, %v9548_v21, %v7023_v19  ;;  %v4559_v28 = vadd.f32 %v12836_v8, %v4398_v18  ;;  %v9860_v44 = vadd.f32 %v9859_v53, %v9858_v47 }
 0x2d4   : > { %6844 = vst.msk [vmem:[#allocation3 + $0x58] sm:$0xf] %vm224_vm0, %v6516_v17  ;;  %v7025_v25 = vrot.slane %v7023_v19, 4  ;;  %v5999_v60 = vrot.slane %v12995_v40, 5  ;;  %v7422_v56 = vld [vmem:[#allocation2 + $0x7c] sm:$0xf]  ;;  %v5548_v20 = vsel %vm10529_vm9, %v13010_v12, %v13001_v50  ;;  %v7090_v35 = vpop.permute.xlu0 %7089 }
 0x2d5   : > { %5182 = vst.msk [vmem:[#allocation2 + $0x88] sm:$0xf] %vm224_vm0, %v4974_v32  ;;  %5185 = vst [vmem:[#allocation2 + $0x8c] sm:$0x1] %v5184_v1  ;;  %v10256_v37 = vld [vmem:[#allocation3 + $0xc8] ss:$12 sps:$4 sm:$0xff]   ;;  %6275 = vrot.lane.b32.xlu1 %v6196_v5, %s10365_s12  ;;  %v4401_v63 = vadd.f32 %v12635_v9, %v9860_v44  ;;  %v7092_v27 = vpop.permute.xlu1 %7091  ;;  %v13101_v44 = vpop.f32.mrf.mxu1 }
 0x2d6   : > { %7930 = vst.msk [vmem:[#allocation3 + $0x40] sm:$0xf] %vm1881_vm2, %v7840_v6  ;;  %v9532_v52 = vrot.slane %v12993_v29, 9  ;;  %v7638_v39 = vshrl.u32 %v7421_v13, 16  ;;  %v13038_v3 = vsel %vm10745_vm13, %v7025_v25, %v7026_v54  ;;  %v6002_v46 = vrot.slane %v13012_v16, 5  ;;  %10089 = vmatprep.mubr.msk.bf16.mxu0 %vm4226_vm15, %v10256_v37  ;;  %7857 = vrot.lane.b32.xlu0 %v7626_v7, %s10365_s12 }
 0x2d7   : > { %v7641_v0 = vshll.u32 %v7421_v13, 16  ;;  %5819 = vst.msk [vmem:[#allocation3 + $0x48] sm:$0xf] %vm1348_vm14, %v5730_v31  ;;  %v7647_v62 = vshll.u32 %v7422_v56, 16  ;;  %v5239_v23 = vld [vmem:[#allocation2 + $0x6c] sm:$0xf]  ;;  %v4562_v9 = vadd.f32 %v12888_v48, %v4401_v63 }
 0x2d8   : > { %v7640_v58 = vrot.slane %v7638_v39, 4  ;;  %v5240_v38 = vld [vmem:[#allocation2 + $0x70] sm:$0xf]  ;;  %v6001_v41 = vrot.slane %v5999_v60, 4  ;;  %v7651_v40 = vshrl.u32 %v7422_v56, 16  ;;  %v6518_v8 = vshrl.u32 %v13014_v57, 16 }
 0x2d9   : > { %v7643_v29 = vrot.slane %v7641_v0, 5  ;;  %v13050_v43 = vld [vmem:[#allocation2 + $0x40] sm:$0xf]  ;;  %5271 = vst.msk [vmem:[#allocation3 + $0xd8] sm:$0xf] %vm224_vm0, %v5239_v23  ;;  %vm4619_vm11 = vcmp.ge.f32.partialorder %v4559_v28, 0.0  ;;  %v13059_v61 = vsel %vm10745_vm13, %v9532_v52, %v5999_v60  ;;  %7859 = vrot.lane.b32.xlu1 %v7636_v10, %s10365_s12  ;;  %v6068_v52 = vpop.permute.xlu1 %6067 }
 0x2da   : > { %5272 = vst.msk [vmem:[#allocation3 + $0xe4] sm:$0xf] %vm224_vm0, %v5240_v38  ;;  %v4651_v55 = vmul.f32 0.1, %v4559_v28  ;;  %v13067_v14 = vrot.slane %v7647_v62, 5  ;;  %v6520_v21 = vrot.slane %v6518_v8, 4  ;;  %5749 = vrot.lane.b32.xlu0 %v5538_v45, %s10363_s10  ;;  %v13081_v13 = vsel %vm10745_vm13, %v6001_v41, %v6002_v46  ;;  %v6066_v45 = vpop.permute.xlu0 %6065 }
 0x2db   : > { %5820 = vst.msk [vmem:[#allocation3 + $0x54] sm:$0xf] %vm1348_vm14, %v5732_v15  ;;  %v7644_v7 = vor.u32 %v7643_v29, %v7640_v58  ;;  %v6521_v19 = vshll.u32 %v13014_v57, 16  ;;  %7179 = vst.msk [vmem:[#allocation3 + $0x4c] sm:$0xf] %vm1348_vm14, %v7090_v35  ;;  %v6527_v24 = vshll.u32 %v13050_v43, 16 }
 0x2dc   : > { %v4683_v51 = vsel %vm4619_vm11, %v4559_v28, %v4651_v55  ;;  %v7653_v59 = vrot.slane %v7651_v40, 4  ;;  %v5312_v4 = vld [vmem:[#allocation2 + $0x6c] sm:$0xf]  ;;  %vm4620_vm12 = vcmp.ge.f32.partialorder %v4562_v9, 0.0  ;;  %v4652_v17 = vmul.f32 0.1, %v4562_v9 }
 0x2dd   : > { %v9683_v50 = vpack.c.bf16 %v4683_v51, %v4683_v51  ;;  %v8237_v49 = vld [vmem:[#allocation3 + $0x30] sm:$0xff]  ;;  %v8239_v10 = vld [vmem:[#allocation3 + $0x3c] sm:$0xff]  ;;  %v13083_v48 = vrot.slane %v7644_v7, 4  ;;  %v6523_v33 = vrot.slane %v6521_v19, 5  ;;  %7180 = vst.msk [vmem:[#allocation3 + $0x58] sm:$0xf] %vm1348_vm14, %v7092_v27  ;;  %5751 = vrot.lane.b32.xlu1 %v5548_v20, %s10363_s10  ;;  %v13120_v19 = vpop.f32.mrf.mxu0  ;;  %v13125_v27 = vpop.f32.mrf.mxu1 }
 0x2de   : > { %v10257_v54 = vld [vmem:[#allocation3 + $0x34] ss:$12 sps:$4 sm:$0xff]   ;;  %v9579_v12 = vcombine.low %v8237_v49, %v8239_v10  ;;  %v6531_v16 = vshrl.u32 %v13050_v43, 16  ;;  %v7423_v32 = vld [vmem:[#allocation2 + $0x80] sm:$0x1]  ;;  %v7654_v1 = vor.u32 %v7653_v59, %v13067_v14  ;;  %v4684_v5 = vsel %vm4620_vm12, %v4562_v9, %v4652_v17  ;;  %7109 = vrot.lane.b32.xlu0 %v13028_v2, %s10363_s10  ;;  %v7282_v38 = vpop.permute.xlu0 %7281 }
 0x2df   : > { %v4977_v26 = vshrl.u32 %v9683_v50, 16  ;;  %v4980_v11 = vshll.u32 %v9683_v50, 16  ;;  %8780 = vmatprep.mubr.bf16.mxu1 %v10257_v54  ;;  %v6524_v57 = vor.u32 %v6523_v33, %v6520_v21  ;;  %v5313_v6 = vld [vmem:[#allocation2 + $0x70] sm:$0xf]  ;;  %6155 = vst.msk [vmem:[#allocation3 + $0x48] sm:$0xf] %vm1688_vm1, %v6066_v45  ;;  %v7650_v47 = vsel %vm10529_vm9, %v13083_v48, %v13067_v14 }
 0x2e0   : > { %8781 = vmatmul.mubr.bf16.gmra.mxu1 %v9579_v12  ;;  %v13094_v25 = vrot.slane %v6527_v24, 5  ;;  %v5550_v60 = vshrl.u32 %v5312_v4, 16  ;;  %v5186_v18 = vld [vmem:[#allocation2 + $0x90] sm:$0xf]  ;;  %v9684_v37 = vpack.c.bf16 %v4684_v5, %v4684_v5  ;;  %v5553_v31 = vshll.u32 %v5312_v4, 16 }
 0x2e1   : > { %v13096_v56 = vrot.slane %v4977_v26, 7  ;;  %v6525_v39 = vrot.slane %v6524_v57, 4  ;;  %6156 = vst.msk [vmem:[#allocation3 + $0x54] sm:$0xf] %vm1688_vm1, %v6068_v52  ;;  %v7657_v53 = vshll.u32 %v7423_v32, 16  ;;  %v5559_v46 = vshll.u32 %v5313_v6, 16  ;;  %7111 = vrot.lane.b32.xlu1 %v13038_v3, %s10363_s10  ;;  %v7284_v3 = vpop.permute.xlu1 %7283 }
 0x2e2   : > { %v5552_v20 = vrot.slane %v5550_v60, 4  ;;  %v5563_v0 = vshrl.u32 %v5313_v6, 16  ;;  %v6387_v28 = vld [vmem:[#allocation2 + $0x44] sm:$0x1]  ;;  %v4985_v62 = vshrl.u32 %v9684_v37, 16  ;;  %v4988_v23 = vshll.u32 %v9684_v37, 16  ;;  %6085 = vrot.lane.b32.xlu0 %v13059_v61, %s10364_s17  ;;  %v6258_v10 = vpop.permute.xlu0 %6257 }
 0x2e3   : > { %v4982_v58 = vor.u32 %v4980_v11, %v13096_v56  ;;  %v13106_v2 = vrot.slane %v7654_v1, 4  ;;  %v5314_v15 = vld [vmem:[#allocation2 + $0x74] sm:$0x1]  ;;  %v4983_v41 = vrot.slane %v13096_v56, 4  ;;  %v5190_v29 = vld [vmem:[#allocation2 + $0x98] sm:$0x1]  ;;  %v6530_v40 = vsel %vm10529_vm9, %v6525_v39, %v13094_v25 }
 0x2e4   : > { %7371 = vst.msk [vmem:[#allocation3 + $0x4c] sm:$0xf] %vm1688_vm1, %v7282_v38  ;;  %v5555_v43 = vrot.slane %v5553_v31, 5  ;;  %v13113_v8 = vrot.slane %v5559_v46, 5  ;;  %v4987_v63 = vrot.slane %v4985_v62, 7  ;;  %v6533_v35 = vrot.slane %v6531_v16, 4  ;;  %v9862_v16 = vpop.f32.mrf.mxu0  ;;  %v13153_v46 = vpop.f32.mrf.mxu1 }
 0x2e5   : > { %v5187_v55 = vsel %vm10515_vm7, %v4982_v58, %v5186_v18  ;;  %6845 = vst.msk [vmem:[#allocation3 + $0x64] sm:$0xf] %vm224_vm0, %v6530_v40  ;;  %v6537_v7 = vshll.u32 %v6387_v28, 16  ;;  %v6897_v21 = vld [vmem:[#allocation2 + $0x7c] sm:$0xf]  ;;  %v13123_v9 = vrot.slane %v7657_v53, 5  ;;  %6087 = vrot.lane.b32.xlu1 %v13081_v13, %s10364_s17 }
 0x2e6   : > { %5188 = vst [vmem:[#allocation2 + $0x90] sm:$0xf] %v5187_v55  ;;  %7372 = vst.msk [vmem:[#allocation3 + $0x58] sm:$0xf] %vm1688_vm1, %v7284_v3  ;;  %v7221_v51 = vld [vmem:[#allocation2 + $0x78] sm:$0xf]  ;;  %v5556_v24 = vor.u32 %v5555_v43, %v5552_v20  ;;  %v4990_v61 = vor.u32 %v4988_v23, %v4987_v63  ;;  %v6534_v54 = vor.u32 %v6533_v35, %v13094_v25  ;;  %v6260_v25 = vpop.permute.xlu1 %6259  ;;  %v9864_v52 = vpop.f32.mrf.mxu0 }
 0x2e7   : > { %v5565_v59 = vrot.slane %v5563_v0, 4  ;;  %v5569_v4 = vshll.u32 %v5314_v15, 16  ;;  %v7984_v50 = vld [vmem:[#allocation2 + $0x84] sm:$0xe]  ;;  %v4992_v49 = vrot.slane %v4987_v63, 4  ;;  %v6539_v33 = vrot.slane %v6537_v7, 5  ;;  %7301 = vrot.lane.b32.xlu0 %v7221_v51, %s10364_s17  ;;  %v7842_v28 = vpop.permute.xlu0 %7841 }
 0x2e8   : > { %v6896_v17 = vld [vmem:[#allocation2 + $0x78] sm:$0xe]  ;;  %v7985_v12 = vld [vmem:[#allocation2 + $0x88] sm:$0xf]  ;;  %6347 = vst.msk [vmem:[#allocation3 + $0x48] sm:$0xf] %vm1881_vm2, %v6258_v10  ;;  %v4991_v13 = vsel %vm10522_vm8, %v4983_v41, %v4990_v61  ;;  %v7660_v39 = vsel %vm10529_vm9, %v13106_v2, %v13123_v9  ;;  %v9865_v15 = vpop.f32.mrf.mxu0 }
 0x2e9   : > { %v13131_v26 = vrot.slane %v5556_v24, 4  ;;  %v5566_v11 = vor.u32 %v5565_v59, %v13113_v8  ;;  %v13134_v45 = vrot.slane %v5569_v4, 5  ;;  %v7030_v57 = vrot.slane %v6897_v21, 5  ;;  %v7986_v32 = vld [vmem:[#allocation2 + $0x8c] sm:$0x1] }
 0x2ea   : > { %v13136_v1 = vld [vmem:[#allocation2 + $0x6c] sm:$0xe]  ;;  %v13138_v6 = vld [vmem:[#allocation2 + $0x70] sm:$0xf]  ;;  %v5191_v5 = vsel %vm10537_vm10, %v4992_v49, %v5190_v29  ;;  %v7222_v60 = vld [vmem:[#allocation2 + $0x7c] sm:$0xf]  ;;  %v7844_v7 = vpop.permute.xlu1 %7843  ;;  %v9863_v59 = vadd.f32 %v9862_v16, %v13120_v19 }
 0x2eb   : > { %v6535_v56 = vrot.slane %v6534_v54, 4  ;;  %v9565_v18 = vrot.slane %v7984_v50, 9  ;;  %v6898_v37 = vld [vmem:[#allocation2 + $0x80] sm:$0x1]  ;;  %5189 = vst.msk [vmem:[#allocation2 + $0x94] sm:$0xf] %vm224_vm0, %v4991_v13  ;;  %7303 = vrot.lane.b32.xlu1 %v7222_v60, %s10364_s17  ;;  %v5562_v58 = vsel %vm10529_vm9, %v13131_v26, %v13113_v8  ;;  %v9866_v54 = vadd.f32 %v9865_v15, %v9864_v52 }
 0x2ec   : > { %5192 = vst [vmem:[#allocation2 + $0x98] sm:$0x1] %v5191_v5  ;;  %6348 = vst.msk [vmem:[#allocation3 + $0x54] sm:$0xf] %vm1881_vm2, %v6260_v25  ;;  %v13151_v31 = vrot.slane %v5566_v11, 4  ;;  %v9549_v53 = vrot.slane %v6896_v17, 9 }
 0x2ed   : > { %v8118_v20 = vrot.slane %v7985_v12, 5  ;;  %v5241_v0 = vld [vmem:[#allocation2 + $0x78] sm:$0xf]  ;;  %v6540_v62 = vsel %vm10529_vm9, %v6535_v56, %v6539_v33  ;;  %v8121_v23 = vrot.slane %v7986_v32, 5  ;;  %v7032_v38 = vrot.slane %v7030_v57, 4  ;;  %v5734_v12 = vpop.permute.xlu0 %5733 }
 0x2ee   : > { %v7424_v41 = vld [vmem:[#allocation2 + $0x84] sm:$0xf]  ;;  %5273 = vst.msk [vmem:[#allocation3 + $0xf0] sm:$0xf] %vm224_vm0, %v5241_v0  ;;  %v5242_v29 = vld [vmem:[#allocation2 + $0x7c] sm:$0xf]  ;;  %v13167_v43 = vsel %vm10745_vm13, %v9549_v53, %v7030_v57  ;;  %v5572_v21 = vsel %vm10529_vm9, %v13151_v31, %v13134_v45  ;;  %v4569_v57 = vpop.f32.mrf.mxu1  ;;  %v5736_v60 = vpop.permute.xlu1 %5735 }
 0x2ef   : > { %7931 = vst.msk [vmem:[#allocation3 + $0x4c] sm:$0xf] %vm1881_vm2, %v7842_v28  ;;  %v6197_v40 = vld [vmem:[#allocation2 + $0x6c] sm:$0xf]  ;;  %v8119_v55 = vsel %vm10745_vm13, %v9565_v18, %v8118_v20  ;;  %v8120_v63 = vrot.slane %v8118_v20, 4  ;;  %v7033_v3 = vrot.slane %v6898_v37, 5 }
 0x2f0   : > { %6846 = vst.msk [vmem:[#allocation3 + $0x70] sm:$0xf] %vm224_vm0, %v6540_v62  ;;  %v13171_v35 = vld [vmem:[#allocation2 + $0x74] sm:$0x1]  ;;  %5274 = vst.msk [vmem:[#allocation3 + $0xfc] sm:$0xf] %vm224_vm0, %v5242_v29  ;;  %6277 = vrot.lane.b32.xlu0 %v6197_v40, %s10365_s12 }
 0x2f1   : > { %8215 = vst.msk [vmem:[#allocation3 + $0xe0] sm:$0xf] %vm224_vm0, %v8119_v55  ;;  %v9533_v51 = vrot.slane %v13136_v1, 9  ;;  %v6006_v24 = vrot.slane %v13138_v6, 5  ;;  %v7987_v4 = vld [vmem:[#allocation2 + $0x90] sm:$0xe]  ;;  %v8122_v49 = vsel %vm10745_vm13, %v8120_v63, %v8121_v23  ;;  %v13190_v10 = vsel %vm10745_vm13, %v7032_v38, %v7033_v3 }
 0x2f2   : > { %v13183_v50 = vld [vmem:[#allocation2 + $0x88] sm:$0xf]  ;;  %7932 = vst.msk [vmem:[#allocation3 + $0x58] sm:$0xf] %vm1881_vm2, %v7844_v7  ;;  %v6198_v61 = vld [vmem:[#allocation2 + $0x70] sm:$0xf]  ;;  %v7096_v2 = vpop.permute.xlu1 %7095 }
 0x2f3   : > { %v7662_v33 = vshrl.u32 %v7424_v41, 16  ;;  %v13192_v17 = vld [vmem:[#allocation2 + $0x48] sm:$0xf]  ;;  %6279 = vrot.lane.b32.xlu1 %v6198_v61, %s10365_s12  ;;  %8216 = vst.msk [vmem:[#allocation3 + $0xec] sm:$0xf] %vm224_vm0, %v8122_v49  ;;  %v6009_v19 = vrot.slane %v13171_v35, 5  ;;  %v13216_v56 = vsel %vm10745_vm13, %v9533_v51, %v6006_v24 }
 0x2f4   : > { %v13200_v16 = vld [vmem:[%s14319_s2] ss:$0 sm:$0xff]  ;;  %v9566_v32 = vrot.slane %v7987_v4, 9  ;;  %v7665_v1 = vshll.u32 %v7424_v41, 16  ;;  %5821 = vst.msk [vmem:[#allocation3 + $0x60] sm:$0xf] %vm1348_vm14, %v5734_v12  ;;  %7861 = vrot.lane.b32.xlu0 %v7650_v47, %s10365_s12  ;;  %v7094_v47 = vpop.permute.xlu0 %7093 }
 0x2f5   : > { %v4406_v11 = vadd.f32 %v13200_v16, %v9863_v59  ;;  %v13204_v6 = vrot.slane %v6006_v24, 4  ;;  %v4409_v13 = vadd.f32 %v13200_v16, %v9866_v54  ;;  %v7664_v5 = vrot.slane %v7662_v33, 4  ;;  %v7988_v37 = vld [vmem:[#allocation2 + $0x94] sm:$0xf]  ;;  %v7989_v52 = vld [vmem:[#allocation2 + $0x98] sm:$0x1] }
 0x2f6   : > { %v7671_v25 = vshll.u32 %v13183_v50, 16  ;;  %v7667_v53 = vrot.slane %v7665_v1, 5  ;;  %v6542_v20 = vshrl.u32 %v13192_v17, 16  ;;  %5822 = vst.msk [vmem:[#allocation3 + $0x6c] sm:$0xf] %vm1348_vm14, %v5736_v60  ;;  %v8125_v28 = vrot.slane %v7988_v37, 5 }
 0x2f7   : > { %v4567_v18 = vadd.f32 %v13125_v27, %v4406_v11  ;;  %v4570_v0 = vadd.f32 %v4569_v57, %v4409_v13  ;;  %v8128_v62 = vrot.slane %v7989_v52, 5  ;;  %v7675_v14 = vshrl.u32 %v13183_v50, 16  ;;  %v13222_v48 = vld [vmem:[#allocation2 + $0x4c] sm:$0xf]  ;;  %7863 = vrot.lane.b32.xlu1 %v7660_v39, %s10365_s12  ;;  %v8241_v27 = vld [vmem:[#allocation3 + $0x48] sm:$0xff]  ;;  %v6072_v11 = vpop.permute.xlu1 %6071 }
 0x2f8   : > { %v7668_v38 = vor.u32 %v7667_v53, %v7664_v5  ;;  %v13230_v15 = vrot.slane %v7671_v25, 5  ;;  %7181 = vst.msk [vmem:[#allocation3 + $0x64] sm:$0xf] %vm1348_vm14, %v7094_v47  ;;  %v8126_v29 = vsel %vm10745_vm13, %v9566_v32, %v8125_v28  ;;  %v8127_v40 = vrot.slane %v8125_v28, 4  ;;  %5753 = vrot.lane.b32.xlu0 %v5562_v58, %s10363_s10  ;;  %7182 = vst.msk [vmem:[#allocation3 + $0x70] sm:$0xf] %vm1348_vm14, %v7096_v2  ;;  %v6070_v58 = vpop.permute.xlu0 %6069 }
 0x2f9   : > { %vm4621_vm3 = vcmp.ge.f32.partialorder %v4567_v18, 0.0  ;;  %v4653_v23 = vmul.f32 0.1, %v4567_v18  ;;  %vm4622_vm4 = vcmp.ge.f32.partialorder %v4570_v0, 0.0  ;;  %v4654_v41 = vmul.f32 0.1, %v4570_v0 }
 0x2fa   : > { %v8243_v9 = vld [vmem:[#allocation3 + $0x54] sm:$0xff]  ;;  %8217 = vst.msk [vmem:[#allocation3 + $0xf8] sm:$0xf] %vm224_vm0, %v8126_v29  ;;  %v6544_v63 = vrot.slane %v6542_v20, 4  ;;  %v6545_v3 = vshll.u32 %v13192_v17, 16  ;;  %v6551_v7 = vshll.u32 %v13222_v48, 16  ;;  %v8129_v8 = vsel %vm10745_vm13, %v8127_v40, %v8128_v62  ;;  %v9867_v29 = vpop.f32.mrf.mxu0 }
 0x2fb   : > { %v10259_v39 = vld [vmem:[#allocation3 + $0x4c] ss:$12 sps:$4 sm:$0xff]   ;;  %v4685_v55 = vsel %vm4621_vm3, %v4567_v18, %v4653_v23  ;;  %v9582_v51 = vcombine.low %v8241_v27, %v8243_v9  ;;  %v4686_v4 = vsel %vm4622_vm4, %v4570_v0, %v4654_v41  ;;  %v7426_v26 = vld [vmem:[#allocation2 + $0x8c] sm:$0x1]  ;;  %5755 = vrot.lane.b32.xlu1 %v5572_v21, %s10363_s10  ;;  %8218 = vst.msk [vmem:[#allocation3 + $0x104] sm:$0xf] %vm224_vm0, %v8129_v8 }
 0x2fc   : > { %v10261_v24 = vld [vmem:[#allocation3 + $0xe0] ss:$12 sps:$4 sm:$0xff]   ;;  %v9685_v59 = vpack.c.bf16 %v4685_v55, %v4685_v55  ;;  %8788 = vmatprep.mubr.bf16.mxu1 %v10259_v39  ;;  %v9686_v50 = vpack.c.bf16 %v4686_v4, %v4686_v4  ;;  %v13255_v61 = vrot.slane %v7668_v38, 4  ;;  %v6547_v49 = vrot.slane %v6545_v3, 5  ;;  %6157 = vst.msk [vmem:[#allocation3 + $0x60] sm:$0xf] %vm1688_vm1, %v6070_v58  ;;  %7113 = vrot.lane.b32.xlu0 %v13167_v43, %s10363_s10  ;;  %v7286_v53 = vpop.permute.xlu0 %7285  ;;  %v7288_v38 = vpop.permute.xlu1 %7287 }
 0x2fd   : > { %v13257_v54 = vrot.slane %v6551_v7, 5  ;;  %v5315_v33 = vld [vmem:[#allocation2 + $0x78] sm:$0xf]  ;;  %8789 = vmatmul.mubr.bf16.gmra.mxu1 %v9582_v51  ;;  %10090 = vmatmul.mubr.msk.bf16.gmra.mxu0 %vm4226_vm15, %v10261_v24  ;;  %v6555_v45 = vshrl.u32 %v13222_v48, 16  ;;  %v7677_v31 = vrot.slane %v7675_v14, 4  ;;  %v7681_v5 = vshll.u32 %v7426_v26, 16 }
 0x2fe   : > { %v4994_v17 = vshrl.u32 %v9685_v59, 16  ;;  %v4997_v12 = vshll.u32 %v9685_v59, 16  ;;  %v5316_v21 = vld [vmem:[#allocation2 + $0x7c] sm:$0xf]  ;;  %v5002_v32 = vshrl.u32 %v9686_v50, 16  ;;  %v5005_v1 = vshll.u32 %v9686_v50, 16 }
 0x2ff   : > { %v5193_v57 = vld [vmem:[#allocation2 + $0x9c] sm:$0xf]  ;;  %v6548_v13 = vor.u32 %v6547_v49, %v6544_v63  ;;  %6158 = vst.msk [vmem:[#allocation3 + $0x6c] sm:$0xf] %vm1688_vm1, %v6072_v11  ;;  %v5197_v60 = vld [vmem:[#allocation2 + $0xa4] sm:$0x1]  ;;  %v7678_v18 = vor.u32 %v7677_v31, %v13230_v15  ;;  %7115 = vrot.lane.b32.xlu1 %v13190_v10, %s10363_s10 }
 0x300   : > { %v4996_v25 = vrot.slane %v4994_v17, 7  ;;  %v5574_v37 = vshrl.u32 %v5315_v33, 16  ;;  %v5577_v52 = vshll.u32 %v5315_v33, 16  ;;  %v5004_v20 = vrot.slane %v5002_v32, 7  ;;  %v6390_v62 = vld [vmem:[#allocation2 + $0x50] sm:$0x1]  ;;  %6089 = vrot.lane.b32.xlu0 %v13216_v56, %s10364_s17  ;;  %v6262_v51 = vpop.permute.xlu0 %6261  ;;  %v6264_v49 = vpop.permute.xlu1 %6263 }
 0x301   : > { %v6549_v43 = vrot.slane %v6548_v13, 4  ;;  %v13268_v0 = vrot.slane %v7681_v5, 5  ;;  %v5583_v28 = vshll.u32 %v5316_v21, 16  ;;  %v13270_v14 = vld [vmem:[#allocation2 + $0x80] sm:$0x1]  ;;  %v13273_v27 = vrot.slane %v7678_v18, 4 }
 0x302   : > { %7373 = vst.msk [vmem:[#allocation3 + $0x64] sm:$0xf] %vm1688_vm1, %v7286_v53  ;;  %v4999_v48 = vor.u32 %v4997_v12, %v4996_v25  ;;  %v5000_v47 = vrot.slane %v4996_v25, 4  ;;  %v5576_v23 = vrot.slane %v5574_v37, 4  ;;  %v5007_v10 = vor.u32 %v5005_v1, %v5004_v20  ;;  %v13280_v9 = vld [vmem:[#allocation2 + $0x84] sm:$0xe] }
 0x303   : > { %v5009_v41 = vrot.slane %v5004_v20, 4  ;;  %v6554_v40 = vsel %vm10529_vm9, %v6549_v43, %v13257_v54  ;;  %v5579_v2 = vrot.slane %v5577_v52, 5  ;;  %v13282_v39 = vld [vmem:[#allocation2 + $0x88] sm:$0xf]  ;;  %7374 = vst.msk [vmem:[#allocation3 + $0x70] sm:$0xf] %vm1688_vm1, %v7288_v38  ;;  %v6010_v56 = vsel %vm10745_vm13, %v13204_v6, %v6009_v19  ;;  %v9868_v19 = vpop.f32.mrf.mxu0 }
 0x304   : > { %v5194_v55 = vsel %vm10515_vm7, %v4999_v48, %v5193_v57  ;;  %v10262_v63 = vld [vmem:[#allocation3 + $0xf8] ss:$12 sps:$4 sm:$0xff]   ;;  %6847 = vst.msk [vmem:[#allocation3 + $0x7c] sm:$0xf] %vm224_vm0, %v6554_v40  ;;  %v13293_v3 = vrot.slane %v5583_v28, 5  ;;  %v5587_v7 = vshrl.u32 %v5316_v21, 16  ;;  %6091 = vrot.lane.b32.xlu1 %v6010_v56, %s10364_s17  ;;  %v5008_v35 = vsel %vm10522_vm8, %v5000_v47, %v5007_v10  ;;  %v7848_v48 = vpop.permute.xlu1 %7847 }
 0x305   : > { %5195 = vst [vmem:[#allocation2 + $0x9c] sm:$0xf] %v5194_v55  ;;  %v5198_v24 = vsel %vm10537_vm10, %v5009_v41, %v5197_v60  ;;  %v5580_v6 = vor.u32 %v5579_v2, %v5576_v23  ;;  %v6557_v59 = vrot.slane %v6555_v45, 4  ;;  %6349 = vst.msk [vmem:[#allocation3 + $0x60] sm:$0xf] %vm1881_vm2, %v6262_v51  ;;  %10093 = vmatprep.mubr.msk.bf16.mxu0 %vm4226_vm15, %v10262_v63  ;;  %v6561_v26 = vshll.u32 %v6390_v62, 16  ;;  %v9870_v33 = vpop.f32.mrf.mxu0  ;;  %v7846_v60 = vpop.permute.xlu0 %7845 }
 0x306   : > { %v7223_v4 = vld [vmem:[#allocation2 + $0x84] sm:$0xf]  ;;  %5196 = vst.msk [vmem:[#allocation2 + $0xa0] sm:$0xf] %vm224_vm0, %v5008_v35  ;;  %5199 = vst [vmem:[#allocation2 + $0xa4] sm:$0x1] %v5198_v24  ;;  %v9869_v8 = vadd.f32 %v9868_v19, %v9867_v29 }
 0x307   : > { %v5589_v58 = vrot.slane %v5587_v7, 4  ;;  %v5593_v50 = vshll.u32 %v13270_v14, 16  ;;  %7305 = vrot.lane.b32.xlu0 %v7223_v4, %s10364_s17  ;;  %v13305_v17 = vrot.slane %v5580_v6, 4  ;;  %v6558_v12 = vor.u32 %v6557_v59, %v13257_v54  ;;  %6350 = vst.msk [vmem:[#allocation3 + $0x6c] sm:$0xf] %vm1881_vm2, %v6264_v49  ;;  %v9871_v18 = vpop.f32.mrf.mxu0 }
 0x308   : > { %v9550_v45 = vrot.slane %v13280_v9, 9  ;;  %v7037_v31 = vrot.slane %v13282_v39, 5  ;;  %v7224_v21 = vld [vmem:[#allocation2 + $0x88] sm:$0xf]  ;;  %v6199_v11 = vld [vmem:[#allocation2 + $0x78] sm:$0xf]  ;;  %v4414_v57 = vadd.f32 %v13200_v16, %v9869_v8  ;;  %v7674_v54 = vsel %vm10529_vm9, %v13255_v61, %v13230_v15  ;;  %v5740_v19 = vpop.permute.xlu1 %5739 }
 0x309   : > { %v5590_v32 = vor.u32 %v5589_v58, %v13293_v3  ;;  %v13313_v1 = vld [vmem:[#allocation2 + $0x78] sm:$0xe]  ;;  %v13315_v13 = vld [vmem:[#allocation2 + $0x7c] sm:$0xf]  ;;  %v5243_v5 = vld [vmem:[#allocation2 + $0x84] sm:$0xf]  ;;  %7307 = vrot.lane.b32.xlu1 %v7224_v21, %s10364_s17  ;;  %v9872_v28 = vadd.f32 %v9871_v18, %v9870_v33  ;;  %v7684_v15 = vsel %vm10529_vm9, %v13273_v27, %v13268_v0  ;;  %v5586_v23 = vsel %vm10529_vm9, %v13305_v17, %v13293_v3  ;;  %v5738_v2 = vpop.permute.xlu0 %5737 }
 0x30a   : > { %v5244_v25 = vld [vmem:[#allocation2 + $0x88] sm:$0xf]  ;;  %v6559_v37 = vrot.slane %v6558_v12, 4  ;;  %v6563_v52 = vrot.slane %v6561_v26, 5  ;;  %v13322_v53 = vld [vmem:[#allocation2 + $0x8c] sm:$0x1]  ;;  %v4575_v43 = vadd.f32 %v13101_v44, %v4414_v57  ;;  %v13345_v0 = vsel %vm10745_vm13, %v9550_v45, %v7037_v31 }
 0x30b   : > { %v7427_v20 = vld [vmem:[#allocation2 + $0x90] sm:$0xf]  ;;  %5275 = vst.msk [vmem:[#allocation3 + $0x108] sm:$0xf] %vm224_vm0, %v5243_v5  ;;  %5276 = vst.msk [vmem:[#allocation3 + $0x114] sm:$0xf] %vm224_vm0, %v5244_v25  ;;  %6281 = vrot.lane.b32.xlu0 %v6199_v11, %s10365_s12  ;;  %v4417_v41 = vadd.f32 %v13200_v16, %v9872_v28 }
 0x30c   : > { %7933 = vst.msk [vmem:[#allocation3 + $0x64] sm:$0xf] %vm1881_vm2, %v7846_v60  ;;  %v13332_v61 = vrot.slane %v5593_v50, 5  ;;  %v5245_v62 = vld [vmem:[#allocation2 + $0x90] sm:$0xf]  ;;  %v6564_v44 = vsel %vm10529_vm9, %v6559_v37, %v6563_v52  ;;  %v13341_v38 = vrot.slane %v5590_v32, 4  ;;  %v7100_v5 = vpop.permute.xlu1 %7099 }
 0x30d   : > { %v5246_v14 = vld [vmem:[#allocation2 + $0x94] sm:$0xf]  ;;  %v6200_v47 = vld [vmem:[#allocation2 + $0x7c] sm:$0xf]  ;;  %v13347_v27 = vld [vmem:[#allocation2 + $0x80] sm:$0x1]  ;;  %v4578_v3 = vadd.f32 %v13153_v46, %v4417_v41  ;;  %v7098_v33 = vpop.permute.xlu0 %7097 }
 0x30e   : > { %5277 = vst.msk [vmem:[#allocation3 + $0x120] sm:$0xf] %vm224_vm0, %v5245_v62  ;;  %5278 = vst.msk [vmem:[#allocation3 + $0x12c] sm:$0xf] %vm224_vm0, %v5246_v14  ;;  %vm4623_vm5 = vcmp.ge.f32.partialorder %v4575_v43, 0.0  ;;  %v7039_v29 = vrot.slane %v7037_v31, 4  ;;  %6283 = vrot.lane.b32.xlu1 %v6200_v47, %s10365_s12  ;;  %v5596_v6 = vsel %vm10529_vm9, %v13341_v38, %v13332_v61 }
 0x30f   : > { %7934 = vst.msk [vmem:[#allocation3 + $0x70] sm:$0xf] %vm1881_vm2, %v7848_v48  ;;  %v4655_v10 = vmul.f32 0.1, %v4575_v43  ;;  %v7428_v40 = vld [vmem:[#allocation2 + $0x94] sm:$0xf]  ;;  %7865 = vrot.lane.b32.xlu0 %v7674_v54, %s10365_s12 }
 0x310   : > { %6848 = vst.msk [vmem:[#allocation3 + $0x88] sm:$0xf] %vm224_vm0, %v6564_v44  ;;  %v7040_v9 = vrot.slane %v13322_v53, 5  ;;  %v9534_v39 = vrot.slane %v13313_v1, 9  ;;  %v6013_v56 = vrot.slane %v13315_v13, 5  ;;  %v7686_v55 = vshrl.u32 %v7427_v20, 16 }
 0x311   : > { %5823 = vst.msk [vmem:[#allocation3 + $0x78] sm:$0xf] %vm1348_vm14, %v5738_v2  ;;  %v4687_v63 = vsel %vm4623_vm5, %v4575_v43, %v4655_v10  ;;  %v6016_v7 = vrot.slane %v13347_v27, 5  ;;  %v7689_v51 = vshll.u32 %v7427_v20, 16  ;;  %v6391_v35 = vld [vmem:[#allocation2 + $0x54] sm:$0xf]  ;;  %v6074_v62 = vpop.permute.xlu0 %6073 }
 0x312   : > { %v9687_v24 = vpack.c.bf16 %v4687_v63, %v4687_v63  ;;  %v13366_v59 = vrot.slane %v7686_v55, 4  ;;  %v7695_v4 = vshll.u32 %v7428_v40, 16  ;;  %v13368_v8 = vld [vmem:[#allocation2 + $0x58] sm:$0xf]  ;;  %5824 = vst.msk [vmem:[#allocation3 + $0x84] sm:$0xf] %vm1348_vm14, %v5740_v19  ;;  %7867 = vrot.lane.b32.xlu1 %v7684_v15, %s10365_s12  ;;  %v7041_v11 = vsel %vm10745_vm13, %v7039_v29, %v7040_v9 }
 0x313   : > { %vm4624_vm6 = vcmp.ge.f32.partialorder %v4578_v3, 0.0  ;;  %v4656_v46 = vmul.f32 0.1, %v4578_v3  ;;  %v13371_v26 = vrot.slane %v7689_v51, 5  ;;  %v7699_v58 = vshrl.u32 %v7428_v40, 16  ;;  %v8245_v21 = vld [vmem:[#allocation3 + $0x60] sm:$0xff]  ;;  %5757 = vrot.lane.b32.xlu0 %v5586_v23, %s10363_s10  ;;  %v6076_v40 = vpop.permute.xlu1 %6075  ;;  %v13397_v51 = vpop.f32.mrf.mxu1 }
 0x314   : > { %v5011_v50 = vshrl.u32 %v9687_v24, 16  ;;  %v5014_v49 = vshll.u32 %v9687_v24, 16  ;;  %v6566_v17 = vshrl.u32 %v6391_v35, 16  ;;  %v6569_v12 = vshll.u32 %v6391_v35, 16  ;;  %v5200_v45 = vld [vmem:[#allocation2 + $0xa8] sm:$0xf] }
 0x315   : > { %7183 = vst.msk [vmem:[#allocation3 + $0x7c] sm:$0xf] %vm1348_vm14, %v7098_v33  ;;  %v4688_v31 = vsel %vm4624_vm6, %v4578_v3, %v4656_v46  ;;  %v6014_v57 = vsel %vm10745_vm13, %v9534_v39, %v6013_v56  ;;  %v6575_v32 = vshll.u32 %v13368_v8, 16  ;;  %7184 = vst.msk [vmem:[#allocation3 + $0x88] sm:$0xf] %vm1348_vm14, %v7100_v5  ;;  %v6015_v52 = vrot.slane %v6013_v56, 4  ;;  %v7290_v19 = vpop.permute.xlu0 %7289 }
 0x316   : > { %v5013_v1 = vrot.slane %v5011_v50, 7  ;;  %v9688_v13 = vpack.c.bf16 %v4688_v31, %v4688_v31  ;;  %v8247_v25 = vld [vmem:[#allocation3 + $0x6c] sm:$0xff]  ;;  %v6568_v54 = vrot.slane %v6566_v17, 4  ;;  %v6571_v18 = vrot.slane %v6569_v12, 5  ;;  %5759 = vrot.lane.b32.xlu1 %v5596_v6, %s10363_s10  ;;  %v7429_v48 = vld [vmem:[#allocation2 + $0x98] sm:$0x1] }
 0x317   : > { %v10263_v60 = vld [vmem:[#allocation3 + $0x64] ss:$12 sps:$4 sm:$0xff]   ;;  %v9585_v37 = vcombine.low %v8245_v21, %v8247_v25  ;;  %v13382_v53 = vrot.slane %v7695_v4, 5  ;;  %v7701_v20 = vrot.slane %v7699_v58, 4  ;;  %v5318_v43 = vld [vmem:[#allocation2 + $0x84] sm:$0xf]  ;;  %v7692_v14 = vor.u32 %v13371_v26, %v13366_v59  ;;  %7117 = vrot.lane.b32.xlu0 %v13345_v0, %s10363_s10  ;;  %v7292_v27 = vpop.permute.xlu1 %7291 }
 0x318   : > { %v5016_v28 = vor.u32 %v5014_v49, %v5013_v1  ;;  %v5019_v15 = vshrl.u32 %v9688_v13, 16  ;;  %v5022_v61 = vshll.u32 %v9688_v13, 16  ;;  %8796 = vmatprep.mubr.bf16.mxu1 %v10263_v60  ;;  %v5319_v47 = vld [vmem:[#allocation2 + $0x88] sm:$0xf]  ;;  %v5017_v23 = vrot.slane %v5013_v1, 4  ;;  %v13424_v13 = vpop.f32.mrf.mxu1 }
 0x319   : > { %6159 = vst.msk [vmem:[#allocation3 + $0x78] sm:$0xf] %vm1688_vm1, %v6074_v62  ;;  %8797 = vmatmul.mubr.bf16.gmra.mxu1 %v9585_v37  ;;  %v6572_v44 = vor.u32 %v6571_v18, %v6568_v54  ;;  %v13388_v38 = vrot.slane %v6575_v32, 5  ;;  %v6579_v10 = vshrl.u32 %v13368_v8, 16  ;;  %v5598_v2 = vshrl.u32 %v5318_v43, 16  ;;  %v6266_v5 = vpop.permute.xlu0 %6265 }
 0x31a   : > { %v5201_v41 = vsel %vm10515_vm7, %v5016_v28, %v5200_v45  ;;  %v5021_v29 = vrot.slane %v5019_v15, 7  ;;  %v5601_v9 = vshll.u32 %v5318_v43, 16  ;;  %v5204_v39 = vld [vmem:[#allocation2 + $0xb0] sm:$0x1]  ;;  %6160 = vst.msk [vmem:[#allocation3 + $0x84] sm:$0xf] %vm1688_vm1, %v6076_v40  ;;  %v7702_v55 = vor.u32 %v7701_v20, %v13382_v53  ;;  %7119 = vrot.lane.b32.xlu1 %v7041_v11, %s10363_s10  ;;  %v9873_v11 = vpop.f32.mrf.mxu0 }
 0x31b   : > { %5202 = vst [vmem:[#allocation2 + $0xa8] sm:$0xf] %v5201_v41  ;;  %v6573_v56 = vrot.slane %v6572_v44, 4  ;;  %v7705_v63 = vshll.u32 %v7429_v48, 16  ;;  %v5607_v3 = vshll.u32 %v5319_v47, 16  ;;  %v5600_v0 = vrot.slane %v5598_v2, 4  ;;  %6093 = vrot.lane.b32.xlu0 %v6014_v57, %s10364_s17  ;;  %v6268_v62 = vpop.permute.xlu1 %6267  ;;  %v13441_v2 = vpop.f32.mrf.mxu1 }
 0x31c   : > { %v5024_v35 = vor.u32 %v5022_v61, %v5021_v29  ;;  %v5026_v24 = vrot.slane %v5021_v29, 4  ;;  %v5603_v6 = vrot.slane %v5601_v9, 5  ;;  %v6393_v59 = vld [vmem:[#allocation2 + $0x5c] sm:$0x1]  ;;  %7375 = vst.msk [vmem:[#allocation3 + $0x7c] sm:$0xf] %vm1688_vm1, %v7290_v19  ;;  %v6017_v4 = vsel %vm10745_vm13, %v6015_v52, %v6016_v7  ;;  %v9874_v28 = vpop.f32.mrf.mxu0 }
 0x31d   : > { %v6578_v8 = vsel %vm10529_vm9, %v6573_v56, %v13388_v38  ;;  %v13408_v46 = vrot.slane %v5607_v3, 5  ;;  %v5611_v26 = vshrl.u32 %v5319_v47, 16  ;;  %v5320_v58 = vld [vmem:[#allocation2 + $0x8c] sm:$0x1]  ;;  %v7990_v50 = vld [vmem:[#allocation2 + $0x9c] sm:$0xe]  ;;  %v9875_v47 = vadd.f32 %v9874_v28, %v9873_v11 }
 0x31e   : > { %v5025_v49 = vsel %vm10522_vm8, %v5017_v23, %v5024_v35  ;;  %v5205_v33 = vsel %vm10537_vm10, %v5026_v24, %v5204_v39  ;;  %6849 = vst.msk [vmem:[#allocation3 + $0x94] sm:$0xf] %vm224_vm0, %v6578_v8  ;;  %v5604_v7 = vor.u32 %v5603_v6, %v5600_v0  ;;  %v6581_v17 = vrot.slane %v6579_v10, 4  ;;  %v13416_v12 = vld [vmem:[#allocation2 + $0x90] sm:$0xe]  ;;  %6095 = vrot.lane.b32.xlu1 %v6017_v4, %s10364_s17  ;;  %v9876_v10 = vpop.f32.mrf.mxu0  ;;  %v7850_v39 = vpop.permute.xlu0 %7849 }
 0x31f   : > { %v7991_v45 = vld [vmem:[#allocation2 + $0xa0] sm:$0xf]  ;;  %5203 = vst.msk [vmem:[#allocation2 + $0xac] sm:$0xf] %vm224_vm0, %v5025_v49  ;;  %5206 = vst [vmem:[#allocation2 + $0xb0] sm:$0x1] %v5205_v33  ;;  %v7852_v8 = vpop.permute.xlu1 %7851 }
 0x320   : > { %7376 = vst.msk [vmem:[#allocation3 + $0x88] sm:$0xf] %vm1688_vm1, %v7292_v27  ;;  %v13420_v31 = vrot.slane %v7692_v14, 4  ;;  %v13422_v21 = vrot.slane %v7702_v55, 4  ;;  %v6585_v32 = vshll.u32 %v6393_v59, 16  ;;  %v5613_v57 = vrot.slane %v5611_v26, 4  ;;  %v9877_v6 = vpop.f32.mrf.mxu0 }
 0x321   : > { %v6903_v1 = vld [vmem:[#allocation2 + $0x94] sm:$0xf]  ;;  %v13427_v25 = vrot.slane %v7705_v63, 5  ;;  %v6582_v60 = vor.u32 %v6581_v17, %v13388_v38  ;;  %v5617_v54 = vshll.u32 %v5320_v58, 16  ;;  %v7992_v18 = vld [vmem:[#allocation2 + $0xa4] sm:$0x1]  ;;  %v9878_v26 = vadd.f32 %v9877_v6, %v9876_v10 }
 0x322   : > { %v9567_v37 = vrot.slane %v7990_v50, 9  ;;  %6351 = vst.msk [vmem:[#allocation3 + $0x78] sm:$0xf] %vm1881_vm2, %v6266_v5  ;;  %v7225_v52 = vld [vmem:[#allocation2 + $0x90] sm:$0xf]  ;;  %v13431_v20 = vrot.slane %v5604_v7, 4  ;;  %v5614_v15 = vor.u32 %v5613_v57, %v13408_v46  ;;  %v7698_v55 = vsel %vm10529_vm9, %v13420_v31, %v13382_v53  ;;  %v5742_v11 = vpop.permute.xlu0 %5741 }
 0x323   : > { %v6587_v43 = vrot.slane %v6585_v32, 5  ;;  %v8132_v61 = vrot.slane %v7991_v45, 5  ;;  %7309 = vrot.lane.b32.xlu0 %v7225_v52, %s10364_s17  ;;  %v7226_v14 = vld [vmem:[#allocation2 + $0x94] sm:$0xf]  ;;  %v6583_v48 = vrot.slane %v6582_v60, 4  ;;  %v9551_v23 = vrot.slane %v13416_v12, 9  ;;  %v4585_v45 = vpop.f32.mrf.mxu1 }
 0x324   : > { %v13436_v44 = vld [vmem:[#allocation2 + $0x88] sm:$0xf]  ;;  %6352 = vst.msk [vmem:[#allocation3 + $0x84] sm:$0xf] %vm1881_vm2, %v6268_v62  ;;  %v7044_v38 = vrot.slane %v6903_v1, 5  ;;  %v8135_v40 = vrot.slane %v7992_v18, 5  ;;  %7311 = vrot.lane.b32.xlu1 %v7226_v14, %s10364_s17  ;;  %v7708_v63 = vsel %vm10529_vm9, %v13422_v21, %v13427_v25  ;;  %v5610_v24 = vsel %vm10529_vm9, %v13431_v20, %v13408_v46 }
 0x325   : > { %v8133_v41 = vsel %vm10745_vm13, %v9567_v37, %v8132_v61  ;;  %v8134_v29 = vrot.slane %v8132_v61, 4  ;;  %v7993_v9 = vld [vmem:[#allocation2 + $0xa8] sm:$0xe]  ;;  %v6201_v56 = vld [vmem:[#allocation2 + $0x84] sm:$0xf]  ;;  %v6588_v3 = vsel %vm10529_vm9, %v6583_v48, %v6587_v43  ;;  %v13463_v53 = vrot.slane %v5614_v15, 4 }
 0x326   : > { %8219 = vst.msk [vmem:[#allocation3 + $0x110] sm:$0xf] %vm224_vm0, %v8133_v41  ;;  %v13455_v35 = vld [vmem:[#allocation2 + $0x84] sm:$0xe]  ;;  %6850 = vst.msk [vmem:[#allocation3 + $0xa0] sm:$0xf] %vm224_vm0, %v6588_v3  ;;  %v4422_v50 = vadd.f32 %v13200_v16, %v9875_v47  ;;  %v13478_v17 = vsel %vm10745_vm13, %v9551_v23, %v7044_v38  ;;  %v4425_v5 = vadd.f32 %v13200_v16, %v9878_v26 }
 0x327   : > { %7935 = vst.msk [vmem:[#allocation3 + $0x7c] sm:$0xf] %vm1881_vm2, %v7850_v39  ;;  %v13465_v19 = vrot.slane %v5617_v54, 5  ;;  %v8136_v0 = vsel %vm10745_vm13, %v8134_v29, %v8135_v40  ;;  %v6904_v59 = vld [vmem:[#allocation2 + $0x98] sm:$0x1]  ;;  %6285 = vrot.lane.b32.xlu0 %v6201_v56, %s10365_s12  ;;  %v6020_v58 = vrot.slane %v13436_v44, 5  ;;  %v7102_v44 = vpop.permute.xlu0 %7101 }
 0x328   : > { %v13469_v4 = vld [vmem:[#allocation2 + $0x8c] sm:$0x1]  ;;  %8220 = vst.msk [vmem:[#allocation3 + $0x11c] sm:$0xf] %vm224_vm0, %v8136_v0  ;;  %v7995_v33 = vld [vmem:[#allocation2 + $0xb0] sm:$0x1]  ;;  %v4583_v1 = vadd.f32 %v13424_v13, %v4422_v50  ;;  %v5744_v13 = vpop.permute.xlu1 %5743  ;;  %v4586_v61 = vadd.f32 %v4585_v45, %v4425_v5 }
 0x329   : > { %v7994_v49 = vld [vmem:[#allocation2 + $0xac] sm:$0xf]  ;;  %v9568_v27 = vrot.slane %v7993_v9, 9  ;;  %7936 = vst.msk [vmem:[#allocation3 + $0x88] sm:$0xf] %vm1881_vm2, %v7852_v8  ;;  %v7046_v12 = vrot.slane %v7044_v38, 4  ;;  %v5620_v54 = vsel %vm10529_vm9, %v13463_v53, %v13465_v19 }
 0x32a   : > { %v6202_v7 = vld [vmem:[#allocation2 + $0x88] sm:$0xf]  ;;  %v8139_v31 = vrot.slane %v7994_v49, 5  ;;  %v8142_v21 = vrot.slane %v7995_v33, 5  ;;  %v7047_v32 = vrot.slane %v6904_v59, 5  ;;  %v9535_v57 = vrot.slane %v13455_v35, 9 }
 0x32b   : > { %6287 = vrot.lane.b32.xlu1 %v6202_v7, %s10365_s12  ;;  %v7430_v25 = vld [vmem:[#allocation2 + $0x9c] sm:$0xf]  ;;  %v13484_v60 = vld [vmem:[#allocation2 + $0xa0] sm:$0xf]  ;;  %5825 = vst.msk [vmem:[#allocation3 + $0x90] sm:$0xf] %vm1348_vm14, %v5742_v11  ;;  %7869 = vrot.lane.b32.xlu0 %v7698_v55, %s10365_s12  ;;  %v6078_v26 = vpop.permute.xlu0 %6077 }
 0x32c   : > { %v6023_v18 = vrot.slane %v13469_v4, 5  ;;  %v8140_v37 = vsel %vm10745_vm13, %v9568_v27, %v8139_v31  ;;  %v8141_v52 = vrot.slane %v8139_v31, 4  ;;  %v6394_v43 = vld [vmem:[#allocation2 + $0x60] sm:$0xf]  ;;  %v13495_v28 = vrot.slane %v6020_v58, 4  ;;  %v7104_v55 = vpop.permute.xlu1 %7103 }
 0x32d   : > { %vm4625_vm11 = vcmp.ge.f32.partialorder %v4583_v1, 0.0  ;;  %v4657_v15 = vmul.f32 0.1, %v4583_v1  ;;  %8221 = vst.msk [vmem:[#allocation3 + $0x128] sm:$0xf] %vm224_vm0, %v8140_v37  ;;  %v7710_v48 = vshrl.u32 %v7430_v25, 16  ;;  %v7048_v40 = vsel %vm10745_vm13, %v7046_v12, %v7047_v32 }
 0x32e   : > { %v13498_v62 = vld [vmem:[#allocation2 + $0x64] sm:$0xf]  ;;  %5826 = vst.msk [vmem:[#allocation3 + $0x9c] sm:$0xf] %vm1348_vm14, %v5744_v13  ;;  %v8143_v14 = vsel %vm10745_vm13, %v8141_v52, %v8142_v21  ;;  %v7713_v47 = vshll.u32 %v7430_v25, 16  ;;  %v7719_v23 = vshll.u32 %v13484_v60, 16  ;;  %v6021_v53 = vsel %vm10745_vm13, %v9535_v57, %v6020_v58 }
 0x32f   : > { %7871 = vrot.lane.b32.xlu1 %v7708_v63, %s10365_s12  ;;  %v4689_v38 = vsel %vm4625_vm11, %v4583_v1, %v4657_v15  ;;  %vm4626_vm12 = vcmp.ge.f32.partialorder %v4586_v61, 0.0  ;;  %v4658_v10 = vmul.f32 0.1, %v4586_v61  ;;  %8222 = vst.msk [vmem:[#allocation3 + $0x134] sm:$0xf] %vm224_vm0, %v8143_v14  ;;  %v6590_v41 = vshrl.u32 %v6394_v43, 16  ;;  %5761 = vrot.lane.b32.xlu0 %v5610_v24, %s10363_s10 }
 0x330   : > { %7185 = vst.msk [vmem:[#allocation3 + $0x94] sm:$0xf] %vm1348_vm14, %v7102_v44  ;;  %v10267_v29 = vld [vmem:[#allocation3 + $0x110] ss:$12 sps:$4 sm:$0xff]   ;;  %v9689_v9 = vpack.c.bf16 %v4689_v38, %v4689_v38  ;;  %v7723_v39 = vshrl.u32 %v13484_v60, 16  ;;  %v6593_v56 = vshll.u32 %v6394_v43, 16  ;;  %v6080_v21 = vpop.permute.xlu1 %6079  ;;  %v6024_v60 = vsel %vm10745_vm13, %v13495_v28, %v6023_v18  ;;  %v7294_v43 = vpop.permute.xlu0 %7293 }
 0x331   : > { %v8249_v63 = vld [vmem:[#allocation3 + $0x78] sm:$0xff]  ;;  %v8251_v3 = vld [vmem:[#allocation3 + $0x84] sm:$0xff]  ;;  %v4690_v19 = vsel %vm4626_vm12, %v4586_v61, %v4658_v10  ;;  %v6592_v0 = vrot.slane %v6590_v41, 4  ;;  %v6599_v6 = vshll.u32 %v13498_v62, 16  ;;  %7186 = vst.msk [vmem:[#allocation3 + $0xa0] sm:$0xf] %vm1348_vm14, %v7104_v55  ;;  %10094 = vmatmul.mubr.msk.bf16.gmra.mxu0 %vm4226_vm15, %v10267_v29 }
 0x332   : > { %v10265_v35 = vld [vmem:[#allocation3 + $0x7c] ss:$12 sps:$4 sm:$0xff]   ;;  %v9588_v59 = vcombine.low %v8249_v63, %v8251_v3  ;;  %v5028_v8 = vshrl.u32 %v9689_v9, 16  ;;  %v5031_v46 = vshll.u32 %v9689_v9, 16  ;;  %v9690_v20 = vpack.c.bf16 %v4690_v19, %v4690_v19  ;;  %v5321_v24 = vld [vmem:[#allocation2 + $0x90] sm:$0xf] }
 0x333   : > { %5763 = vrot.lane.b32.xlu1 %v5620_v54, %s10363_s10  ;;  %8804 = vmatprep.mubr.bf16.mxu1 %v10265_v35  ;;  %v5207_v50 = vld [vmem:[#allocation2 + $0xb4] sm:$0xf]  ;;  %v13523_v58 = vrot.slane %v7710_v48, 4  ;;  %v13525_v49 = vrot.slane %v7713_v47, 5  ;;  %v13527_v33 = vrot.slane %v7719_v23, 5  ;;  %v6595_v27 = vrot.slane %v6593_v56, 5  ;;  %v9879_v23 = vpop.f32.mrf.mxu0 }
 0x334   : > { %6161 = vst.msk [vmem:[#allocation3 + $0x90] sm:$0xf] %vm1688_vm1, %v6078_v26  ;;  %8805 = vmatmul.mubr.bf16.gmra.mxu1 %v9588_v59  ;;  %v5030_v7 = vrot.slane %v5028_v8, 7  ;;  %v5036_v12 = vshrl.u32 %v9690_v20, 16  ;;  %v5039_v45 = vshll.u32 %v9690_v20, 16  ;;  %v6603_v31 = vshrl.u32 %v13498_v62, 16  ;;  %7121 = vrot.lane.b32.xlu0 %v13478_v17, %s10363_s10  ;;  %v7296_v44 = vpop.permute.xlu1 %7295  ;;  %v6270_v63 = vpop.permute.xlu0 %6269 }
 0x335   : > { %v5211_v11 = vld [vmem:[#allocation2 + $0xbc] sm:$0x1]  ;;  %v6596_v32 = vor.u32 %v6595_v27, %v6592_v0  ;;  %v13533_v57 = vrot.slane %v6599_v6, 5  ;;  %v7725_v1 = vrot.slane %v7723_v39, 4  ;;  %v5322_v5 = vld [vmem:[#allocation2 + $0x94] sm:$0xf]  ;;  %v7716_v13 = vor.u32 %v13525_v49, %v13523_v58  ;;  %v9880_v3 = vpop.f32.mrf.mxu0 }
 0x336   : > { %v5622_v25 = vshrl.u32 %v5321_v24, 16  ;;  %6162 = vst.msk [vmem:[#allocation3 + $0x9c] sm:$0xf] %vm1688_vm1, %v6080_v21  ;;  %v5033_v54 = vor.u32 %v5031_v46, %v5030_v7  ;;  %v5034_v37 = vrot.slane %v5030_v7, 4  ;;  %v5038_v52 = vrot.slane %v5036_v12, 7 }
 0x337   : > { %v10268_v17 = vld [vmem:[#allocation3 + $0x128] ss:$12 sps:$4 sm:$0xff]   ;;  %7123 = vrot.lane.b32.xlu1 %v7048_v40, %s10363_s10  ;;  %v6597_v15 = vrot.slane %v6596_v32, 4  ;;  %v7432_v61 = vld [vmem:[#allocation2 + $0xa4] sm:$0x1]  ;;  %v5625_v14 = vshll.u32 %v5321_v24, 16  ;;  %v7726_v10 = vor.u32 %v7725_v1, %v13527_v33  ;;  %v9881_v6 = vadd.f32 %v9880_v3, %v9879_v23  ;;  %v9882_v26 = vpop.f32.mrf.mxu0 }
 0x338   : > { %v5624_v62 = vrot.slane %v5622_v25, 4  ;;  %7377 = vst.msk [vmem:[#allocation3 + $0x94] sm:$0xf] %vm1688_vm1, %v7294_v43  ;;  %v5208_v4 = vsel %vm10515_vm7, %v5033_v54, %v5207_v50  ;;  %v5041_v18 = vor.u32 %v5039_v45, %v5038_v52  ;;  %v5043_v28 = vrot.slane %v5038_v52, 4  ;;  %10097 = vmatprep.mubr.msk.bf16.mxu0 %vm4226_vm15, %v10268_v17  ;;  %v6396_v47 = vld [vmem:[#allocation2 + $0x68] sm:$0x1]  ;;  %6097 = vrot.lane.b32.xlu0 %v6021_v53, %s10364_s17  ;;  %v6272_v50 = vpop.permute.xlu1 %6271 }
 0x339   : > { %v5631_v48 = vshll.u32 %v5322_v5, 16  ;;  %5209 = vst [vmem:[#allocation2 + $0xb4] sm:$0xf] %v5208_v4  ;;  %v6602_v38 = vsel %vm10529_vm9, %v6597_v15, %v13533_v57  ;;  %v5627_v41 = vrot.slane %v5625_v14, 5  ;;  %v5635_v29 = vshrl.u32 %v5322_v5, 16  ;;  %v9883_v32 = vpop.f32.mrf.mxu0 }
 0x33a   : > { %7378 = vst.msk [vmem:[#allocation3 + $0xa0] sm:$0xf] %vm1688_vm1, %v7296_v44  ;;  %v5042_v40 = vsel %vm10522_vm8, %v5034_v37, %v5041_v18  ;;  %v5212_v9 = vsel %vm10537_vm10, %v5043_v28, %v5211_v11  ;;  %v7729_v39 = vshll.u32 %v7432_v61, 16  ;;  %v6605_v56 = vrot.slane %v6603_v31, 4  ;;  %v5323_v55 = vld [vmem:[#allocation2 + $0x98] sm:$0x1]  ;;  %v7854_v11 = vpop.permute.xlu0 %7853 }
 0x33b   : > { %6851 = vst.msk [vmem:[#allocation3 + $0xac] sm:$0xf] %vm224_vm0, %v6602_v38  ;;  %6099 = vrot.lane.b32.xlu1 %v6024_v60, %s10364_s17  ;;  %v7227_v35 = vld [vmem:[#allocation2 + $0x9c] sm:$0xf]  ;;  %5210 = vst.msk [vmem:[#allocation2 + $0xb8] sm:$0xf] %vm224_vm0, %v5042_v40  ;;  %v5628_v53 = vor.u32 %v5627_v41, %v5624_v62  ;;  %v4430_v7 = vadd.f32 %v13200_v16, %v9881_v6  ;;  %v9884_v16 = vadd.f32 %v9883_v32, %v9882_v26 }
 0x33c   : > { %5213 = vst [vmem:[#allocation2 + $0xbc] sm:$0x1] %v5212_v9  ;;  %v6609_v19 = vshll.u32 %v6396_v47, 16  ;;  %v6905_v0 = vld [vmem:[#allocation2 + $0x9c] sm:$0xe]  ;;  %v13562_v59 = vrot.slane %v5631_v48, 5  ;;  %v6606_v8 = vor.u32 %v6605_v56, %v13533_v57  ;;  %7313 = vrot.lane.b32.xlu0 %v7227_v35, %s10364_s17  ;;  %v7856_v17 = vpop.permute.xlu1 %7855 }
 0x33d   : > { %6353 = vst.msk [vmem:[#allocation3 + $0x90] sm:$0xf] %vm1881_vm2, %v6270_v63  ;;  %v5637_v46 = vrot.slane %v5635_v29, 4  ;;  %v6906_v20 = vld [vmem:[#allocation2 + $0xa0] sm:$0xf]  ;;  %v7717_v58 = vrot.slane %v7716_v13, 4  ;;  %v4591_v60 = vadd.f32 %v13397_v51, %v4430_v7 }
 0x33e   : > { %v5247_v24 = vld [vmem:[#allocation2 + $0x9c] sm:$0xf]  ;;  %v13566_v49 = vrot.slane %v7726_v10, 4  ;;  %v5248_v27 = vld [vmem:[#allocation2 + $0xa0] sm:$0xf]  ;;  %v7731_v45 = vrot.slane %v7729_v39, 5 }
 0x33f   : > { %5279 = vst.msk [vmem:[#allocation3 + $0x138] sm:$0xf] %vm224_vm0, %v5247_v24  ;;  %v7228_v12 = vld [vmem:[#allocation2 + $0xa0] sm:$0xf]  ;;  %v6607_v31 = vrot.slane %v6606_v8, 4  ;;  %v6611_v21 = vrot.slane %v6609_v19, 5  ;;  %v5638_v52 = vor.u32 %v5637_v46, %v13562_v59  ;;  %v7722_v13 = vsel %vm10529_vm9, %v7717_v58, %v13527_v33  ;;  %v5746_v33 = vpop.permute.xlu0 %5745 }
 0x340   : > { %6354 = vst.msk [vmem:[#allocation3 + $0x9c] sm:$0xf] %vm1881_vm2, %v6272_v50  ;;  %7315 = vrot.lane.b32.xlu1 %v7228_v12, %s10364_s17  ;;  %v13573_v57 = vrot.slane %v5628_v53, 4  ;;  %v5641_v1 = vshll.u32 %v5323_v55, 16  ;;  %v9552_v5 = vrot.slane %v6905_v0, 9  ;;  %v7051_v25 = vrot.slane %v6906_v20, 5  ;;  %v5748_v56 = vpop.permute.xlu1 %5747 }
 0x341   : > { %5280 = vst.msk [vmem:[#allocation3 + $0x144] sm:$0xf] %vm224_vm0, %v5248_v27  ;;  %v6203_v54 = vld [vmem:[#allocation2 + $0x90] sm:$0xf]  ;;  %v6612_v37 = vsel %vm10529_vm9, %v6607_v31, %v6611_v21  ;;  %v6204_v43 = vld [vmem:[#allocation2 + $0x94] sm:$0xf]  ;;  %v7732_v4 = vsel %vm10529_vm9, %v13566_v49, %v7731_v45 }
 0x342   : > { %7937 = vst.msk [vmem:[#allocation3 + $0x94] sm:$0xf] %vm1881_vm2, %v7854_v11  ;;  %6289 = vrot.lane.b32.xlu0 %v6203_v54, %s10365_s12  ;;  %v13585_v51 = vld [vmem:[#allocation2 + $0xa4] sm:$0x1]  ;;  %v6397_v15 = vld [vmem:[#allocation2 + $0x6c] sm:$0xf]  ;;  %v5634_v28 = vsel %vm10529_vm9, %v13573_v57, %v13562_v59  ;;  %v13601_v47 = vsel %vm10745_vm13, %v9552_v5, %v7051_v25 }
 0x343   : > { %6852 = vst.msk [vmem:[#allocation3 + $0xb8] sm:$0xf] %vm224_vm0, %v6612_v37  ;;  %vm4627_vm3 = vcmp.ge.f32.partialorder %v4591_v60, 0.0  ;;  %v4659_v61 = vmul.f32 0.1, %v4591_v60  ;;  %v5643_v48 = vrot.slane %v5641_v1, 5  ;;  %v7106_v59 = vpop.permute.xlu0 %7105 }
 0x344   : > { %v10298_v62 = vld [vmem:[%s14319_s2] ss:$0 sm:$0xff]  ;;  %7938 = vst.msk [vmem:[#allocation3 + $0xa0] sm:$0xf] %vm1881_vm2, %v7856_v17  ;;  %v7433_v18 = vld [vmem:[#allocation2 + $0xa8] sm:$0xf]  ;;  %6291 = vrot.lane.b32.xlu1 %v6204_v43, %s10365_s12  ;;  %v7108_v27 = vpop.permute.xlu1 %7107 }
 0x345   : > { %v4433_v14 = vadd.f32 %v10298_v62, %v9884_v16  ;;  %v13603_v23 = vrot.slane %v7051_v25, 4  ;;  %v13605_v44 = vld [vmem:[#allocation2 + $0x70] sm:$0xf]  ;;  %v4691_v38 = vsel %vm4627_vm3, %v4591_v60, %v4659_v61  ;;  %5827 = vst.msk [vmem:[#allocation3 + $0xa8] sm:$0xf] %vm1348_vm14, %v5746_v33  ;;  %v5639_v41 = vrot.slane %v5638_v52, 4 }
 0x346   : > { %v13609_v29 = vld [vmem:[#allocation2 + $0x90] sm:$0xe]  ;;  %v7434_v40 = vld [vmem:[#allocation2 + $0xac] sm:$0xf]  ;;  %v6614_v9 = vshrl.u32 %v6397_v15, 16  ;;  %v9691_v39 = vpack.c.bf16 %v4691_v38, %v4691_v38  ;;  %7873 = vrot.lane.b32.xlu0 %v7722_v13, %s10365_s12  ;;  %v7054_v55 = vrot.slane %v13585_v51, 5 }
 0x347   : > { %v4594_v10 = vadd.f32 %v13441_v2, %v4433_v14  ;;  %v5882_v63 = vld [vmem:[#allocation2 + $0x94] sm:$0xf]  ;;  %v7734_v3 = vshrl.u32 %v7433_v18, 16  ;;  %v7737_v35 = vshll.u32 %v7433_v18, 16  ;;  %5828 = vst.msk [vmem:[#allocation3 + $0xb4] sm:$0xf] %vm1348_vm14, %v5748_v56  ;;  %v5644_v7 = vsel %vm10529_vm9, %v5639_v41, %v5643_v48  ;;  %v6082_v54 = vpop.permute.xlu0 %6081 }
 0x348   : > { %v6616_v2 = vrot.slane %v6614_v9, 4  ;;  %v6617_v19 = vshll.u32 %v6397_v15, 16  ;;  %v5045_v0 = vshrl.u32 %v9691_v39, 16  ;;  %v5048_v6 = vshll.u32 %v9691_v39, 16  ;;  %7875 = vrot.lane.b32.xlu1 %v7732_v4, %s10365_s12  ;;  %7187 = vst.msk [vmem:[#allocation3 + $0xac] sm:$0xf] %vm1348_vm14, %v7106_v59  ;;  %v6084_v18 = vpop.permute.xlu1 %6083 }
 0x349   : > { %vm4628_vm4 = vcmp.ge.f32.partialorder %v4594_v10, 0.0  ;;  %v4660_v53 = vmul.f32 0.1, %v4594_v10  ;;  %v9536_v8 = vrot.slane %v13609_v29, 9  ;;  %v7743_v46 = vshll.u32 %v7434_v40, 16  ;;  %v8253_v12 = vld [vmem:[#allocation3 + $0x90] sm:$0xff] }
 0x34a   : > { %v7747_v24 = vshrl.u32 %v7434_v40, 16  ;;  %v6619_v26 = vrot.slane %v6617_v19, 5  ;;  %v6623_v50 = vshll.u32 %v13605_v44, 16  ;;  %v13618_v58 = vrot.slane %v5045_v0, 7  ;;  %5765 = vrot.lane.b32.xlu0 %v5634_v28, %s10363_s10  ;;  %v5214_v11 = vld [vmem:[#allocation2 + $0xc0] sm:$0xf] }
 0x34b   : > { %v4692_v20 = vsel %vm4628_vm4, %v4594_v10, %v4660_v53  ;;  %v8255_v45 = vld [vmem:[#allocation3 + $0x9c] sm:$0xff]  ;;  %v6027_v21 = vrot.slane %v5882_v63, 5  ;;  %7188 = vst.msk [vmem:[#allocation3 + $0xb8] sm:$0xf] %vm1348_vm14, %v7108_v27  ;;  %v13624_v57 = vrot.slane %v7734_v3, 4  ;;  %v13626_v1 = vrot.slane %v7737_v35, 5  ;;  %v7298_v40 = vpop.permute.xlu0 %7297 }
 0x34c   : > { %v9692_v49 = vpack.c.bf16 %v4692_v20, %v4692_v20  ;;  %v10269_v31 = vld [vmem:[#allocation3 + $0x94] ss:$12 sps:$4 sm:$0xff]   ;;  %v9591_v32 = vcombine.low %v8253_v12, %v8255_v45  ;;  %v6620_v5 = vor.u32 %v6619_v26, %v6616_v2  ;;  %v5050_v25 = vor.u32 %v5048_v6, %v13618_v58  ;;  %5767 = vrot.lane.b32.xlu1 %v5644_v7, %s10363_s10  ;;  %v5324_v15 = vld [vmem:[#allocation2 + $0x9c] sm:$0xf]  ;;  %v5218_v4 = vld [vmem:[#allocation2 + $0xc8] sm:$0x1]  ;;  %v7300_v0 = vpop.permute.xlu1 %7299 }
 0x34d   : > { %8812 = vmatprep.mubr.bf16.mxu1 %v10269_v31  ;;  %v5883_v37 = vld [vmem:[#allocation2 + $0x98] sm:$0x1]  ;;  %v13630_v52 = vrot.slane %v7743_v46, 5  ;;  %6163 = vst.msk [vmem:[#allocation3 + $0xa8] sm:$0xf] %vm1688_vm1, %v6082_v54  ;;  %v6625_v43 = vrot.slane %v6623_v50, 5  ;;  %v7055_v33 = vsel %vm10745_vm13, %v13603_v23, %v7054_v55  ;;  %v6028_v48 = vsel %vm10745_vm13, %v9536_v8, %v6027_v21 }
 0x34e   : > { %v5053_v60 = vshrl.u32 %v9692_v49, 16  ;;  %v5056_v16 = vshll.u32 %v9692_v49, 16  ;;  %8813 = vmatmul.mubr.bf16.gmra.mxu1 %v9591_v32  ;;  %v6621_v17 = vrot.slane %v6620_v5, 4  ;;  %v6627_v13 = vshrl.u32 %v13605_v44, 16  ;;  %7125 = vrot.lane.b32.xlu0 %v13601_v47, %s10363_s10  ;;  %v6399_v28 = vld [vmem:[#allocation2 + $0x74] sm:$0x1] }
 0x34f   : > { %v13634_v51 = vrot.slane %v7747_v24, 4  ;;  %v5051_v61 = vrot.slane %v13618_v58, 4  ;;  %v5215_v62 = vsel %vm10515_vm7, %v5050_v25, %v5214_v11  ;;  %6164 = vst.msk [vmem:[#allocation3 + $0xb4] sm:$0xf] %vm1688_vm1, %v6084_v18  ;;  %v6029_v44 = vrot.slane %v6027_v21, 4  ;;  %v6274_v26 = vpop.permute.xlu0 %6273 }
 0x350   : > { %v5055_v14 = vrot.slane %v5053_v60, 7  ;;  %5216 = vst [vmem:[#allocation2 + $0xc0] sm:$0xf] %v5215_v62  ;;  %v6030_v22 = vrot.slane %v5883_v37, 5  ;;  %v6626_v38 = vsel %vm10529_vm9, %v6621_v17, %v6625_v43  ;;  %v7435_v10 = vld [vmem:[#allocation2 + $0xb0] sm:$0x1]  ;;  %7127 = vrot.lane.b32.xlu1 %v7055_v33, %s10363_s10  ;;  %v7740_v56 = vor.u32 %v13626_v1, %v13624_v57  ;;  %v6276_v11 = vpop.permute.xlu1 %6275 }
 0x351   : > { %v5325_v41 = vld [vmem:[#allocation2 + $0xa0] sm:$0xf]  ;;  %6853 = vst.msk [vmem:[#allocation3 + $0xc4] sm:$0xf] %vm224_vm0, %v6626_v38  ;;  %v5646_v23 = vshrl.u32 %v5324_v15, 16  ;;  %v5649_v9 = vshll.u32 %v5324_v15, 16  ;;  %v7750_v55 = vor.u32 %v13634_v51, %v13630_v52 }
 0x352   : > { %v5058_v47 = vor.u32 %v5056_v16, %v5055_v14  ;;  %v5060_v29 = vrot.slane %v5055_v14, 4  ;;  %v7996_v39 = vld [vmem:[#allocation2 + $0xb4] sm:$0xe]  ;;  %7379 = vst.msk [vmem:[#allocation3 + $0xac] sm:$0xf] %vm1688_vm1, %v7298_v40  ;;  %v6629_v63 = vrot.slane %v6627_v13, 4  ;;  %6101 = vrot.lane.b32.xlu0 %v6028_v48, %s10364_s17  ;;  %v6031_v30 = vsel %vm10745_vm13, %v6029_v44, %v6030_v22 }
 0x353   : > { %v6633_v3 = vshll.u32 %v6399_v28, 16  ;;  %v7997_v35 = vld [vmem:[#allocation2 + $0xb8] sm:$0xf]  ;;  %v5249_v53 = vld [vmem:[#allocation2 + $0xa8] sm:$0xf]  ;;  %v5655_v6 = vshll.u32 %v5325_v41, 16  ;;  %v7858_v13 = vpop.permute.xlu0 %7857 }
 0x354   : > { %v5059_v2 = vsel %vm10522_vm8, %v5051_v61, %v5058_v47  ;;  %v5219_v19 = vsel %vm10537_vm10, %v5060_v29, %v5218_v4  ;;  %v5659_v59 = vshrl.u32 %v5325_v41, 16  ;;  %v7998_v8 = vld [vmem:[#allocation2 + $0xbc] sm:$0x1]  ;;  %5281 = vst.msk [vmem:[#allocation3 + $0x150] sm:$0xf] %vm224_vm0, %v5249_v53  ;;  %v7753_v20 = vshll.u32 %v7435_v10, 16  ;;  %6103 = vrot.lane.b32.xlu1 %v6031_v30, %s10364_s17  ;;  %v7860_v28 = vpop.permute.xlu1 %7859 }
 0x355   : > { %v5250_v46 = vld [vmem:[#allocation2 + $0xac] sm:$0xf]  ;;  %5220 = vst [vmem:[#allocation2 + $0xc8] sm:$0x1] %v5219_v19  ;;  %5217 = vst.msk [vmem:[#allocation2 + $0xc4] sm:$0xf] %vm224_vm0, %v5059_v2  ;;  %v6630_v42 = vor.u32 %v6629_v63, %v6625_v43 }
 0x356   : > { %7380 = vst.msk [vmem:[#allocation3 + $0xb8] sm:$0xf] %vm1688_vm1, %v7300_v0  ;;  %v6635_v24 = vrot.slane %v6633_v3, 5  ;;  %v5648_v50 = vrot.slane %v5646_v23, 4  ;;  %v5651_v58 = vrot.slane %v5649_v9, 5  ;;  %v9569_v27 = vrot.slane %v7996_v39, 9 }
 0x357   : > { %5282 = vst.msk [vmem:[#allocation3 + $0x15c] sm:$0xf] %vm224_vm0, %v5250_v46  ;;  %v5326_v49 = vld [vmem:[#allocation2 + $0xa4] sm:$0x1]  ;;  %v7229_v7 = vld [vmem:[#allocation2 + $0xa8] sm:$0xf]  ;;  %v5750_v9 = vpop.permute.xlu0 %5749 }
 0x358   : > { %6355 = vst.msk [vmem:[#allocation3 + $0xa8] sm:$0xf] %vm1881_vm2, %v6274_v26  ;;  %v6631_v12 = vrot.slane %v6630_v42, 4  ;;  %v8146_v45 = vrot.slane %v7997_v35, 5  ;;  %v8149_v31 = vrot.slane %v7998_v8, 5  ;;  %7317 = vrot.lane.b32.xlu0 %v7229_v7, %s10364_s17  ;;  %v7741_v32 = vrot.slane %v7740_v56, 4 }
 0x359   : > { %v6400_v21 = vld [vmem:[#allocation2 + $0x78] sm:$0xf]  ;;  %v13670_v57 = vrot.slane %v7750_v55, 4  ;;  %v13672_v1 = vrot.slane %v5655_v6, 5  ;;  %v5661_v5 = vrot.slane %v5659_v59, 4  ;;  %v7755_v16 = vrot.slane %v7753_v20, 5  ;;  %v5752_v6 = vpop.permute.xlu1 %5751 }
 0x35a   : > { %v7436_v25 = vld [vmem:[#allocation2 + $0xb4] sm:$0xf]  ;;  %6356 = vst.msk [vmem:[#allocation3 + $0xb4] sm:$0xf] %vm1881_vm2, %v6276_v11  ;;  %v7230_v60 = vld [vmem:[#allocation2 + $0xac] sm:$0xf]  ;;  %v6636_v54 = vsel %vm10529_vm9, %v6631_v12, %v6635_v24  ;;  %v8147_v17 = vsel %vm10745_vm13, %v9569_v27, %v8146_v45  ;;  %v5652_v15 = vor.u32 %v5651_v58, %v5648_v50  ;;  %v7746_v10 = vsel %vm10529_vm9, %v7741_v32, %v13630_v52 }
 0x35b   : > { %v13677_v37 = vld [vmem:[#allocation2 + $0xac] sm:$0xf]  ;;  %v8148_v43 = vrot.slane %v8146_v45, 4  ;;  %7319 = vrot.lane.b32.xlu1 %v7230_v60, %s10364_s17  ;;  %v6205_v51 = vld [vmem:[#allocation2 + $0x9c] sm:$0xf]  ;;  %v5665_v62 = vshll.u32 %v5326_v49, 16  ;;  %v5662_v44 = vor.u32 %v5661_v5, %v13672_v1  ;;  %v7756_v41 = vsel %vm10529_vm9, %v13670_v57, %v7755_v16  ;;  %v7110_v58 = vpop.permute.xlu0 %7109 }
 0x35c   : > { %6854 = vst.msk [vmem:[#allocation3 + $0xd0] sm:$0xf] %vm224_vm0, %v6636_v54  ;;  %8223 = vst.msk [vmem:[#allocation3 + $0x140] sm:$0xf] %vm224_vm0, %v8147_v17  ;;  %v13684_v61 = vld [vmem:[#allocation2 + $0x7c] sm:$0xf]  ;;  %6293 = vrot.lane.b32.xlu0 %v6205_v51, %s10365_s12 }
 0x35d   : > { %7939 = vst.msk [vmem:[#allocation3 + $0xac] sm:$0xf] %vm1881_vm2, %v7858_v13  ;;  %v13687_v14 = vld [vmem:[#allocation2 + $0xa8] sm:$0xe]  ;;  %v8150_v4 = vsel %vm10745_vm13, %v8148_v43, %v8149_v31  ;;  %v7758_v18 = vshrl.u32 %v7436_v25, 16  ;;  %v7761_v33 = vshll.u32 %v7436_v25, 16  ;;  %v7112_v25 = vpop.permute.xlu1 %7111 }
 0x35e   : > { %v6206_v48 = vld [vmem:[#allocation2 + $0xa0] sm:$0xf]  ;;  %v7058_v22 = vrot.slane %v13677_v37, 5  ;;  %8224 = vst.msk [vmem:[#allocation3 + $0x14c] sm:$0xf] %vm224_vm0, %v8150_v4  ;;  %v6638_v38 = vshrl.u32 %v6400_v21, 16 }
 0x35f   : > { %7940 = vst.msk [vmem:[#allocation3 + $0xb8] sm:$0xf] %vm1881_vm2, %v7860_v28  ;;  %v13702_v47 = vld [vmem:[#allocation2 + $0xb0] sm:$0x1]  ;;  %v13704_v29 = vld [vmem:[#allocation2 + $0x9c] sm:$0xe]  ;;  %6295 = vrot.lane.b32.xlu1 %v6206_v48, %s10365_s12 }
 0x360   : > { %v13706_v40 = vld [vmem:[#allocation2 + $0xa0] sm:$0xf]  ;;  %v6641_v23 = vshll.u32 %v6400_v21, 16  ;;  %v5653_v39 = vrot.slane %v5652_v15, 4  ;;  %v9553_v56 = vrot.slane %v13687_v14, 9  ;;  %v6640_v63 = vrot.slane %v6638_v38, 4  ;;  %7877 = vrot.lane.b32.xlu0 %v7746_v10, %s10365_s12 }
 0x361   : > { %v7437_v55 = vld [vmem:[#allocation2 + $0xb8] sm:$0xf]  ;;  %v6647_v52 = vshll.u32 %v13684_v61, 16  ;;  %5829 = vst.msk [vmem:[#allocation3 + $0xc0] sm:$0xf] %vm1348_vm14, %v5750_v9  ;;  %v5667_v3 = vrot.slane %v5665_v62, 5  ;;  %v6086_v62 = vpop.permute.xlu0 %6085  ;;  %v6088_v10 = vpop.permute.xlu1 %6087 }
 0x362   : > { %v7760_v35 = vrot.slane %v7758_v18, 4  ;;  %v7763_v53 = vrot.slane %v7761_v33, 5  ;;  %v6643_v2 = vrot.slane %v6641_v23, 5  ;;  %v5327_v19 = vld [vmem:[#allocation2 + $0xa8] sm:$0xf]  ;;  %v5663_v59 = vrot.slane %v5662_v44, 4 }
 0x363   : > { %v6402_v0 = vld [vmem:[#allocation2 + $0x80] sm:$0x1]  ;;  %v7060_v8 = vrot.slane %v7058_v22, 4  ;;  %v7061_v46 = vrot.slane %v13702_v47, 5  ;;  %v13714_v30 = vld [vmem:[#allocation2 + $0xa4] sm:$0x1]  ;;  %7879 = vrot.lane.b32.xlu1 %v7756_v41, %s10365_s12  ;;  %v5658_v21 = vsel %vm10529_vm9, %v5653_v39, %v13672_v1  ;;  %v7059_v16 = vsel %vm10745_vm13, %v9553_v56, %v7058_v22 }
 0x364   : > { %v6651_v20 = vshrl.u32 %v13684_v61, 16  ;;  %5830 = vst.msk [vmem:[#allocation3 + $0xcc] sm:$0xf] %vm1348_vm14, %v5752_v6  ;;  %v7767_v42 = vshll.u32 %v7437_v55, 16  ;;  %v7771_v24 = vshrl.u32 %v7437_v55, 16  ;;  %v6644_v26 = vor.u32 %v6643_v2, %v6640_v63  ;;  %5769 = vrot.lane.b32.xlu0 %v5658_v21, %s10363_s10  ;;  %v8257_v54 = vld [vmem:[#allocation3 + $0xa8] sm:$0xff] }
 0x365   : > { %v6649_v50 = vrot.slane %v6647_v52, 5  ;;  %v9537_v49 = vrot.slane %v13704_v29, 9  ;;  %v6034_v27 = vrot.slane %v13706_v40, 5  ;;  %v7438_v7 = vld [vmem:[#allocation2 + $0xbc] sm:$0x1]  ;;  %v5670_v45 = vshrl.u32 %v5327_v19, 16  ;;  %v7302_v55 = vpop.permute.xlu0 %7301 }
 0x366   : > { %v13721_v12 = vld [vmem:[#allocation2 + $0xac] sm:$0xf]  ;;  %v5673_v31 = vshll.u32 %v5327_v19, 16  ;;  %7189 = vst.msk [vmem:[#allocation3 + $0xc4] sm:$0xf] %vm1348_vm14, %v7110_v58  ;;  %v6037_v32 = vrot.slane %v13714_v30, 5  ;;  %v7764_v57 = vor.u32 %v7763_v53, %v7760_v35  ;;  %v5668_v60 = vsel %vm10529_vm9, %v5663_v59, %v5667_v3 }
 0x367   : > { %v10273_v11 = vld [vmem:[#allocation3 + $0x140] ss:$12 sps:$4 sm:$0xff]   ;;  %v6645_v5 = vrot.slane %v6644_v26, 4  ;;  %v8259_v37 = vld [vmem:[#allocation3 + $0xb4] sm:$0xff]  ;;  %v6653_v43 = vrot.slane %v6651_v20, 4  ;;  %v6657_v1 = vshll.u32 %v6402_v0, 16  ;;  %5771 = vrot.lane.b32.xlu1 %v5668_v60, %s10363_s10  ;;  %v7062_v29 = vsel %vm10745_vm13, %v7060_v8, %v7061_v46  ;;  %v7304_v8 = vpop.permute.xlu1 %7303 }
 0x368   : > { %v10271_v17 = vld [vmem:[#allocation3 + $0xac] ss:$12 sps:$4 sm:$0xff]   ;;  %7190 = vst.msk [vmem:[#allocation3 + $0xd0] sm:$0xf] %vm1348_vm14, %v7112_v25  ;;  %v9594_v13 = vcombine.low %v8257_v54, %v8259_v37  ;;  %10098 = vmatmul.mubr.msk.bf16.gmra.mxu0 %vm4226_vm15, %v10273_v11  ;;  %v13735_v51 = vrot.slane %v7767_v42, 5  ;;  %v7773_v61 = vrot.slane %v7771_v24, 4  ;;  %7129 = vrot.lane.b32.xlu0 %v7059_v16, %s10363_s10  ;;  %v6035_v63 = vsel %vm10745_vm13, %v9537_v49, %v6034_v27 }
 0x369   : > { %v6650_v15 = vsel %vm10529_vm9, %v6645_v5, %v6649_v50  ;;  %8820 = vmatprep.mubr.bf16.mxu1 %v10271_v17  ;;  %v6036_v14 = vrot.slane %v6034_v27, 4  ;;  %v5672_v4 = vrot.slane %v5670_v45, 4  ;;  %v5675_v18 = vrot.slane %v5673_v31, 5  ;;  %v13742_v28 = vld [vmem:[%s10508_s9] sm:$0xff]   ;;  %6165 = vst.msk [vmem:[#allocation3 + $0xc0] sm:$0xf] %vm1688_vm1, %v6086_v62  ;;  %v6278_v45 = vpop.permute.xlu0 %6277 }
 0x36a   : > { %6855 = vst.msk [vmem:[#allocation3 + $0xdc] sm:$0xf] %vm224_vm0, %v6650_v15  ;;  %v6654_v33 = vor.u32 %v6653_v43, %v6649_v50  ;;  %8821 = vmatmul.mubr.bf16.gmra.mxu1 %v9594_v13  ;;  %v13745_v48 = vrot.slane %v7764_v57, 4  ;;  %v7777_v44 = vshll.u32 %v7438_v7, 16  ;;  %v5679_v22 = vshll.u32 %v13721_v12, 16 }
 0x36b   : > { %v5683_v38 = vshrl.u32 %v13721_v12, 16  ;;  %v6659_v47 = vrot.slane %v6657_v1, 5  ;;  %6166 = vst.msk [vmem:[#allocation3 + $0xcc] sm:$0xf] %vm1688_vm1, %v6088_v10  ;;  %v7774_v40 = vor.u32 %v7773_v61, %v13735_v51  ;;  %v5329_v23 = vld [vmem:[#allocation2 + $0xb0] sm:$0x1]  ;;  %v9696_v9 = vunpack.c.l.bf16 %v13742_v28  ;;  %7131 = vrot.lane.b32.xlu1 %v7062_v29, %s10363_s10  ;;  %v6280_v1 = vpop.permute.xlu1 %6279 }
 0x36c   : > { %v6655_v41 = vrot.slane %v6654_v33, 4  ;;  %v7439_v39 = vld [vmem:[#allocation2 + $0xc0] sm:$0xf]  ;;  %v6403_v56 = vld [vmem:[#allocation2 + $0x84] sm:$0xf]  ;;  %v6038_v52 = vsel %vm10745_vm13, %v6036_v14, %v6037_v32  ;;  %v5676_v3 = vor.u32 %v5675_v18, %v5672_v4  ;;  %v7770_v19 = vsel %vm10529_vm9, %v13745_v48, %v13735_v51  ;;  %6105 = vrot.lane.b32.xlu0 %v6035_v63, %s10364_s17 }
 0x36d   : > { %v7440_v53 = vld [vmem:[#allocation2 + $0xc4] sm:$0xf]  ;;  %v13762_v2 = vld [vmem:[#allocation2 + $0x88] sm:$0xf]  ;;  %7381 = vst.msk [vmem:[#allocation3 + $0xc4] sm:$0xf] %vm1688_vm1, %v7302_v55  ;;  %v9697_v21 = vunpack.c.h.bf16 %v13742_v28  ;;  %v7862_v10 = vpop.permute.xlu0 %7861 }
 0x36e   : > { %v6660_v35 = vsel %vm10529_vm9, %v6655_v41, %v6659_v47  ;;  %v13769_v0 = vrot.slane %v7777_v44, 5  ;;  %v13771_v6 = vrot.slane %v5679_v22, 5  ;;  %v13774_v59 = vrot.slane %v5683_v38, 4  ;;  %v13777_v30 = vld [vmem:[#allocation2 + $0xb8] sm:$0xf] }
 0x36f   : > { %6856 = vst.msk [vmem:[#allocation3 + $0xe8] sm:$0xf] %vm224_vm0, %v6660_v35  ;;  %v5689_v46 = vshll.u32 %v5329_v23, 16  ;;  %v7782_v20 = vshrl.u32 %v7439_v39, 16  ;;  %v7785_v42 = vshll.u32 %v7439_v39, 16  ;;  %v6662_v24 = vshrl.u32 %v6403_v56, 16  ;;  %6107 = vrot.lane.b32.xlu1 %v6038_v52, %s10364_s17 }
 0x370   : > { %v5330_v26 = vld [vmem:[#allocation2 + $0xb4] sm:$0xf]  ;;  %7382 = vst.msk [vmem:[#allocation3 + $0xd0] sm:$0xf] %vm1688_vm1, %v7304_v8  ;;  %v13780_v58 = vrot.slane %v7774_v40, 4  ;;  %v7791_v49 = vshll.u32 %v7440_v53, 16  ;;  %v5686_v25 = vor.u32 %v13774_v59, %v13771_v6 }
 0x371   : > { %v7231_v50 = vld [vmem:[#allocation2 + $0xb4] sm:$0xf]  ;;  %v6665_v27 = vshll.u32 %v6403_v56, 16  ;;  %v6671_v7 = vshll.u32 %v13762_v2, 16  ;;  %v13784_v31 = vrot.slane %v5676_v3, 4  ;;  %v7795_v11 = vshrl.u32 %v7440_v53, 16  ;;  %v7864_v3 = vpop.permute.xlu1 %7863 }
 0x372   : > { %v5251_v12 = vld [vmem:[#allocation2 + $0xb4] sm:$0xf]  ;;  %v6664_v32 = vrot.slane %v6662_v24, 4  ;;  %v6405_v57 = vld [vmem:[#allocation2 + $0x8c] sm:$0x1]  ;;  %v6675_v37 = vshrl.u32 %v13762_v2, 16  ;;  %7321 = vrot.lane.b32.xlu0 %v7231_v50, %s10364_s17 }
 0x373   : > { %5283 = vst.msk [vmem:[#allocation3 + $0x168] sm:$0xf] %vm224_vm0, %v5251_v12  ;;  %v5252_v5 = vld [vmem:[#allocation2 + $0xb8] sm:$0xf]  ;;  %v13791_v60 = vld [vmem:[#allocation2 + $0xb4] sm:$0xe] }
 0x374   : > { %6357 = vst.msk [vmem:[#allocation3 + $0xc0] sm:$0xf] %vm1881_vm2, %v6278_v45  ;;  %v13793_v16 = vld [vmem:[#allocation2 + $0xac] sm:$0xf]  ;;  %v6667_v54 = vrot.slane %v6665_v27, 5  ;;  %v5694_v43 = vshrl.u32 %v5330_v26, 16 }
 0x375   : > { %v5331_v17 = vld [vmem:[#allocation2 + $0xb8] sm:$0xf]  ;;  %5284 = vst.msk [vmem:[#allocation3 + $0x174] sm:$0xf] %vm224_vm0, %v5252_v5  ;;  %v13798_v15 = vrot.slane %v5689_v46, 5  ;;  %v7784_v61 = vrot.slane %v7782_v20, 4  ;;  %v5756_v5 = vpop.permute.xlu1 %5755 }
 0x376   : > { %v7232_v13 = vld [vmem:[#allocation2 + $0xb8] sm:$0xf]  ;;  %v7787_v62 = vrot.slane %v7785_v42, 5  ;;  %v5697_v14 = vshll.u32 %v5330_v26, 16  ;;  %6358 = vst.msk [vmem:[#allocation3 + $0xcc] sm:$0xf] %vm1881_vm2, %v6280_v1  ;;  %v6668_v22 = vor.u32 %v6667_v54, %v6664_v32  ;;  %v5754_v26 = vpop.permute.xlu0 %5753 }
 0x377   : > { %v6207_v4 = vld [vmem:[#allocation2 + $0xa8] sm:$0xf]  ;;  %v7065_v18 = vrot.slane %v13777_v30, 5  ;;  %v6913_v33 = vld [vmem:[#allocation2 + $0xbc] sm:$0x1]  ;;  %v13802_v44 = vrot.slane %v7791_v49, 5  ;;  %7323 = vrot.lane.b32.xlu1 %v7232_v13, %s10364_s17 }
 0x378   : > { %v6673_v38 = vrot.slane %v6671_v7, 5  ;;  %v5887_v41 = vld [vmem:[#allocation2 + $0xa8] sm:$0xe]  ;;  %v7797_v47 = vrot.slane %v7795_v11, 4  ;;  %v5696_v29 = vrot.slane %v5694_v43, 4  ;;  %v5703_v40 = vshll.u32 %v5331_v17, 16  ;;  %6297 = vrot.lane.b32.xlu0 %v6207_v4, %s10365_s12 }
 0x379   : > { %v5707_v23 = vshrl.u32 %v5331_v17, 16  ;;  %7941 = vst.msk [vmem:[#allocation3 + $0xc4] sm:$0xf] %vm1881_vm2, %v7862_v10  ;;  %v6669_v39 = vrot.slane %v6668_v22, 4  ;;  %v7441_v56 = vld [vmem:[#allocation2 + $0xc8] sm:$0x1]  ;;  %v7788_v59 = vor.u32 %v7787_v62, %v7784_v61  ;;  %v5682_v17 = vsel %vm10529_vm9, %v13784_v31, %v13771_v6  ;;  %v7116_v22 = vpop.permute.xlu1 %7115 }
 0x37a   : > { %v5699_v55 = vrot.slane %v5697_v14, 5  ;;  %v6677_v63 = vrot.slane %v6675_v37, 4  ;;  %v6681_v52 = vshll.u32 %v6405_v57, 16  ;;  %v9554_v35 = vrot.slane %v13791_v60, 9  ;;  %7942 = vst.msk [vmem:[#allocation3 + $0xd0] sm:$0xf] %vm1881_vm2, %v7864_v3 }
 0x37b   : > { %v7068_v53 = vrot.slane %v6913_v33, 5  ;;  %v6041_v2 = vrot.slane %v13793_v16, 5  ;;  %v6208_v8 = vld [vmem:[#allocation2 + $0xac] sm:$0xf]  ;;  %v13810_v46 = vrot.slane %v5686_v25, 4  ;;  %v6674_v20 = vsel %vm10529_vm9, %v6669_v39, %v6673_v38 }
 0x37c   : > { %v5889_v30 = vld [vmem:[#allocation2 + $0xb0] sm:$0x1]  ;;  %v6678_v42 = vor.u32 %v6677_v63, %v6673_v38  ;;  %v6683_v24 = vrot.slane %v6681_v52, 5  ;;  %6299 = vrot.lane.b32.xlu1 %v6208_v8, %s10365_s12  ;;  %v7067_v50 = vrot.slane %v7065_v18, 4  ;;  %v9538_v49 = vrot.slane %v5887_v41, 9  ;;  %7881 = vrot.lane.b32.xlu0 %v7770_v19, %s10365_s12 }
 0x37d   : > { %6857 = vst.msk [vmem:[#allocation3 + $0xf4] sm:$0xf] %vm224_vm0, %v6674_v20  ;;  %v7798_v27 = vor.u32 %v7797_v47, %v13802_v44  ;;  %v7801_v7 = vshll.u32 %v7441_v56, 16  ;;  %v5700_v12 = vor.u32 %v5699_v55, %v5696_v29  ;;  %v13818_v45 = vrot.slane %v5703_v40, 5  ;;  %v6406_v57 = vld [vmem:[#allocation2 + $0x90] sm:$0xf]  ;;  %v13874_v56 = vpop.f32.mrf.mxu0  ;;  %v9919_v20 = vpop.f32.mrf.mxu1 }
 0x37e   : > { %5831 = vst.msk [vmem:[#allocation3 + $0xd8] sm:$0xf] %vm1348_vm14, %v5754_v26  ;;  %v6679_v11 = vrot.slane %v6678_v42, 4  ;;  %v5709_v32 = vrot.slane %v5707_v23, 4  ;;  %v7780_v25 = vsel %vm10529_vm9, %v13780_v58, %v13769_v0  ;;  %v6043_v60 = vrot.slane %v6041_v2, 4  ;;  %v7114_v58 = vpop.permute.xlu0 %7113 }
 0x37f   : > { %v6044_v16 = vrot.slane %v5889_v30, 5  ;;  %v13830_v54 = vrot.slane %v7788_v59, 4  ;;  %v5332_v37 = vld [vmem:[#allocation2 + $0xbc] sm:$0x1]  ;;  %5832 = vst.msk [vmem:[#allocation3 + $0xe4] sm:$0xf] %vm1348_vm14, %v5756_v5  ;;  %v5692_v51 = vsel %vm10529_vm9, %v13810_v46, %v13798_v15  ;;  %v7066_v48 = vsel %vm10745_vm13, %v9554_v35, %v7065_v18  ;;  %v8927_v5 = vpop.f32.mrf.mxu0 }
 0x380   : > { %v6684_v19 = vsel %vm10529_vm9, %v6679_v11, %v6683_v24  ;;  %v6407_v0 = vld [vmem:[#allocation2 + $0x94] sm:$0xf]  ;;  %7883 = vrot.lane.b32.xlu1 %v7780_v25, %s10365_s12  ;;  %v7069_v43 = vsel %vm10745_vm13, %v7067_v50, %v7068_v53  ;;  %v13850_v6 = vsel %vm10745_vm13, %v9538_v49, %v6041_v2  ;;  %v13852_v31 = vrot.slane %v7798_v27, 4  ;;  %v6914_v13 = vld [vmem:[#allocation2 + $0xc0] sm:$0xe]  ;;  %5773 = vrot.lane.b32.xlu0 %v5682_v17, %s10363_s10  ;;  %v8261_v38 = vld [vmem:[#allocation3 + $0xc0] sm:$0xff]  ;;  %v6092_v49 = vpop.permute.xlu1 %6091  ;;  %v9920_v25 = vpop.f32.mrf.mxu1 }
 0x381   : > { %v13854_v1 = vrot.slane %v7801_v7, 5  ;;  %6858 = vst.msk [vmem:[#allocation3 + $0x100] sm:$0xf] %vm224_vm0, %v6684_v19  ;;  %v6915_v15 = vld [vmem:[#allocation2 + $0xc4] sm:$0xf]  ;;  %v13858_v62 = vrot.slane %v5700_v12, 4  ;;  %v5710_v14 = vor.u32 %v5709_v32, %v13818_v45  ;;  %v13866_v47 = vsel %vm10745_vm13, %v6043_v60, %v6044_v16 }
 0x382   : > { %v6408_v61 = vld [vmem:[#allocation2 + $0x98] sm:$0x1]  ;;  %7191 = vst.msk [vmem:[#allocation3 + $0xdc] sm:$0xf] %vm1348_vm14, %v7114_v58  ;;  %v5713_v4 = vshll.u32 %v5332_v37, 16  ;;  %v6686_v33 = vshrl.u32 %v6406_v57, 16  ;;  %v7794_v29 = vsel %vm10529_vm9, %v13830_v54, %v13802_v44  ;;  %v6090_v53 = vpop.permute.xlu0 %6089  ;;  %v9921_v19 = vadd.f32 %v9920_v25, %v9919_v20 }
 0x383   : > { %v13861_v18 = vld [vmem:[#allocation2 + $0xc8] sm:$0x1]  ;;  %v6689_v40 = vshll.u32 %v6406_v57, 16  ;;  %v6695_v23 = vshll.u32 %v6407_v0, 16  ;;  %v13872_v39 = vld [vmem:[#allocation2 + $0x9c] sm:$0xf]  ;;  %v7804_v2 = vsel %vm10529_vm9, %v13852_v31, %v13854_v1  ;;  %v5706_v7 = vsel %vm10529_vm9, %v13858_v62, %v13818_v45 }
 0x384   : > { %v8263_v10 = vld [vmem:[#allocation3 + $0xcc] sm:$0xff]  ;;  %7192 = vst.msk [vmem:[#allocation3 + $0xe8] sm:$0xf] %vm1348_vm14, %v7116_v22  ;;  %v9555_v63 = vrot.slane %v6914_v13, 9  ;;  %v7072_v52 = vrot.slane %v6915_v15, 5  ;;  %v6688_v35 = vrot.slane %v6686_v33, 4  ;;  %5775 = vrot.lane.b32.xlu1 %v5692_v51, %s10363_s10  ;;  %7133 = vrot.lane.b32.xlu0 %v7066_v48, %s10363_s10  ;;  %v7308_v22 = vpop.permute.xlu1 %7307 }
 0x385   : > { %v10274_v41 = vld [vmem:[#allocation3 + $0xc4] ss:$12 sps:$4 sm:$0xff]   ;;  %v9597_v55 = vcombine.low %v8261_v38, %v8263_v10  ;;  %v13877_v3 = vld [vmem:[#allocation2 + $0xb4] sm:$0xe]  ;;  %v13884_v59 = vld [vmem:[#allocation2 + $0xb8] sm:$0xf] }
 0x386   : > { %8828 = vmatprep.mubr.bf16.mxu1 %v10274_v41  ;;  %v6691_v8 = vrot.slane %v6689_v40, 5  ;;  %v6697_v46 = vrot.slane %v6695_v23, 5  ;;  %v6699_v30 = vshrl.u32 %v6407_v0, 16  ;;  %6167 = vst.msk [vmem:[#allocation3 + $0xd8] sm:$0xf] %vm1688_vm1, %v6090_v53  ;;  %v13887_v42 = vrot.slane %v5710_v14, 4  ;;  %v7306_v48 = vpop.permute.xlu0 %7305  ;;  %v13926_v40 = vpop.f32.mrf.mxu0 }
 0x387   : > { %8829 = vmatmul.mubr.bf16.gmra.mxu1 %v9597_v55  ;;  %v13889_v24 = vrot.slane %v5713_v4, 5  ;;  %v7075_v26 = vrot.slane %v13861_v18, 5  ;;  %v6705_v50 = vshll.u32 %v6408_v61, 16  ;;  %v13896_v27 = vld [vmem:[%s14321_s4] ss:$0 sm:$0xff]  ;;  %v9539_v12 = vrot.slane %v13877_v3, 9  ;;  %v9922_v61 = vpop.f32.mrf.mxu1 }
 0x388   : > { %v6692_v11 = vor.u32 %v6691_v8, %v6688_v35  ;;  %v6701_v32 = vrot.slane %v6699_v30, 4  ;;  %v6410_v57 = vld [vmem:[#allocation2 + $0xa0] sm:$0xf]  ;;  %6168 = vst.msk [vmem:[#allocation3 + $0xe4] sm:$0xf] %vm1688_vm1, %v6092_v49  ;;  %v13906_v60 = vsel %vm10745_vm13, %v9555_v63, %v7072_v52  ;;  %v7074_v16 = vrot.slane %v7072_v52, 4  ;;  %7135 = vrot.lane.b32.xlu1 %v7069_v43, %s10363_s10  ;;  %6109 = vrot.lane.b32.xlu0 %v13850_v6, %s10364_s17 }
 0x389   : > { %v6048_v37 = vrot.slane %v13884_v59, 5  ;;  %v13909_v17 = vld [vmem:[#allocation2 + $0xbc] sm:$0x1]  ;;  %v6710_v51 = vshrl.u32 %v13872_v39, 16  ;;  %v6707_v13 = vrot.slane %v6705_v50, 5  ;;  %v5716_v14 = vsel %vm10529_vm9, %v13887_v42, %v13889_v24  ;;  %v9923_v23 = vpop.f32.mrf.mxu1 }
 0x38a   : > { %v6693_v0 = vrot.slane %v6692_v11, 4  ;;  %v6702_v58 = vor.u32 %v6701_v32, %v6697_v46  ;;  %v6411_v15 = vld [vmem:[#allocation2 + $0xa4] sm:$0x1]  ;;  %7383 = vst.msk [vmem:[#allocation3 + $0xdc] sm:$0xf] %vm1688_vm1, %v7306_v48  ;;  %v6713_v18 = vshll.u32 %v13872_v39, 16  ;;  %v8767_v43 = vadd.f32 %v9921_v19, %v13896_v27  ;;  %v6282_v53 = vpop.permute.xlu0 %6281 }
 0x38b   : > { %v6712_v4 = vrot.slane %v6710_v51, 4  ;;  %v6719_v33 = vshll.u32 %v6410_v57, 16  ;;  %v6051_v38 = vrot.slane %v13909_v17, 5  ;;  %7384 = vst.msk [vmem:[#allocation3 + $0xe8] sm:$0xf] %vm1688_vm1, %v7308_v22  ;;  %v6723_v63 = vshrl.u32 %v6410_v57, 16 }
 0x38c   : > { %v6698_v10 = vsel %vm10529_vm9, %v6693_v0, %v6697_v46  ;;  %v6703_v41 = vrot.slane %v6702_v58, 4  ;;  %v6715_v39 = vrot.slane %v6713_v18, 5  ;;  %v6729_v52 = vshll.u32 %v6411_v15, 16  ;;  %v6412_v35 = vld [vmem:[#allocation2 + $0xa8] sm:$0xf]  ;;  %6111 = vrot.lane.b32.xlu1 %v13866_v47, %s10364_s17 }
 0x38d   : > { %6859 = vst.msk [vmem:[#allocation3 + $0x10c] sm:$0xf] %vm224_vm0, %v6698_v10  ;;  %v6721_v55 = vrot.slane %v6719_v33, 5  ;;  %v8928_v6 = vadd.f32 %v8927_v5, %v8767_v43  ;;  %v9924_v8 = vadd.f32 %v9923_v23, %v9922_v61  ;;  %v13938_v46 = vsel %vm10745_vm13, %v7074_v16, %v7075_v26  ;;  %v6413_v20 = vld [vmem:[#allocation2 + $0xac] sm:$0xf]  ;;  %v6284_v5 = vpop.permute.xlu1 %6283  ;;  %v8930_v16 = vpop.f32.mrf.mxu0 }
 0x38e   : > { %v6708_v30 = vsel %vm10529_vm9, %v6703_v41, %v6707_v13  ;;  %6359 = vst.msk [vmem:[#allocation3 + $0xd8] sm:$0xf] %vm1881_vm2, %v6282_v53  ;;  %v7233_v50 = vld [vmem:[#allocation2 + $0xc0] sm:$0xf]  ;;  %v13945_v49 = vrot.slane %v6048_v37, 4  ;;  %v6716_v11 = vor.u32 %v6715_v39, %v6712_v4  ;;  %v6725_v47 = vrot.slane %v6723_v63, 4  ;;  %v7866_v61 = vpop.permute.xlu0 %7865 }
 0x38f   : > { %6860 = vst.msk [vmem:[#allocation3 + $0x118] sm:$0xf] %vm224_vm0, %v6708_v30  ;;  %v6731_v32 = vrot.slane %v6729_v52, 5  ;;  %vm9054_vm7 = vcmp.ge.f32.partialorder %v8928_v6, 0.0  ;;  %v9086_v57 = vmul.f32 0.1, %v8928_v6  ;;  %v8770_v26 = vadd.f32 %v9924_v8, %v13896_v27  ;;  %7325 = vrot.lane.b32.xlu0 %v7233_v50, %s10364_s17 }
 0x390   : > { %v6734_v25 = vshrl.u32 %v6412_v35, 16  ;;  %6360 = vst.msk [vmem:[#allocation3 + $0xe4] sm:$0xf] %vm1881_vm2, %v6284_v5  ;;  %v7234_v51 = vld [vmem:[#allocation2 + $0xc4] sm:$0xf]  ;;  %v6717_v48 = vrot.slane %v6716_v11, 4  ;;  %v6726_v19 = vor.u32 %v6725_v47, %v6721_v55 }
 0x391   : > { %v6737_v0 = vshll.u32 %v6412_v35, 16  ;;  %v6743_v58 = vshll.u32 %v6413_v20, 16  ;;  %v9118_v13 = vsel %vm9054_vm7, %v8928_v6, %v9086_v57  ;;  %v8931_v15 = vadd.f32 %v8930_v16, %v8770_v26  ;;  %7327 = vrot.lane.b32.xlu1 %v7234_v51, %s10364_s17  ;;  %v13952_v4 = vld [vmem:[#allocation2 + $0xcc] sm:$0xf]  ;;  %v6414_v43 = vld [vmem:[#allocation2 + $0xb0] sm:$0x1]  ;;  %v7868_v35 = vpop.permute.xlu1 %7867 }
 0x392   : > { %v6736_v18 = vrot.slane %v6734_v25, 4  ;;  %v6747_v33 = vshrl.u32 %v6413_v20, 16  ;;  %v9214_v22 = vadd.f32 %v9696_v9, %v9118_v13  ;;  %7943 = vst.msk [vmem:[#allocation3 + $0xdc] sm:$0xf] %vm1881_vm2, %v7866_v61  ;;  %v6209_v10 = vld [vmem:[#allocation2 + $0xb4] sm:$0xf]  ;;  %v6722_v41 = vsel %vm10529_vm9, %v6717_v48, %v6721_v55  ;;  %v5758_v47 = vpop.permute.xlu0 %5757 }
 0x393   : > { %v6727_v23 = vrot.slane %v6726_v19, 4  ;;  %v6739_v39 = vrot.slane %v6737_v0, 5  ;;  %v6415_v63 = vld [vmem:[#allocation2 + $0xb4] sm:$0xf]  ;;  %vm9055_vm8 = vcmp.ge.f32.partialorder %v8931_v15, 0.0  ;;  %6301 = vrot.lane.b32.xlu0 %v6209_v10, %s10365_s12  ;;  %v6745_v6 = vrot.slane %v6743_v58, 5 }
 0x394   : > { %v9087_v52 = vmul.f32 0.1, %v8931_v15  ;;  %6861 = vst.msk [vmem:[#allocation3 + $0x124] sm:$0xf] %vm224_vm0, %v6722_v41  ;;  %v6749_v53 = vrot.slane %v6747_v33, 4  ;;  %v7806_v55 = vshrl.u32 %v13952_v4, 16 }
 0x395   : > { %9246 = vst.msk [vmem:[%s13962_s15] sm:$0xff] %vm4226_vm15, %v9214_v22  ;;  %v6210_v9 = vld [vmem:[#allocation2 + $0xb8] sm:$0xf]  ;;  %v6732_v8 = vsel %vm10529_vm9, %v6727_v23, %v6731_v32  ;;  %v6740_v30 = vor.u32 %v6739_v39, %v6736_v18  ;;  %v6753_v20 = vshll.u32 %v6414_v43, 16  ;;  %v13972_v57 = vld [vmem:[#allocation2 + $0xd0] sm:$0xf]  ;;  %v5760_v58 = vpop.permute.xlu1 %5759 }
 0x396   : > { %7944 = vst.msk [vmem:[#allocation3 + $0xe8] sm:$0xf] %vm1881_vm2, %v7868_v35  ;;  %v6416_v50 = vld [vmem:[#allocation2 + $0xb8] sm:$0xf]  ;;  %v9119_v11 = vsel %vm9055_vm8, %v8931_v15, %v9087_v52  ;;  %6303 = vrot.lane.b32.xlu1 %v6210_v9, %s10365_s12  ;;  %v7809_v26 = vshll.u32 %v13952_v4, 16  ;;  %v6750_v5 = vor.u32 %v6749_v53, %v6745_v6  ;;  %v6758_v25 = vshrl.u32 %v6415_v63, 16  ;;  %v7118_v44 = vpop.permute.xlu0 %7117 }
 0x397   : > { %6862 = vst.msk [vmem:[#allocation3 + $0x130] sm:$0xf] %vm224_vm0, %v6732_v8  ;;  %v6417_v16 = vld [vmem:[#allocation2 + $0xbc] sm:$0x1]  ;;  %v9215_v32 = vadd.f32 %v9697_v21, %v9119_v11  ;;  %v6741_v51 = vrot.slane %v6740_v30, 4  ;;  %v6755_v48 = vrot.slane %v6753_v20, 5  ;;  %7885 = vrot.lane.b32.xlu0 %v7794_v29, %s10365_s12  ;;  %v6049_v4 = vsel %vm10745_vm13, %v9539_v12, %v6048_v37 }
 0x398   : > { %5833 = vst.msk [vmem:[#allocation3 + $0xf0] sm:$0xf] %vm1348_vm14, %v5758_v47  ;;  %v6761_v19 = vshll.u32 %v6415_v63, 16  ;;  %v6418_v0 = vld [vmem:[#allocation2 + $0xc0] sm:$0xf]  ;;  %v6751_v13 = vrot.slane %v6750_v5, 4 }
 0x399   : > { %v6760_v15 = vrot.slane %v6758_v25, 4  ;;  %v6767_v61 = vshll.u32 %v6416_v50, 16  ;;  %v6771_v18 = vshrl.u32 %v6416_v50, 16  ;;  %v6419_v28 = vld [vmem:[#allocation2 + $0xc4] sm:$0xf]  ;;  %9247 = vst.msk [vmem:[%s13962_s15 + $0x8] sm:$0xff] %vm4226_vm15, %v9215_v32  ;;  %v6746_v33 = vsel %vm10529_vm9, %v6741_v51, %v6745_v6 }
 0x39a   : > { %5834 = vst.msk [vmem:[#allocation3 + $0xfc] sm:$0xf] %vm1348_vm14, %v5760_v58  ;;  %v7815_v21 = vshll.u32 %v13972_v57, 16  ;;  %v6763_v43 = vrot.slane %v6761_v19, 5  ;;  %v6777_v22 = vshll.u32 %v6417_v16, 16  ;;  %7887 = vrot.lane.b32.xlu1 %v7804_v2, %s10365_s12  ;;  %v7819_v54 = vshrl.u32 %v13972_v57, 16  ;;  %v7120_v2 = vpop.permute.xlu1 %7119  ;;  %v6094_v32 = vpop.permute.xlu0 %6093 }
 0x39b   : > { %v6420_v10 = vld [vmem:[#allocation2 + $0xc8] sm:$0x1]  ;;  %6863 = vst.msk [vmem:[#allocation3 + $0x13c] sm:$0xf] %vm224_vm0, %v6746_v33  ;;  %v6756_v29 = vsel %vm10529_vm9, %v6751_v13, %v6755_v48  ;;  %v6769_v41 = vrot.slane %v6767_v61, 5  ;;  %v6773_v23 = vrot.slane %v6771_v18, 4  ;;  %5777 = vrot.lane.b32.xlu0 %v5706_v7, %s10363_s10  ;;  %v9925_v48 = vpop.f32.mrf.mxu1  ;;  %v6052_v57 = vsel %vm10745_vm13, %v13945_v49, %v6051_v38 }
 0x39c   : > { %v8000_v39 = vld [vmem:[#allocation2 + $0xc4] sm:$0xf]  ;;  %7193 = vst.msk [vmem:[#allocation3 + $0xf4] sm:$0xf] %vm1348_vm14, %v7118_v44  ;;  %v8265_v63 = vld [vmem:[#allocation3 + $0xd8] sm:$0xff]  ;;  %v6764_v52 = vor.u32 %v6763_v43, %v6760_v15  ;;  %v6779_v35 = vrot.slane %v6777_v22, 5 }
 0x39d   : > { %6864 = vst.msk [vmem:[#allocation3 + $0x148] sm:$0xf] %vm224_vm0, %v6756_v29  ;;  %v6782_v6 = vshrl.u32 %v6418_v0, 16  ;;  %v6785_v31 = vshll.u32 %v6418_v0, 16  ;;  %v7999_v1 = vld [vmem:[#allocation2 + $0xc0] sm:$0xe]  ;;  %v6774_v8 = vor.u32 %v6773_v23, %v6769_v41  ;;  %v9926_v61 = vpop.f32.mrf.mxu1 }
 0x39e   : > { %v8267_v53 = vld [vmem:[#allocation3 + $0xe4] sm:$0xff]  ;;  %v6791_v30 = vshll.u32 %v6419_v28, 16  ;;  %v6795_v20 = vshrl.u32 %v6419_v28, 16  ;;  %v6801_v50 = vshll.u32 %v6420_v10, 16  ;;  %7194 = vst.msk [vmem:[#allocation3 + $0x100] sm:$0xf] %vm1348_vm14, %v7120_v2  ;;  %5779 = vrot.lane.b32.xlu1 %v5716_v14, %s10363_s10  ;;  %v6096_v42 = vpop.permute.xlu1 %6095  ;;  %v7310_v43 = vpop.permute.xlu0 %7309  ;;  %v9927_v22 = vadd.f32 %v9926_v61, %v9925_v48 }
 0x39f   : > { %v10276_v9 = vld [vmem:[#allocation3 + $0xdc] ss:$12 sps:$4 sm:$0xff]   ;;  %v9600_v11 = vcombine.low %v8265_v63, %v8267_v53  ;;  %v6765_v47 = vrot.slane %v6764_v52, 4  ;;  %v6784_v5 = vrot.slane %v6782_v6, 4  ;;  %v6787_v25 = vrot.slane %v6785_v31, 5  ;;  %7137 = vrot.lane.b32.xlu0 %v13906_v60, %s10363_s10  ;;  %v9928_v10 = vpop.f32.mrf.mxu1  ;;  %v9758_v37 = vld [vmem:[%s10508_s9 + $0x8] sm:$0xff]  }
 0x3a0   : > { %v8001_v16 = vld [vmem:[#allocation2 + $0xc8] sm:$0x1]  ;;  %8836 = vmatprep.mubr.bf16.mxu1 %v10276_v9  ;;  %v14018_v45 = vrot.slane %v7806_v55, 4  ;;  %v6775_v62 = vrot.slane %v6774_v8, 4  ;;  %v6793_v7 = vrot.slane %v6791_v30, 5  ;;  %v6797_v51 = vrot.slane %v6795_v20, 4 }
 0x3a1   : > { %6169 = vst.msk [vmem:[#allocation3 + $0xf0] sm:$0xf] %vm1688_vm1, %v6094_v32  ;;  %8837 = vmatmul.mubr.bf16.gmra.mxu1 %v9600_v11  ;;  %v6770_v19 = vsel %vm10529_vm9, %v6765_v47, %v6769_v41  ;;  %v6788_v0 = vor.u32 %v6787_v25, %v6784_v5  ;;  %v9570_v58 = vrot.slane %v7999_v1, 9  ;;  %v8153_v13 = vrot.slane %v8000_v39, 5  ;;  %6170 = vst.msk [vmem:[#allocation3 + $0xfc] sm:$0xf] %vm1688_vm1, %v6096_v42 }
 0x3a2   : > { %6865 = vst.msk [vmem:[#allocation3 + $0x154] sm:$0xf] %vm224_vm0, %v6770_v19  ;;  %v6780_v24 = vsel %vm10529_vm9, %v6775_v62, %v6779_v35  ;;  %v6798_v14 = vor.u32 %v6797_v51, %v6793_v7  ;;  %v6803_v55 = vrot.slane %v6801_v50, 5  ;;  %v8156_v15 = vrot.slane %v8001_v16, 5  ;;  %7139 = vrot.lane.b32.xlu1 %v13938_v46, %s10363_s10  ;;  %v7312_v29 = vpop.permute.xlu1 %7311  ;;  %v7444_v41 = vld [vmem:[#allocation2 + $0xd4] sm:$0x1]  ;;  %v6286_v52 = vpop.permute.xlu0 %6285 }
 0x3a3   : > { %v7811_v18 = vrot.slane %v7809_v26, 5  ;;  %6866 = vst.msk [vmem:[#allocation3 + $0x160] sm:$0xf] %vm224_vm0, %v6780_v24  ;;  %v6789_v28 = vrot.slane %v6788_v0, 4  ;;  %v8154_v60 = vsel %vm10745_vm13, %v9570_v58, %v8153_v13  ;;  %v8155_v33 = vrot.slane %v8153_v13, 4  ;;  %6113 = vrot.lane.b32.xlu0 %v6049_v4, %s10364_s17  ;;  %v14092_v13 = vpop.f32.mrf.mxu0 }
 0x3a4   : > { %v6799_v26 = vrot.slane %v6798_v14, 4  ;;  %8225 = vst.msk [vmem:[#allocation3 + $0x158] sm:$0xf] %vm224_vm0, %v8154_v60  ;;  %v7817_v44 = vrot.slane %v7815_v21, 5  ;;  %v7821_v46 = vrot.slane %v7819_v54, 4  ;;  %v8775_v12 = vadd.f32 %v9927_v22, %v13896_v27  ;;  %v9929_v54 = vpop.f32.mrf.mxu1 }
 0x3a5   : > { %7385 = vst.msk [vmem:[#allocation3 + $0xf4] sm:$0xf] %vm1688_vm1, %v7310_v43  ;;  %v6794_v59 = vsel %vm10529_vm9, %v6789_v28, %v6793_v7  ;;  %v8157_v3 = vsel %vm10745_vm13, %v8155_v33, %v8156_v15  ;;  %7386 = vst.msk [vmem:[#allocation3 + $0x100] sm:$0xf] %vm1688_vm1, %v7312_v29  ;;  %v7235_v23 = vld [vmem:[#allocation2 + $0xcc] sm:$0xf]  ;;  %v7812_v39 = vor.u32 %v7811_v18, %v14018_v45  ;;  %v9700_v6 = vunpack.c.l.bf16 %v9758_v37 }
 0x3a6   : > { %6867 = vst.msk [vmem:[#allocation3 + $0x16c] sm:$0xf] %vm224_vm0, %v6794_v59  ;;  %v6804_v21 = vsel %vm10529_vm9, %v6799_v26, %v6803_v55  ;;  %8226 = vst.msk [vmem:[#allocation3 + $0x164] sm:$0xf] %vm224_vm0, %v8157_v3  ;;  %v8936_v63 = vadd.f32 %v13874_v56, %v8775_v12  ;;  %6115 = vrot.lane.b32.xlu1 %v6052_v57, %s10364_s17  ;;  %v9930_v35 = vadd.f32 %v9929_v54, %v9928_v10  ;;  %v7236_v17 = vld [vmem:[#allocation2 + $0xd0] sm:$0xf]  ;;  %v6288_v49 = vpop.permute.xlu1 %6287  ;;  %v7870_v9 = vpop.permute.xlu0 %7869 }
 0x3a7   : > { %6868 = vst.msk [vmem:[#allocation3 + $0x178] sm:$0xf] %vm224_vm0, %v6804_v21  ;;  %v7822_v31 = vor.u32 %v7821_v46, %v7817_v44  ;;  %v7825_v1 = vshll.u32 %v7444_v41, 16  ;;  %7329 = vrot.lane.b32.xlu0 %v7235_v23, %s10364_s17  ;;  %v7813_v56 = vrot.slane %v7812_v39, 4  ;;  %v9701_v30 = vunpack.c.h.bf16 %v9758_v37  ;;  %v6211_v20 = vld [vmem:[#allocation2 + $0xc0] sm:$0xf]  ;;  %v9931_v24 = vpop.f32.mrf.mxu1  ;;  %v8943_v55 = vpop.f32.mrf.mxu0 }
 0x3a8   : > { %6361 = vst.msk [vmem:[#allocation3 + $0xf0] sm:$0xf] %vm1881_vm2, %v6286_v52  ;;  %vm9056_vm10 = vcmp.ge.f32.partialorder %v8936_v63, 0.0  ;;  %v9088_v36 = vmul.f32 0.1, %v8936_v63  ;;  %v8778_v38 = vadd.f32 %v9930_v35, %v13896_v27  ;;  %v9759_v33 = vld [vmem:[%s10508_s9 + $0x10] sm:$0xff]  }
 0x3a9   : > { %6362 = vst.msk [vmem:[#allocation3 + $0xfc] sm:$0xf] %vm1881_vm2, %v6288_v49  ;;  %7945 = vst.msk [vmem:[#allocation3 + $0xf4] sm:$0xf] %vm1881_vm2, %v7870_v9  ;;  %v7823_v50 = vrot.slane %v7822_v31, 4  ;;  %v7827_v11 = vrot.slane %v7825_v1, 5  ;;  %v7818_v25 = vsel %vm10529_vm9, %v7813_v56, %v7817_v44  ;;  %v9932_v15 = vpop.f32.mrf.mxu1  ;;  %v14100_v22 = vpop.f32.mrf.mxu0  ;;  %v9704_v46 = vunpack.c.l.bf16 %v9759_v33 }
 0x3aa   : > { %v9120_v2 = vsel %vm9056_vm10, %v8936_v63, %v9088_v36  ;;  %v8939_v53 = vadd.f32 %v13926_v40, %v8778_v38  ;;  %7331 = vrot.lane.b32.xlu1 %v7236_v17, %s10364_s17  ;;  %v7872_v5 = vpop.permute.xlu1 %7871  ;;  %v6212_v40 = vld [vmem:[#allocation2 + $0xc4] sm:$0xf]  ;;  %v5762_v32 = vpop.permute.xlu0 %5761  ;;  %v9933_v18 = vadd.f32 %v9932_v15, %v9931_v24  ;;  %v9705_v54 = vunpack.c.h.bf16 %v9759_v33 }
 0x3ab   : > { %v9216_v8 = vadd.f32 %v9700_v6, %v9120_v2  ;;  %6305 = vrot.lane.b32.xlu0 %v6211_v20, %s10365_s12  ;;  %7946 = vst.msk [vmem:[#allocation3 + $0x100] sm:$0xf] %vm1881_vm2, %v7872_v5  ;;  %v7828_v62 = vsel %vm10529_vm9, %v7823_v50, %v7827_v11  ;;  %v9934_v28 = vpop.f32.mrf.mxu1  ;;  %v8946_v37 = vpop.f32.mrf.mxu0  ;;  %v9760_v11 = vld [vmem:[%s10508_s9 + $0x18] sm:$0xff]  }
 0x3ac   : > { %vm9057_vm0 = vcmp.ge.f32.partialorder %v8939_v53, 0.0  ;;  %v9089_v47 = vmul.f32 0.1, %v8939_v53  ;;  %5835 = vst.msk [vmem:[#allocation3 + $0x108] sm:$0xf] %vm1348_vm14, %v5762_v32  ;;  %v8783_v60 = vadd.f32 %v9933_v18, %v13896_v27  ;;  %v9708_v32 = vunpack.c.l.bf16 %v9760_v11 }
 0x3ad   : > { %9248 = vst.msk [vmem:[%s13962_s15 + $0x10] sm:$0xff] %vm4226_vm15, %v9216_v8  ;;  %v9935_v4 = vpop.f32.mrf.mxu1  ;;  %v14136_v33 = vpop.f32.mrf.mxu0 }
 0x3ae   : > { %v9121_v16 = vsel %vm9057_vm0, %v8939_v53, %v9089_v47  ;;  %6307 = vrot.lane.b32.xlu1 %v6212_v40, %s10365_s12  ;;  %v5764_v7 = vpop.permute.xlu1 %5763  ;;  %v7122_v51 = vpop.permute.xlu0 %7121  ;;  %v8944_v26 = vadd.f32 %v8943_v55, %v8783_v60  ;;  %v9936_v44 = vadd.f32 %v9935_v4, %v9934_v28 }
 0x3af   : > { %v9217_v45 = vadd.f32 %v9701_v30, %v9121_v16  ;;  %7889 = vrot.lane.b32.xlu0 %v7818_v25, %s10365_s12  ;;  %5836 = vst.msk [vmem:[#allocation3 + $0x114] sm:$0xf] %vm1348_vm14, %v5764_v7  ;;  %7195 = vst.msk [vmem:[#allocation3 + $0x10c] sm:$0xf] %vm1348_vm14, %v7122_v51 }
 0x3b0   : > { %v8269_v19 = vld [vmem:[#allocation3 + $0xf0] sm:$0xff]  ;;  %vm9058_vm9 = vcmp.ge.f32.partialorder %v8944_v26, 0.0  ;;  %v9090_v59 = vmul.f32 0.1, %v8944_v26  ;;  %v8786_v3 = vadd.f32 %v9936_v44, %v13896_v27 }
 0x3b1   : > { %9249 = vst.msk [vmem:[%s13962_s15 + $0x18] sm:$0xff] %vm4226_vm15, %v9217_v45 }
 0x3b2   : > { %7891 = vrot.lane.b32.xlu1 %v7828_v62, %s10365_s12  ;;  %v7124_v48 = vpop.permute.xlu1 %7123  ;;  %v8271_v0 = vld [vmem:[#allocation3 + $0xfc] sm:$0xff]  ;;  %v6098_v42 = vpop.permute.xlu0 %6097  ;;  %v9122_v29 = vsel %vm9058_vm9, %v8944_v26, %v9090_v59  ;;  %v8947_v41 = vadd.f32 %v8946_v37, %v8786_v3  ;;  %v9761_v37 = vld [vmem:[%s10508_s9 + $0x20] sm:$0xff]   ;;  %s9292_s12 = sshll.u32 %s13962_s15, 4  ;;  %s14269_s12 = int_to_ptr.vmem [resolvable:$true] %s9292_s12 }
 0x3b3   : > { %v10278_v58 = vld [vmem:[#allocation3 + $0xf4] ss:$12 sps:$4 sm:$0xff]   ;;  %7196 = vst.msk [vmem:[#allocation3 + $0x118] sm:$0xf] %vm1348_vm14, %v7124_v48  ;;  %v9603_v34 = vcombine.low %v8269_v19, %v8271_v0  ;;  %v9218_v57 = vadd.f32 %v9704_v46, %v9122_v29  ;;  %s10300_s26 = scalar_lea.vmem %s14269_s12, 4096  ;;  %p10307_p0 = scmp.lt.s32.totalorder %s14269_s12, %s10305_s6 }
 0x3b4   : > { %8844 = vmatprep.mubr.bf16.mxu1 %v10278_v58  ;;  %6171 = vst.msk [vmem:[#allocation3 + $0x108] sm:$0xf] %vm1688_vm1, %v6098_v42  ;;  %vm9059_vm13 = vcmp.ge.f32.partialorder %v8947_v41, 0.0  ;;  %v9091_v23 = vmul.f32 0.1, %v8947_v41  ;;  %v9709_v58 = vunpack.c.h.bf16 %v9760_v11  ;;  %p10301_p11 = scmp.ne.s32.totalorder %s14269_s12, %s10300_s26  ;;  %p10308_p1 = scmp.lt.s32.totalorder %s10306_s7, %s10300_s26 }
 0x3b5   : > { %8845 = vmatmul.mubr.bf16.gmra.mxu1 %v9603_v34  ;;  %9250 = vst.msk [vmem:[%s13962_s15 + $0x20] sm:$0xff] %vm4226_vm15, %v9218_v57 }
 0x3b6   : > { %v6100_v14 = vpop.permute.xlu1 %6099  ;;  %v7314_v61 = vpop.permute.xlu0 %7313  ;;  %v9123_v63 = vsel %vm9059_vm13, %v8947_v41, %v9091_v23  ;;  %p10302_p12 = pnand %p10301_p11, %p10437_p5  ;;  %p10309_p2 = por %p10308_p1, %p10307_p0 }
 0x3b7   : > { %6172 = vst.msk [vmem:[#allocation3 + $0x114] sm:$0xf] %vm1688_vm1, %v6100_v14  ;;  %7387 = vst.msk [vmem:[#allocation3 + $0x10c] sm:$0xf] %vm1688_vm1, %v7314_v61  ;;  %v9219_v35 = vadd.f32 %v9705_v54, %v9123_v63 }
 0x3b8   : > { %p10303_p13 = pneg %p10302_p12 }
 0x3b9   : > { %9251 = vst.msk [vmem:[%s13962_s15 + $0x28] sm:$0xff] %vm4226_vm15, %v9219_v35 }
 0x3ba   : > { %v7316_v43 = vpop.permute.xlu1 %7315  ;;  %v6290_v10 = vpop.permute.xlu0 %6289  ;;  %p10310_p3 = pnand %p10309_p2, %p10303_p13 }
 0x3bb   : > { %7388 = vst.msk [vmem:[#allocation3 + $0x118] sm:$0xf] %vm1688_vm1, %v7316_v43 }
 0x3bc   : > { %6363 = vst.msk [vmem:[#allocation3 + $0x108] sm:$0xf] %vm1881_vm2, %v6290_v10  ;;  %v8959_v10 = vpop.f32.mrf.mxu0 }
 0x3bd   : > { %v9937_v2 = vpop.f32.mrf.mxu1 }
 0x3be   : > { %v6292_v12 = vpop.permute.xlu1 %6291  ;;  %v7874_v21 = vpop.permute.xlu0 %7873 }
 0x3bf   : > { %6364 = vst.msk [vmem:[#allocation3 + $0x114] sm:$0xf] %vm1881_vm2, %v6292_v12  ;;  %7947 = vst.msk [vmem:[#allocation3 + $0x10c] sm:$0xf] %vm1881_vm2, %v7874_v21  ;;  %v9938_v9 = vpop.f32.mrf.mxu1  ;;  %v14144_v41 = vpop.f32.mrf.mxu0 }
 0x3c0   : > { %v9939_v30 = vadd.f32 %v9938_v9, %v9937_v2 }
 0x3c1   : > { %v9940_v20 = vpop.f32.mrf.mxu1 }
 0x3c2   : > { %v7876_v39 = vpop.permute.xlu1 %7875  ;;  %v5766_v52 = vpop.permute.xlu0 %5765  ;;  %v8791_v50 = vadd.f32 %v9939_v30, %v13896_v27 }
 0x3c3   : > { %7948 = vst.msk [vmem:[#allocation3 + $0x118] sm:$0xf] %vm1881_vm2, %v7876_v39  ;;  %v9941_v5 = vpop.f32.mrf.mxu1  ;;  %v9712_v39 = vunpack.c.l.bf16 %v9761_v37 }
 0x3c4   : > { %5837 = vst.msk [vmem:[#allocation3 + $0x120] sm:$0xf] %vm1348_vm14, %v5766_v52  ;;  %v8952_v40 = vadd.f32 %v14092_v13, %v8791_v50  ;;  %v9942_v16 = vadd.f32 %v9941_v5, %v9940_v20 }
 0x3c6   : > { %v5768_v6 = vpop.permute.xlu1 %5767  ;;  %v7126_v17 = vpop.permute.xlu0 %7125  ;;  %v8273_v1 = vld [vmem:[#allocation3 + $0x108] sm:$0xff]  ;;  %vm9060_vm5 = vcmp.ge.f32.partialorder %v8952_v40, 0.0  ;;  %v9092_v45 = vmul.f32 0.1, %v8952_v40  ;;  %v8794_v62 = vadd.f32 %v9942_v16, %v13896_v27 }
 0x3c7   : > { %5838 = vst.msk [vmem:[#allocation3 + $0x12c] sm:$0xf] %vm1348_vm14, %v5768_v6  ;;  %7197 = vst.msk [vmem:[#allocation3 + $0x124] sm:$0xf] %vm1348_vm14, %v7126_v17  ;;  %v8962_v6 = vpop.f32.mrf.mxu0 }
 0x3c8   : > { %v9124_v51 = vsel %vm9060_vm5, %v8952_v40, %v9092_v45  ;;  %v8955_v48 = vadd.f32 %v14100_v22, %v8794_v62 }
 0x3c9   : > { %v9220_v0 = vadd.f32 %v9708_v32, %v9124_v51 }
 0x3ca   : > { %v7128_v31 = vpop.permute.xlu1 %7127  ;;  %v8275_v36 = vld [vmem:[#allocation3 + $0x114] sm:$0xff]  ;;  %v6102_v56 = vpop.permute.xlu0 %6101  ;;  %vm9061_vm6 = vcmp.ge.f32.partialorder %v8955_v48, 0.0  ;;  %v9093_v13 = vmul.f32 0.1, %v8955_v48 }
 0x3cb   : > { %v10280_v38 = vld [vmem:[#allocation3 + $0x10c] ss:$12 sps:$4 sm:$0xff]   ;;  %7198 = vst.msk [vmem:[#allocation3 + $0x130] sm:$0xf] %vm1348_vm14, %v7128_v31  ;;  %v9606_v49 = vcombine.low %v8273_v1, %v8275_v36 }
 0x3cc   : > { %8852 = vmatprep.mubr.bf16.mxu1 %v10280_v38  ;;  %6173 = vst.msk [vmem:[#allocation3 + $0x120] sm:$0xf] %vm1688_vm1, %v6102_v56  ;;  %v9125_v42 = vsel %vm9061_vm6, %v8955_v48, %v9093_v13  ;;  %v9713_v38 = vunpack.c.h.bf16 %v9761_v37  ;;  %v9762_v48 = vld [vmem:[%s10508_s9 + $0x28] sm:$0xff]   ;;  %v10087_v37 = vpop.f32.mrf.mxu0 }
 0x3cd   : > { %8853 = vmatmul.mubr.bf16.gmra.mxu1 %v9606_v49  ;;  %9252 = vst.msk [vmem:[%s13962_s15 + $0x30] sm:$0xff] %vm4226_vm15, %v9220_v0  ;;  %v9221_v14 = vadd.f32 %v9709_v58, %v9125_v42  ;;  %v9716_v42 = vunpack.c.l.bf16 %v9762_v48 }
 0x3ce   : > { %v6104_v53 = vpop.permute.xlu1 %6103  ;;  %v7318_v8 = vpop.permute.xlu0 %7317 }
 0x3cf   : > { %6174 = vst.msk [vmem:[#allocation3 + $0x12c] sm:$0xf] %vm1688_vm1, %v6104_v53  ;;  %7389 = vst.msk [vmem:[#allocation3 + $0x124] sm:$0xf] %vm1688_vm1, %v7318_v8 }
 0x3d0   : > { %9253 = vst.msk [vmem:[%s13962_s15 + $0x38] sm:$0xff] %vm4226_vm15, %v9221_v14 }
 0x3d2   : > { %v7320_v47 = vpop.permute.xlu1 %7319  ;;  %v6294_v25 = vpop.permute.xlu0 %6293 }
 0x3d3   : > { %7390 = vst.msk [vmem:[#allocation3 + $0x130] sm:$0xf] %vm1688_vm1, %v7320_v47 }
 0x3d4   : > { %6365 = vst.msk [vmem:[#allocation3 + $0x120] sm:$0xf] %vm1881_vm2, %v6294_v25 }
 0x3d6   : > { %v6296_v7 = vpop.permute.xlu1 %6295  ;;  %v7878_v19 = vpop.permute.xlu0 %7877 }
 0x3d7   : > { %6366 = vst.msk [vmem:[#allocation3 + $0x12c] sm:$0xf] %vm1881_vm2, %v6296_v7  ;;  %7949 = vst.msk [vmem:[#allocation3 + $0x124] sm:$0xf] %vm1881_vm2, %v7878_v19 }
 0x3d9   : > { %v9943_v4 = vpop.f32.mrf.mxu1 }
 0x3da   : > { %v7880_v34 = vpop.permute.xlu1 %7879  ;;  %v5770_v24 = vpop.permute.xlu0 %5769 }
 0x3db   : > { %7950 = vst.msk [vmem:[#allocation3 + $0x130] sm:$0xf] %vm1881_vm2, %v7880_v34  ;;  %v9944_v44 = vpop.f32.mrf.mxu1 }
 0x3dc   : > { %5839 = vst.msk [vmem:[#allocation3 + $0x138] sm:$0xf] %vm1348_vm14, %v5770_v24  ;;  %v9945_v59 = vadd.f32 %v9944_v44, %v9943_v4 }
 0x3dd   : > { %v9946_v3 = vpop.f32.mrf.mxu1 }
 0x3de   : > { %v5772_v55 = vpop.permute.xlu1 %5771  ;;  %v7130_v15 = vpop.permute.xlu0 %7129  ;;  %v8277_v18 = vld [vmem:[#allocation3 + $0x120] sm:$0xff]  ;;  %v8799_v12 = vadd.f32 %v9945_v59, %v13896_v27 }
 0x3df   : > { %5840 = vst.msk [vmem:[#allocation3 + $0x144] sm:$0xf] %vm1348_vm14, %v5772_v55  ;;  %7199 = vst.msk [vmem:[#allocation3 + $0x13c] sm:$0xf] %vm1348_vm14, %v7130_v15  ;;  %v9947_v21 = vpop.f32.mrf.mxu1 }
 0x3e0   : > { %v8960_v57 = vadd.f32 %v8959_v10, %v8799_v12  ;;  %v9948_v23 = vadd.f32 %v9947_v21, %v9946_v3 }
 0x3e2   : > { %v7132_v61 = vpop.permute.xlu1 %7131  ;;  %v8279_v28 = vld [vmem:[#allocation3 + $0x12c] sm:$0xff]  ;;  %v6106_v22 = vpop.permute.xlu0 %6105  ;;  %vm9062_vm11 = vcmp.ge.f32.partialorder %v8960_v57, 0.0  ;;  %v9094_v63 = vmul.f32 0.1, %v8960_v57  ;;  %v8802_v52 = vadd.f32 %v9948_v23, %v13896_v27 }
 0x3e3   : > { %v10282_v60 = vld [vmem:[#allocation3 + $0x124] ss:$12 sps:$4 sm:$0xff]   ;;  %7200 = vst.msk [vmem:[#allocation3 + $0x148] sm:$0xf] %vm1348_vm14, %v7132_v61  ;;  %v9609_v43 = vcombine.low %v8277_v18, %v8279_v28 }
 0x3e4   : > { %8860 = vmatprep.mubr.bf16.mxu1 %v10282_v60  ;;  %6175 = vst.msk [vmem:[#allocation3 + $0x138] sm:$0xf] %vm1688_vm1, %v6106_v22  ;;  %v9126_v17 = vsel %vm9062_vm11, %v8960_v57, %v9094_v63  ;;  %v8963_v31 = vadd.f32 %v8962_v6, %v8802_v52  ;;  %v9717_v60 = vunpack.c.h.bf16 %v9762_v48  ;;  %v9763_v6 = vld [vmem:[%s10508_s9 + $0x30] sm:$0xff]  }
 0x3e5   : > { %8861 = vmatmul.mubr.bf16.gmra.mxu1 %v9609_v43  ;;  %v9222_v36 = vadd.f32 %v9712_v39, %v9126_v17 }
 0x3e6   : > { %v6108_v26 = vpop.permute.xlu1 %6107  ;;  %v7322_v46 = vpop.permute.xlu0 %7321  ;;  %vm9063_vm12 = vcmp.ge.f32.partialorder %v8963_v31, 0.0  ;;  %v9095_v49 = vmul.f32 0.1, %v8963_v31 }
 0x3e7   : > { %6176 = vst.msk [vmem:[#allocation3 + $0x144] sm:$0xf] %vm1688_vm1, %v6108_v26  ;;  %7391 = vst.msk [vmem:[#allocation3 + $0x13c] sm:$0xf] %vm1688_vm1, %v7322_v46 }
 0x3e8   : > { %9254 = vst.msk [vmem:[%s13962_s15 + $0x40] sm:$0xff] %vm4226_vm15, %v9222_v36  ;;  %v9127_v2 = vsel %vm9063_vm12, %v8963_v31, %v9095_v49 }
 0x3e9   : > { %v9223_v9 = vadd.f32 %v9713_v38, %v9127_v2 }
 0x3ea   : > { %v7324_v29 = vpop.permute.xlu1 %7323  ;;  %v6298_v54 = vpop.permute.xlu0 %6297 }
 0x3eb   : > { %7392 = vst.msk [vmem:[#allocation3 + $0x148] sm:$0xf] %vm1688_vm1, %v7324_v29 }
 0x3ec   : > { %6367 = vst.msk [vmem:[#allocation3 + $0x138] sm:$0xf] %vm1881_vm2, %v6298_v54  ;;  %v8975_v54 = vpop.f32.mrf.mxu0 }
 0x3ed   : > { %9255 = vst.msk [vmem:[%s13962_s15 + $0x48] sm:$0xff] %vm4226_vm15, %v9223_v9 }
 0x3ee   : > { %v6300_v35 = vpop.permute.xlu1 %6299  ;;  %v7882_v1 = vpop.permute.xlu0 %7881 }
 0x3ef   : > { %6368 = vst.msk [vmem:[#allocation3 + $0x144] sm:$0xf] %vm1881_vm2, %v6300_v35  ;;  %7951 = vst.msk [vmem:[#allocation3 + $0x13c] sm:$0xf] %vm1881_vm2, %v7882_v1  ;;  %v10088_v31 = vpop.f32.mrf.mxu0 }
 0x3f2   : > { %v7884_v56 = vpop.permute.xlu1 %7883  ;;  %v5774_v53 = vpop.permute.xlu0 %5773 }
 0x3f3   : > { %7952 = vst.msk [vmem:[#allocation3 + $0x148] sm:$0xf] %vm1881_vm2, %v7884_v56  ;;  %v9720_v56 = vunpack.c.l.bf16 %v9763_v6 }
 0x3f4   : > { %5841 = vst.msk [vmem:[#allocation3 + $0x150] sm:$0xf] %vm1348_vm14, %v5774_v53  ;;  %v9949_v25 = vpop.f32.mrf.mxu1  ;;  %v14191_v53 = vld [vmem:[%s14321_s4] ss:$0 sm:$0xff] }
 0x3f6   : > { %v5776_v8 = vpop.permute.xlu1 %5775  ;;  %v7134_v30 = vpop.permute.xlu0 %7133  ;;  %v8281_v50 = vld [vmem:[#allocation3 + $0x138] sm:$0xff] }
 0x3f7   : > { %5842 = vst.msk [vmem:[#allocation3 + $0x15c] sm:$0xf] %vm1348_vm14, %v5776_v8  ;;  %7201 = vst.msk [vmem:[#allocation3 + $0x154] sm:$0xf] %vm1348_vm14, %v7134_v30  ;;  %v9950_v32 = vpop.f32.mrf.mxu1  ;;  %v8978_v8 = vpop.f32.mrf.mxu0 }
 0x3f8   : > { %v9951_v62 = vadd.f32 %v9950_v32, %v9949_v25 }
 0x3f9   : > { %v9952_v7 = vpop.f32.mrf.mxu1 }
 0x3fa   : > { %v7136_v20 = vpop.permute.xlu1 %7135  ;;  %v8283_v11 = vld [vmem:[#allocation3 + $0x144] sm:$0xff]  ;;  %v6110_v40 = vpop.permute.xlu0 %6109  ;;  %v8807_v51 = vadd.f32 %v9951_v62, %v13896_v27 }
 0x3fb   : > { %v10284_v47 = vld [vmem:[#allocation3 + $0x13c] ss:$12 sps:$4 sm:$0xff]   ;;  %7202 = vst.msk [vmem:[#allocation3 + $0x160] sm:$0xf] %vm1348_vm14, %v7136_v20  ;;  %v9612_v5 = vcombine.low %v8281_v50, %v8283_v11  ;;  %v9953_v0 = vpop.f32.mrf.mxu1  ;;  %v10291_v62 = vld [vmem:[#allocation3 + $0x158] ss:$12 sps:$4 sm:$0xff]  }
 0x3fc   : > { %8868 = vmatprep.mubr.bf16.mxu1 %v10284_v47  ;;  %6177 = vst.msk [vmem:[#allocation3 + $0x150] sm:$0xf] %vm1688_vm1, %v6110_v40  ;;  %v8968_v58 = vadd.f32 %v14136_v33, %v8807_v51  ;;  %v9954_v34 = vadd.f32 %v9953_v0, %v9952_v7  ;;  %v9721_v47 = vunpack.c.h.bf16 %v9763_v6  ;;  %v10292_v0 = vld [vmem:[#allocation3 + $0x170] ss:$12 sps:$4 sm:$0xff]  }
 0x3fd   : > { %8869 = vmatmul.mubr.bf16.gmra.mxu1 %v9612_v5 }
 0x3fe   : > { %v6112_v16 = vpop.permute.xlu1 %6111  ;;  %vm9064_vm3 = vcmp.ge.f32.partialorder %v8968_v58, 0.0  ;;  %v9096_v24 = vmul.f32 0.1, %v8968_v58  ;;  %v8810_v14 = vadd.f32 %v9954_v34, %v13896_v27 }
 0x3ff   : > { %6178 = vst.msk [vmem:[#allocation3 + $0x15c] sm:$0xf] %vm1688_vm1, %v6112_v16 }
 0x400   : > { %v9128_v15 = vsel %vm9064_vm3, %v8968_v58, %v9096_v24  ;;  %v8971_v61 = vadd.f32 %v14144_v41, %v8810_v14 }
 0x401   : > { %v7326_v45 = vpop.permute.xlu0 %7325  ;;  %v9224_v28 = vadd.f32 %v9716_v42, %v9128_v15 }
 0x402   : > { %7393 = vst.msk [vmem:[#allocation3 + $0x154] sm:$0xf] %vm1688_vm1, %v7326_v45  ;;  %vm9065_vm4 = vcmp.ge.f32.partialorder %v8971_v61, 0.0  ;;  %v9097_v33 = vmul.f32 0.1, %v8971_v61 }
 0x403   : > { %v7328_v19 = vpop.permute.xlu1 %7327  ;;  %9256 = vst.msk [vmem:[%s13962_s15 + $0x50] sm:$0xff] %vm4226_vm15, %v9224_v28 }
 0x404   : > { %7394 = vst.msk [vmem:[#allocation3 + $0x160] sm:$0xf] %vm1688_vm1, %v7328_v19  ;;  %v9129_v22 = vsel %vm9065_vm4, %v8971_v61, %v9097_v33 }
 0x405   : > { %v6302_v13 = vpop.permute.xlu0 %6301  ;;  %v9225_v26 = vadd.f32 %v9717_v60, %v9129_v22 }
 0x406   : > { %6369 = vst.msk [vmem:[#allocation3 + $0x150] sm:$0xf] %vm1881_vm2, %v6302_v13  ;;  %v9764_v13 = vld [vmem:[%s10508_s9 + $0x38] sm:$0xff]  }
 0x407   : > { %9257 = vst.msk [vmem:[%s13962_s15 + $0x58] sm:$0xff] %vm4226_vm15, %v9225_v26  ;;  %v9724_v14 = vunpack.c.l.bf16 %v9764_v13  ;;  %v9725_v60 = vunpack.c.h.bf16 %v9764_v13  ;;  %v9767_v13 = vld [vmem:[%s10508_s9 + $0x50] sm:$0xff]  }
 0x408   : > { %v6304_v55 = vpop.permute.xlu1 %6303 }
 0x409   : > { %6370 = vst.msk [vmem:[#allocation3 + $0x15c] sm:$0xf] %vm1881_vm2, %v6304_v55  ;;  %v7886_v18 = vpop.permute.xlu0 %7885 }
 0x40a   : > { %7953 = vst.msk [vmem:[#allocation3 + $0x154] sm:$0xf] %vm1881_vm2, %v7886_v18 }
 0x40c   : > { %v7888_v43 = vpop.permute.xlu1 %7887 }
 0x40d   : > { %7954 = vst.msk [vmem:[#allocation3 + $0x160] sm:$0xf] %vm1881_vm2, %v7888_v43  ;;  %v5778_v4 = vpop.permute.xlu0 %5777 }
 0x40e   : > { %5843 = vst.msk [vmem:[#allocation3 + $0x168] sm:$0xf] %vm1348_vm14, %v5778_v4  ;;  %v9955_v21 = vpop.f32.mrf.mxu1  ;;  %v10091_v4 = vpop.f32.mrf.mxu0 }
 0x410   : > { %v5780_v10 = vpop.permute.xlu1 %5779  ;;  %v9956_v23 = vpop.f32.mrf.mxu1 }
 0x411   : > { %5844 = vst.msk [vmem:[#allocation3 + $0x174] sm:$0xf] %vm1348_vm14, %v5780_v10  ;;  %v7138_v44 = vpop.permute.xlu0 %7137  ;;  %v8285_v59 = vld [vmem:[#allocation3 + $0x150] sm:$0xff]  ;;  %v9957_v63 = vadd.f32 %v9956_v23, %v9955_v21  ;;  %v8991_v10 = vpop.f32.mrf.mxu0 }
 0x412   : > { %7203 = vst.msk [vmem:[#allocation3 + $0x16c] sm:$0xf] %vm1348_vm14, %v7138_v44  ;;  %v9958_v52 = vpop.f32.mrf.mxu1 }
 0x413   : > { %v8815_v35 = vadd.f32 %v9957_v63, %v13896_v27 }
 0x414   : > { %v7140_v46 = vpop.permute.xlu1 %7139  ;;  %v8287_v3 = vld [vmem:[#allocation3 + $0x15c] sm:$0xff]  ;;  %v9959_v1 = vpop.f32.mrf.mxu1 }
 0x415   : > { %v10286_v12 = vld [vmem:[#allocation3 + $0x154] ss:$12 sps:$4 sm:$0xff]   ;;  %7204 = vst.msk [vmem:[#allocation3 + $0x178] sm:$0xf] %vm1348_vm14, %v7140_v46  ;;  %v9615_v29 = vcombine.low %v8285_v59, %v8287_v3  ;;  %v6114_v41 = vpop.permute.xlu0 %6113  ;;  %v8976_v36 = vadd.f32 %v8975_v54, %v8815_v35  ;;  %v9960_v49 = vadd.f32 %v9959_v1, %v9958_v52 }
 0x416   : > { %8876 = vmatprep.mubr.bf16.mxu1 %v10286_v12  ;;  %6179 = vst.msk [vmem:[#allocation3 + $0x168] sm:$0xf] %vm1688_vm1, %v6114_v41  ;;  %v9765_v12 = vld [vmem:[%s10508_s9 + $0x40] sm:$0xff]  }
 0x417   : > { %8877 = vmatmul.mubr.bf16.gmra.mxu1 %v9615_v29  ;;  %vm9066_vm14 = vcmp.ge.f32.partialorder %v8976_v36, 0.0  ;;  %v9098_v2 = vmul.f32 0.1, %v8976_v36  ;;  %v8818_v27 = vadd.f32 %v14191_v53, %v9960_v49  ;;  %v9729_v6 = vunpack.c.h.bf16 %v9765_v12 }
 0x418   : > { %v6116_v57 = vpop.permute.xlu1 %6115 }
 0x419   : > { %6180 = vst.msk [vmem:[#allocation3 + $0x174] sm:$0xf] %vm1688_vm1, %v6116_v57  ;;  %v7330_v39 = vpop.permute.xlu0 %7329  ;;  %v9130_v30 = vsel %vm9066_vm14, %v8976_v36, %v9098_v2  ;;  %v8979_v20 = vadd.f32 %v8978_v8, %v8818_v27  ;;  %v9728_v57 = vunpack.c.l.bf16 %v9765_v12  ;;  %v9766_v27 = vld [vmem:[%s10508_s9 + $0x48] sm:$0xff]   ;;  %v9768_v12 = vld [vmem:[%s10508_s9 + $0x58] sm:$0xff]  }
 0x41a   : > { %7395 = vst.msk [vmem:[#allocation3 + $0x16c] sm:$0xf] %vm1688_vm1, %v7330_v39  ;;  %v9226_v11 = vadd.f32 %v9720_v56, %v9130_v30 }
 0x41b   : > { %v9099_v5 = vmul.f32 0.1, %v8979_v20 }
 0x41c   : > { %v7332_v17 = vpop.permute.xlu1 %7331  ;;  %9258 = vst.msk [vmem:[%s13962_s15 + $0x60] sm:$0xff] %vm4226_vm15, %v9226_v11 }
 0x41d   : > { %7396 = vst.msk [vmem:[#allocation3 + $0x178] sm:$0xf] %vm1688_vm1, %v7332_v17  ;;  %v6306_v38 = vpop.permute.xlu0 %6305  ;;  %vm9067_vm1 = vcmp.ge.f32.partialorder %v8979_v20, 0.0 }
 0x41e   : > { %6371 = vst.msk [vmem:[#allocation3 + $0x168] sm:$0xf] %vm1881_vm2, %v6306_v38  ;;  %v9131_v25 = vsel %vm9067_vm1, %v8979_v20, %v9099_v5  ;;  %v9732_v20 = vunpack.c.l.bf16 %v9766_v27 }
 0x41f   : > { %v9227_v16 = vadd.f32 %v9721_v47, %v9131_v25  ;;  %v9733_v25 = vunpack.c.h.bf16 %v9766_v27  ;;  %v9769_v27 = vld [vmem:[%s10508_s9 + $0x60] sm:$0xff]  }
 0x420   : > { %v6308_v9 = vpop.permute.xlu1 %6307 }
 0x421   : > { %6372 = vst.msk [vmem:[#allocation3 + $0x174] sm:$0xf] %vm1881_vm2, %v6308_v9  ;;  %v7890_v50 = vpop.permute.xlu0 %7889 }
 0x422   : > { %7955 = vst.msk [vmem:[#allocation3 + $0x16c] sm:$0xf] %vm1881_vm2, %v7890_v50 }
 0x423   : > { %9259 = vst.msk [vmem:[%s13962_s15 + $0x68] sm:$0xff] %vm4226_vm15, %v9227_v16 }
 0x424   : > { %v7892_v40 = vpop.permute.xlu1 %7891 }
 0x425   : > { %7956 = vst.msk [vmem:[#allocation3 + $0x178] sm:$0xf] %vm1881_vm2, %v7892_v40 }
 0x428   : > { %v10290_v45 = vld [vmem:[#allocation3 + $0x168] ss:$12 sps:$4 sm:$0xff]  }
 0x42a   : > { %v9961_v7 = vpop.f32.mrf.mxu1 }
 0x42c   : > { %v10288_v32 = vld [vmem:[#allocation3 + $0x16c] ss:$12 sps:$4 sm:$0xff]   ;;  %v9962_v51 = vpop.f32.mrf.mxu1 }
 0x42d   : > { %8884 = vmatprep.mubr.bf16.mxu1 %v10288_v32  ;;  %v9963_v48 = vadd.f32 %v9962_v51, %v9961_v7 }
 0x42e   : > { %8885 = vmatmul.mubr.bf16.gmra.mxu1 %v10290_v45  ;;  %v9964_v19 = vpop.f32.mrf.mxu1 }
 0x42f   : > { %10101 = vmatprep.mubr.msk.bf16.mxu1 %vm4226_vm15, %v10291_v62  ;;  %v8823_v58 = vadd.f32 %v14191_v53, %v9963_v48 }
 0x430   : > { %v9965_v34 = vpop.f32.mrf.mxu1 }
 0x431   : > { %v8984_v42 = vadd.f32 %v10087_v37, %v8823_v58  ;;  %v9966_v24 = vadd.f32 %v9965_v34, %v9964_v19  ;;  %v10092_v37 = vpop.f32.mrf.mxu0 }
 0x433   : > { %vm9068_vm2 = vcmp.ge.f32.partialorder %v8984_v42, 0.0  ;;  %v9100_v55 = vmul.f32 0.1, %v8984_v42  ;;  %v8826_v15 = vadd.f32 %v14191_v53, %v9966_v24  ;;  %v8994_v39 = vpop.f32.mrf.mxu0 }
 0x435   : > { %v9132_v61 = vsel %vm9068_vm2, %v8984_v42, %v9100_v55  ;;  %v8987_v18 = vadd.f32 %v10088_v31, %v8826_v15  ;;  %v10095_v62 = vpop.f32.mrf.mxu0  ;;  %v9736_v55 = vunpack.c.l.bf16 %v9767_v13 }
 0x436   : > { %10102 = vmatmul.mubr.msk.bf16.vlgmr.msra.gmra.mxu1 %vm4226_vm15, %v10292_v0  ;;  %v9228_v28 = vadd.f32 %v9724_v14, %v9132_v61 }
 0x437   : > { %vm9069_vm7 = vcmp.ge.f32.partialorder %v8987_v18, 0.0  ;;  %v9101_v33 = vmul.f32 0.1, %v8987_v18  ;;  %v9007_v51 = vpop.f32.mrf.mxu0 }
 0x438   : > { %9260 = vst.msk [vmem:[%s13962_s15 + $0x70] sm:$0xff] %vm4226_vm15, %v9228_v28 }
 0x439   : > { %v9133_v43 = vsel %vm9069_vm7, %v8987_v18, %v9101_v33  ;;  %v10096_v34 = vpop.f32.mrf.mxu0 }
 0x43a   : > { %v9229_v22 = vadd.f32 %v9725_v60, %v9133_v43  ;;  %v9737_v43 = vunpack.c.h.bf16 %v9767_v13  ;;  %v9770_v13 = vld [vmem:[%s10508_s9 + $0x68] sm:$0xff]  }
 0x43b   : > { %v9010_v18 = vpop.f32.mrf.mxu0 }
 0x43c   : > { %9261 = vst.msk [vmem:[%s13962_s15 + $0x78] sm:$0xff] %vm4226_vm15, %v9229_v22 }
 0x447   : > { %v9967_v26 = vpop.f32.mrf.mxu1 }
 0x449   : > { %v9968_v44 = vpop.f32.mrf.mxu1 }
 0x44a   : > { %v9969_v46 = vadd.f32 %v9968_v44, %v9967_v26 }
 0x44b   : > { %v9970_v59 = vpop.f32.mrf.mxu1 }
 0x44c   : > { %v8831_v3 = vadd.f32 %v14191_v53, %v9969_v46 }
 0x44d   : > { %v9971_v29 = vpop.f32.mrf.mxu1 }
 0x44e   : > { %v8992_v41 = vadd.f32 %v8991_v10, %v8831_v3  ;;  %v9972_v21 = vadd.f32 %v9971_v29, %v9970_v59 }
 0x450   : > { %vm9070_vm8 = vcmp.ge.f32.partialorder %v8992_v41, 0.0  ;;  %v9102_v54 = vmul.f32 0.1, %v8992_v41  ;;  %v8834_v23 = vadd.f32 %v14191_v53, %v9972_v21  ;;  %v9740_v21 = vunpack.c.l.bf16 %v9768_v12 }
 0x452   : > { %v9134_v63 = vsel %vm9070_vm8, %v8992_v41, %v9102_v54  ;;  %v8995_v52 = vadd.f32 %v8994_v39, %v8834_v23 }
 0x453   : > { %v9230_v35 = vadd.f32 %v9728_v57, %v9134_v63 }
 0x454   : > { %vm9071_vm10 = vcmp.ge.f32.partialorder %v8995_v52, 0.0  ;;  %v9103_v17 = vmul.f32 0.1, %v8995_v52 }
 0x455   : > { %9262 = vst.msk [vmem:[%s13962_s15 + $0x80] sm:$0xff] %vm4226_vm15, %v9230_v35 }
 0x456   : > { %v9135_v31 = vsel %vm9071_vm10, %v8995_v52, %v9103_v17  ;;  %v9741_v52 = vunpack.c.h.bf16 %v9768_v12 }
 0x457   : > { %v9231_v1 = vadd.f32 %v9729_v6, %v9135_v31  ;;  %v10099_v31 = vpop.f32.mrf.mxu0 }
 0x459   : > { %9263 = vst.msk [vmem:[%s13962_s15 + $0x88] sm:$0xff] %vm4226_vm15, %v9231_v1 }
 0x461   : > { %v9973_v36 = vpop.f32.mrf.mxu1 }
 0x463   : > { %v9974_v38 = vpop.f32.mrf.mxu1 }
 0x464   : > { %v9975_v49 = vadd.f32 %v9974_v38, %v9973_v36  ;;  %v9023_v36 = vpop.f32.mrf.mxu0 }
 0x465   : > { %v9976_v56 = vpop.f32.mrf.mxu1 }
 0x466   : > { %v8839_v2 = vadd.f32 %v14191_v53, %v9975_v49 }
 0x467   : > { %v9977_v9 = vpop.f32.mrf.mxu1 }
 0x468   : > { %v9000_v8 = vadd.f32 %v10091_v4, %v8839_v2  ;;  %v9978_v30 = vadd.f32 %v9977_v9, %v9976_v56  ;;  %v10100_v9 = vpop.f32.mrf.mxu0 }
 0x46a   : > { %vm9072_vm0 = vcmp.ge.f32.partialorder %v9000_v8, 0.0  ;;  %v9104_v50 = vmul.f32 0.1, %v9000_v8  ;;  %v8842_v11 = vadd.f32 %v14191_v53, %v9978_v30 }
 0x46c   : > { %v9136_v47 = vsel %vm9072_vm0, %v9000_v8, %v9104_v50  ;;  %v9003_v5 = vadd.f32 %v10092_v37, %v8842_v11  ;;  %v9744_v50 = vunpack.c.l.bf16 %v9769_v27 }
 0x46d   : > { %v9232_v40 = vadd.f32 %v9732_v20, %v9136_v47 }
 0x46e   : > { %vm9073_vm9 = vcmp.ge.f32.partialorder %v9003_v5, 0.0  ;;  %v9105_v16 = vmul.f32 0.1, %v9003_v5 }
 0x46f   : > { %9264 = vst.msk [vmem:[%s13962_s15 + $0x90] sm:$0xff] %vm4226_vm15, %v9232_v40 }
 0x470   : > { %v9137_v32 = vsel %vm9073_vm9, %v9003_v5, %v9105_v16  ;;  %v9026_v5 = vpop.f32.mrf.mxu0 }
 0x471   : > { %v9233_v45 = vadd.f32 %v9733_v25, %v9137_v32  ;;  %v9745_v32 = vunpack.c.h.bf16 %v9769_v27 }
 0x473   : > { %9265 = vst.msk [vmem:[%s13962_s15 + $0x98] sm:$0xff] %vm4226_vm15, %v9233_v45 }
 0x475   : > { %v9979_v7 = vpop.f32.mrf.mxu1 }
 0x477   : > { %v9980_v48 = vpop.f32.mrf.mxu1 }
 0x478   : > { %v9981_v19 = vadd.f32 %v9980_v48, %v9979_v7 }
 0x479   : > { %v9982_v0 = vpop.f32.mrf.mxu1 }
 0x47a   : > { %v8847_v58 = vadd.f32 %v14191_v53, %v9981_v19 }
 0x47b   : > { %v9983_v42 = vpop.f32.mrf.mxu1 }
 0x47c   : > { %v9008_v24 = vadd.f32 %v9007_v51, %v8847_v58  ;;  %v9984_v14 = vadd.f32 %v9983_v42, %v9982_v0 }
 0x47e   : > { %vm9074_vm13 = vcmp.ge.f32.partialorder %v9008_v24, 0.0  ;;  %v9106_v15 = vmul.f32 0.1, %v9008_v24  ;;  %v8850_v61 = vadd.f32 %v14191_v53, %v9984_v14  ;;  %v9748_v14 = vunpack.c.l.bf16 %v9770_v13 }
 0x480   : > { %v9138_v28 = vsel %vm9074_vm13, %v9008_v24, %v9106_v15  ;;  %v9011_v60 = vadd.f32 %v9010_v18, %v8850_v61 }
 0x481   : > { %v9234_v33 = vadd.f32 %v9736_v55, %v9138_v28 }
 0x482   : > { %vm9075_vm5 = vcmp.ge.f32.partialorder %v9011_v60, 0.0  ;;  %v9107_v22 = vmul.f32 0.1, %v9011_v60 }
 0x483   : > { %9266 = vst.msk [vmem:[%s13962_s15 + $0xa0] sm:$0xff] %vm4226_vm15, %v9234_v33 }
 0x484   : > { %v9139_v4 = vsel %vm9075_vm5, %v9011_v60, %v9107_v22  ;;  %v9749_v60 = vunpack.c.h.bf16 %v9770_v13 }
 0x485   : > { %v9235_v26 = vadd.f32 %v9737_v43, %v9139_v4 }
 0x487   : > { %9267 = vst.msk [vmem:[%s13962_s15 + $0xa8] sm:$0xff] %vm4226_vm15, %v9235_v26 }
 0x48d   : > { %v9985_v10 = vpop.f32.mrf.mxu1 }
 0x48f   : > { %v9986_v44 = vpop.f32.mrf.mxu1 }
 0x490   : > { %v9987_v46 = vadd.f32 %v9986_v44, %v9985_v10 }
 0x491   : > { %v9988_v59 = vpop.f32.mrf.mxu1 }
 0x492   : > { %v8855_v3 = vadd.f32 %v14191_v53, %v9987_v46 }
 0x493   : > { %v9989_v37 = vpop.f32.mrf.mxu1 }
 0x494   : > { %v9016_v29 = vadd.f32 %v10095_v62, %v8855_v3  ;;  %v9990_v41 = vadd.f32 %v9989_v37, %v9988_v59 }
 0x496   : > { %vm9076_vm6 = vcmp.ge.f32.partialorder %v9016_v29, 0.0  ;;  %v9108_v57 = vmul.f32 0.1, %v9016_v29  ;;  %v8858_v54 = vadd.f32 %v14191_v53, %v9990_v41 }
 0x498   : > { %v9140_v23 = vsel %vm9076_vm6, %v9016_v29, %v9108_v57  ;;  %v9019_v39 = vadd.f32 %v10096_v34, %v8858_v54  ;;  %v9772_v57 = vld [vmem:[%s10508_s9 + $0x78] sm:$0xff]  }
 0x499   : > { %v9236_v63 = vadd.f32 %v9740_v21, %v9140_v23 }
 0x49a   : > { %vm9077_vm11 = vcmp.ge.f32.partialorder %v9019_v39, 0.0  ;;  %v9109_v35 = vmul.f32 0.1, %v9019_v39 }
 0x49b   : > { %9268 = vst.msk [vmem:[%s13962_s15 + $0xb0] sm:$0xff] %vm4226_vm15, %v9236_v63 }
 0x49c   : > { %v9141_v6 = vsel %vm9077_vm11, %v9019_v39, %v9109_v35  ;;  %v9756_v35 = vunpack.c.l.bf16 %v9772_v57 }
 0x49d   : > { %v9237_v17 = vadd.f32 %v9741_v52, %v9141_v6  ;;  %v9771_v52 = vld [vmem:[%s10508_s9 + $0x70] sm:$0xff]   ;;  %s9693_s9 = sshll.u32 %s10420_s22, 12  ;;  %s14277_s22 = scalar_lea.sflag [#allocation5], %s215_s13 }
 0x49e   : > { %s14267_s25 = scalar_lea.hbm %s14322_s5, %s9693_s9 }
 0x49f   : > { %9269 = vst.msk [vmem:[%s13962_s15 + $0xb8] sm:$0xff] %vm4226_vm15, %v9237_v17 }
 0x4a5   : > { %v9991_v1 = vpop.f32.mrf.mxu1 }
 0x4a7   : > { %v9992_v38 = vpop.f32.mrf.mxu1 }
 0x4a8   : > { %v9993_v49 = vadd.f32 %v9992_v38, %v9991_v1 }
 0x4a9   : > { %v9994_v56 = vpop.f32.mrf.mxu1 }
 0x4aa   : > { %v8863_v2 = vadd.f32 %v14191_v53, %v9993_v49 }
 0x4ab   : > { %v9995_v8 = vpop.f32.mrf.mxu1 }
 0x4ac   : > { %v9024_v30 = vadd.f32 %v9023_v36, %v8863_v2  ;;  %v9996_v20 = vadd.f32 %v9995_v8, %v9994_v56  ;;  %v9752_v36 = vunpack.c.l.bf16 %v9771_v52  ;;  %v9757_v8 = vunpack.c.h.bf16 %v9772_v57 }
 0x4ae   : > { %vm9078_vm12 = vcmp.ge.f32.partialorder %v9024_v30, 0.0  ;;  %v9110_v11 = vmul.f32 0.1, %v9024_v30  ;;  %v8866_v47 = vadd.f32 %v14191_v53, %v9996_v20 }
 0x4b0   : > { %v9142_v40 = vsel %vm9078_vm12, %v9024_v30, %v9110_v11  ;;  %v9027_v25 = vadd.f32 %v9026_v5, %v8866_v47 }
 0x4b1   : > { %v9238_v16 = vadd.f32 %v9744_v50, %v9142_v40 }
 0x4b2   : > { %vm9079_vm3 = vcmp.ge.f32.partialorder %v9027_v25, 0.0  ;;  %v9111_v45 = vmul.f32 0.1, %v9027_v25 }
 0x4b3   : > { %9270 = vst.msk [vmem:[%s13962_s15 + $0xc0] sm:$0xff] %vm4226_vm15, %v9238_v16 }
 0x4b4   : > { %v9143_v62 = vsel %vm9079_vm3, %v9027_v25, %v9111_v45 }
 0x4b5   : > { %v9239_v7 = vadd.f32 %v9745_v32, %v9143_v62 }
 0x4b7   : > { %9271 = vst.msk [vmem:[%s13962_s15 + $0xc8] sm:$0xff] %vm4226_vm15, %v9239_v7 }
 0x4bd   : > { %v9997_v51 = vpop.f32.mrf.mxu1 }
 0x4bf   : > { %v9998_v48 = vpop.f32.mrf.mxu1 }
 0x4c0   : > { %v9999_v19 = vadd.f32 %v9998_v48, %v9997_v51 }
 0x4c1   : > { %v10000_v0 = vpop.f32.mrf.mxu1 }
 0x4c2   : > { %v8871_v58 = vadd.f32 %v14191_v53, %v9999_v19 }
 0x4c3   : > { %v10001_v34 = vpop.f32.mrf.mxu1 }
 0x4c4   : > { %v9032_v42 = vadd.f32 %v10099_v31, %v8871_v58  ;;  %v10002_v24 = vadd.f32 %v10001_v34, %v10000_v0 }
 0x4c6   : > { %vm9080_vm4 = vcmp.ge.f32.partialorder %v9032_v42, 0.0  ;;  %v9112_v55 = vmul.f32 0.1, %v9032_v42  ;;  %v8874_v15 = vadd.f32 %v14191_v53, %v10002_v24 }
 0x4c8   : > { %v9144_v61 = vsel %vm9080_vm4, %v9032_v42, %v9112_v55  ;;  %v9035_v18 = vadd.f32 %v10100_v9, %v8874_v15 }
 0x4c9   : > { %v9240_v28 = vadd.f32 %v9748_v14, %v9144_v61 }
 0x4ca   : > { %vm9081_vm14 = vcmp.ge.f32.partialorder %v9035_v18, 0.0  ;;  %v9113_v33 = vmul.f32 0.1, %v9035_v18 }
 0x4cb   : > { %9272 = vst.msk [vmem:[%s13962_s15 + $0xd0] sm:$0xff] %vm4226_vm15, %v9240_v28 }
 0x4cc   : > { %v9145_v43 = vsel %vm9081_vm14, %v9035_v18, %v9113_v33 }
 0x4cd   : > { %v9241_v22 = vadd.f32 %v9749_v60, %v9145_v43 }
 0x4cf   : > { %9273 = vst.msk [vmem:[%s13962_s15 + $0xd8] sm:$0xff] %vm4226_vm15, %v9241_v22 }
 0x4d7   : > { %v10003_v4 = vpop.f32.mrf.mxu1 }
 0x4d9   : > { %v10004_v26 = vpop.f32.mrf.mxu1 }
 0x4da   : > { %v10005_v37 = vadd.f32 %v10004_v26, %v10003_v4 }
 0x4db   : > { %v10006_v10 = vpop.f32.mrf.mxu1 }
 0x4dc   : > { %v8879_v63 = vadd.f32 %v14191_v53, %v10005_v37 }
 0x4dd   : > { %v10007_v44 = vpop.f32.mrf.mxu1 }
 0x4de   : > { %v10008_v54 = vadd.f32 %v10007_v44, %v10006_v10 }
 0x4e0   : > { %v8882_v49 = vadd.f32 %v14191_v53, %v10008_v54 }
 0x4ee   : > { %v10009_v46 = vpop.f32.mrf.mxu1 }
 0x4f0   : > { %v10010_v59 = vpop.f32.mrf.mxu1 }
 0x4f1   : > { %v10011_v3 = vadd.f32 %v10010_v59, %v10009_v46 }
 0x4f2   : > { %v10012_v12 = vpop.f32.mrf.mxu1 }
 0x4f3   : > { %v8887_v21 = vadd.f32 %v14191_v53, %v10011_v3 }
 0x4f4   : > { %v10013_v29 = vpop.f32.mrf.mxu1 }
 0x4f5   : > { %v10014_v41 = vadd.f32 %v10013_v29, %v10012_v12 }
 0x4f6   : > { %v10103_v23 = vpop.f32.mrf.mxu1 }
 0x4f7   : > { %v9048_v39 = vadd.f32 %v10103_v23, %v8887_v21  ;;  %v8890_v1 = vadd.f32 %v14191_v53, %v10014_v41  ;;  %v9753_v53 = vunpack.c.h.bf16 %v9771_v52 }
 0x4f8   : > { %v9039_v6 = vpop.f32.mrf.mxu1 }
 0x4f9   : > { %vm9084_vm1 = vcmp.ge.f32.partialorder %v9048_v39, 0.0  ;;  %v9116_v17 = vmul.f32 0.1, %v9048_v39  ;;  %v9040_v31 = vadd.f32 %v9039_v6, %v8879_v63 }
 0x4fa   : > { %v10104_v38 = vpop.f32.mrf.mxu1 }
 0x4fb   : > { %v9148_v56 = vsel %vm9084_vm1, %v9048_v39, %v9116_v17  ;;  %vm9082_vm2 = vcmp.ge.f32.partialorder %v9040_v31, 0.0  ;;  %v9114_v2 = vmul.f32 0.1, %v9040_v31  ;;  %v9051_v27 = vadd.f32 %v10104_v38, %v8890_v1 }
 0x4fc   : > { %v9244_v9 = vadd.f32 %v9756_v35, %v9148_v56  ;;  %v9042_v30 = vpop.f32.mrf.mxu1 }
 0x4fd   : > { %v9146_v20 = vsel %vm9082_vm2, %v9040_v31, %v9114_v2  ;;  %vm9085_vm7 = vcmp.ge.f32.partialorder %v9051_v27, 0.0  ;;  %v9117_v50 = vmul.f32 0.1, %v9051_v27  ;;  %v9043_v11 = vadd.f32 %v9042_v30, %v8882_v49 }
 0x4fe   : > { %9276 = vst.msk [vmem:[%s13962_s15 + $0xf0] sm:$0xff] %vm4226_vm15, %v9244_v9  ;;  %v9242_v47 = vadd.f32 %v9752_v36, %v9146_v20 }
 0x4ff   : > { %v9149_v5 = vsel %vm9085_vm7, %v9051_v27, %v9117_v50  ;;  %vm9083_vm8 = vcmp.ge.f32.partialorder %v9043_v11, 0.0  ;;  %v9115_v40 = vmul.f32 0.1, %v9043_v11 }
 0x500   : > { %9274 = vst.msk [vmem:[%s13962_s15 + $0xe0] sm:$0xff] %vm4226_vm15, %v9242_v47  ;;  %v9245_v25 = vadd.f32 %v9757_v8, %v9149_v5 }
 0x501   : > { %v9147_v16 = vsel %vm9083_vm8, %v9043_v11, %v9115_v40 }
 0x502   : > { %9277 = vst.msk [vmem:[%s13962_s15 + $0xf8] sm:$0xff] %vm4226_vm15, %v9245_v25  ;;  %v9243_v32 = vadd.f32 %v9753_v53, %v9147_v16 }
 0x504   : > { %9275 = vst.msk [vmem:[%s13962_s15 + $0xe8] sm:$0xff] %vm4226_vm15, %v9243_v32 }
 0x505   : > { %10313 = shalt.err (!%p10310_p3)
}
 0x506   : > { %s10314_s8 = scalar_lea.hbm %s14267_s25, 4096  ;;  %s10318_s14 = scalar_lea.hbm %s14322_s5, 8192 }
 0x507   : > { %p10315_p4 = scmp.ne.s32.totalorder %s14267_s25, %s10314_s8  ;;  %p10319_p9 = scmp.lt.s32.totalorder %s14267_s25, %s14322_s5 }
 0x508   : > { %p10320_p10 = scmp.lt.s32.totalorder %s10318_s14, %s10314_s8 }
 0x509   : > { %p10316_p7 = pnand %p10315_p4, %p10437_p5 }
 0x50a   : > { %p10321_p11 = por %p10320_p10, %p10319_p9 }
 0x50b   : > { %p10317_p8 = pneg %p10316_p7 }
 0x50d   : > { %p10322_p12 = pnand %p10321_p11, %p10317_p8 }
 0x50f   : > { %10325 = shalt.err (!%p10322_p12)
}
 0x510   : > { %s10367_s17 = smov 128   ;;  %s10368_s9 = smov 8  }
 0x511   : > { %10109 = dma.vmem_to_hbm [thread:$0]  (%p10437_p5), %s14269_s12, 4096, %s14267_s25, %s14277_s22, %s10367_s17, %s10367_s17, %s10368_s9  }
 0x512 PF: > { %p10115_p13 = scmp.ge.s32.totalorder %s10360_s21, 2  ;;  %s9307_s16 = sand.u32 1, %s10348_s18  }
 0x513   : > { %s9308_s23 = scalar_lea.sflag [#allocation5], %s9307_s16 }
 0x514   : > { %p10112_p0 = pnand %p10115_p13, %p10441_p6 }
 0x516   : > { %p10113_p1 = pneg %p10112_p0 }
 0x518   : > { %10343 = dma.done.wait (%p10113_p1), %s9308_s23, 4096  }
 0x519   : > { %10345 = vsyncadd (%p10113_p1), %s9308_s23, 4294963200  ;;  %p15_p2 = scmp.ge.s32.totalorder %s10424_s24, 4   ;;  %s14335_s18 = smov %s10352_s19 }
 0x51a   : > { %s14336_s19 = smov %s10356_s20  ;;  %s14337_s20 = smov %s10435_s27 }
 0x51b   : > { %s14338_s21 = smov %s10424_s24  ;;  %17 = sbr.rel (!%p15_p2) target bundleno = 3 (0x3), region = 77 }
 0x520   :  { %9313 = vsyncpa [#allocation5], 1 }
 0x521   :  { %9315 = vsyncpa [#allocation5 + $0x1], 1 }

</bundles_post_ra>
